<compile_context>
chip_gen: v7x
topology: tpu7x:2x2x1
jax: 0.10.0
libtpu: 0.0.40
codegen_flags: <defaults>
</compile_context>

<pallas_src>
import functools
import math

import jax
import jax.numpy as jnp
from jax import lax
from jax.experimental import pallas as pl
from jax.experimental.pallas import tpu as pltpu
from jax.scipy.special import erf as _jax_erf

_BF16 = jnp.bfloat16
_INV_LOG2 = 1.0 / math.log(2.0)
_INV_SQRT2 = 1.0 / math.sqrt(2.0)


# ----------------------------- in-kernel helpers -----------------------------

def _layernorm(x, gamma, beta, eps=1e-5):
    mu = jnp.mean(x, axis=-1, keepdims=True)
    var = jnp.mean((x - mu) ** 2, axis=-1, keepdims=True)
    return (x - mu) * lax.rsqrt(var + eps) * gamma + beta


def _dense_bf16(x, w, b):
    """(B, L, Din) @ (Din, Dout) + b; bf16 MXU operands, f32 accumulation."""
    bb, ll, din = x.shape
    y = jnp.dot(x.reshape(bb * ll, din).astype(_BF16), w.astype(_BF16),
                preferred_element_type=jnp.float32)
    return y.reshape(bb, ll, -1) + b


def _dense_f32(x, w, b):
    """f32 matmul (kept f32: drives the sigma-clamped, near-step CDF)."""
    bb, ll, din = x.shape
    y = jnp.dot(x.reshape(bb * ll, din), w, preferred_element_type=jnp.float32)
    return y.reshape(bb, ll, -1) + b


def _scores(q, k):
    """batched q @ k^T by contracting last dims: (B,L,H)x(B,L,H) -> (B,L,L)."""
    return lax.dot_general(q.astype(_BF16), k.astype(_BF16),
                           dimension_numbers=(((2,), (2,)), ((0,), (0,))),
                           preferred_element_type=jnp.float32)


def _weighted_v(w, v):
    """(B,L,L) x (B,L,D) -> (B,L,D); bf16 operands, f32 accumulation."""
    return lax.dot_general(w.astype(_BF16), v.astype(_BF16),
                           dimension_numbers=(((2,), (1,)), ((0,), (0,))),
                           preferred_element_type=jnp.float32)


def _erf(x):
    """Abramowitz & Stegun 7.1.26 erf (|err| < 1.5e-7); exp/abs/where only,
    guaranteed to lower on the TPU VPU/EUP."""
    a1, a2, a3, a4, a5 = (0.254829592, -0.284496736, 1.421413741,
                          -1.453152027, 1.061405429)
    p = 0.3275911
    ax = jnp.abs(x)
    t = 1.0 / (1.0 + p * ax)
    poly = ((((a5 * t + a4) * t + a3) * t + a2) * t + a1) * t
    y = 1.0 - poly * jnp.exp(-ax * ax)
    return jnp.where(x >= 0.0, y, -y)


def _cross_attention(k, q, v, ln, w1, b1, w2, b2):
    """Memory_Attention_Layer.cross_attention on (B, L, D) tiles.

    Faithful to the PyTorch module: softmax FIRST, then scaled by 1/sqrt(h);
    the scale is folded into the (B,L,1) row-sum reciprocal."""
    h = k.shape[-1]
    s = _scores(q, k)                                         # (B, L, L) f32
    m = jnp.max(s, axis=-1, keepdims=True)
    e = jnp.exp(s - m)
    w = e * ((1.0 / math.sqrt(float(h))) / jnp.sum(e, axis=-1, keepdims=True))
    out = _weighted_v(w, v)                                   # (B, L, D) f32
    z = _layernorm(out + v, ln[0], ln[1])
    f = jnp.maximum(_dense_bf16(z, w1, b1), 0.0)
    f = _dense_bf16(f, w2, b2)
    return _layernorm(f + z, ln[2], ln[3])


# --------------------------------- kernel ------------------------------------

def _entropy_mal_kernel(
        x_ref, pos_ref, wkqv_ref, bkqv_ref,
        lnx_ref, lnk_ref, lnq_ref,
        fxw1_ref, fxb1_ref, fxw2_ref, fxb2_ref,
        fkw1_ref, fkb1_ref, fkw2_ref, fkb2_ref,
        fqw1_ref, fqb1_ref, fqw2_ref, fqb2_ref,
        wpk_ref, bpk_ref, wpq_ref, bpq_ref,
        out_ref,
        kmem_ref, qmem_ref,
        *, chunk, H, C):
    c = pl.program_id(0)                       # recurrence-chunk index

    # carries live in VMEM scratch only across grid steps; zero at chunk 0 so
    # the recurrence never touches stale VMEM (values at g==0 are discarded
    # by the select below anyway).
    @pl.when(c == 0)
    def _():
        kmem_ref[...] = jnp.zeros_like(kmem_ref)
        qmem_ref[...] = jnp.zeros_like(qmem_ref)

    # hoist every constant load out of the recurrence loop (loaded once)
    pos = pos_ref[...]
    wkqv, bkqv = wkqv_ref[...], bkqv_ref[...]
    lnx, lnk, lnq = lnx_ref[...], lnk_ref[...], lnq_ref[...]
    fxw1, fxb1, fxw2, fxb2 = (fxw1_ref[...], fxb1_ref[...],
                              fxw2_ref[...], fxb2_ref[...])
    fkw1, fkb1, fkw2, fkb2 = (fkw1_ref[...], fkb1_ref[...],
                              fkw2_ref[...], fkb2_ref[...])
    fqw1, fqb1, fqw2, fqb2 = (fqw1_ref[...], fqb1_ref[...],
                              fqw2_ref[...], fqb2_ref[...])
    wpk, bpk = wpk_ref[...], bpk_ref[...]
    wpq, bpq = wpq_ref[...], bpq_ref[...]

    km, qm = kmem_ref[...], qmem_ref[...]                      # (B, L, H) f32

    # `chunk` is a small static int -> fully unrolled straight-line loop
    # (equivalent to lax.fori_loop(..., unroll=True), but every x_ref /
    # out_ref access stays a static slice of the leading slab dim).
    for t in range(chunk):
        g = c * chunk + t                                      # global step

        x = x_ref[t] + pos                                     # (B, L, C)
        kqv = _dense_bf16(x, wkqv, bkqv)                       # (B, L, 128)
        k_raw = kqv[..., :H]
        q_raw = kqv[..., H:2 * H]
        v_raw = kqv[..., 2 * H:2 * H + C]

        # i > 0 path (cheap at these tile sizes; at g == 0 its result is
        # discarded by the branch-free select, which removes the previous
        # cur_ref VMEM round-trip from the serial critical path).
        k_new = _cross_attention(k_raw, qm, k_raw, lnk, fkw1, fkb1, fkw2, fkb2)
        q_new = _cross_attention(km, q_raw, q_raw, lnq, fqw1, fqb1, fqw2, fqb2)
        v_new = _cross_attention(k_new, q_new, v_raw, lnx,
                                 fxw1, fxb1, fxw2, fxb2)

        first = g == 0
        k_out = jnp.where(first, k_raw, k_new)
        q_out = jnp.where(first, q_raw, q_new)
        v_out = jnp.where(first, v_raw, v_new)
        km, qm = k_out, q_out                                  # new carries

        # ---- EntropyBlockTrans tail (postlayers + entropy coding, eval) ----
        mu = _dense_f32(k_out, wpk, bpk)
        sg = _dense_f32(q_out, wpq, bpq)
        sigma = jnp.clip(jnp.maximum(sg, 0.0), 1e-8, 1.0)

        # TODO(synk): training-mode additive uniform(-0.5, 0.5) noise path is
        # not implemented; this is the eval-mode round() quantization.
        cx = jnp.round(v_out)            # round-half-even == torch.round
        inv = _INV_SQRT2 / sigma
        probs = 0.5 * (_erf((cx + 0.5 - mu) * inv) -
                       _erf((cx - 0.5 - mu) * inv))
        probs = jnp.maximum(probs, 0.0)              # guard f32 rounding
        bits = jnp.clip(-jnp.log(probs + 1e-8) * _INV_LOG2, 0.0, 50.0)

        # direct lane-slice stores into the wide output slab (no concatenate)
        out_ref[t, :, :, 0:H] = k_out
        out_ref[t, :, :, H:2 * H] = q_out
        out_ref[t, :, :, 2 * H:2 * H + C] = v_out
        out_ref[t, :, :, 2 * H + C:2 * H + 2 * C] = probs
        out_ref[t, :, :, 2 * H + 2 * C:2 * H + 3 * C] = cx
        out_ref[t, :, :, 2 * H + 3 * C:2 * H + 4 * C] = bits

    kmem_ref[...] = km
    qmem_ref[...] = qm


# -------------------------------- wrapper -------------------------------------

def _chunk_size(num, max_chunk=8):
    """Largest divisor of num that is <= max_chunk (amortizes per-grid-step
    overhead; T | num keeps the recurrence free of remainder masking)."""
    for t in range(min(num, max_chunk), 0, -1):
        if num % t == 0:
            return t
    return 1


@jax.jit
def entropy_block_trans_forward(x, pos, p):
    """x: (B, num, L, C) f32.  Returns (probs, total_bits, compress_x, (K,Q,V)).

    TODO(synk): num_layers > 1 would chain this pallas_call with x = V between
    layers (default module config uses num_layers = 1)."""
    B, num, L, C = x.shape
    H = p['lnk'].shape[-1]
    W = 2 * H + 4 * C
    T = _chunk_size(num)
    n_chunks = num // T

    # Recurrence axis leading; whole batch folded into the block.
    x_t = jnp.transpose(x, (1, 0, 2, 3))                       # (num, B, L, C)

    params = (pos, p['wkqv'], p['bkqv'],
              p['lnx'], p['lnk'], p['lnq'],
              p['fxw1'], p['fxb1'], p['fxw2'], p['fxb2'],
              p['fkw1'], p['fkb1'], p['fkw2'], p['fkb2'],
              p['fqw1'], p['fqb1'], p['fqw2'], p['fqb2'],
              p['wpk'], p['bpk'], p['wpq'], p['bpq'])

    def const_spec(a):
        nd = a.ndim
        return pl.BlockSpec(a.shape, lambda c, _nd=nd: (0,) * _nd)

    in_specs = [pl.BlockSpec((T, B, L, C), lambda c: (c, 0, 0, 0))]
    in_specs += [const_spec(a) for a in params]
    out_specs = pl.BlockSpec((T, B, L, W), lambda c: (c, 0, 0, 0))
    out_shape = jax.ShapeDtypeStruct((num, B, L, W), jnp.float32)

    kernel = functools.partial(_entropy_mal_kernel, chunk=T, H=H, C=C)

    # advisory cost estimate (helps XLA schedule around this serial kernel)
    kqv_w = p['wkqv'].shape[-1]

    def _ca(D):
        return 2 * L * L * H + 2 * L * L * D + 4 * L * D * D
    flops_step = B * (2 * L * C * kqv_w + 2 * _ca(H) + _ca(C) + 4 * L * H * C)
    cost = pl.CostEstimate(
        flops=int(num * flops_step),
        transcendentals=int(num * B * (3 * L * L + 4 * L * C)),
        bytes_accessed=int(x.size * 4 + num * B * L * W * 4 +
                           sum(int(a.size) * a.dtype.itemsize for a in params)))

    out = pl.pallas_call(
        kernel,
        grid=(n_chunks,),
        in_specs=in_specs,
        out_specs=out_specs,
        out_shape=out_shape,
        scratch_shapes=[pltpu.VMEM((B, L, H), jnp.float32),    # k_memory carry
                        pltpu.VMEM((B, L, H), jnp.float32)],   # q_memory carry
        compiler_params=pltpu.CompilerParams(
            dimension_semantics=("arbitrary",),   # sequential recurrence axis
            vmem_limit_bytes=32 * 1024 * 1024),
        cost_estimate=cost,
    )(x_t, *params)

    out = jnp.transpose(out, (1, 0, 2, 3))                     # (B, num, L, W)
    K = out[..., :H]
    Q = out[..., H:2 * H]
    V = out[..., 2 * H:2 * H + C]
    probs = out[..., 2 * H + C:2 * H + 2 * C]
    compress_x = out[..., 2 * H + 2 * C:2 * H + 3 * C]
    bits = out[..., 2 * H + 3 * C:]
    total_bits = jnp.sum(bits)             # single scalar reduction (wrapper)
    return probs, total_bits, compress_x, (K, Q, V)


# --------------------------- pure-JAX reference --------------------------------

def _ref_bdot(a, b):
    return jnp.einsum('...ij,jk->...ik', a.astype(_BF16), b.astype(_BF16),
                      preferred_element_type=jnp.float32)


def reference_tail(K, Q, V, p, erf_fn):
    """postlayer_k/q + eval-mode entropy coding in plain JAX (f32)."""
    mu = jnp.einsum('...ij,jk->...ik', K, p['wpk'],
                    preferred_element_type=jnp.float32) + p['bpk']
    sg = jnp.einsum('...ij,jk->...ik', Q, p['wpq'],
                    preferred_element_type=jnp.float32) + p['bpq']
    sigma = jnp.clip(jnp.maximum(sg, 0.0), 1e-8, 1.0)
    cx = jnp.round(V)
    inv = 1.0 / (sigma * math.sqrt(2.0))
    probs = 0.5 * (erf_fn((cx + 0.5 - mu) * inv) - erf_fn((cx - 0.5 - mu) * inv))
    probs = jnp.maximum(probs, 0.0)
    bits = jnp.clip(-jnp.log(probs + 1e-8) * _INV_LOG2, 0.0, 50.0)
    return probs, jnp.sum(bits), cx


def reference_forward(x, pos, p):
    """Pure-JAX reference for EntropyBlockTrans (eval mode).

    Mirrors the kernel's bf16-MXU-operand / f32-accumulate convention so the
    comparison isolates structural correctness."""
    _, num, _, _ = x.shape
    xp = x + pos[None, None]

    def get_kqv(xs):
        return (_ref_bdot(xs, p['wk']) + p['bk'],
                _ref_bdot(xs, p['wq']) + p['bq'],
                _ref_bdot(xs, p['wv']) + p['bv'])

    def ln(t, g, b):
        m = jnp.mean(t, -1, keepdims=True)
        va = jnp.mean((t - m) ** 2, -1, keepdims=True)
        return (t - m) / jnp.sqrt(va + 1e-5) * g + b

    def cross(k, q, v, lnp, w1, b1, w2, b2):
        h = k.shape[-1]
        s = jnp.einsum('blh,bmh->blm', q.astype(_BF16), k.astype(_BF16),
                       preferred_element_type=jnp.float32)
        w = jax.nn.softmax(s, -1) * (1.0 / math.sqrt(float(h)))
        out = jnp.einsum('blm,bmd->bld', w.astype(_BF16), v.astype(_BF16),
                         preferred_element_type=jnp.float32)
        z = ln(out + v, lnp[0], lnp[1])
        f = jnp.maximum(_ref_bdot(z, w1) + b1, 0.0)
        f = _ref_bdot(f, w2) + b2
        return ln(f + z, lnp[2], lnp[3])

    km, qm, v = get_kqv(xp[:, 0])
    Ks, Qs, Vs = [km], [qm], [v]
    for i in range(1, num):
        k, q, v = get_kqv(xp[:, i])
        k = cross(k, qm, k, p['lnk'], p['fkw1'], p['fkb1'], p['fkw2'], p['fkb2'])
        q = cross(km, q, q, p['lnq'], p['fqw1'], p['fqb1'], p['fqw2'], p['fqb2'])
        v = cross(k, q, v, p['lnx'], p['fxw1'], p['fxb1'], p['fxw2'], p['fxb2'])
        km, qm = k, q
        Ks.append(k); Qs.append(q); Vs.append(v)
    K, Q, V = jnp.stack(Ks, 1), jnp.stack(Qs, 1), jnp.stack(Vs, 1)
    probs, total_bits, cx = reference_tail(K, Q, V, p, _jax_erf)
    return probs, total_bits, cx, (K, Q, V)


# ---------------------------------- main --------------------------------------

def _block_diag(blocks):
    """(nh, a, b) per-head weights -> (nh*a, nh*b) block-diagonal matrix."""
    nh, a, b = blocks.shape
    out = jnp.zeros((nh * a, nh * b), dtype=blocks.dtype)
    for i in range(nh):
        out = out.at[i * a:(i + 1) * a, i * b:(i + 1) * b].set(blocks[i])
    return out


if __name__ == "__main__":
    B, num, L = 2, 3, 8
    C, H, heads = 32, 32, 4
    shc, shd = C // heads, H // heads

    keys = iter(jax.random.split(jax.random.PRNGKey(0), 64))

    def nrm(shape, scale=0.2):
        return scale * jax.random.normal(next(keys), shape, dtype=jnp.float32)

    p = {}
    # per-head K/Q/V Linears -> block-diagonal dense weights (f32, reference)
    p['wk'] = _block_diag(nrm((heads, shc, shd)))
    p['wq'] = _block_diag(nrm((heads, shc, shd)))
    p['wv'] = _block_diag(nrm((heads, shc, shc)))
    p['bk'], p['bq'], p['bv'] = nrm((1, H), 0.1), nrm((1, H), 0.1), nrm((1, C), 0.1)

    # fused (C, 2H+C) projection, zero-padded to a 128-lane-wide MXU result
    wkqv = jnp.concatenate([p['wk'], p['wq'], p['wv']], axis=1)
    bkqv = jnp.concatenate([p['bk'], p['bq'], p['bv']], axis=1)
    pad = (-wkqv.shape[1]) % 128
    if pad:
        wkqv = jnp.pad(wkqv, ((0, 0), (0, pad)))
        bkqv = jnp.pad(bkqv, ((0, 0), (0, pad)))
    p['wkqv'] = wkqv.astype(_BF16)
    p['bkqv'] = bkqv

    def ln_params(D):
        return jnp.concatenate([1.0 + nrm((1, D), 0.05), nrm((1, D), 0.05),
                                1.0 + nrm((1, D), 0.05), nrm((1, D), 0.05)], 0)

    p['lnx'], p['lnk'], p['lnq'] = ln_params(C), ln_params(H), ln_params(H)

    # FFN weights in bf16 (MXU operands), biases in f32
    p['fxw1'], p['fxb1'] = nrm((C, C)).astype(_BF16), nrm((1, C), 0.1)
    p['fxw2'], p['fxb2'] = nrm((C, C)).astype(_BF16), nrm((1, C), 0.1)
    p['fkw1'], p['fkb1'] = nrm((H, H)).astype(_BF16), nrm((1, H), 0.1)
    p['fkw2'], p['fkb2'] = nrm((H, H)).astype(_BF16), nrm((1, H), 0.1)
    p['fqw1'], p['fqb1'] = nrm((H, H)).astype(_BF16), nrm((1, H), 0.1)
    p['fqw2'], p['fqb2'] = nrm((H, H)).astype(_BF16), nrm((1, H), 0.1)

    # EntropyBlockTrans post-layers (kept f32: they drive a near-step CDF)
    p['wpk'], p['bpk'] = nrm((H, C)), nrm((1, C), 0.1)
    p['wpq'], p['bpq'] = nrm((H, C)), nrm((1, C), 0.1)

    # learnable_position_emb(arange(L)) rows
    pos = nrm((L, C), 0.1)
    x = jax.random.normal(next(keys), (B, num, L, C), dtype=jnp.float32)

    probs, total_bits, compress_x, (K, Q, V) = entropy_block_trans_forward(x, pos, p)
    jax.block_until_ready((probs, total_bits, compress_x, K, Q, V))

    probs_r, bits_r, cx_r, (Kr, Qr, Vr) = reference_forward(x, pos, p)

    # 1) Memory_Attention_Layer recurrence outputs.
    for got, ref in ((K, Kr), (Q, Qr), (V, Vr)):
        assert got.shape == ref.shape
        assert bool(jnp.all(jnp.isfinite(got)))
        assert bool(jnp.allclose(got, ref, atol=2e-2, rtol=2e-2))

    # 2) Entropy tail validated on identical inputs (round() and the
    #    sigma-clamped CDF are discontinuous, so element-wise end-to-end
    #    comparison is ill-posed by construction).
    probs_t, bits_t, cx_t = reference_tail(K, Q, V, p, _jax_erf)
    assert bool(jnp.all(jnp.isfinite(probs)))
    assert bool(jnp.allclose(compress_x, cx_t, atol=1e-6))
    frac_bad = float(jnp.mean((jnp.abs(probs - probs_t) > 1e-2).astype(jnp.float32)))
    assert frac_bad < 0.01
    assert abs(float(total_bits) - float(bits_t)) <= 0.05 * float(bits_t) + 25.0

    # 3) loose end-to-end sanity check on the scalar rate.
    assert abs(float(total_bits) - float(bits_r)) <= 0.1 * float(bits_r) + 25.0

    print("KERNEL_OK")
</pallas_src>

<mosaic_0001>
module attributes {stable_mosaic.version = 11 : i64} {
  func.func @_entropy_mal_kernel(%arg0: i32, %arg1: memref<3x2x8x32xf32, #tpu.memory_space<vmem>>, %arg2: memref<8x32xf32, #tpu.memory_space<vmem>>, %arg3: memref<32x128xbf16, #tpu.memory_space<vmem>>, %arg4: memref<1x128xf32, #tpu.memory_space<vmem>>, %arg5: memref<4x32xf32, #tpu.memory_space<vmem>>, %arg6: memref<4x32xf32, #tpu.memory_space<vmem>>, %arg7: memref<4x32xf32, #tpu.memory_space<vmem>>, %arg8: memref<32x32xbf16, #tpu.memory_space<vmem>>, %arg9: memref<1x32xf32, #tpu.memory_space<vmem>>, %arg10: memref<32x32xbf16, #tpu.memory_space<vmem>>, %arg11: memref<1x32xf32, #tpu.memory_space<vmem>>, %arg12: memref<32x32xbf16, #tpu.memory_space<vmem>>, %arg13: memref<1x32xf32, #tpu.memory_space<vmem>>, %arg14: memref<32x32xbf16, #tpu.memory_space<vmem>>, %arg15: memref<1x32xf32, #tpu.memory_space<vmem>>, %arg16: memref<32x32xbf16, #tpu.memory_space<vmem>>, %arg17: memref<1x32xf32, #tpu.memory_space<vmem>>, %arg18: memref<32x32xbf16, #tpu.memory_space<vmem>>, %arg19: memref<1x32xf32, #tpu.memory_space<vmem>>, %arg20: memref<32x32xf32, #tpu.memory_space<vmem>>, %arg21: memref<1x32xf32, #tpu.memory_space<vmem>>, %arg22: memref<32x32xf32, #tpu.memory_space<vmem>>, %arg23: memref<1x32xf32, #tpu.memory_space<vmem>>, %arg24: memref<3x2x8x192xf32, #tpu.memory_space<vmem>>, %arg25: memref<2x8x32xf32, #tpu.memory_space<vmem>>, %arg26: memref<2x8x32xf32, #tpu.memory_space<vmem>>) attributes {dimension_semantics = [#tpu.dimension_semantics<arbitrary>], iteration_bounds = array<i64: 1>, scalar_prefetch = 0 : i64, scratch_operands = 2 : i64, tpu.core_type = #tpu.core_type<tc>, window_params = [{transform_indices = @transform_0, window_bounds = array<i64: 3, 2, 8, 32>}, {pipeline_mode = #tpu.pipeline_mode<synchronous>, transform_indices = @transform_1, window_bounds = array<i64: 8, 32>}, {pipeline_mode = #tpu.pipeline_mode<synchronous>, transform_indices = @transform_2, window_bounds = array<i64: 32, 128>}, {pipeline_mode = #tpu.pipeline_mode<synchronous>, transform_indices = @transform_3, window_bounds = array<i64: 1, 128>}, {pipeline_mode = #tpu.pipeline_mode<synchronous>, transform_indices = @transform_4, window_bounds = array<i64: 4, 32>}, {pipeline_mode = #tpu.pipeline_mode<synchronous>, transform_indices = @transform_5, window_bounds = array<i64: 4, 32>}, {pipeline_mode = #tpu.pipeline_mode<synchronous>, transform_indices = @transform_6, window_bounds = array<i64: 4, 32>}, {pipeline_mode = #tpu.pipeline_mode<synchronous>, transform_indices = @transform_7, window_bounds = array<i64: 32, 32>}, {pipeline_mode = #tpu.pipeline_mode<synchronous>, transform_indices = @transform_8, window_bounds = array<i64: 1, 32>}, {pipeline_mode = #tpu.pipeline_mode<synchronous>, transform_indices = @transform_9, window_bounds = array<i64: 32, 32>}, {pipeline_mode = #tpu.pipeline_mode<synchronous>, transform_indices = @transform_10, window_bounds = array<i64: 1, 32>}, {pipeline_mode = #tpu.pipeline_mode<synchronous>, transform_indices = @transform_11, window_bounds = array<i64: 32, 32>}, {pipeline_mode = #tpu.pipeline_mode<synchronous>, transform_indices = @transform_12, window_bounds = array<i64: 1, 32>}, {pipeline_mode = #tpu.pipeline_mode<synchronous>, transform_indices = @transform_13, window_bounds = array<i64: 32, 32>}, {pipeline_mode = #tpu.pipeline_mode<synchronous>, transform_indices = @transform_14, window_bounds = array<i64: 1, 32>}, {pipeline_mode = #tpu.pipeline_mode<synchronous>, transform_indices = @transform_15, window_bounds = array<i64: 32, 32>}, {pipeline_mode = #tpu.pipeline_mode<synchronous>, transform_indices = @transform_16, window_bounds = array<i64: 1, 32>}, {pipeline_mode = #tpu.pipeline_mode<synchronous>, transform_indices = @transform_17, window_bounds = array<i64: 32, 32>}, {pipeline_mode = #tpu.pipeline_mode<synchronous>, transform_indices = @transform_18, window_bounds = array<i64: 1, 32>}, {pipeline_mode = #tpu.pipeline_mode<synchronous>, transform_indices = @transform_19, window_bounds = array<i64: 32, 32>}, {pipeline_mode = #tpu.pipeline_mode<synchronous>, transform_indices = @transform_20, window_bounds = array<i64: 1, 32>}, {pipeline_mode = #tpu.pipeline_mode<synchronous>, transform_indices = @transform_21, window_bounds = array<i64: 32, 32>}, {pipeline_mode = #tpu.pipeline_mode<synchronous>, transform_indices = @transform_22, window_bounds = array<i64: 1, 32>}, {transform_indices = @transform_23, window_bounds = array<i64: 3, 2, 8, 192>}]} {
    %c0_i32 = arith.constant 0 : i32
    %0 = arith.cmpi eq, %arg0, %c0_i32 : i32
    %1 = arith.extui %0 : i1 to i32
    %c0_i32_0 = arith.constant 0 : i32
    %2 = arith.cmpi ne, %1, %c0_i32_0 : i32
    scf.if %2 {
      %cst_420 = arith.constant 0.000000e+00 : f32
      %1298 = vector.broadcast %cst_420 : f32 to vector<2x8x32xf32>
      %c0_421 = arith.constant 0 : index
      %c0_422 = arith.constant 0 : index
      %c0_423 = arith.constant 0 : index
      %1299 = vector.load %arg25[%c0_421, %c0_422, %c0_423] : memref<2x8x32xf32, #tpu.memory_space<vmem>>, vector<2x8x32xf32>
      tpu.vector_store %arg25[%c0_421, %c0_422, %c0_423], %1298 {strides = array<i32>} : memref<2x8x32xf32, #tpu.memory_space<vmem>>, vector<2x8x32xf32>,
      %cst_424 = arith.constant 0.000000e+00 : f32
      %1300 = vector.broadcast %cst_424 : f32 to vector<2x8x32xf32>
      %c0_425 = arith.constant 0 : index
      %c0_426 = arith.constant 0 : index
      %c0_427 = arith.constant 0 : index
      %1301 = vector.load %arg26[%c0_425, %c0_426, %c0_427] : memref<2x8x32xf32, #tpu.memory_space<vmem>>, vector<2x8x32xf32>
      tpu.vector_store %arg26[%c0_425, %c0_426, %c0_427], %1300 {strides = array<i32>} : memref<2x8x32xf32, #tpu.memory_space<vmem>>, vector<2x8x32xf32>,
    } else {
    }
    %c0 = arith.constant 0 : index
    %c0_1 = arith.constant 0 : index
    %3 = vector.load %arg2[%c0, %c0_1] : memref<8x32xf32, #tpu.memory_space<vmem>>, vector<8x32xf32>
    %c0_2 = arith.constant 0 : index
    %c0_3 = arith.constant 0 : index
    %4 = vector.load %arg3[%c0_2, %c0_3] : memref<32x128xbf16, #tpu.memory_space<vmem>>, vector<32x128xbf16>
    %c0_4 = arith.constant 0 : index
    %c0_5 = arith.constant 0 : index
    %5 = vector.load %arg4[%c0_4, %c0_5] : memref<1x128xf32, #tpu.memory_space<vmem>>, vector<1x128xf32>
    %c0_6 = arith.constant 0 : index
    %c0_7 = arith.constant 0 : index
    %6 = vector.load %arg5[%c0_6, %c0_7] : memref<4x32xf32, #tpu.memory_space<vmem>>, vector<4x32xf32>
    %c0_8 = arith.constant 0 : index
    %c0_9 = arith.constant 0 : index
    %7 = vector.load %arg6[%c0_8, %c0_9] : memref<4x32xf32, #tpu.memory_space<vmem>>, vector<4x32xf32>
    %c0_10 = arith.constant 0 : index
    %c0_11 = arith.constant 0 : index
    %8 = vector.load %arg7[%c0_10, %c0_11] : memref<4x32xf32, #tpu.memory_space<vmem>>, vector<4x32xf32>
    %c0_12 = arith.constant 0 : index
    %c0_13 = arith.constant 0 : index
    %9 = vector.load %arg8[%c0_12, %c0_13] : memref<32x32xbf16, #tpu.memory_space<vmem>>, vector<32x32xbf16>
    %c0_14 = arith.constant 0 : index
    %c0_15 = arith.constant 0 : index
    %10 = vector.load %arg9[%c0_14, %c0_15] : memref<1x32xf32, #tpu.memory_space<vmem>>, vector<1x32xf32>
    %c0_16 = arith.constant 0 : index
    %c0_17 = arith.constant 0 : index
    %11 = vector.load %arg10[%c0_16, %c0_17] : memref<32x32xbf16, #tpu.memory_space<vmem>>, vector<32x32xbf16>
    %c0_18 = arith.constant 0 : index
    %c0_19 = arith.constant 0 : index
    %12 = vector.load %arg11[%c0_18, %c0_19] : memref<1x32xf32, #tpu.memory_space<vmem>>, vector<1x32xf32>
    %c0_20 = arith.constant 0 : index
    %c0_21 = arith.constant 0 : index
    %13 = vector.load %arg12[%c0_20, %c0_21] : memref<32x32xbf16, #tpu.memory_space<vmem>>, vector<32x32xbf16>
    %c0_22 = arith.constant 0 : index
    %c0_23 = arith.constant 0 : index
    %14 = vector.load %arg13[%c0_22, %c0_23] : memref<1x32xf32, #tpu.memory_space<vmem>>, vector<1x32xf32>
    %c0_24 = arith.constant 0 : index
    %c0_25 = arith.constant 0 : index
    %15 = vector.load %arg14[%c0_24, %c0_25] : memref<32x32xbf16, #tpu.memory_space<vmem>>, vector<32x32xbf16>
    %c0_26 = arith.constant 0 : index
    %c0_27 = arith.constant 0 : index
    %16 = vector.load %arg15[%c0_26, %c0_27] : memref<1x32xf32, #tpu.memory_space<vmem>>, vector<1x32xf32>
    %c0_28 = arith.constant 0 : index
    %c0_29 = arith.constant 0 : index
    %17 = vector.load %arg16[%c0_28, %c0_29] : memref<32x32xbf16, #tpu.memory_space<vmem>>, vector<32x32xbf16>
    %c0_30 = arith.constant 0 : index
    %c0_31 = arith.constant 0 : index
    %18 = vector.load %arg17[%c0_30, %c0_31] : memref<1x32xf32, #tpu.memory_space<vmem>>, vector<1x32xf32>
    %c0_32 = arith.constant 0 : index
    %c0_33 = arith.constant 0 : index
    %19 = vector.load %arg18[%c0_32, %c0_33] : memref<32x32xbf16, #tpu.memory_space<vmem>>, vector<32x32xbf16>
    %c0_34 = arith.constant 0 : index
    %c0_35 = arith.constant 0 : index
    %20 = vector.load %arg19[%c0_34, %c0_35] : memref<1x32xf32, #tpu.memory_space<vmem>>, vector<1x32xf32>
    %c0_36 = arith.constant 0 : index
    %c0_37 = arith.constant 0 : index
    %21 = vector.load %arg20[%c0_36, %c0_37] : memref<32x32xf32, #tpu.memory_space<vmem>>, vector<32x32xf32>
    %c0_38 = arith.constant 0 : index
    %c0_39 = arith.constant 0 : index
    %22 = vector.load %arg21[%c0_38, %c0_39] : memref<1x32xf32, #tpu.memory_space<vmem>>, vector<1x32xf32>
    %c0_40 = arith.constant 0 : index
    %c0_41 = arith.constant 0 : index
    %23 = vector.load %arg22[%c0_40, %c0_41] : memref<32x32xf32, #tpu.memory_space<vmem>>, vector<32x32xf32>
    %c0_42 = arith.constant 0 : index
    %c0_43 = arith.constant 0 : index
    %24 = vector.load %arg23[%c0_42, %c0_43] : memref<1x32xf32, #tpu.memory_space<vmem>>, vector<1x32xf32>
    %c0_44 = arith.constant 0 : index
    %c0_45 = arith.constant 0 : index
    %c0_46 = arith.constant 0 : index
    %25 = vector.load %arg25[%c0_44, %c0_45, %c0_46] : memref<2x8x32xf32, #tpu.memory_space<vmem>>, vector<2x8x32xf32>
    %c0_47 = arith.constant 0 : index
    %c0_48 = arith.constant 0 : index
    %c0_49 = arith.constant 0 : index
    %26 = vector.load %arg26[%c0_47, %c0_48, %c0_49] : memref<2x8x32xf32, #tpu.memory_space<vmem>>, vector<2x8x32xf32>
    %c3_i32 = arith.constant 3 : i32
    %27 = arith.muli %arg0, %c3_i32 : i32
    %c0_i32_50 = arith.constant 0 : i32
    %28 = arith.addi %27, %c0_i32_50 : i32
    %c0_51 = arith.constant 0 : index
    %c0_52 = arith.constant 0 : index
    %c0_53 = arith.constant 0 : index
    %c0_54 = arith.constant 0 : index
    %29 = vector.load %arg1[%c0_51, %c0_52, %c0_53, %c0_54] : memref<3x2x8x32xf32, #tpu.memory_space<vmem>>, vector<1x2x8x32xf32>
    %30 = vector.shape_cast %29 : vector<1x2x8x32xf32> to vector<2x8x32xf32>
    %31 = vector.shape_cast %3 : vector<8x32xf32> to vector<1x8x32xf32>
    %32 = vector.broadcast %31 : vector<1x8x32xf32> to vector<2x8x32xf32>
    %33 = arith.addf %30, %32 : vector<2x8x32xf32>
    %34 = vector.shape_cast %33 : vector<2x8x32xf32> to vector<16x32xf32>
    %35 = arith.truncf %34 : vector<16x32xf32> to vector<16x32xbf16>
    %cst = arith.constant dense<0.000000e+00> : vector<16x128xf32>
    %36 = tpu.matmul %35, %4, %cst {dimension_numbers = #tpu.dot_dimension_numbers<[1], [0], [0], [1], [0, 0, 1, 1], [], []>} : vector<16x32xbf16>, vector<32x128xbf16>, vector<16x128xf32> -> vector<16x128xf32>
    %37 = vector.shape_cast %36 : vector<16x128xf32> to vector<2x8x128xf32>
    %38 = vector.shape_cast %5 : vector<1x128xf32> to vector<1x1x128xf32>
    %39 = vector.broadcast %38 : vector<1x1x128xf32> to vector<2x8x128xf32>
    %40 = arith.addf %37, %39 : vector<2x8x128xf32>
    %41 = vector.extract_strided_slice %40 {offsets = [0, 0, 0], sizes = [2, 8, 32], strides = [1, 1, 1]} : vector<2x8x128xf32> to vector<2x8x32xf32>
    %42 = vector.extract_strided_slice %40 {offsets = [0, 0, 32], sizes = [2, 8, 32], strides = [1, 1, 1]} : vector<2x8x128xf32> to vector<2x8x32xf32>
    %43 = vector.extract_strided_slice %40 {offsets = [0, 0, 64], sizes = [2, 8, 32], strides = [1, 1, 1]} : vector<2x8x128xf32> to vector<2x8x32xf32>
    %44 = arith.truncf %26 : vector<2x8x32xf32> to vector<2x8x32xbf16>
    %45 = arith.truncf %41 : vector<2x8x32xf32> to vector<2x8x32xbf16>
    %cst_55 = arith.constant dense<0.000000e+00> : vector<2x8x8xf32>
    %46 = tpu.matmul %44, %45, %cst_55 {dimension_numbers = #tpu.dot_dimension_numbers<[2], [2], [1], [1], [0, 0, 0, 1, 1, 1], [0], [0]>} : vector<2x8x32xbf16>, vector<2x8x32xbf16>, vector<2x8x8xf32> -> vector<2x8x8xf32>
    %cst_56 = arith.constant dense<0xFF800000> : vector<2x8xf32>
    %47 = vector.multi_reduction <maximumf>, %46, %cst_56 [2] : vector<2x8x8xf32> to vector<2x8xf32>
    %48 = vector.shape_cast %47 : vector<2x8xf32> to vector<2x8x1xf32>
    %49 = vector.broadcast %48 : vector<2x8x1xf32> to vector<2x8x8xf32>
    %50 = arith.subf %46, %49 : vector<2x8x8xf32>
    %51 = math.exp %50 : vector<2x8x8xf32>
    %cst_57 = arith.constant dense<0.000000e+00> : vector<2x8xf32>
    %52 = vector.multi_reduction <add>, %51, %cst_57 [2] : vector<2x8x8xf32> to vector<2x8xf32>
    %53 = vector.shape_cast %52 : vector<2x8xf32> to vector<2x8x1xf32>
    %cst_58 = arith.constant 0.176776692 : f32
    %54 = vector.broadcast %cst_58 : f32 to vector<2x8x1xf32>
    %55 = arith.divf %54, %53 : vector<2x8x1xf32>
    %56 = vector.broadcast %55 : vector<2x8x1xf32> to vector<2x8x8xf32>
    %57 = arith.mulf %51, %56 : vector<2x8x8xf32>
    %58 = arith.truncf %57 : vector<2x8x8xf32> to vector<2x8x8xbf16>
    %59 = arith.truncf %41 : vector<2x8x32xf32> to vector<2x8x32xbf16>
    %cst_59 = arith.constant dense<0.000000e+00> : vector<2x8x32xf32>
    %60 = tpu.matmul %58, %59, %cst_59 {dimension_numbers = #tpu.dot_dimension_numbers<[2], [1], [1], [2], [0, 0, 0, 1, 1, 2], [0], [0]>} : vector<2x8x8xbf16>, vector<2x8x32xbf16>, vector<2x8x32xf32> -> vector<2x8x32xf32>
    %61 = arith.addf %60, %41 : vector<2x8x32xf32>
    %62 = vector.extract_strided_slice %7 {offsets = [0, 0], sizes = [1, 32], strides = [1, 1]} : vector<4x32xf32> to vector<1x32xf32>
    %63 = vector.shape_cast %62 : vector<1x32xf32> to vector<32xf32>
    %64 = vector.extract_strided_slice %7 {offsets = [1, 0], sizes = [1, 32], strides = [1, 1]} : vector<4x32xf32> to vector<1x32xf32>
    %65 = vector.shape_cast %64 : vector<1x32xf32> to vector<32xf32>
    %cst_60 = arith.constant dense<0.000000e+00> : vector<2x8xf32>
    %66 = vector.multi_reduction <add>, %61, %cst_60 [2] : vector<2x8x32xf32> to vector<2x8xf32>
    %67 = vector.shape_cast %66 : vector<2x8xf32> to vector<2x8x1xf32>
    %cst_61 = arith.constant 3.200000e+01 : f32
    %68 = vector.broadcast %cst_61 : f32 to vector<2x8x1xf32>
    %69 = arith.divf %67, %68 : vector<2x8x1xf32>
    %70 = vector.broadcast %69 : vector<2x8x1xf32> to vector<2x8x32xf32>
    %71 = arith.subf %61, %70 : vector<2x8x32xf32>
    %72 = arith.mulf %71, %71 : vector<2x8x32xf32>
    %cst_62 = arith.constant dense<0.000000e+00> : vector<2x8xf32>
    %73 = vector.multi_reduction <add>, %72, %cst_62 [2] : vector<2x8x32xf32> to vector<2x8xf32>
    %74 = vector.shape_cast %73 : vector<2x8xf32> to vector<2x8x1xf32>
    %cst_63 = arith.constant 3.200000e+01 : f32
    %75 = vector.broadcast %cst_63 : f32 to vector<2x8x1xf32>
    %76 = arith.divf %74, %75 : vector<2x8x1xf32>
    %77 = vector.broadcast %69 : vector<2x8x1xf32> to vector<2x8x32xf32>
    %78 = arith.subf %61, %77 : vector<2x8x32xf32>
    %cst_64 = arith.constant 9.99999974E-6 : f32
    %79 = vector.broadcast %cst_64 : f32 to vector<2x8x1xf32>
    %80 = arith.addf %76, %79 : vector<2x8x1xf32>
    %81 = math.rsqrt %80 : vector<2x8x1xf32>
    %82 = vector.broadcast %81 : vector<2x8x1xf32> to vector<2x8x32xf32>
    %83 = arith.mulf %78, %82 : vector<2x8x32xf32>
    %84 = vector.shape_cast %63 : vector<32xf32> to vector<1x1x32xf32>
    %85 = vector.broadcast %84 : vector<1x1x32xf32> to vector<2x8x32xf32>
    %86 = arith.mulf %83, %85 : vector<2x8x32xf32>
    %87 = vector.shape_cast %65 : vector<32xf32> to vector<1x1x32xf32>
    %88 = vector.broadcast %87 : vector<1x1x32xf32> to vector<2x8x32xf32>
    %89 = arith.addf %86, %88 : vector<2x8x32xf32>
    %90 = vector.shape_cast %89 : vector<2x8x32xf32> to vector<16x32xf32>
    %91 = arith.truncf %90 : vector<16x32xf32> to vector<16x32xbf16>
    %cst_65 = arith.constant dense<0.000000e+00> : vector<16x32xf32>
    %92 = tpu.matmul %91, %13, %cst_65 {dimension_numbers = #tpu.dot_dimension_numbers<[1], [0], [0], [1], [0, 0, 1, 1], [], []>} : vector<16x32xbf16>, vector<32x32xbf16>, vector<16x32xf32> -> vector<16x32xf32>
    %93 = vector.shape_cast %92 : vector<16x32xf32> to vector<2x8x32xf32>
    %94 = vector.shape_cast %14 : vector<1x32xf32> to vector<1x1x32xf32>
    %95 = vector.broadcast %94 : vector<1x1x32xf32> to vector<2x8x32xf32>
    %96 = arith.addf %93, %95 : vector<2x8x32xf32>
    %cst_66 = arith.constant 0.000000e+00 : f32
    %97 = vector.broadcast %cst_66 : f32 to vector<2x8x32xf32>
    %98 = arith.maximumf %96, %97 : vector<2x8x32xf32>
    %99 = vector.shape_cast %98 : vector<2x8x32xf32> to vector<16x32xf32>
    %100 = arith.truncf %99 : vector<16x32xf32> to vector<16x32xbf16>
    %cst_67 = arith.constant dense<0.000000e+00> : vector<16x32xf32>
    %101 = tpu.matmul %100, %15, %cst_67 {dimension_numbers = #tpu.dot_dimension_numbers<[1], [0], [0], [1], [0, 0, 1, 1], [], []>} : vector<16x32xbf16>, vector<32x32xbf16>, vector<16x32xf32> -> vector<16x32xf32>
    %102 = vector.shape_cast %101 : vector<16x32xf32> to vector<2x8x32xf32>
    %103 = vector.shape_cast %16 : vector<1x32xf32> to vector<1x1x32xf32>
    %104 = vector.broadcast %103 : vector<1x1x32xf32> to vector<2x8x32xf32>
    %105 = arith.addf %102, %104 : vector<2x8x32xf32>
    %106 = arith.addf %105, %89 : vector<2x8x32xf32>
    %107 = vector.extract_strided_slice %7 {offsets = [2, 0], sizes = [1, 32], strides = [1, 1]} : vector<4x32xf32> to vector<1x32xf32>
    %108 = vector.shape_cast %107 : vector<1x32xf32> to vector<32xf32>
    %109 = vector.extract_strided_slice %7 {offsets = [3, 0], sizes = [1, 32], strides = [1, 1]} : vector<4x32xf32> to vector<1x32xf32>
    %110 = vector.shape_cast %109 : vector<1x32xf32> to vector<32xf32>
    %cst_68 = arith.constant dense<0.000000e+00> : vector<2x8xf32>
    %111 = vector.multi_reduction <add>, %106, %cst_68 [2] : vector<2x8x32xf32> to vector<2x8xf32>
    %112 = vector.shape_cast %111 : vector<2x8xf32> to vector<2x8x1xf32>
    %cst_69 = arith.constant 3.200000e+01 : f32
    %113 = vector.broadcast %cst_69 : f32 to vector<2x8x1xf32>
    %114 = arith.divf %112, %113 : vector<2x8x1xf32>
    %115 = vector.broadcast %114 : vector<2x8x1xf32> to vector<2x8x32xf32>
    %116 = arith.subf %106, %115 : vector<2x8x32xf32>
    %117 = arith.mulf %116, %116 : vector<2x8x32xf32>
    %cst_70 = arith.constant dense<0.000000e+00> : vector<2x8xf32>
    %118 = vector.multi_reduction <add>, %117, %cst_70 [2] : vector<2x8x32xf32> to vector<2x8xf32>
    %119 = vector.shape_cast %118 : vector<2x8xf32> to vector<2x8x1xf32>
    %cst_71 = arith.constant 3.200000e+01 : f32
    %120 = vector.broadcast %cst_71 : f32 to vector<2x8x1xf32>
    %121 = arith.divf %119, %120 : vector<2x8x1xf32>
    %122 = vector.broadcast %114 : vector<2x8x1xf32> to vector<2x8x32xf32>
    %123 = arith.subf %106, %122 : vector<2x8x32xf32>
    %cst_72 = arith.constant 9.99999974E-6 : f32
    %124 = vector.broadcast %cst_72 : f32 to vector<2x8x1xf32>
    %125 = arith.addf %121, %124 : vector<2x8x1xf32>
    %126 = math.rsqrt %125 : vector<2x8x1xf32>
    %127 = vector.broadcast %126 : vector<2x8x1xf32> to vector<2x8x32xf32>
    %128 = arith.mulf %123, %127 : vector<2x8x32xf32>
    %129 = vector.shape_cast %108 : vector<32xf32> to vector<1x1x32xf32>
    %130 = vector.broadcast %129 : vector<1x1x32xf32> to vector<2x8x32xf32>
    %131 = arith.mulf %128, %130 : vector<2x8x32xf32>
    %132 = vector.shape_cast %110 : vector<32xf32> to vector<1x1x32xf32>
    %133 = vector.broadcast %132 : vector<1x1x32xf32> to vector<2x8x32xf32>
    %134 = arith.addf %131, %133 : vector<2x8x32xf32>
    %135 = arith.truncf %42 : vector<2x8x32xf32> to vector<2x8x32xbf16>
    %136 = arith.truncf %25 : vector<2x8x32xf32> to vector<2x8x32xbf16>
    %cst_73 = arith.constant dense<0.000000e+00> : vector<2x8x8xf32>
    %137 = tpu.matmul %135, %136, %cst_73 {dimension_numbers = #tpu.dot_dimension_numbers<[2], [2], [1], [1], [0, 0, 0, 1, 1, 1], [0], [0]>} : vector<2x8x32xbf16>, vector<2x8x32xbf16>, vector<2x8x8xf32> -> vector<2x8x8xf32>
    %cst_74 = arith.constant dense<0xFF800000> : vector<2x8xf32>
    %138 = vector.multi_reduction <maximumf>, %137, %cst_74 [2] : vector<2x8x8xf32> to vector<2x8xf32>
    %139 = vector.shape_cast %138 : vector<2x8xf32> to vector<2x8x1xf32>
    %140 = vector.broadcast %139 : vector<2x8x1xf32> to vector<2x8x8xf32>
    %141 = arith.subf %137, %140 : vector<2x8x8xf32>
    %142 = math.exp %141 : vector<2x8x8xf32>
    %cst_75 = arith.constant dense<0.000000e+00> : vector<2x8xf32>
    %143 = vector.multi_reduction <add>, %142, %cst_75 [2] : vector<2x8x8xf32> to vector<2x8xf32>
    %144 = vector.shape_cast %143 : vector<2x8xf32> to vector<2x8x1xf32>
    %cst_76 = arith.constant 0.176776692 : f32
    %145 = vector.broadcast %cst_76 : f32 to vector<2x8x1xf32>
    %146 = arith.divf %145, %144 : vector<2x8x1xf32>
    %147 = vector.broadcast %146 : vector<2x8x1xf32> to vector<2x8x8xf32>
    %148 = arith.mulf %142, %147 : vector<2x8x8xf32>
    %149 = arith.truncf %148 : vector<2x8x8xf32> to vector<2x8x8xbf16>
    %150 = arith.truncf %42 : vector<2x8x32xf32> to vector<2x8x32xbf16>
    %cst_77 = arith.constant dense<0.000000e+00> : vector<2x8x32xf32>
    %151 = tpu.matmul %149, %150, %cst_77 {dimension_numbers = #tpu.dot_dimension_numbers<[2], [1], [1], [2], [0, 0, 0, 1, 1, 2], [0], [0]>} : vector<2x8x8xbf16>, vector<2x8x32xbf16>, vector<2x8x32xf32> -> vector<2x8x32xf32>
    %152 = arith.addf %151, %42 : vector<2x8x32xf32>
    %153 = vector.extract_strided_slice %8 {offsets = [0, 0], sizes = [1, 32], strides = [1, 1]} : vector<4x32xf32> to vector<1x32xf32>
    %154 = vector.shape_cast %153 : vector<1x32xf32> to vector<32xf32>
    %155 = vector.extract_strided_slice %8 {offsets = [1, 0], sizes = [1, 32], strides = [1, 1]} : vector<4x32xf32> to vector<1x32xf32>
    %156 = vector.shape_cast %155 : vector<1x32xf32> to vector<32xf32>
    %cst_78 = arith.constant dense<0.000000e+00> : vector<2x8xf32>
    %157 = vector.multi_reduction <add>, %152, %cst_78 [2] : vector<2x8x32xf32> to vector<2x8xf32>
    %158 = vector.shape_cast %157 : vector<2x8xf32> to vector<2x8x1xf32>
    %cst_79 = arith.constant 3.200000e+01 : f32
    %159 = vector.broadcast %cst_79 : f32 to vector<2x8x1xf32>
    %160 = arith.divf %158, %159 : vector<2x8x1xf32>
    %161 = vector.broadcast %160 : vector<2x8x1xf32> to vector<2x8x32xf32>
    %162 = arith.subf %152, %161 : vector<2x8x32xf32>
    %163 = arith.mulf %162, %162 : vector<2x8x32xf32>
    %cst_80 = arith.constant dense<0.000000e+00> : vector<2x8xf32>
    %164 = vector.multi_reduction <add>, %163, %cst_80 [2] : vector<2x8x32xf32> to vector<2x8xf32>
    %165 = vector.shape_cast %164 : vector<2x8xf32> to vector<2x8x1xf32>
    %cst_81 = arith.constant 3.200000e+01 : f32
    %166 = vector.broadcast %cst_81 : f32 to vector<2x8x1xf32>
    %167 = arith.divf %165, %166 : vector<2x8x1xf32>
    %168 = vector.broadcast %160 : vector<2x8x1xf32> to vector<2x8x32xf32>
    %169 = arith.subf %152, %168 : vector<2x8x32xf32>
    %cst_82 = arith.constant 9.99999974E-6 : f32
    %170 = vector.broadcast %cst_82 : f32 to vector<2x8x1xf32>
    %171 = arith.addf %167, %170 : vector<2x8x1xf32>
    %172 = math.rsqrt %171 : vector<2x8x1xf32>
    %173 = vector.broadcast %172 : vector<2x8x1xf32> to vector<2x8x32xf32>
    %174 = arith.mulf %169, %173 : vector<2x8x32xf32>
    %175 = vector.shape_cast %154 : vector<32xf32> to vector<1x1x32xf32>
    %176 = vector.broadcast %175 : vector<1x1x32xf32> to vector<2x8x32xf32>
    %177 = arith.mulf %174, %176 : vector<2x8x32xf32>
    %178 = vector.shape_cast %156 : vector<32xf32> to vector<1x1x32xf32>
    %179 = vector.broadcast %178 : vector<1x1x32xf32> to vector<2x8x32xf32>
    %180 = arith.addf %177, %179 : vector<2x8x32xf32>
    %181 = vector.shape_cast %180 : vector<2x8x32xf32> to vector<16x32xf32>
    %182 = arith.truncf %181 : vector<16x32xf32> to vector<16x32xbf16>
    %cst_83 = arith.constant dense<0.000000e+00> : vector<16x32xf32>
    %183 = tpu.matmul %182, %17, %cst_83 {dimension_numbers = #tpu.dot_dimension_numbers<[1], [0], [0], [1], [0, 0, 1, 1], [], []>} : vector<16x32xbf16>, vector<32x32xbf16>, vector<16x32xf32> -> vector<16x32xf32>
    %184 = vector.shape_cast %183 : vector<16x32xf32> to vector<2x8x32xf32>
    %185 = vector.shape_cast %18 : vector<1x32xf32> to vector<1x1x32xf32>
    %186 = vector.broadcast %185 : vector<1x1x32xf32> to vector<2x8x32xf32>
    %187 = arith.addf %184, %186 : vector<2x8x32xf32>
    %cst_84 = arith.constant 0.000000e+00 : f32
    %188 = vector.broadcast %cst_84 : f32 to vector<2x8x32xf32>
    %189 = arith.maximumf %187, %188 : vector<2x8x32xf32>
    %190 = vector.shape_cast %189 : vector<2x8x32xf32> to vector<16x32xf32>
    %191 = arith.truncf %190 : vector<16x32xf32> to vector<16x32xbf16>
    %cst_85 = arith.constant dense<0.000000e+00> : vector<16x32xf32>
    %192 = tpu.matmul %191, %19, %cst_85 {dimension_numbers = #tpu.dot_dimension_numbers<[1], [0], [0], [1], [0, 0, 1, 1], [], []>} : vector<16x32xbf16>, vector<32x32xbf16>, vector<16x32xf32> -> vector<16x32xf32>
    %193 = vector.shape_cast %192 : vector<16x32xf32> to vector<2x8x32xf32>
    %194 = vector.shape_cast %20 : vector<1x32xf32> to vector<1x1x32xf32>
    %195 = vector.broadcast %194 : vector<1x1x32xf32> to vector<2x8x32xf32>
    %196 = arith.addf %193, %195 : vector<2x8x32xf32>
    %197 = arith.addf %196, %180 : vector<2x8x32xf32>
    %198 = vector.extract_strided_slice %8 {offsets = [2, 0], sizes = [1, 32], strides = [1, 1]} : vector<4x32xf32> to vector<1x32xf32>
    %199 = vector.shape_cast %198 : vector<1x32xf32> to vector<32xf32>
    %200 = vector.extract_strided_slice %8 {offsets = [3, 0], sizes = [1, 32], strides = [1, 1]} : vector<4x32xf32> to vector<1x32xf32>
    %201 = vector.shape_cast %200 : vector<1x32xf32> to vector<32xf32>
    %cst_86 = arith.constant dense<0.000000e+00> : vector<2x8xf32>
    %202 = vector.multi_reduction <add>, %197, %cst_86 [2] : vector<2x8x32xf32> to vector<2x8xf32>
    %203 = vector.shape_cast %202 : vector<2x8xf32> to vector<2x8x1xf32>
    %cst_87 = arith.constant 3.200000e+01 : f32
    %204 = vector.broadcast %cst_87 : f32 to vector<2x8x1xf32>
    %205 = arith.divf %203, %204 : vector<2x8x1xf32>
    %206 = vector.broadcast %205 : vector<2x8x1xf32> to vector<2x8x32xf32>
    %207 = arith.subf %197, %206 : vector<2x8x32xf32>
    %208 = arith.mulf %207, %207 : vector<2x8x32xf32>
    %cst_88 = arith.constant dense<0.000000e+00> : vector<2x8xf32>
    %209 = vector.multi_reduction <add>, %208, %cst_88 [2] : vector<2x8x32xf32> to vector<2x8xf32>
    %210 = vector.shape_cast %209 : vector<2x8xf32> to vector<2x8x1xf32>
    %cst_89 = arith.constant 3.200000e+01 : f32
    %211 = vector.broadcast %cst_89 : f32 to vector<2x8x1xf32>
    %212 = arith.divf %210, %211 : vector<2x8x1xf32>
    %213 = vector.broadcast %205 : vector<2x8x1xf32> to vector<2x8x32xf32>
    %214 = arith.subf %197, %213 : vector<2x8x32xf32>
    %cst_90 = arith.constant 9.99999974E-6 : f32
    %215 = vector.broadcast %cst_90 : f32 to vector<2x8x1xf32>
    %216 = arith.addf %212, %215 : vector<2x8x1xf32>
    %217 = math.rsqrt %216 : vector<2x8x1xf32>
    %218 = vector.broadcast %217 : vector<2x8x1xf32> to vector<2x8x32xf32>
    %219 = arith.mulf %214, %218 : vector<2x8x32xf32>
    %220 = vector.shape_cast %199 : vector<32xf32> to vector<1x1x32xf32>
    %221 = vector.broadcast %220 : vector<1x1x32xf32> to vector<2x8x32xf32>
    %222 = arith.mulf %219, %221 : vector<2x8x32xf32>
    %223 = vector.shape_cast %201 : vector<32xf32> to vector<1x1x32xf32>
    %224 = vector.broadcast %223 : vector<1x1x32xf32> to vector<2x8x32xf32>
    %225 = arith.addf %222, %224 : vector<2x8x32xf32>
    %226 = arith.truncf %225 : vector<2x8x32xf32> to vector<2x8x32xbf16>
    %227 = arith.truncf %134 : vector<2x8x32xf32> to vector<2x8x32xbf16>
    %cst_91 = arith.constant dense<0.000000e+00> : vector<2x8x8xf32>
    %228 = tpu.matmul %226, %227, %cst_91 {dimension_numbers = #tpu.dot_dimension_numbers<[2], [2], [1], [1], [0, 0, 0, 1, 1, 1], [0], [0]>} : vector<2x8x32xbf16>, vector<2x8x32xbf16>, vector<2x8x8xf32> -> vector<2x8x8xf32>
    %cst_92 = arith.constant dense<0xFF800000> : vector<2x8xf32>
    %229 = vector.multi_reduction <maximumf>, %228, %cst_92 [2] : vector<2x8x8xf32> to vector<2x8xf32>
    %230 = vector.shape_cast %229 : vector<2x8xf32> to vector<2x8x1xf32>
    %231 = vector.broadcast %230 : vector<2x8x1xf32> to vector<2x8x8xf32>
    %232 = arith.subf %228, %231 : vector<2x8x8xf32>
    %233 = math.exp %232 : vector<2x8x8xf32>
    %cst_93 = arith.constant dense<0.000000e+00> : vector<2x8xf32>
    %234 = vector.multi_reduction <add>, %233, %cst_93 [2] : vector<2x8x8xf32> to vector<2x8xf32>
    %235 = vector.shape_cast %234 : vector<2x8xf32> to vector<2x8x1xf32>
    %cst_94 = arith.constant 0.176776692 : f32
    %236 = vector.broadcast %cst_94 : f32 to vector<2x8x1xf32>
    %237 = arith.divf %236, %235 : vector<2x8x1xf32>
    %238 = vector.broadcast %237 : vector<2x8x1xf32> to vector<2x8x8xf32>
    %239 = arith.mulf %233, %238 : vector<2x8x8xf32>
    %240 = arith.truncf %239 : vector<2x8x8xf32> to vector<2x8x8xbf16>
    %241 = arith.truncf %43 : vector<2x8x32xf32> to vector<2x8x32xbf16>
    %cst_95 = arith.constant dense<0.000000e+00> : vector<2x8x32xf32>
    %242 = tpu.matmul %240, %241, %cst_95 {dimension_numbers = #tpu.dot_dimension_numbers<[2], [1], [1], [2], [0, 0, 0, 1, 1, 2], [0], [0]>} : vector<2x8x8xbf16>, vector<2x8x32xbf16>, vector<2x8x32xf32> -> vector<2x8x32xf32>
    %243 = arith.addf %242, %43 : vector<2x8x32xf32>
    %244 = vector.extract_strided_slice %6 {offsets = [0, 0], sizes = [1, 32], strides = [1, 1]} : vector<4x32xf32> to vector<1x32xf32>
    %245 = vector.shape_cast %244 : vector<1x32xf32> to vector<32xf32>
    %246 = vector.extract_strided_slice %6 {offsets = [1, 0], sizes = [1, 32], strides = [1, 1]} : vector<4x32xf32> to vector<1x32xf32>
    %247 = vector.shape_cast %246 : vector<1x32xf32> to vector<32xf32>
    %cst_96 = arith.constant dense<0.000000e+00> : vector<2x8xf32>
    %248 = vector.multi_reduction <add>, %243, %cst_96 [2] : vector<2x8x32xf32> to vector<2x8xf32>
    %249 = vector.shape_cast %248 : vector<2x8xf32> to vector<2x8x1xf32>
    %cst_97 = arith.constant 3.200000e+01 : f32
    %250 = vector.broadcast %cst_97 : f32 to vector<2x8x1xf32>
    %251 = arith.divf %249, %250 : vector<2x8x1xf32>
    %252 = vector.broadcast %251 : vector<2x8x1xf32> to vector<2x8x32xf32>
    %253 = arith.subf %243, %252 : vector<2x8x32xf32>
    %254 = arith.mulf %253, %253 : vector<2x8x32xf32>
    %cst_98 = arith.constant dense<0.000000e+00> : vector<2x8xf32>
    %255 = vector.multi_reduction <add>, %254, %cst_98 [2] : vector<2x8x32xf32> to vector<2x8xf32>
    %256 = vector.shape_cast %255 : vector<2x8xf32> to vector<2x8x1xf32>
    %cst_99 = arith.constant 3.200000e+01 : f32
    %257 = vector.broadcast %cst_99 : f32 to vector<2x8x1xf32>
    %258 = arith.divf %256, %257 : vector<2x8x1xf32>
    %259 = vector.broadcast %251 : vector<2x8x1xf32> to vector<2x8x32xf32>
    %260 = arith.subf %243, %259 : vector<2x8x32xf32>
    %cst_100 = arith.constant 9.99999974E-6 : f32
    %261 = vector.broadcast %cst_100 : f32 to vector<2x8x1xf32>
    %262 = arith.addf %258, %261 : vector<2x8x1xf32>
    %263 = math.rsqrt %262 : vector<2x8x1xf32>
    %264 = vector.broadcast %263 : vector<2x8x1xf32> to vector<2x8x32xf32>
    %265 = arith.mulf %260, %264 : vector<2x8x32xf32>
    %266 = vector.shape_cast %245 : vector<32xf32> to vector<1x1x32xf32>
    %267 = vector.broadcast %266 : vector<1x1x32xf32> to vector<2x8x32xf32>
    %268 = arith.mulf %265, %267 : vector<2x8x32xf32>
    %269 = vector.shape_cast %247 : vector<32xf32> to vector<1x1x32xf32>
    %270 = vector.broadcast %269 : vector<1x1x32xf32> to vector<2x8x32xf32>
    %271 = arith.addf %268, %270 : vector<2x8x32xf32>
    %272 = vector.shape_cast %271 : vector<2x8x32xf32> to vector<16x32xf32>
    %273 = arith.truncf %272 : vector<16x32xf32> to vector<16x32xbf16>
    %cst_101 = arith.constant dense<0.000000e+00> : vector<16x32xf32>
    %274 = tpu.matmul %273, %9, %cst_101 {dimension_numbers = #tpu.dot_dimension_numbers<[1], [0], [0], [1], [0, 0, 1, 1], [], []>} : vector<16x32xbf16>, vector<32x32xbf16>, vector<16x32xf32> -> vector<16x32xf32>
    %275 = vector.shape_cast %274 : vector<16x32xf32> to vector<2x8x32xf32>
    %276 = vector.shape_cast %10 : vector<1x32xf32> to vector<1x1x32xf32>
    %277 = vector.broadcast %276 : vector<1x1x32xf32> to vector<2x8x32xf32>
    %278 = arith.addf %275, %277 : vector<2x8x32xf32>
    %cst_102 = arith.constant 0.000000e+00 : f32
    %279 = vector.broadcast %cst_102 : f32 to vector<2x8x32xf32>
    %280 = arith.maximumf %278, %279 : vector<2x8x32xf32>
    %281 = vector.shape_cast %280 : vector<2x8x32xf32> to vector<16x32xf32>
    %282 = arith.truncf %281 : vector<16x32xf32> to vector<16x32xbf16>
    %cst_103 = arith.constant dense<0.000000e+00> : vector<16x32xf32>
    %283 = tpu.matmul %282, %11, %cst_103 {dimension_numbers = #tpu.dot_dimension_numbers<[1], [0], [0], [1], [0, 0, 1, 1], [], []>} : vector<16x32xbf16>, vector<32x32xbf16>, vector<16x32xf32> -> vector<16x32xf32>
    %284 = vector.shape_cast %283 : vector<16x32xf32> to vector<2x8x32xf32>
    %285 = vector.shape_cast %12 : vector<1x32xf32> to vector<1x1x32xf32>
    %286 = vector.broadcast %285 : vector<1x1x32xf32> to vector<2x8x32xf32>
    %287 = arith.addf %284, %286 : vector<2x8x32xf32>
    %288 = arith.addf %287, %271 : vector<2x8x32xf32>
    %289 = vector.extract_strided_slice %6 {offsets = [2, 0], sizes = [1, 32], strides = [1, 1]} : vector<4x32xf32> to vector<1x32xf32>
    %290 = vector.shape_cast %289 : vector<1x32xf32> to vector<32xf32>
    %291 = vector.extract_strided_slice %6 {offsets = [3, 0], sizes = [1, 32], strides = [1, 1]} : vector<4x32xf32> to vector<1x32xf32>
    %292 = vector.shape_cast %291 : vector<1x32xf32> to vector<32xf32>
    %cst_104 = arith.constant dense<0.000000e+00> : vector<2x8xf32>
    %293 = vector.multi_reduction <add>, %288, %cst_104 [2] : vector<2x8x32xf32> to vector<2x8xf32>
    %294 = vector.shape_cast %293 : vector<2x8xf32> to vector<2x8x1xf32>
    %cst_105 = arith.constant 3.200000e+01 : f32
    %295 = vector.broadcast %cst_105 : f32 to vector<2x8x1xf32>
    %296 = arith.divf %294, %295 : vector<2x8x1xf32>
    %297 = vector.broadcast %296 : vector<2x8x1xf32> to vector<2x8x32xf32>
    %298 = arith.subf %288, %297 : vector<2x8x32xf32>
    %299 = arith.mulf %298, %298 : vector<2x8x32xf32>
    %cst_106 = arith.constant dense<0.000000e+00> : vector<2x8xf32>
    %300 = vector.multi_reduction <add>, %299, %cst_106 [2] : vector<2x8x32xf32> to vector<2x8xf32>
    %301 = vector.shape_cast %300 : vector<2x8xf32> to vector<2x8x1xf32>
    %cst_107 = arith.constant 3.200000e+01 : f32
    %302 = vector.broadcast %cst_107 : f32 to vector<2x8x1xf32>
    %303 = arith.divf %301, %302 : vector<2x8x1xf32>
    %304 = vector.broadcast %296 : vector<2x8x1xf32> to vector<2x8x32xf32>
    %305 = arith.subf %288, %304 : vector<2x8x32xf32>
    %cst_108 = arith.constant 9.99999974E-6 : f32
    %306 = vector.broadcast %cst_108 : f32 to vector<2x8x1xf32>
    %307 = arith.addf %303, %306 : vector<2x8x1xf32>
    %308 = math.rsqrt %307 : vector<2x8x1xf32>
    %309 = vector.broadcast %308 : vector<2x8x1xf32> to vector<2x8x32xf32>
    %310 = arith.mulf %305, %309 : vector<2x8x32xf32>
    %311 = vector.shape_cast %290 : vector<32xf32> to vector<1x1x32xf32>
    %312 = vector.broadcast %311 : vector<1x1x32xf32> to vector<2x8x32xf32>
    %313 = arith.mulf %310, %312 : vector<2x8x32xf32>
    %314 = vector.shape_cast %292 : vector<32xf32> to vector<1x1x32xf32>
    %315 = vector.broadcast %314 : vector<1x1x32xf32> to vector<2x8x32xf32>
    %316 = arith.addf %313, %315 : vector<2x8x32xf32>
    %c0_i32_109 = arith.constant 0 : i32
    %317 = arith.cmpi eq, %28, %c0_i32_109 : i32
    %318 = arith.select %317, %41, %134 : vector<2x8x32xf32>
    %319 = arith.select %317, %42, %225 : vector<2x8x32xf32>
    %320 = arith.select %317, %43, %316 : vector<2x8x32xf32>
    %321 = vector.shape_cast %318 : vector<2x8x32xf32> to vector<16x32xf32>
    %cst_110 = arith.constant dense<0.000000e+00> : vector<16x32xf32>
    %322 = tpu.matmul %321, %21, %cst_110 {dimension_numbers = #tpu.dot_dimension_numbers<[1], [0], [0], [1], [0, 0, 1, 1], [], []>} : vector<16x32xf32>, vector<32x32xf32>, vector<16x32xf32> -> vector<16x32xf32>
    %323 = vector.shape_cast %322 : vector<16x32xf32> to vector<2x8x32xf32>
    %324 = vector.shape_cast %22 : vector<1x32xf32> to vector<1x1x32xf32>
    %325 = vector.broadcast %324 : vector<1x1x32xf32> to vector<2x8x32xf32>
    %326 = arith.addf %323, %325 : vector<2x8x32xf32>
    %327 = vector.shape_cast %319 : vector<2x8x32xf32> to vector<16x32xf32>
    %cst_111 = arith.constant dense<0.000000e+00> : vector<16x32xf32>
    %328 = tpu.matmul %327, %23, %cst_111 {dimension_numbers = #tpu.dot_dimension_numbers<[1], [0], [0], [1], [0, 0, 1, 1], [], []>} : vector<16x32xf32>, vector<32x32xf32>, vector<16x32xf32> -> vector<16x32xf32>
    %329 = vector.shape_cast %328 : vector<16x32xf32> to vector<2x8x32xf32>
    %330 = vector.shape_cast %24 : vector<1x32xf32> to vector<1x1x32xf32>
    %331 = vector.broadcast %330 : vector<1x1x32xf32> to vector<2x8x32xf32>
    %332 = arith.addf %329, %331 : vector<2x8x32xf32>
    %cst_112 = arith.constant 0.000000e+00 : f32
    %333 = vector.broadcast %cst_112 : f32 to vector<2x8x32xf32>
    %334 = arith.maximumf %332, %333 : vector<2x8x32xf32>
    %cst_113 = arith.constant 9.99999993E-9 : f32
    %cst_114 = arith.constant 1.000000e+00 : f32
    %335 = vector.broadcast %cst_113 : f32 to vector<2x8x32xf32>
    %336 = arith.maximumf %335, %334 : vector<2x8x32xf32>
    %337 = vector.broadcast %cst_114 : f32 to vector<2x8x32xf32>
    %338 = arith.minimumf %337, %336 : vector<2x8x32xf32>
    %339 = math.roundeven %320 : vector<2x8x32xf32>
    %cst_115 = arith.constant 0.707106769 : f32
    %340 = vector.broadcast %cst_115 : f32 to vector<2x8x32xf32>
    %341 = arith.divf %340, %338 : vector<2x8x32xf32>
    %cst_116 = arith.constant 5.000000e-01 : f32
    %342 = vector.broadcast %cst_116 : f32 to vector<2x8x32xf32>
    %343 = arith.addf %339, %342 : vector<2x8x32xf32>
    %344 = arith.subf %343, %326 : vector<2x8x32xf32>
    %345 = arith.mulf %344, %341 : vector<2x8x32xf32>
    %346 = math.absf %345 : vector<2x8x32xf32>
    %cst_117 = arith.constant 0.327591091 : f32
    %347 = vector.broadcast %cst_117 : f32 to vector<2x8x32xf32>
    %348 = arith.mulf %347, %346 : vector<2x8x32xf32>
    %cst_118 = arith.constant 1.000000e+00 : f32
    %349 = vector.broadcast %cst_118 : f32 to vector<2x8x32xf32>
    %350 = arith.addf %349, %348 : vector<2x8x32xf32>
    %cst_119 = arith.constant 1.000000e+00 : f32
    %351 = vector.broadcast %cst_119 : f32 to vector<2x8x32xf32>
    %352 = arith.divf %351, %350 : vector<2x8x32xf32>
    %cst_120 = arith.constant 1.06140542 : f32
    %353 = vector.broadcast %cst_120 : f32 to vector<2x8x32xf32>
    %354 = arith.mulf %353, %352 : vector<2x8x32xf32>
    %cst_121 = arith.constant -1.45315206 : f32
    %355 = vector.broadcast %cst_121 : f32 to vector<2x8x32xf32>
    %356 = arith.addf %354, %355 : vector<2x8x32xf32>
    %357 = arith.mulf %356, %352 : vector<2x8x32xf32>
    %cst_122 = arith.constant 1.42141378 : f32
    %358 = vector.broadcast %cst_122 : f32 to vector<2x8x32xf32>
    %359 = arith.addf %357, %358 : vector<2x8x32xf32>
    %360 = arith.mulf %359, %352 : vector<2x8x32xf32>
    %cst_123 = arith.constant -0.284496725 : f32
    %361 = vector.broadcast %cst_123 : f32 to vector<2x8x32xf32>
    %362 = arith.addf %360, %361 : vector<2x8x32xf32>
    %363 = arith.mulf %362, %352 : vector<2x8x32xf32>
    %cst_124 = arith.constant 0.254829586 : f32
    %364 = vector.broadcast %cst_124 : f32 to vector<2x8x32xf32>
    %365 = arith.addf %363, %364 : vector<2x8x32xf32>
    %366 = arith.mulf %365, %352 : vector<2x8x32xf32>
    %cst_125 = arith.constant 0.000000e+00 : f32
    %367 = vector.broadcast %cst_125 : f32 to vector<2x8x32xf32>
    %368 = arith.subf %367, %346 : vector<2x8x32xf32>
    %369 = arith.mulf %368, %346 : vector<2x8x32xf32>
    %370 = math.exp %369 : vector<2x8x32xf32>
    %371 = arith.mulf %366, %370 : vector<2x8x32xf32>
    %cst_126 = arith.constant 1.000000e+00 : f32
    %372 = vector.broadcast %cst_126 : f32 to vector<2x8x32xf32>
    %373 = arith.subf %372, %371 : vector<2x8x32xf32>
    %cst_127 = arith.constant 0.000000e+00 : f32
    %374 = vector.broadcast %cst_127 : f32 to vector<2x8x32xf32>
    %375 = arith.cmpf oge, %345, %374 : vector<2x8x32xf32>
    %cst_128 = arith.constant 0.000000e+00 : f32
    %376 = vector.broadcast %cst_128 : f32 to vector<2x8x32xf32>
    %377 = arith.subf %376, %373 : vector<2x8x32xf32>
    %378 = arith.select %375, %373, %377 : vector<2x8x32xi1>, vector<2x8x32xf32>
    %cst_129 = arith.constant 5.000000e-01 : f32
    %379 = vector.broadcast %cst_129 : f32 to vector<2x8x32xf32>
    %380 = arith.subf %339, %379 : vector<2x8x32xf32>
    %381 = arith.subf %380, %326 : vector<2x8x32xf32>
    %382 = arith.mulf %381, %341 : vector<2x8x32xf32>
    %383 = math.absf %382 : vector<2x8x32xf32>
    %cst_130 = arith.constant 0.327591091 : f32
    %384 = vector.broadcast %cst_130 : f32 to vector<2x8x32xf32>
    %385 = arith.mulf %384, %383 : vector<2x8x32xf32>
    %cst_131 = arith.constant 1.000000e+00 : f32
    %386 = vector.broadcast %cst_131 : f32 to vector<2x8x32xf32>
    %387 = arith.addf %386, %385 : vector<2x8x32xf32>
    %cst_132 = arith.constant 1.000000e+00 : f32
    %388 = vector.broadcast %cst_132 : f32 to vector<2x8x32xf32>
    %389 = arith.divf %388, %387 : vector<2x8x32xf32>
    %cst_133 = arith.constant 1.06140542 : f32
    %390 = vector.broadcast %cst_133 : f32 to vector<2x8x32xf32>
    %391 = arith.mulf %390, %389 : vector<2x8x32xf32>
    %cst_134 = arith.constant -1.45315206 : f32
    %392 = vector.broadcast %cst_134 : f32 to vector<2x8x32xf32>
    %393 = arith.addf %391, %392 : vector<2x8x32xf32>
    %394 = arith.mulf %393, %389 : vector<2x8x32xf32>
    %cst_135 = arith.constant 1.42141378 : f32
    %395 = vector.broadcast %cst_135 : f32 to vector<2x8x32xf32>
    %396 = arith.addf %394, %395 : vector<2x8x32xf32>
    %397 = arith.mulf %396, %389 : vector<2x8x32xf32>
    %cst_136 = arith.constant -0.284496725 : f32
    %398 = vector.broadcast %cst_136 : f32 to vector<2x8x32xf32>
    %399 = arith.addf %397, %398 : vector<2x8x32xf32>
    %400 = arith.mulf %399, %389 : vector<2x8x32xf32>
    %cst_137 = arith.constant 0.254829586 : f32
    %401 = vector.broadcast %cst_137 : f32 to vector<2x8x32xf32>
    %402 = arith.addf %400, %401 : vector<2x8x32xf32>
    %403 = arith.mulf %402, %389 : vector<2x8x32xf32>
    %cst_138 = arith.constant 0.000000e+00 : f32
    %404 = vector.broadcast %cst_138 : f32 to vector<2x8x32xf32>
    %405 = arith.subf %404, %383 : vector<2x8x32xf32>
    %406 = arith.mulf %405, %383 : vector<2x8x32xf32>
    %407 = math.exp %406 : vector<2x8x32xf32>
    %408 = arith.mulf %403, %407 : vector<2x8x32xf32>
    %cst_139 = arith.constant 1.000000e+00 : f32
    %409 = vector.broadcast %cst_139 : f32 to vector<2x8x32xf32>
    %410 = arith.subf %409, %408 : vector<2x8x32xf32>
    %cst_140 = arith.constant 0.000000e+00 : f32
    %411 = vector.broadcast %cst_140 : f32 to vector<2x8x32xf32>
    %412 = arith.cmpf oge, %382, %411 : vector<2x8x32xf32>
    %cst_141 = arith.constant 0.000000e+00 : f32
    %413 = vector.broadcast %cst_141 : f32 to vector<2x8x32xf32>
    %414 = arith.subf %413, %410 : vector<2x8x32xf32>
    %415 = arith.select %412, %410, %414 : vector<2x8x32xi1>, vector<2x8x32xf32>
    %416 = arith.subf %378, %415 : vector<2x8x32xf32>
    %cst_142 = arith.constant 5.000000e-01 : f32
    %417 = vector.broadcast %cst_142 : f32 to vector<2x8x32xf32>
    %418 = arith.mulf %417, %416 : vector<2x8x32xf32>
    %cst_143 = arith.constant 0.000000e+00 : f32
    %419 = vector.broadcast %cst_143 : f32 to vector<2x8x32xf32>
    %420 = arith.maximumf %418, %419 : vector<2x8x32xf32>
    %cst_144 = arith.constant 9.99999993E-9 : f32
    %421 = vector.broadcast %cst_144 : f32 to vector<2x8x32xf32>
    %422 = arith.addf %420, %421 : vector<2x8x32xf32>
    %423 = math.log %422 : vector<2x8x32xf32>
    %cst_145 = arith.constant 0.000000e+00 : f32
    %424 = vector.broadcast %cst_145 : f32 to vector<2x8x32xf32>
    %425 = arith.subf %424, %423 : vector<2x8x32xf32>
    %cst_146 = arith.constant 1.44269502 : f32
    %426 = vector.broadcast %cst_146 : f32 to vector<2x8x32xf32>
    %427 = arith.mulf %425, %426 : vector<2x8x32xf32>
    %cst_147 = arith.constant 0.000000e+00 : f32
    %cst_148 = arith.constant 5.000000e+01 : f32
    %428 = vector.broadcast %cst_147 : f32 to vector<2x8x32xf32>
    %429 = arith.maximumf %428, %427 : vector<2x8x32xf32>
    %430 = vector.broadcast %cst_148 : f32 to vector<2x8x32xf32>
    %431 = arith.minimumf %430, %429 : vector<2x8x32xf32>
    %c0_149 = arith.constant 0 : index
    %c0_150 = arith.constant 0 : index
    %c0_151 = arith.constant 0 : index
    %c0_152 = arith.constant 0 : index
    %432 = vector.load %arg24[%c0_149, %c0_150, %c0_151, %c0_152] : memref<3x2x8x192xf32, #tpu.memory_space<vmem>>, vector<1x2x8x32xf32>
    %433 = vector.shape_cast %432 : vector<1x2x8x32xf32> to vector<2x8x32xf32>
    %434 = vector.shape_cast %318 : vector<2x8x32xf32> to vector<1x2x8x32xf32>
    tpu.vector_store %arg24[%c0_149, %c0_150, %c0_151, %c0_152], %434 {strides = array<i32>} : memref<3x2x8x192xf32, #tpu.memory_space<vmem>>, vector<1x2x8x32xf32>,
    %c0_153 = arith.constant 0 : index
    %c0_154 = arith.constant 0 : index
    %c0_155 = arith.constant 0 : index
    %c32 = arith.constant 32 : index
    %435 = vector.load %arg24[%c0_153, %c0_154, %c0_155, %c32] : memref<3x2x8x192xf32, #tpu.memory_space<vmem>>, vector<1x2x8x32xf32>
    %436 = vector.shape_cast %435 : vector<1x2x8x32xf32> to vector<2x8x32xf32>
    %437 = vector.shape_cast %319 : vector<2x8x32xf32> to vector<1x2x8x32xf32>
    tpu.vector_store %arg24[%c0_153, %c0_154, %c0_155, %c32], %437 {strides = array<i32>} : memref<3x2x8x192xf32, #tpu.memory_space<vmem>>, vector<1x2x8x32xf32>,
    %c0_156 = arith.constant 0 : index
    %c0_157 = arith.constant 0 : index
    %c0_158 = arith.constant 0 : index
    %c64 = arith.constant 64 : index
    %438 = vector.load %arg24[%c0_156, %c0_157, %c0_158, %c64] : memref<3x2x8x192xf32, #tpu.memory_space<vmem>>, vector<1x2x8x32xf32>
    %439 = vector.shape_cast %438 : vector<1x2x8x32xf32> to vector<2x8x32xf32>
    %440 = vector.shape_cast %320 : vector<2x8x32xf32> to vector<1x2x8x32xf32>
    tpu.vector_store %arg24[%c0_156, %c0_157, %c0_158, %c64], %440 {strides = array<i32>} : memref<3x2x8x192xf32, #tpu.memory_space<vmem>>, vector<1x2x8x32xf32>,
    %c0_159 = arith.constant 0 : index
    %c0_160 = arith.constant 0 : index
    %c0_161 = arith.constant 0 : index
    %c96 = arith.constant 96 : index
    %441 = vector.load %arg24[%c0_159, %c0_160, %c0_161, %c96] : memref<3x2x8x192xf32, #tpu.memory_space<vmem>>, vector<1x2x8x32xf32>
    %442 = vector.shape_cast %441 : vector<1x2x8x32xf32> to vector<2x8x32xf32>
    %443 = vector.shape_cast %420 : vector<2x8x32xf32> to vector<1x2x8x32xf32>
    tpu.vector_store %arg24[%c0_159, %c0_160, %c0_161, %c96], %443 {strides = array<i32>} : memref<3x2x8x192xf32, #tpu.memory_space<vmem>>, vector<1x2x8x32xf32>,
    %c0_162 = arith.constant 0 : index
    %c0_163 = arith.constant 0 : index
    %c0_164 = arith.constant 0 : index
    %c128 = arith.constant 128 : index
    %444 = vector.load %arg24[%c0_162, %c0_163, %c0_164, %c128] : memref<3x2x8x192xf32, #tpu.memory_space<vmem>>, vector<1x2x8x32xf32>
    %445 = vector.shape_cast %444 : vector<1x2x8x32xf32> to vector<2x8x32xf32>
    %446 = vector.shape_cast %339 : vector<2x8x32xf32> to vector<1x2x8x32xf32>
    tpu.vector_store %arg24[%c0_162, %c0_163, %c0_164, %c128], %446 {strides = array<i32>} : memref<3x2x8x192xf32, #tpu.memory_space<vmem>>, vector<1x2x8x32xf32>,
    %c0_165 = arith.constant 0 : index
    %c0_166 = arith.constant 0 : index
    %c0_167 = arith.constant 0 : index
    %c160 = arith.constant 160 : index
    %447 = vector.load %arg24[%c0_165, %c0_166, %c0_167, %c160] : memref<3x2x8x192xf32, #tpu.memory_space<vmem>>, vector<1x2x8x32xf32>
    %448 = vector.shape_cast %447 : vector<1x2x8x32xf32> to vector<2x8x32xf32>
    %449 = vector.shape_cast %431 : vector<2x8x32xf32> to vector<1x2x8x32xf32>
    tpu.vector_store %arg24[%c0_165, %c0_166, %c0_167, %c160], %449 {strides = array<i32>} : memref<3x2x8x192xf32, #tpu.memory_space<vmem>>, vector<1x2x8x32xf32>,
    %c3_i32_168 = arith.constant 3 : i32
    %450 = arith.muli %arg0, %c3_i32_168 : i32
    %c1_i32 = arith.constant 1 : i32
    %451 = arith.addi %450, %c1_i32 : i32
    %c1 = arith.constant 1 : index
    %c0_169 = arith.constant 0 : index
    %c0_170 = arith.constant 0 : index
    %c0_171 = arith.constant 0 : index
    %452 = vector.load %arg1[%c1, %c0_169, %c0_170, %c0_171] : memref<3x2x8x32xf32, #tpu.memory_space<vmem>>, vector<1x2x8x32xf32>
    %453 = vector.shape_cast %452 : vector<1x2x8x32xf32> to vector<2x8x32xf32>
    %454 = vector.shape_cast %3 : vector<8x32xf32> to vector<1x8x32xf32>
    %455 = vector.broadcast %454 : vector<1x8x32xf32> to vector<2x8x32xf32>
    %456 = arith.addf %453, %455 : vector<2x8x32xf32>
    %457 = vector.shape_cast %456 : vector<2x8x32xf32> to vector<16x32xf32>
    %458 = arith.truncf %457 : vector<16x32xf32> to vector<16x32xbf16>
    %cst_172 = arith.constant dense<0.000000e+00> : vector<16x128xf32>
    %459 = tpu.matmul %458, %4, %cst_172 {dimension_numbers = #tpu.dot_dimension_numbers<[1], [0], [0], [1], [0, 0, 1, 1], [], []>} : vector<16x32xbf16>, vector<32x128xbf16>, vector<16x128xf32> -> vector<16x128xf32>
    %460 = vector.shape_cast %459 : vector<16x128xf32> to vector<2x8x128xf32>
    %461 = vector.shape_cast %5 : vector<1x128xf32> to vector<1x1x128xf32>
    %462 = vector.broadcast %461 : vector<1x1x128xf32> to vector<2x8x128xf32>
    %463 = arith.addf %460, %462 : vector<2x8x128xf32>
    %464 = vector.extract_strided_slice %463 {offsets = [0, 0, 0], sizes = [2, 8, 32], strides = [1, 1, 1]} : vector<2x8x128xf32> to vector<2x8x32xf32>
    %465 = vector.extract_strided_slice %463 {offsets = [0, 0, 32], sizes = [2, 8, 32], strides = [1, 1, 1]} : vector<2x8x128xf32> to vector<2x8x32xf32>
    %466 = vector.extract_strided_slice %463 {offsets = [0, 0, 64], sizes = [2, 8, 32], strides = [1, 1, 1]} : vector<2x8x128xf32> to vector<2x8x32xf32>
    %467 = arith.truncf %319 : vector<2x8x32xf32> to vector<2x8x32xbf16>
    %468 = arith.truncf %464 : vector<2x8x32xf32> to vector<2x8x32xbf16>
    %cst_173 = arith.constant dense<0.000000e+00> : vector<2x8x8xf32>
    %469 = tpu.matmul %467, %468, %cst_173 {dimension_numbers = #tpu.dot_dimension_numbers<[2], [2], [1], [1], [0, 0, 0, 1, 1, 1], [0], [0]>} : vector<2x8x32xbf16>, vector<2x8x32xbf16>, vector<2x8x8xf32> -> vector<2x8x8xf32>
    %cst_174 = arith.constant dense<0xFF800000> : vector<2x8xf32>
    %470 = vector.multi_reduction <maximumf>, %469, %cst_174 [2] : vector<2x8x8xf32> to vector<2x8xf32>
    %471 = vector.shape_cast %470 : vector<2x8xf32> to vector<2x8x1xf32>
    %472 = vector.broadcast %471 : vector<2x8x1xf32> to vector<2x8x8xf32>
    %473 = arith.subf %469, %472 : vector<2x8x8xf32>
    %474 = math.exp %473 : vector<2x8x8xf32>
    %cst_175 = arith.constant dense<0.000000e+00> : vector<2x8xf32>
    %475 = vector.multi_reduction <add>, %474, %cst_175 [2] : vector<2x8x8xf32> to vector<2x8xf32>
    %476 = vector.shape_cast %475 : vector<2x8xf32> to vector<2x8x1xf32>
    %cst_176 = arith.constant 0.176776692 : f32
    %477 = vector.broadcast %cst_176 : f32 to vector<2x8x1xf32>
    %478 = arith.divf %477, %476 : vector<2x8x1xf32>
    %479 = vector.broadcast %478 : vector<2x8x1xf32> to vector<2x8x8xf32>
    %480 = arith.mulf %474, %479 : vector<2x8x8xf32>
    %481 = arith.truncf %480 : vector<2x8x8xf32> to vector<2x8x8xbf16>
    %482 = arith.truncf %464 : vector<2x8x32xf32> to vector<2x8x32xbf16>
    %cst_177 = arith.constant dense<0.000000e+00> : vector<2x8x32xf32>
    %483 = tpu.matmul %481, %482, %cst_177 {dimension_numbers = #tpu.dot_dimension_numbers<[2], [1], [1], [2], [0, 0, 0, 1, 1, 2], [0], [0]>} : vector<2x8x8xbf16>, vector<2x8x32xbf16>, vector<2x8x32xf32> -> vector<2x8x32xf32>
    %484 = arith.addf %483, %464 : vector<2x8x32xf32>
    %485 = vector.extract_strided_slice %7 {offsets = [0, 0], sizes = [1, 32], strides = [1, 1]} : vector<4x32xf32> to vector<1x32xf32>
    %486 = vector.shape_cast %485 : vector<1x32xf32> to vector<32xf32>
    %487 = vector.extract_strided_slice %7 {offsets = [1, 0], sizes = [1, 32], strides = [1, 1]} : vector<4x32xf32> to vector<1x32xf32>
    %488 = vector.shape_cast %487 : vector<1x32xf32> to vector<32xf32>
    %cst_178 = arith.constant dense<0.000000e+00> : vector<2x8xf32>
    %489 = vector.multi_reduction <add>, %484, %cst_178 [2] : vector<2x8x32xf32> to vector<2x8xf32>
    %490 = vector.shape_cast %489 : vector<2x8xf32> to vector<2x8x1xf32>
    %cst_179 = arith.constant 3.200000e+01 : f32
    %491 = vector.broadcast %cst_179 : f32 to vector<2x8x1xf32>
    %492 = arith.divf %490, %491 : vector<2x8x1xf32>
    %493 = vector.broadcast %492 : vector<2x8x1xf32> to vector<2x8x32xf32>
    %494 = arith.subf %484, %493 : vector<2x8x32xf32>
    %495 = arith.mulf %494, %494 : vector<2x8x32xf32>
    %cst_180 = arith.constant dense<0.000000e+00> : vector<2x8xf32>
    %496 = vector.multi_reduction <add>, %495, %cst_180 [2] : vector<2x8x32xf32> to vector<2x8xf32>
    %497 = vector.shape_cast %496 : vector<2x8xf32> to vector<2x8x1xf32>
    %cst_181 = arith.constant 3.200000e+01 : f32
    %498 = vector.broadcast %cst_181 : f32 to vector<2x8x1xf32>
    %499 = arith.divf %497, %498 : vector<2x8x1xf32>
    %500 = vector.broadcast %492 : vector<2x8x1xf32> to vector<2x8x32xf32>
    %501 = arith.subf %484, %500 : vector<2x8x32xf32>
    %cst_182 = arith.constant 9.99999974E-6 : f32
    %502 = vector.broadcast %cst_182 : f32 to vector<2x8x1xf32>
    %503 = arith.addf %499, %502 : vector<2x8x1xf32>
    %504 = math.rsqrt %503 : vector<2x8x1xf32>
    %505 = vector.broadcast %504 : vector<2x8x1xf32> to vector<2x8x32xf32>
    %506 = arith.mulf %501, %505 : vector<2x8x32xf32>
    %507 = vector.shape_cast %486 : vector<32xf32> to vector<1x1x32xf32>
    %508 = vector.broadcast %507 : vector<1x1x32xf32> to vector<2x8x32xf32>
    %509 = arith.mulf %506, %508 : vector<2x8x32xf32>
    %510 = vector.shape_cast %488 : vector<32xf32> to vector<1x1x32xf32>
    %511 = vector.broadcast %510 : vector<1x1x32xf32> to vector<2x8x32xf32>
    %512 = arith.addf %509, %511 : vector<2x8x32xf32>
    %513 = vector.shape_cast %512 : vector<2x8x32xf32> to vector<16x32xf32>
    %514 = arith.truncf %513 : vector<16x32xf32> to vector<16x32xbf16>
    %cst_183 = arith.constant dense<0.000000e+00> : vector<16x32xf32>
    %515 = tpu.matmul %514, %13, %cst_183 {dimension_numbers = #tpu.dot_dimension_numbers<[1], [0], [0], [1], [0, 0, 1, 1], [], []>} : vector<16x32xbf16>, vector<32x32xbf16>, vector<16x32xf32> -> vector<16x32xf32>
    %516 = vector.shape_cast %515 : vector<16x32xf32> to vector<2x8x32xf32>
    %517 = vector.shape_cast %14 : vector<1x32xf32> to vector<1x1x32xf32>
    %518 = vector.broadcast %517 : vector<1x1x32xf32> to vector<2x8x32xf32>
    %519 = arith.addf %516, %518 : vector<2x8x32xf32>
    %cst_184 = arith.constant 0.000000e+00 : f32
    %520 = vector.broadcast %cst_184 : f32 to vector<2x8x32xf32>
    %521 = arith.maximumf %519, %520 : vector<2x8x32xf32>
    %522 = vector.shape_cast %521 : vector<2x8x32xf32> to vector<16x32xf32>
    %523 = arith.truncf %522 : vector<16x32xf32> to vector<16x32xbf16>
    %cst_185 = arith.constant dense<0.000000e+00> : vector<16x32xf32>
    %524 = tpu.matmul %523, %15, %cst_185 {dimension_numbers = #tpu.dot_dimension_numbers<[1], [0], [0], [1], [0, 0, 1, 1], [], []>} : vector<16x32xbf16>, vector<32x32xbf16>, vector<16x32xf32> -> vector<16x32xf32>
    %525 = vector.shape_cast %524 : vector<16x32xf32> to vector<2x8x32xf32>
    %526 = vector.shape_cast %16 : vector<1x32xf32> to vector<1x1x32xf32>
    %527 = vector.broadcast %526 : vector<1x1x32xf32> to vector<2x8x32xf32>
    %528 = arith.addf %525, %527 : vector<2x8x32xf32>
    %529 = arith.addf %528, %512 : vector<2x8x32xf32>
    %530 = vector.extract_strided_slice %7 {offsets = [2, 0], sizes = [1, 32], strides = [1, 1]} : vector<4x32xf32> to vector<1x32xf32>
    %531 = vector.shape_cast %530 : vector<1x32xf32> to vector<32xf32>
    %532 = vector.extract_strided_slice %7 {offsets = [3, 0], sizes = [1, 32], strides = [1, 1]} : vector<4x32xf32> to vector<1x32xf32>
    %533 = vector.shape_cast %532 : vector<1x32xf32> to vector<32xf32>
    %cst_186 = arith.constant dense<0.000000e+00> : vector<2x8xf32>
    %534 = vector.multi_reduction <add>, %529, %cst_186 [2] : vector<2x8x32xf32> to vector<2x8xf32>
    %535 = vector.shape_cast %534 : vector<2x8xf32> to vector<2x8x1xf32>
    %cst_187 = arith.constant 3.200000e+01 : f32
    %536 = vector.broadcast %cst_187 : f32 to vector<2x8x1xf32>
    %537 = arith.divf %535, %536 : vector<2x8x1xf32>
    %538 = vector.broadcast %537 : vector<2x8x1xf32> to vector<2x8x32xf32>
    %539 = arith.subf %529, %538 : vector<2x8x32xf32>
    %540 = arith.mulf %539, %539 : vector<2x8x32xf32>
    %cst_188 = arith.constant dense<0.000000e+00> : vector<2x8xf32>
    %541 = vector.multi_reduction <add>, %540, %cst_188 [2] : vector<2x8x32xf32> to vector<2x8xf32>
    %542 = vector.shape_cast %541 : vector<2x8xf32> to vector<2x8x1xf32>
    %cst_189 = arith.constant 3.200000e+01 : f32
    %543 = vector.broadcast %cst_189 : f32 to vector<2x8x1xf32>
    %544 = arith.divf %542, %543 : vector<2x8x1xf32>
    %545 = vector.broadcast %537 : vector<2x8x1xf32> to vector<2x8x32xf32>
    %546 = arith.subf %529, %545 : vector<2x8x32xf32>
    %cst_190 = arith.constant 9.99999974E-6 : f32
    %547 = vector.broadcast %cst_190 : f32 to vector<2x8x1xf32>
    %548 = arith.addf %544, %547 : vector<2x8x1xf32>
    %549 = math.rsqrt %548 : vector<2x8x1xf32>
    %550 = vector.broadcast %549 : vector<2x8x1xf32> to vector<2x8x32xf32>
    %551 = arith.mulf %546, %550 : vector<2x8x32xf32>
    %552 = vector.shape_cast %531 : vector<32xf32> to vector<1x1x32xf32>
    %553 = vector.broadcast %552 : vector<1x1x32xf32> to vector<2x8x32xf32>
    %554 = arith.mulf %551, %553 : vector<2x8x32xf32>
    %555 = vector.shape_cast %533 : vector<32xf32> to vector<1x1x32xf32>
    %556 = vector.broadcast %555 : vector<1x1x32xf32> to vector<2x8x32xf32>
    %557 = arith.addf %554, %556 : vector<2x8x32xf32>
    %558 = arith.truncf %465 : vector<2x8x32xf32> to vector<2x8x32xbf16>
    %559 = arith.truncf %318 : vector<2x8x32xf32> to vector<2x8x32xbf16>
    %cst_191 = arith.constant dense<0.000000e+00> : vector<2x8x8xf32>
    %560 = tpu.matmul %558, %559, %cst_191 {dimension_numbers = #tpu.dot_dimension_numbers<[2], [2], [1], [1], [0, 0, 0, 1, 1, 1], [0], [0]>} : vector<2x8x32xbf16>, vector<2x8x32xbf16>, vector<2x8x8xf32> -> vector<2x8x8xf32>
    %cst_192 = arith.constant dense<0xFF800000> : vector<2x8xf32>
    %561 = vector.multi_reduction <maximumf>, %560, %cst_192 [2] : vector<2x8x8xf32> to vector<2x8xf32>
    %562 = vector.shape_cast %561 : vector<2x8xf32> to vector<2x8x1xf32>
    %563 = vector.broadcast %562 : vector<2x8x1xf32> to vector<2x8x8xf32>
    %564 = arith.subf %560, %563 : vector<2x8x8xf32>
    %565 = math.exp %564 : vector<2x8x8xf32>
    %cst_193 = arith.constant dense<0.000000e+00> : vector<2x8xf32>
    %566 = vector.multi_reduction <add>, %565, %cst_193 [2] : vector<2x8x8xf32> to vector<2x8xf32>
    %567 = vector.shape_cast %566 : vector<2x8xf32> to vector<2x8x1xf32>
    %cst_194 = arith.constant 0.176776692 : f32
    %568 = vector.broadcast %cst_194 : f32 to vector<2x8x1xf32>
    %569 = arith.divf %568, %567 : vector<2x8x1xf32>
    %570 = vector.broadcast %569 : vector<2x8x1xf32> to vector<2x8x8xf32>
    %571 = arith.mulf %565, %570 : vector<2x8x8xf32>
    %572 = arith.truncf %571 : vector<2x8x8xf32> to vector<2x8x8xbf16>
    %573 = arith.truncf %465 : vector<2x8x32xf32> to vector<2x8x32xbf16>
    %cst_195 = arith.constant dense<0.000000e+00> : vector<2x8x32xf32>
    %574 = tpu.matmul %572, %573, %cst_195 {dimension_numbers = #tpu.dot_dimension_numbers<[2], [1], [1], [2], [0, 0, 0, 1, 1, 2], [0], [0]>} : vector<2x8x8xbf16>, vector<2x8x32xbf16>, vector<2x8x32xf32> -> vector<2x8x32xf32>
    %575 = arith.addf %574, %465 : vector<2x8x32xf32>
    %576 = vector.extract_strided_slice %8 {offsets = [0, 0], sizes = [1, 32], strides = [1, 1]} : vector<4x32xf32> to vector<1x32xf32>
    %577 = vector.shape_cast %576 : vector<1x32xf32> to vector<32xf32>
    %578 = vector.extract_strided_slice %8 {offsets = [1, 0], sizes = [1, 32], strides = [1, 1]} : vector<4x32xf32> to vector<1x32xf32>
    %579 = vector.shape_cast %578 : vector<1x32xf32> to vector<32xf32>
    %cst_196 = arith.constant dense<0.000000e+00> : vector<2x8xf32>
    %580 = vector.multi_reduction <add>, %575, %cst_196 [2] : vector<2x8x32xf32> to vector<2x8xf32>
    %581 = vector.shape_cast %580 : vector<2x8xf32> to vector<2x8x1xf32>
    %cst_197 = arith.constant 3.200000e+01 : f32
    %582 = vector.broadcast %cst_197 : f32 to vector<2x8x1xf32>
    %583 = arith.divf %581, %582 : vector<2x8x1xf32>
    %584 = vector.broadcast %583 : vector<2x8x1xf32> to vector<2x8x32xf32>
    %585 = arith.subf %575, %584 : vector<2x8x32xf32>
    %586 = arith.mulf %585, %585 : vector<2x8x32xf32>
    %cst_198 = arith.constant dense<0.000000e+00> : vector<2x8xf32>
    %587 = vector.multi_reduction <add>, %586, %cst_198 [2] : vector<2x8x32xf32> to vector<2x8xf32>
    %588 = vector.shape_cast %587 : vector<2x8xf32> to vector<2x8x1xf32>
    %cst_199 = arith.constant 3.200000e+01 : f32
    %589 = vector.broadcast %cst_199 : f32 to vector<2x8x1xf32>
    %590 = arith.divf %588, %589 : vector<2x8x1xf32>
    %591 = vector.broadcast %583 : vector<2x8x1xf32> to vector<2x8x32xf32>
    %592 = arith.subf %575, %591 : vector<2x8x32xf32>
    %cst_200 = arith.constant 9.99999974E-6 : f32
    %593 = vector.broadcast %cst_200 : f32 to vector<2x8x1xf32>
    %594 = arith.addf %590, %593 : vector<2x8x1xf32>
    %595 = math.rsqrt %594 : vector<2x8x1xf32>
    %596 = vector.broadcast %595 : vector<2x8x1xf32> to vector<2x8x32xf32>
    %597 = arith.mulf %592, %596 : vector<2x8x32xf32>
    %598 = vector.shape_cast %577 : vector<32xf32> to vector<1x1x32xf32>
    %599 = vector.broadcast %598 : vector<1x1x32xf32> to vector<2x8x32xf32>
    %600 = arith.mulf %597, %599 : vector<2x8x32xf32>
    %601 = vector.shape_cast %579 : vector<32xf32> to vector<1x1x32xf32>
    %602 = vector.broadcast %601 : vector<1x1x32xf32> to vector<2x8x32xf32>
    %603 = arith.addf %600, %602 : vector<2x8x32xf32>
    %604 = vector.shape_cast %603 : vector<2x8x32xf32> to vector<16x32xf32>
    %605 = arith.truncf %604 : vector<16x32xf32> to vector<16x32xbf16>
    %cst_201 = arith.constant dense<0.000000e+00> : vector<16x32xf32>
    %606 = tpu.matmul %605, %17, %cst_201 {dimension_numbers = #tpu.dot_dimension_numbers<[1], [0], [0], [1], [0, 0, 1, 1], [], []>} : vector<16x32xbf16>, vector<32x32xbf16>, vector<16x32xf32> -> vector<16x32xf32>
    %607 = vector.shape_cast %606 : vector<16x32xf32> to vector<2x8x32xf32>
    %608 = vector.shape_cast %18 : vector<1x32xf32> to vector<1x1x32xf32>
    %609 = vector.broadcast %608 : vector<1x1x32xf32> to vector<2x8x32xf32>
    %610 = arith.addf %607, %609 : vector<2x8x32xf32>
    %cst_202 = arith.constant 0.000000e+00 : f32
    %611 = vector.broadcast %cst_202 : f32 to vector<2x8x32xf32>
    %612 = arith.maximumf %610, %611 : vector<2x8x32xf32>
    %613 = vector.shape_cast %612 : vector<2x8x32xf32> to vector<16x32xf32>
    %614 = arith.truncf %613 : vector<16x32xf32> to vector<16x32xbf16>
    %cst_203 = arith.constant dense<0.000000e+00> : vector<16x32xf32>
    %615 = tpu.matmul %614, %19, %cst_203 {dimension_numbers = #tpu.dot_dimension_numbers<[1], [0], [0], [1], [0, 0, 1, 1], [], []>} : vector<16x32xbf16>, vector<32x32xbf16>, vector<16x32xf32> -> vector<16x32xf32>
    %616 = vector.shape_cast %615 : vector<16x32xf32> to vector<2x8x32xf32>
    %617 = vector.shape_cast %20 : vector<1x32xf32> to vector<1x1x32xf32>
    %618 = vector.broadcast %617 : vector<1x1x32xf32> to vector<2x8x32xf32>
    %619 = arith.addf %616, %618 : vector<2x8x32xf32>
    %620 = arith.addf %619, %603 : vector<2x8x32xf32>
    %621 = vector.extract_strided_slice %8 {offsets = [2, 0], sizes = [1, 32], strides = [1, 1]} : vector<4x32xf32> to vector<1x32xf32>
    %622 = vector.shape_cast %621 : vector<1x32xf32> to vector<32xf32>
    %623 = vector.extract_strided_slice %8 {offsets = [3, 0], sizes = [1, 32], strides = [1, 1]} : vector<4x32xf32> to vector<1x32xf32>
    %624 = vector.shape_cast %623 : vector<1x32xf32> to vector<32xf32>
    %cst_204 = arith.constant dense<0.000000e+00> : vector<2x8xf32>
    %625 = vector.multi_reduction <add>, %620, %cst_204 [2] : vector<2x8x32xf32> to vector<2x8xf32>
    %626 = vector.shape_cast %625 : vector<2x8xf32> to vector<2x8x1xf32>
    %cst_205 = arith.constant 3.200000e+01 : f32
    %627 = vector.broadcast %cst_205 : f32 to vector<2x8x1xf32>
    %628 = arith.divf %626, %627 : vector<2x8x1xf32>
    %629 = vector.broadcast %628 : vector<2x8x1xf32> to vector<2x8x32xf32>
    %630 = arith.subf %620, %629 : vector<2x8x32xf32>
    %631 = arith.mulf %630, %630 : vector<2x8x32xf32>
    %cst_206 = arith.constant dense<0.000000e+00> : vector<2x8xf32>
    %632 = vector.multi_reduction <add>, %631, %cst_206 [2] : vector<2x8x32xf32> to vector<2x8xf32>
    %633 = vector.shape_cast %632 : vector<2x8xf32> to vector<2x8x1xf32>
    %cst_207 = arith.constant 3.200000e+01 : f32
    %634 = vector.broadcast %cst_207 : f32 to vector<2x8x1xf32>
    %635 = arith.divf %633, %634 : vector<2x8x1xf32>
    %636 = vector.broadcast %628 : vector<2x8x1xf32> to vector<2x8x32xf32>
    %637 = arith.subf %620, %636 : vector<2x8x32xf32>
    %cst_208 = arith.constant 9.99999974E-6 : f32
    %638 = vector.broadcast %cst_208 : f32 to vector<2x8x1xf32>
    %639 = arith.addf %635, %638 : vector<2x8x1xf32>
    %640 = math.rsqrt %639 : vector<2x8x1xf32>
    %641 = vector.broadcast %640 : vector<2x8x1xf32> to vector<2x8x32xf32>
    %642 = arith.mulf %637, %641 : vector<2x8x32xf32>
    %643 = vector.shape_cast %622 : vector<32xf32> to vector<1x1x32xf32>
    %644 = vector.broadcast %643 : vector<1x1x32xf32> to vector<2x8x32xf32>
    %645 = arith.mulf %642, %644 : vector<2x8x32xf32>
    %646 = vector.shape_cast %624 : vector<32xf32> to vector<1x1x32xf32>
    %647 = vector.broadcast %646 : vector<1x1x32xf32> to vector<2x8x32xf32>
    %648 = arith.addf %645, %647 : vector<2x8x32xf32>
    %649 = arith.truncf %648 : vector<2x8x32xf32> to vector<2x8x32xbf16>
    %650 = arith.truncf %557 : vector<2x8x32xf32> to vector<2x8x32xbf16>
    %cst_209 = arith.constant dense<0.000000e+00> : vector<2x8x8xf32>
    %651 = tpu.matmul %649, %650, %cst_209 {dimension_numbers = #tpu.dot_dimension_numbers<[2], [2], [1], [1], [0, 0, 0, 1, 1, 1], [0], [0]>} : vector<2x8x32xbf16>, vector<2x8x32xbf16>, vector<2x8x8xf32> -> vector<2x8x8xf32>
    %cst_210 = arith.constant dense<0xFF800000> : vector<2x8xf32>
    %652 = vector.multi_reduction <maximumf>, %651, %cst_210 [2] : vector<2x8x8xf32> to vector<2x8xf32>
    %653 = vector.shape_cast %652 : vector<2x8xf32> to vector<2x8x1xf32>
    %654 = vector.broadcast %653 : vector<2x8x1xf32> to vector<2x8x8xf32>
    %655 = arith.subf %651, %654 : vector<2x8x8xf32>
    %656 = math.exp %655 : vector<2x8x8xf32>
    %cst_211 = arith.constant dense<0.000000e+00> : vector<2x8xf32>
    %657 = vector.multi_reduction <add>, %656, %cst_211 [2] : vector<2x8x8xf32> to vector<2x8xf32>
    %658 = vector.shape_cast %657 : vector<2x8xf32> to vector<2x8x1xf32>
    %cst_212 = arith.constant 0.176776692 : f32
    %659 = vector.broadcast %cst_212 : f32 to vector<2x8x1xf32>
    %660 = arith.divf %659, %658 : vector<2x8x1xf32>
    %661 = vector.broadcast %660 : vector<2x8x1xf32> to vector<2x8x8xf32>
    %662 = arith.mulf %656, %661 : vector<2x8x8xf32>
    %663 = arith.truncf %662 : vector<2x8x8xf32> to vector<2x8x8xbf16>
    %664 = arith.truncf %466 : vector<2x8x32xf32> to vector<2x8x32xbf16>
    %cst_213 = arith.constant dense<0.000000e+00> : vector<2x8x32xf32>
    %665 = tpu.matmul %663, %664, %cst_213 {dimension_numbers = #tpu.dot_dimension_numbers<[2], [1], [1], [2], [0, 0, 0, 1, 1, 2], [0], [0]>} : vector<2x8x8xbf16>, vector<2x8x32xbf16>, vector<2x8x32xf32> -> vector<2x8x32xf32>
    %666 = arith.addf %665, %466 : vector<2x8x32xf32>
    %667 = vector.extract_strided_slice %6 {offsets = [0, 0], sizes = [1, 32], strides = [1, 1]} : vector<4x32xf32> to vector<1x32xf32>
    %668 = vector.shape_cast %667 : vector<1x32xf32> to vector<32xf32>
    %669 = vector.extract_strided_slice %6 {offsets = [1, 0], sizes = [1, 32], strides = [1, 1]} : vector<4x32xf32> to vector<1x32xf32>
    %670 = vector.shape_cast %669 : vector<1x32xf32> to vector<32xf32>
    %cst_214 = arith.constant dense<0.000000e+00> : vector<2x8xf32>
    %671 = vector.multi_reduction <add>, %666, %cst_214 [2] : vector<2x8x32xf32> to vector<2x8xf32>
    %672 = vector.shape_cast %671 : vector<2x8xf32> to vector<2x8x1xf32>
    %cst_215 = arith.constant 3.200000e+01 : f32
    %673 = vector.broadcast %cst_215 : f32 to vector<2x8x1xf32>
    %674 = arith.divf %672, %673 : vector<2x8x1xf32>
    %675 = vector.broadcast %674 : vector<2x8x1xf32> to vector<2x8x32xf32>
    %676 = arith.subf %666, %675 : vector<2x8x32xf32>
    %677 = arith.mulf %676, %676 : vector<2x8x32xf32>
    %cst_216 = arith.constant dense<0.000000e+00> : vector<2x8xf32>
    %678 = vector.multi_reduction <add>, %677, %cst_216 [2] : vector<2x8x32xf32> to vector<2x8xf32>
    %679 = vector.shape_cast %678 : vector<2x8xf32> to vector<2x8x1xf32>
    %cst_217 = arith.constant 3.200000e+01 : f32
    %680 = vector.broadcast %cst_217 : f32 to vector<2x8x1xf32>
    %681 = arith.divf %679, %680 : vector<2x8x1xf32>
    %682 = vector.broadcast %674 : vector<2x8x1xf32> to vector<2x8x32xf32>
    %683 = arith.subf %666, %682 : vector<2x8x32xf32>
    %cst_218 = arith.constant 9.99999974E-6 : f32
    %684 = vector.broadcast %cst_218 : f32 to vector<2x8x1xf32>
    %685 = arith.addf %681, %684 : vector<2x8x1xf32>
    %686 = math.rsqrt %685 : vector<2x8x1xf32>
    %687 = vector.broadcast %686 : vector<2x8x1xf32> to vector<2x8x32xf32>
    %688 = arith.mulf %683, %687 : vector<2x8x32xf32>
    %689 = vector.shape_cast %668 : vector<32xf32> to vector<1x1x32xf32>
    %690 = vector.broadcast %689 : vector<1x1x32xf32> to vector<2x8x32xf32>
    %691 = arith.mulf %688, %690 : vector<2x8x32xf32>
    %692 = vector.shape_cast %670 : vector<32xf32> to vector<1x1x32xf32>
    %693 = vector.broadcast %692 : vector<1x1x32xf32> to vector<2x8x32xf32>
    %694 = arith.addf %691, %693 : vector<2x8x32xf32>
    %695 = vector.shape_cast %694 : vector<2x8x32xf32> to vector<16x32xf32>
    %696 = arith.truncf %695 : vector<16x32xf32> to vector<16x32xbf16>
    %cst_219 = arith.constant dense<0.000000e+00> : vector<16x32xf32>
    %697 = tpu.matmul %696, %9, %cst_219 {dimension_numbers = #tpu.dot_dimension_numbers<[1], [0], [0], [1], [0, 0, 1, 1], [], []>} : vector<16x32xbf16>, vector<32x32xbf16>, vector<16x32xf32> -> vector<16x32xf32>
    %698 = vector.shape_cast %697 : vector<16x32xf32> to vector<2x8x32xf32>
    %699 = vector.shape_cast %10 : vector<1x32xf32> to vector<1x1x32xf32>
    %700 = vector.broadcast %699 : vector<1x1x32xf32> to vector<2x8x32xf32>
    %701 = arith.addf %698, %700 : vector<2x8x32xf32>
    %cst_220 = arith.constant 0.000000e+00 : f32
    %702 = vector.broadcast %cst_220 : f32 to vector<2x8x32xf32>
    %703 = arith.maximumf %701, %702 : vector<2x8x32xf32>
    %704 = vector.shape_cast %703 : vector<2x8x32xf32> to vector<16x32xf32>
    %705 = arith.truncf %704 : vector<16x32xf32> to vector<16x32xbf16>
    %cst_221 = arith.constant dense<0.000000e+00> : vector<16x32xf32>
    %706 = tpu.matmul %705, %11, %cst_221 {dimension_numbers = #tpu.dot_dimension_numbers<[1], [0], [0], [1], [0, 0, 1, 1], [], []>} : vector<16x32xbf16>, vector<32x32xbf16>, vector<16x32xf32> -> vector<16x32xf32>
    %707 = vector.shape_cast %706 : vector<16x32xf32> to vector<2x8x32xf32>
    %708 = vector.shape_cast %12 : vector<1x32xf32> to vector<1x1x32xf32>
    %709 = vector.broadcast %708 : vector<1x1x32xf32> to vector<2x8x32xf32>
    %710 = arith.addf %707, %709 : vector<2x8x32xf32>
    %711 = arith.addf %710, %694 : vector<2x8x32xf32>
    %712 = vector.extract_strided_slice %6 {offsets = [2, 0], sizes = [1, 32], strides = [1, 1]} : vector<4x32xf32> to vector<1x32xf32>
    %713 = vector.shape_cast %712 : vector<1x32xf32> to vector<32xf32>
    %714 = vector.extract_strided_slice %6 {offsets = [3, 0], sizes = [1, 32], strides = [1, 1]} : vector<4x32xf32> to vector<1x32xf32>
    %715 = vector.shape_cast %714 : vector<1x32xf32> to vector<32xf32>
    %cst_222 = arith.constant dense<0.000000e+00> : vector<2x8xf32>
    %716 = vector.multi_reduction <add>, %711, %cst_222 [2] : vector<2x8x32xf32> to vector<2x8xf32>
    %717 = vector.shape_cast %716 : vector<2x8xf32> to vector<2x8x1xf32>
    %cst_223 = arith.constant 3.200000e+01 : f32
    %718 = vector.broadcast %cst_223 : f32 to vector<2x8x1xf32>
    %719 = arith.divf %717, %718 : vector<2x8x1xf32>
    %720 = vector.broadcast %719 : vector<2x8x1xf32> to vector<2x8x32xf32>
    %721 = arith.subf %711, %720 : vector<2x8x32xf32>
    %722 = arith.mulf %721, %721 : vector<2x8x32xf32>
    %cst_224 = arith.constant dense<0.000000e+00> : vector<2x8xf32>
    %723 = vector.multi_reduction <add>, %722, %cst_224 [2] : vector<2x8x32xf32> to vector<2x8xf32>
    %724 = vector.shape_cast %723 : vector<2x8xf32> to vector<2x8x1xf32>
    %cst_225 = arith.constant 3.200000e+01 : f32
    %725 = vector.broadcast %cst_225 : f32 to vector<2x8x1xf32>
    %726 = arith.divf %724, %725 : vector<2x8x1xf32>
    %727 = vector.broadcast %719 : vector<2x8x1xf32> to vector<2x8x32xf32>
    %728 = arith.subf %711, %727 : vector<2x8x32xf32>
    %cst_226 = arith.constant 9.99999974E-6 : f32
    %729 = vector.broadcast %cst_226 : f32 to vector<2x8x1xf32>
    %730 = arith.addf %726, %729 : vector<2x8x1xf32>
    %731 = math.rsqrt %730 : vector<2x8x1xf32>
    %732 = vector.broadcast %731 : vector<2x8x1xf32> to vector<2x8x32xf32>
    %733 = arith.mulf %728, %732 : vector<2x8x32xf32>
    %734 = vector.shape_cast %713 : vector<32xf32> to vector<1x1x32xf32>
    %735 = vector.broadcast %734 : vector<1x1x32xf32> to vector<2x8x32xf32>
    %736 = arith.mulf %733, %735 : vector<2x8x32xf32>
    %737 = vector.shape_cast %715 : vector<32xf32> to vector<1x1x32xf32>
    %738 = vector.broadcast %737 : vector<1x1x32xf32> to vector<2x8x32xf32>
    %739 = arith.addf %736, %738 : vector<2x8x32xf32>
    %c0_i32_227 = arith.constant 0 : i32
    %740 = arith.cmpi eq, %451, %c0_i32_227 : i32
    %741 = arith.select %740, %464, %557 : vector<2x8x32xf32>
    %742 = arith.select %740, %465, %648 : vector<2x8x32xf32>
    %743 = arith.select %740, %466, %739 : vector<2x8x32xf32>
    %744 = vector.shape_cast %741 : vector<2x8x32xf32> to vector<16x32xf32>
    %cst_228 = arith.constant dense<0.000000e+00> : vector<16x32xf32>
    %745 = tpu.matmul %744, %21, %cst_228 {dimension_numbers = #tpu.dot_dimension_numbers<[1], [0], [0], [1], [0, 0, 1, 1], [], []>} : vector<16x32xf32>, vector<32x32xf32>, vector<16x32xf32> -> vector<16x32xf32>
    %746 = vector.shape_cast %745 : vector<16x32xf32> to vector<2x8x32xf32>
    %747 = vector.shape_cast %22 : vector<1x32xf32> to vector<1x1x32xf32>
    %748 = vector.broadcast %747 : vector<1x1x32xf32> to vector<2x8x32xf32>
    %749 = arith.addf %746, %748 : vector<2x8x32xf32>
    %750 = vector.shape_cast %742 : vector<2x8x32xf32> to vector<16x32xf32>
    %cst_229 = arith.constant dense<0.000000e+00> : vector<16x32xf32>
    %751 = tpu.matmul %750, %23, %cst_229 {dimension_numbers = #tpu.dot_dimension_numbers<[1], [0], [0], [1], [0, 0, 1, 1], [], []>} : vector<16x32xf32>, vector<32x32xf32>, vector<16x32xf32> -> vector<16x32xf32>
    %752 = vector.shape_cast %751 : vector<16x32xf32> to vector<2x8x32xf32>
    %753 = vector.shape_cast %24 : vector<1x32xf32> to vector<1x1x32xf32>
    %754 = vector.broadcast %753 : vector<1x1x32xf32> to vector<2x8x32xf32>
    %755 = arith.addf %752, %754 : vector<2x8x32xf32>
    %cst_230 = arith.constant 0.000000e+00 : f32
    %756 = vector.broadcast %cst_230 : f32 to vector<2x8x32xf32>
    %757 = arith.maximumf %755, %756 : vector<2x8x32xf32>
    %cst_231 = arith.constant 9.99999993E-9 : f32
    %cst_232 = arith.constant 1.000000e+00 : f32
    %758 = vector.broadcast %cst_231 : f32 to vector<2x8x32xf32>
    %759 = arith.maximumf %758, %757 : vector<2x8x32xf32>
    %760 = vector.broadcast %cst_232 : f32 to vector<2x8x32xf32>
    %761 = arith.minimumf %760, %759 : vector<2x8x32xf32>
    %762 = math.roundeven %743 : vector<2x8x32xf32>
    %cst_233 = arith.constant 0.707106769 : f32
    %763 = vector.broadcast %cst_233 : f32 to vector<2x8x32xf32>
    %764 = arith.divf %763, %761 : vector<2x8x32xf32>
    %cst_234 = arith.constant 5.000000e-01 : f32
    %765 = vector.broadcast %cst_234 : f32 to vector<2x8x32xf32>
    %766 = arith.addf %762, %765 : vector<2x8x32xf32>
    %767 = arith.subf %766, %749 : vector<2x8x32xf32>
    %768 = arith.mulf %767, %764 : vector<2x8x32xf32>
    %769 = math.absf %768 : vector<2x8x32xf32>
    %cst_235 = arith.constant 0.327591091 : f32
    %770 = vector.broadcast %cst_235 : f32 to vector<2x8x32xf32>
    %771 = arith.mulf %770, %769 : vector<2x8x32xf32>
    %cst_236 = arith.constant 1.000000e+00 : f32
    %772 = vector.broadcast %cst_236 : f32 to vector<2x8x32xf32>
    %773 = arith.addf %772, %771 : vector<2x8x32xf32>
    %cst_237 = arith.constant 1.000000e+00 : f32
    %774 = vector.broadcast %cst_237 : f32 to vector<2x8x32xf32>
    %775 = arith.divf %774, %773 : vector<2x8x32xf32>
    %cst_238 = arith.constant 1.06140542 : f32
    %776 = vector.broadcast %cst_238 : f32 to vector<2x8x32xf32>
    %777 = arith.mulf %776, %775 : vector<2x8x32xf32>
    %cst_239 = arith.constant -1.45315206 : f32
    %778 = vector.broadcast %cst_239 : f32 to vector<2x8x32xf32>
    %779 = arith.addf %777, %778 : vector<2x8x32xf32>
    %780 = arith.mulf %779, %775 : vector<2x8x32xf32>
    %cst_240 = arith.constant 1.42141378 : f32
    %781 = vector.broadcast %cst_240 : f32 to vector<2x8x32xf32>
    %782 = arith.addf %780, %781 : vector<2x8x32xf32>
    %783 = arith.mulf %782, %775 : vector<2x8x32xf32>
    %cst_241 = arith.constant -0.284496725 : f32
    %784 = vector.broadcast %cst_241 : f32 to vector<2x8x32xf32>
    %785 = arith.addf %783, %784 : vector<2x8x32xf32>
    %786 = arith.mulf %785, %775 : vector<2x8x32xf32>
    %cst_242 = arith.constant 0.254829586 : f32
    %787 = vector.broadcast %cst_242 : f32 to vector<2x8x32xf32>
    %788 = arith.addf %786, %787 : vector<2x8x32xf32>
    %789 = arith.mulf %788, %775 : vector<2x8x32xf32>
    %cst_243 = arith.constant 0.000000e+00 : f32
    %790 = vector.broadcast %cst_243 : f32 to vector<2x8x32xf32>
    %791 = arith.subf %790, %769 : vector<2x8x32xf32>
    %792 = arith.mulf %791, %769 : vector<2x8x32xf32>
    %793 = math.exp %792 : vector<2x8x32xf32>
    %794 = arith.mulf %789, %793 : vector<2x8x32xf32>
    %cst_244 = arith.constant 1.000000e+00 : f32
    %795 = vector.broadcast %cst_244 : f32 to vector<2x8x32xf32>
    %796 = arith.subf %795, %794 : vector<2x8x32xf32>
    %cst_245 = arith.constant 0.000000e+00 : f32
    %797 = vector.broadcast %cst_245 : f32 to vector<2x8x32xf32>
    %798 = arith.cmpf oge, %768, %797 : vector<2x8x32xf32>
    %cst_246 = arith.constant 0.000000e+00 : f32
    %799 = vector.broadcast %cst_246 : f32 to vector<2x8x32xf32>
    %800 = arith.subf %799, %796 : vector<2x8x32xf32>
    %801 = arith.select %798, %796, %800 : vector<2x8x32xi1>, vector<2x8x32xf32>
    %cst_247 = arith.constant 5.000000e-01 : f32
    %802 = vector.broadcast %cst_247 : f32 to vector<2x8x32xf32>
    %803 = arith.subf %762, %802 : vector<2x8x32xf32>
    %804 = arith.subf %803, %749 : vector<2x8x32xf32>
    %805 = arith.mulf %804, %764 : vector<2x8x32xf32>
    %806 = math.absf %805 : vector<2x8x32xf32>
    %cst_248 = arith.constant 0.327591091 : f32
    %807 = vector.broadcast %cst_248 : f32 to vector<2x8x32xf32>
    %808 = arith.mulf %807, %806 : vector<2x8x32xf32>
    %cst_249 = arith.constant 1.000000e+00 : f32
    %809 = vector.broadcast %cst_249 : f32 to vector<2x8x32xf32>
    %810 = arith.addf %809, %808 : vector<2x8x32xf32>
    %cst_250 = arith.constant 1.000000e+00 : f32
    %811 = vector.broadcast %cst_250 : f32 to vector<2x8x32xf32>
    %812 = arith.divf %811, %810 : vector<2x8x32xf32>
    %cst_251 = arith.constant 1.06140542 : f32
    %813 = vector.broadcast %cst_251 : f32 to vector<2x8x32xf32>
    %814 = arith.mulf %813, %812 : vector<2x8x32xf32>
    %cst_252 = arith.constant -1.45315206 : f32
    %815 = vector.broadcast %cst_252 : f32 to vector<2x8x32xf32>
    %816 = arith.addf %814, %815 : vector<2x8x32xf32>
    %817 = arith.mulf %816, %812 : vector<2x8x32xf32>
    %cst_253 = arith.constant 1.42141378 : f32
    %818 = vector.broadcast %cst_253 : f32 to vector<2x8x32xf32>
    %819 = arith.addf %817, %818 : vector<2x8x32xf32>
    %820 = arith.mulf %819, %812 : vector<2x8x32xf32>
    %cst_254 = arith.constant -0.284496725 : f32
    %821 = vector.broadcast %cst_254 : f32 to vector<2x8x32xf32>
    %822 = arith.addf %820, %821 : vector<2x8x32xf32>
    %823 = arith.mulf %822, %812 : vector<2x8x32xf32>
    %cst_255 = arith.constant 0.254829586 : f32
    %824 = vector.broadcast %cst_255 : f32 to vector<2x8x32xf32>
    %825 = arith.addf %823, %824 : vector<2x8x32xf32>
    %826 = arith.mulf %825, %812 : vector<2x8x32xf32>
    %cst_256 = arith.constant 0.000000e+00 : f32
    %827 = vector.broadcast %cst_256 : f32 to vector<2x8x32xf32>
    %828 = arith.subf %827, %806 : vector<2x8x32xf32>
    %829 = arith.mulf %828, %806 : vector<2x8x32xf32>
    %830 = math.exp %829 : vector<2x8x32xf32>
    %831 = arith.mulf %826, %830 : vector<2x8x32xf32>
    %cst_257 = arith.constant 1.000000e+00 : f32
    %832 = vector.broadcast %cst_257 : f32 to vector<2x8x32xf32>
    %833 = arith.subf %832, %831 : vector<2x8x32xf32>
    %cst_258 = arith.constant 0.000000e+00 : f32
    %834 = vector.broadcast %cst_258 : f32 to vector<2x8x32xf32>
    %835 = arith.cmpf oge, %805, %834 : vector<2x8x32xf32>
    %cst_259 = arith.constant 0.000000e+00 : f32
    %836 = vector.broadcast %cst_259 : f32 to vector<2x8x32xf32>
    %837 = arith.subf %836, %833 : vector<2x8x32xf32>
    %838 = arith.select %835, %833, %837 : vector<2x8x32xi1>, vector<2x8x32xf32>
    %839 = arith.subf %801, %838 : vector<2x8x32xf32>
    %cst_260 = arith.constant 5.000000e-01 : f32
    %840 = vector.broadcast %cst_260 : f32 to vector<2x8x32xf32>
    %841 = arith.mulf %840, %839 : vector<2x8x32xf32>
    %cst_261 = arith.constant 0.000000e+00 : f32
    %842 = vector.broadcast %cst_261 : f32 to vector<2x8x32xf32>
    %843 = arith.maximumf %841, %842 : vector<2x8x32xf32>
    %cst_262 = arith.constant 9.99999993E-9 : f32
    %844 = vector.broadcast %cst_262 : f32 to vector<2x8x32xf32>
    %845 = arith.addf %843, %844 : vector<2x8x32xf32>
    %846 = math.log %845 : vector<2x8x32xf32>
    %cst_263 = arith.constant 0.000000e+00 : f32
    %847 = vector.broadcast %cst_263 : f32 to vector<2x8x32xf32>
    %848 = arith.subf %847, %846 : vector<2x8x32xf32>
    %cst_264 = arith.constant 1.44269502 : f32
    %849 = vector.broadcast %cst_264 : f32 to vector<2x8x32xf32>
    %850 = arith.mulf %848, %849 : vector<2x8x32xf32>
    %cst_265 = arith.constant 0.000000e+00 : f32
    %cst_266 = arith.constant 5.000000e+01 : f32
    %851 = vector.broadcast %cst_265 : f32 to vector<2x8x32xf32>
    %852 = arith.maximumf %851, %850 : vector<2x8x32xf32>
    %853 = vector.broadcast %cst_266 : f32 to vector<2x8x32xf32>
    %854 = arith.minimumf %853, %852 : vector<2x8x32xf32>
    %c1_267 = arith.constant 1 : index
    %c0_268 = arith.constant 0 : index
    %c0_269 = arith.constant 0 : index
    %c0_270 = arith.constant 0 : index
    %855 = vector.load %arg24[%c1_267, %c0_268, %c0_269, %c0_270] : memref<3x2x8x192xf32, #tpu.memory_space<vmem>>, vector<1x2x8x32xf32>
    %856 = vector.shape_cast %855 : vector<1x2x8x32xf32> to vector<2x8x32xf32>
    %857 = vector.shape_cast %741 : vector<2x8x32xf32> to vector<1x2x8x32xf32>
    tpu.vector_store %arg24[%c1_267, %c0_268, %c0_269, %c0_270], %857 {strides = array<i32>} : memref<3x2x8x192xf32, #tpu.memory_space<vmem>>, vector<1x2x8x32xf32>,
    %c1_271 = arith.constant 1 : index
    %c0_272 = arith.constant 0 : index
    %c0_273 = arith.constant 0 : index
    %c32_274 = arith.constant 32 : index
    %858 = vector.load %arg24[%c1_271, %c0_272, %c0_273, %c32_274] : memref<3x2x8x192xf32, #tpu.memory_space<vmem>>, vector<1x2x8x32xf32>
    %859 = vector.shape_cast %858 : vector<1x2x8x32xf32> to vector<2x8x32xf32>
    %860 = vector.shape_cast %742 : vector<2x8x32xf32> to vector<1x2x8x32xf32>
    tpu.vector_store %arg24[%c1_271, %c0_272, %c0_273, %c32_274], %860 {strides = array<i32>} : memref<3x2x8x192xf32, #tpu.memory_space<vmem>>, vector<1x2x8x32xf32>,
    %c1_275 = arith.constant 1 : index
    %c0_276 = arith.constant 0 : index
    %c0_277 = arith.constant 0 : index
    %c64_278 = arith.constant 64 : index
    %861 = vector.load %arg24[%c1_275, %c0_276, %c0_277, %c64_278] : memref<3x2x8x192xf32, #tpu.memory_space<vmem>>, vector<1x2x8x32xf32>
    %862 = vector.shape_cast %861 : vector<1x2x8x32xf32> to vector<2x8x32xf32>
    %863 = vector.shape_cast %743 : vector<2x8x32xf32> to vector<1x2x8x32xf32>
    tpu.vector_store %arg24[%c1_275, %c0_276, %c0_277, %c64_278], %863 {strides = array<i32>} : memref<3x2x8x192xf32, #tpu.memory_space<vmem>>, vector<1x2x8x32xf32>,
    %c1_279 = arith.constant 1 : index
    %c0_280 = arith.constant 0 : index
    %c0_281 = arith.constant 0 : index
    %c96_282 = arith.constant 96 : index
    %864 = vector.load %arg24[%c1_279, %c0_280, %c0_281, %c96_282] : memref<3x2x8x192xf32, #tpu.memory_space<vmem>>, vector<1x2x8x32xf32>
    %865 = vector.shape_cast %864 : vector<1x2x8x32xf32> to vector<2x8x32xf32>
    %866 = vector.shape_cast %843 : vector<2x8x32xf32> to vector<1x2x8x32xf32>
    tpu.vector_store %arg24[%c1_279, %c0_280, %c0_281, %c96_282], %866 {strides = array<i32>} : memref<3x2x8x192xf32, #tpu.memory_space<vmem>>, vector<1x2x8x32xf32>,
    %c1_283 = arith.constant 1 : index
    %c0_284 = arith.constant 0 : index
    %c0_285 = arith.constant 0 : index
    %c128_286 = arith.constant 128 : index
    %867 = vector.load %arg24[%c1_283, %c0_284, %c0_285, %c128_286] : memref<3x2x8x192xf32, #tpu.memory_space<vmem>>, vector<1x2x8x32xf32>
    %868 = vector.shape_cast %867 : vector<1x2x8x32xf32> to vector<2x8x32xf32>
    %869 = vector.shape_cast %762 : vector<2x8x32xf32> to vector<1x2x8x32xf32>
    tpu.vector_store %arg24[%c1_283, %c0_284, %c0_285, %c128_286], %869 {strides = array<i32>} : memref<3x2x8x192xf32, #tpu.memory_space<vmem>>, vector<1x2x8x32xf32>,
    %c1_287 = arith.constant 1 : index
    %c0_288 = arith.constant 0 : index
    %c0_289 = arith.constant 0 : index
    %c160_290 = arith.constant 160 : index
    %870 = vector.load %arg24[%c1_287, %c0_288, %c0_289, %c160_290] : memref<3x2x8x192xf32, #tpu.memory_space<vmem>>, vector<1x2x8x32xf32>
    %871 = vector.shape_cast %870 : vector<1x2x8x32xf32> to vector<2x8x32xf32>
    %872 = vector.shape_cast %854 : vector<2x8x32xf32> to vector<1x2x8x32xf32>
    tpu.vector_store %arg24[%c1_287, %c0_288, %c0_289, %c160_290], %872 {strides = array<i32>} : memref<3x2x8x192xf32, #tpu.memory_space<vmem>>, vector<1x2x8x32xf32>,
    %c3_i32_291 = arith.constant 3 : i32
    %873 = arith.muli %arg0, %c3_i32_291 : i32
    %c2_i32 = arith.constant 2 : i32
    %874 = arith.addi %873, %c2_i32 : i32
    %c2 = arith.constant 2 : index
    %c0_292 = arith.constant 0 : index
    %c0_293 = arith.constant 0 : index
    %c0_294 = arith.constant 0 : index
    %875 = vector.load %arg1[%c2, %c0_292, %c0_293, %c0_294] : memref<3x2x8x32xf32, #tpu.memory_space<vmem>>, vector<1x2x8x32xf32>
    %876 = vector.shape_cast %875 : vector<1x2x8x32xf32> to vector<2x8x32xf32>
    %877 = vector.shape_cast %3 : vector<8x32xf32> to vector<1x8x32xf32>
    %878 = vector.broadcast %877 : vector<1x8x32xf32> to vector<2x8x32xf32>
    %879 = arith.addf %876, %878 : vector<2x8x32xf32>
    %880 = vector.shape_cast %879 : vector<2x8x32xf32> to vector<16x32xf32>
    %881 = arith.truncf %880 : vector<16x32xf32> to vector<16x32xbf16>
    %cst_295 = arith.constant dense<0.000000e+00> : vector<16x128xf32>
    %882 = tpu.matmul %881, %4, %cst_295 {dimension_numbers = #tpu.dot_dimension_numbers<[1], [0], [0], [1], [0, 0, 1, 1], [], []>} : vector<16x32xbf16>, vector<32x128xbf16>, vector<16x128xf32> -> vector<16x128xf32>
    %883 = vector.shape_cast %882 : vector<16x128xf32> to vector<2x8x128xf32>
    %884 = vector.shape_cast %5 : vector<1x128xf32> to vector<1x1x128xf32>
    %885 = vector.broadcast %884 : vector<1x1x128xf32> to vector<2x8x128xf32>
    %886 = arith.addf %883, %885 : vector<2x8x128xf32>
    %887 = vector.extract_strided_slice %886 {offsets = [0, 0, 0], sizes = [2, 8, 32], strides = [1, 1, 1]} : vector<2x8x128xf32> to vector<2x8x32xf32>
    %888 = vector.extract_strided_slice %886 {offsets = [0, 0, 32], sizes = [2, 8, 32], strides = [1, 1, 1]} : vector<2x8x128xf32> to vector<2x8x32xf32>
    %889 = vector.extract_strided_slice %886 {offsets = [0, 0, 64], sizes = [2, 8, 32], strides = [1, 1, 1]} : vector<2x8x128xf32> to vector<2x8x32xf32>
    %890 = arith.truncf %742 : vector<2x8x32xf32> to vector<2x8x32xbf16>
    %891 = arith.truncf %887 : vector<2x8x32xf32> to vector<2x8x32xbf16>
    %cst_296 = arith.constant dense<0.000000e+00> : vector<2x8x8xf32>
    %892 = tpu.matmul %890, %891, %cst_296 {dimension_numbers = #tpu.dot_dimension_numbers<[2], [2], [1], [1], [0, 0, 0, 1, 1, 1], [0], [0]>} : vector<2x8x32xbf16>, vector<2x8x32xbf16>, vector<2x8x8xf32> -> vector<2x8x8xf32>
    %cst_297 = arith.constant dense<0xFF800000> : vector<2x8xf32>
    %893 = vector.multi_reduction <maximumf>, %892, %cst_297 [2] : vector<2x8x8xf32> to vector<2x8xf32>
    %894 = vector.shape_cast %893 : vector<2x8xf32> to vector<2x8x1xf32>
    %895 = vector.broadcast %894 : vector<2x8x1xf32> to vector<2x8x8xf32>
    %896 = arith.subf %892, %895 : vector<2x8x8xf32>
    %897 = math.exp %896 : vector<2x8x8xf32>
    %cst_298 = arith.constant dense<0.000000e+00> : vector<2x8xf32>
    %898 = vector.multi_reduction <add>, %897, %cst_298 [2] : vector<2x8x8xf32> to vector<2x8xf32>
    %899 = vector.shape_cast %898 : vector<2x8xf32> to vector<2x8x1xf32>
    %cst_299 = arith.constant 0.176776692 : f32
    %900 = vector.broadcast %cst_299 : f32 to vector<2x8x1xf32>
    %901 = arith.divf %900, %899 : vector<2x8x1xf32>
    %902 = vector.broadcast %901 : vector<2x8x1xf32> to vector<2x8x8xf32>
    %903 = arith.mulf %897, %902 : vector<2x8x8xf32>
    %904 = arith.truncf %903 : vector<2x8x8xf32> to vector<2x8x8xbf16>
    %905 = arith.truncf %887 : vector<2x8x32xf32> to vector<2x8x32xbf16>
    %cst_300 = arith.constant dense<0.000000e+00> : vector<2x8x32xf32>
    %906 = tpu.matmul %904, %905, %cst_300 {dimension_numbers = #tpu.dot_dimension_numbers<[2], [1], [1], [2], [0, 0, 0, 1, 1, 2], [0], [0]>} : vector<2x8x8xbf16>, vector<2x8x32xbf16>, vector<2x8x32xf32> -> vector<2x8x32xf32>
    %907 = arith.addf %906, %887 : vector<2x8x32xf32>
    %908 = vector.extract_strided_slice %7 {offsets = [0, 0], sizes = [1, 32], strides = [1, 1]} : vector<4x32xf32> to vector<1x32xf32>
    %909 = vector.shape_cast %908 : vector<1x32xf32> to vector<32xf32>
    %910 = vector.extract_strided_slice %7 {offsets = [1, 0], sizes = [1, 32], strides = [1, 1]} : vector<4x32xf32> to vector<1x32xf32>
    %911 = vector.shape_cast %910 : vector<1x32xf32> to vector<32xf32>
    %cst_301 = arith.constant dense<0.000000e+00> : vector<2x8xf32>
    %912 = vector.multi_reduction <add>, %907, %cst_301 [2] : vector<2x8x32xf32> to vector<2x8xf32>
    %913 = vector.shape_cast %912 : vector<2x8xf32> to vector<2x8x1xf32>
    %cst_302 = arith.constant 3.200000e+01 : f32
    %914 = vector.broadcast %cst_302 : f32 to vector<2x8x1xf32>
    %915 = arith.divf %913, %914 : vector<2x8x1xf32>
    %916 = vector.broadcast %915 : vector<2x8x1xf32> to vector<2x8x32xf32>
    %917 = arith.subf %907, %916 : vector<2x8x32xf32>
    %918 = arith.mulf %917, %917 : vector<2x8x32xf32>
    %cst_303 = arith.constant dense<0.000000e+00> : vector<2x8xf32>
    %919 = vector.multi_reduction <add>, %918, %cst_303 [2] : vector<2x8x32xf32> to vector<2x8xf32>
    %920 = vector.shape_cast %919 : vector<2x8xf32> to vector<2x8x1xf32>
    %cst_304 = arith.constant 3.200000e+01 : f32
    %921 = vector.broadcast %cst_304 : f32 to vector<2x8x1xf32>
    %922 = arith.divf %920, %921 : vector<2x8x1xf32>
    %923 = vector.broadcast %915 : vector<2x8x1xf32> to vector<2x8x32xf32>
    %924 = arith.subf %907, %923 : vector<2x8x32xf32>
    %cst_305 = arith.constant 9.99999974E-6 : f32
    %925 = vector.broadcast %cst_305 : f32 to vector<2x8x1xf32>
    %926 = arith.addf %922, %925 : vector<2x8x1xf32>
    %927 = math.rsqrt %926 : vector<2x8x1xf32>
    %928 = vector.broadcast %927 : vector<2x8x1xf32> to vector<2x8x32xf32>
    %929 = arith.mulf %924, %928 : vector<2x8x32xf32>
    %930 = vector.shape_cast %909 : vector<32xf32> to vector<1x1x32xf32>
    %931 = vector.broadcast %930 : vector<1x1x32xf32> to vector<2x8x32xf32>
    %932 = arith.mulf %929, %931 : vector<2x8x32xf32>
    %933 = vector.shape_cast %911 : vector<32xf32> to vector<1x1x32xf32>
    %934 = vector.broadcast %933 : vector<1x1x32xf32> to vector<2x8x32xf32>
    %935 = arith.addf %932, %934 : vector<2x8x32xf32>
    %936 = vector.shape_cast %935 : vector<2x8x32xf32> to vector<16x32xf32>
    %937 = arith.truncf %936 : vector<16x32xf32> to vector<16x32xbf16>
    %cst_306 = arith.constant dense<0.000000e+00> : vector<16x32xf32>
    %938 = tpu.matmul %937, %13, %cst_306 {dimension_numbers = #tpu.dot_dimension_numbers<[1], [0], [0], [1], [0, 0, 1, 1], [], []>} : vector<16x32xbf16>, vector<32x32xbf16>, vector<16x32xf32> -> vector<16x32xf32>
    %939 = vector.shape_cast %938 : vector<16x32xf32> to vector<2x8x32xf32>
    %940 = vector.shape_cast %14 : vector<1x32xf32> to vector<1x1x32xf32>
    %941 = vector.broadcast %940 : vector<1x1x32xf32> to vector<2x8x32xf32>
    %942 = arith.addf %939, %941 : vector<2x8x32xf32>
    %cst_307 = arith.constant 0.000000e+00 : f32
    %943 = vector.broadcast %cst_307 : f32 to vector<2x8x32xf32>
    %944 = arith.maximumf %942, %943 : vector<2x8x32xf32>
    %945 = vector.shape_cast %944 : vector<2x8x32xf32> to vector<16x32xf32>
    %946 = arith.truncf %945 : vector<16x32xf32> to vector<16x32xbf16>
    %cst_308 = arith.constant dense<0.000000e+00> : vector<16x32xf32>
    %947 = tpu.matmul %946, %15, %cst_308 {dimension_numbers = #tpu.dot_dimension_numbers<[1], [0], [0], [1], [0, 0, 1, 1], [], []>} : vector<16x32xbf16>, vector<32x32xbf16>, vector<16x32xf32> -> vector<16x32xf32>
    %948 = vector.shape_cast %947 : vector<16x32xf32> to vector<2x8x32xf32>
    %949 = vector.shape_cast %16 : vector<1x32xf32> to vector<1x1x32xf32>
    %950 = vector.broadcast %949 : vector<1x1x32xf32> to vector<2x8x32xf32>
    %951 = arith.addf %948, %950 : vector<2x8x32xf32>
    %952 = arith.addf %951, %935 : vector<2x8x32xf32>
    %953 = vector.extract_strided_slice %7 {offsets = [2, 0], sizes = [1, 32], strides = [1, 1]} : vector<4x32xf32> to vector<1x32xf32>
    %954 = vector.shape_cast %953 : vector<1x32xf32> to vector<32xf32>
    %955 = vector.extract_strided_slice %7 {offsets = [3, 0], sizes = [1, 32], strides = [1, 1]} : vector<4x32xf32> to vector<1x32xf32>
    %956 = vector.shape_cast %955 : vector<1x32xf32> to vector<32xf32>
    %cst_309 = arith.constant dense<0.000000e+00> : vector<2x8xf32>
    %957 = vector.multi_reduction <add>, %952, %cst_309 [2] : vector<2x8x32xf32> to vector<2x8xf32>
    %958 = vector.shape_cast %957 : vector<2x8xf32> to vector<2x8x1xf32>
    %cst_310 = arith.constant 3.200000e+01 : f32
    %959 = vector.broadcast %cst_310 : f32 to vector<2x8x1xf32>
    %960 = arith.divf %958, %959 : vector<2x8x1xf32>
    %961 = vector.broadcast %960 : vector<2x8x1xf32> to vector<2x8x32xf32>
    %962 = arith.subf %952, %961 : vector<2x8x32xf32>
    %963 = arith.mulf %962, %962 : vector<2x8x32xf32>
    %cst_311 = arith.constant dense<0.000000e+00> : vector<2x8xf32>
    %964 = vector.multi_reduction <add>, %963, %cst_311 [2] : vector<2x8x32xf32> to vector<2x8xf32>
    %965 = vector.shape_cast %964 : vector<2x8xf32> to vector<2x8x1xf32>
    %cst_312 = arith.constant 3.200000e+01 : f32
    %966 = vector.broadcast %cst_312 : f32 to vector<2x8x1xf32>
    %967 = arith.divf %965, %966 : vector<2x8x1xf32>
    %968 = vector.broadcast %960 : vector<2x8x1xf32> to vector<2x8x32xf32>
    %969 = arith.subf %952, %968 : vector<2x8x32xf32>
    %cst_313 = arith.constant 9.99999974E-6 : f32
    %970 = vector.broadcast %cst_313 : f32 to vector<2x8x1xf32>
    %971 = arith.addf %967, %970 : vector<2x8x1xf32>
    %972 = math.rsqrt %971 : vector<2x8x1xf32>
    %973 = vector.broadcast %972 : vector<2x8x1xf32> to vector<2x8x32xf32>
    %974 = arith.mulf %969, %973 : vector<2x8x32xf32>
    %975 = vector.shape_cast %954 : vector<32xf32> to vector<1x1x32xf32>
    %976 = vector.broadcast %975 : vector<1x1x32xf32> to vector<2x8x32xf32>
    %977 = arith.mulf %974, %976 : vector<2x8x32xf32>
    %978 = vector.shape_cast %956 : vector<32xf32> to vector<1x1x32xf32>
    %979 = vector.broadcast %978 : vector<1x1x32xf32> to vector<2x8x32xf32>
    %980 = arith.addf %977, %979 : vector<2x8x32xf32>
    %981 = arith.truncf %888 : vector<2x8x32xf32> to vector<2x8x32xbf16>
    %982 = arith.truncf %741 : vector<2x8x32xf32> to vector<2x8x32xbf16>
    %cst_314 = arith.constant dense<0.000000e+00> : vector<2x8x8xf32>
    %983 = tpu.matmul %981, %982, %cst_314 {dimension_numbers = #tpu.dot_dimension_numbers<[2], [2], [1], [1], [0, 0, 0, 1, 1, 1], [0], [0]>} : vector<2x8x32xbf16>, vector<2x8x32xbf16>, vector<2x8x8xf32> -> vector<2x8x8xf32>
    %cst_315 = arith.constant dense<0xFF800000> : vector<2x8xf32>
    %984 = vector.multi_reduction <maximumf>, %983, %cst_315 [2] : vector<2x8x8xf32> to vector<2x8xf32>
    %985 = vector.shape_cast %984 : vector<2x8xf32> to vector<2x8x1xf32>
    %986 = vector.broadcast %985 : vector<2x8x1xf32> to vector<2x8x8xf32>
    %987 = arith.subf %983, %986 : vector<2x8x8xf32>
    %988 = math.exp %987 : vector<2x8x8xf32>
    %cst_316 = arith.constant dense<0.000000e+00> : vector<2x8xf32>
    %989 = vector.multi_reduction <add>, %988, %cst_316 [2] : vector<2x8x8xf32> to vector<2x8xf32>
    %990 = vector.shape_cast %989 : vector<2x8xf32> to vector<2x8x1xf32>
    %cst_317 = arith.constant 0.176776692 : f32
    %991 = vector.broadcast %cst_317 : f32 to vector<2x8x1xf32>
    %992 = arith.divf %991, %990 : vector<2x8x1xf32>
    %993 = vector.broadcast %992 : vector<2x8x1xf32> to vector<2x8x8xf32>
    %994 = arith.mulf %988, %993 : vector<2x8x8xf32>
    %995 = arith.truncf %994 : vector<2x8x8xf32> to vector<2x8x8xbf16>
    %996 = arith.truncf %888 : vector<2x8x32xf32> to vector<2x8x32xbf16>
    %cst_318 = arith.constant dense<0.000000e+00> : vector<2x8x32xf32>
    %997 = tpu.matmul %995, %996, %cst_318 {dimension_numbers = #tpu.dot_dimension_numbers<[2], [1], [1], [2], [0, 0, 0, 1, 1, 2], [0], [0]>} : vector<2x8x8xbf16>, vector<2x8x32xbf16>, vector<2x8x32xf32> -> vector<2x8x32xf32>
    %998 = arith.addf %997, %888 : vector<2x8x32xf32>
    %999 = vector.extract_strided_slice %8 {offsets = [0, 0], sizes = [1, 32], strides = [1, 1]} : vector<4x32xf32> to vector<1x32xf32>
    %1000 = vector.shape_cast %999 : vector<1x32xf32> to vector<32xf32>
    %1001 = vector.extract_strided_slice %8 {offsets = [1, 0], sizes = [1, 32], strides = [1, 1]} : vector<4x32xf32> to vector<1x32xf32>
    %1002 = vector.shape_cast %1001 : vector<1x32xf32> to vector<32xf32>
    %cst_319 = arith.constant dense<0.000000e+00> : vector<2x8xf32>
    %1003 = vector.multi_reduction <add>, %998, %cst_319 [2] : vector<2x8x32xf32> to vector<2x8xf32>
    %1004 = vector.shape_cast %1003 : vector<2x8xf32> to vector<2x8x1xf32>
    %cst_320 = arith.constant 3.200000e+01 : f32
    %1005 = vector.broadcast %cst_320 : f32 to vector<2x8x1xf32>
    %1006 = arith.divf %1004, %1005 : vector<2x8x1xf32>
    %1007 = vector.broadcast %1006 : vector<2x8x1xf32> to vector<2x8x32xf32>
    %1008 = arith.subf %998, %1007 : vector<2x8x32xf32>
    %1009 = arith.mulf %1008, %1008 : vector<2x8x32xf32>
    %cst_321 = arith.constant dense<0.000000e+00> : vector<2x8xf32>
    %1010 = vector.multi_reduction <add>, %1009, %cst_321 [2] : vector<2x8x32xf32> to vector<2x8xf32>
    %1011 = vector.shape_cast %1010 : vector<2x8xf32> to vector<2x8x1xf32>
    %cst_322 = arith.constant 3.200000e+01 : f32
    %1012 = vector.broadcast %cst_322 : f32 to vector<2x8x1xf32>
    %1013 = arith.divf %1011, %1012 : vector<2x8x1xf32>
    %1014 = vector.broadcast %1006 : vector<2x8x1xf32> to vector<2x8x32xf32>
    %1015 = arith.subf %998, %1014 : vector<2x8x32xf32>
    %cst_323 = arith.constant 9.99999974E-6 : f32
    %1016 = vector.broadcast %cst_323 : f32 to vector<2x8x1xf32>
    %1017 = arith.addf %1013, %1016 : vector<2x8x1xf32>
    %1018 = math.rsqrt %1017 : vector<2x8x1xf32>
    %1019 = vector.broadcast %1018 : vector<2x8x1xf32> to vector<2x8x32xf32>
    %1020 = arith.mulf %1015, %1019 : vector<2x8x32xf32>
    %1021 = vector.shape_cast %1000 : vector<32xf32> to vector<1x1x32xf32>
    %1022 = vector.broadcast %1021 : vector<1x1x32xf32> to vector<2x8x32xf32>
    %1023 = arith.mulf %1020, %1022 : vector<2x8x32xf32>
    %1024 = vector.shape_cast %1002 : vector<32xf32> to vector<1x1x32xf32>
    %1025 = vector.broadcast %1024 : vector<1x1x32xf32> to vector<2x8x32xf32>
    %1026 = arith.addf %1023, %1025 : vector<2x8x32xf32>
    %1027 = vector.shape_cast %1026 : vector<2x8x32xf32> to vector<16x32xf32>
    %1028 = arith.truncf %1027 : vector<16x32xf32> to vector<16x32xbf16>
    %cst_324 = arith.constant dense<0.000000e+00> : vector<16x32xf32>
    %1029 = tpu.matmul %1028, %17, %cst_324 {dimension_numbers = #tpu.dot_dimension_numbers<[1], [0], [0], [1], [0, 0, 1, 1], [], []>} : vector<16x32xbf16>, vector<32x32xbf16>, vector<16x32xf32> -> vector<16x32xf32>
    %1030 = vector.shape_cast %1029 : vector<16x32xf32> to vector<2x8x32xf32>
    %1031 = vector.shape_cast %18 : vector<1x32xf32> to vector<1x1x32xf32>
    %1032 = vector.broadcast %1031 : vector<1x1x32xf32> to vector<2x8x32xf32>
    %1033 = arith.addf %1030, %1032 : vector<2x8x32xf32>
    %cst_325 = arith.constant 0.000000e+00 : f32
    %1034 = vector.broadcast %cst_325 : f32 to vector<2x8x32xf32>
    %1035 = arith.maximumf %1033, %1034 : vector<2x8x32xf32>
    %1036 = vector.shape_cast %1035 : vector<2x8x32xf32> to vector<16x32xf32>
    %1037 = arith.truncf %1036 : vector<16x32xf32> to vector<16x32xbf16>
    %cst_326 = arith.constant dense<0.000000e+00> : vector<16x32xf32>
    %1038 = tpu.matmul %1037, %19, %cst_326 {dimension_numbers = #tpu.dot_dimension_numbers<[1], [0], [0], [1], [0, 0, 1, 1], [], []>} : vector<16x32xbf16>, vector<32x32xbf16>, vector<16x32xf32> -> vector<16x32xf32>
    %1039 = vector.shape_cast %1038 : vector<16x32xf32> to vector<2x8x32xf32>
    %1040 = vector.shape_cast %20 : vector<1x32xf32> to vector<1x1x32xf32>
    %1041 = vector.broadcast %1040 : vector<1x1x32xf32> to vector<2x8x32xf32>
    %1042 = arith.addf %1039, %1041 : vector<2x8x32xf32>
    %1043 = arith.addf %1042, %1026 : vector<2x8x32xf32>
    %1044 = vector.extract_strided_slice %8 {offsets = [2, 0], sizes = [1, 32], strides = [1, 1]} : vector<4x32xf32> to vector<1x32xf32>
    %1045 = vector.shape_cast %1044 : vector<1x32xf32> to vector<32xf32>
    %1046 = vector.extract_strided_slice %8 {offsets = [3, 0], sizes = [1, 32], strides = [1, 1]} : vector<4x32xf32> to vector<1x32xf32>
    %1047 = vector.shape_cast %1046 : vector<1x32xf32> to vector<32xf32>
    %cst_327 = arith.constant dense<0.000000e+00> : vector<2x8xf32>
    %1048 = vector.multi_reduction <add>, %1043, %cst_327 [2] : vector<2x8x32xf32> to vector<2x8xf32>
    %1049 = vector.shape_cast %1048 : vector<2x8xf32> to vector<2x8x1xf32>
    %cst_328 = arith.constant 3.200000e+01 : f32
    %1050 = vector.broadcast %cst_328 : f32 to vector<2x8x1xf32>
    %1051 = arith.divf %1049, %1050 : vector<2x8x1xf32>
    %1052 = vector.broadcast %1051 : vector<2x8x1xf32> to vector<2x8x32xf32>
    %1053 = arith.subf %1043, %1052 : vector<2x8x32xf32>
    %1054 = arith.mulf %1053, %1053 : vector<2x8x32xf32>
    %cst_329 = arith.constant dense<0.000000e+00> : vector<2x8xf32>
    %1055 = vector.multi_reduction <add>, %1054, %cst_329 [2] : vector<2x8x32xf32> to vector<2x8xf32>
    %1056 = vector.shape_cast %1055 : vector<2x8xf32> to vector<2x8x1xf32>
    %cst_330 = arith.constant 3.200000e+01 : f32
    %1057 = vector.broadcast %cst_330 : f32 to vector<2x8x1xf32>
    %1058 = arith.divf %1056, %1057 : vector<2x8x1xf32>
    %1059 = vector.broadcast %1051 : vector<2x8x1xf32> to vector<2x8x32xf32>
    %1060 = arith.subf %1043, %1059 : vector<2x8x32xf32>
    %cst_331 = arith.constant 9.99999974E-6 : f32
    %1061 = vector.broadcast %cst_331 : f32 to vector<2x8x1xf32>
    %1062 = arith.addf %1058, %1061 : vector<2x8x1xf32>
    %1063 = math.rsqrt %1062 : vector<2x8x1xf32>
    %1064 = vector.broadcast %1063 : vector<2x8x1xf32> to vector<2x8x32xf32>
    %1065 = arith.mulf %1060, %1064 : vector<2x8x32xf32>
    %1066 = vector.shape_cast %1045 : vector<32xf32> to vector<1x1x32xf32>
    %1067 = vector.broadcast %1066 : vector<1x1x32xf32> to vector<2x8x32xf32>
    %1068 = arith.mulf %1065, %1067 : vector<2x8x32xf32>
    %1069 = vector.shape_cast %1047 : vector<32xf32> to vector<1x1x32xf32>
    %1070 = vector.broadcast %1069 : vector<1x1x32xf32> to vector<2x8x32xf32>
    %1071 = arith.addf %1068, %1070 : vector<2x8x32xf32>
    %1072 = arith.truncf %1071 : vector<2x8x32xf32> to vector<2x8x32xbf16>
    %1073 = arith.truncf %980 : vector<2x8x32xf32> to vector<2x8x32xbf16>
    %cst_332 = arith.constant dense<0.000000e+00> : vector<2x8x8xf32>
    %1074 = tpu.matmul %1072, %1073, %cst_332 {dimension_numbers = #tpu.dot_dimension_numbers<[2], [2], [1], [1], [0, 0, 0, 1, 1, 1], [0], [0]>} : vector<2x8x32xbf16>, vector<2x8x32xbf16>, vector<2x8x8xf32> -> vector<2x8x8xf32>
    %cst_333 = arith.constant dense<0xFF800000> : vector<2x8xf32>
    %1075 = vector.multi_reduction <maximumf>, %1074, %cst_333 [2] : vector<2x8x8xf32> to vector<2x8xf32>
    %1076 = vector.shape_cast %1075 : vector<2x8xf32> to vector<2x8x1xf32>
    %1077 = vector.broadcast %1076 : vector<2x8x1xf32> to vector<2x8x8xf32>
    %1078 = arith.subf %1074, %1077 : vector<2x8x8xf32>
    %1079 = math.exp %1078 : vector<2x8x8xf32>
    %cst_334 = arith.constant dense<0.000000e+00> : vector<2x8xf32>
    %1080 = vector.multi_reduction <add>, %1079, %cst_334 [2] : vector<2x8x8xf32> to vector<2x8xf32>
    %1081 = vector.shape_cast %1080 : vector<2x8xf32> to vector<2x8x1xf32>
    %cst_335 = arith.constant 0.176776692 : f32
    %1082 = vector.broadcast %cst_335 : f32 to vector<2x8x1xf32>
    %1083 = arith.divf %1082, %1081 : vector<2x8x1xf32>
    %1084 = vector.broadcast %1083 : vector<2x8x1xf32> to vector<2x8x8xf32>
    %1085 = arith.mulf %1079, %1084 : vector<2x8x8xf32>
    %1086 = arith.truncf %1085 : vector<2x8x8xf32> to vector<2x8x8xbf16>
    %1087 = arith.truncf %889 : vector<2x8x32xf32> to vector<2x8x32xbf16>
    %cst_336 = arith.constant dense<0.000000e+00> : vector<2x8x32xf32>
    %1088 = tpu.matmul %1086, %1087, %cst_336 {dimension_numbers = #tpu.dot_dimension_numbers<[2], [1], [1], [2], [0, 0, 0, 1, 1, 2], [0], [0]>} : vector<2x8x8xbf16>, vector<2x8x32xbf16>, vector<2x8x32xf32> -> vector<2x8x32xf32>
    %1089 = arith.addf %1088, %889 : vector<2x8x32xf32>
    %1090 = vector.extract_strided_slice %6 {offsets = [0, 0], sizes = [1, 32], strides = [1, 1]} : vector<4x32xf32> to vector<1x32xf32>
    %1091 = vector.shape_cast %1090 : vector<1x32xf32> to vector<32xf32>
    %1092 = vector.extract_strided_slice %6 {offsets = [1, 0], sizes = [1, 32], strides = [1, 1]} : vector<4x32xf32> to vector<1x32xf32>
    %1093 = vector.shape_cast %1092 : vector<1x32xf32> to vector<32xf32>
    %cst_337 = arith.constant dense<0.000000e+00> : vector<2x8xf32>
    %1094 = vector.multi_reduction <add>, %1089, %cst_337 [2] : vector<2x8x32xf32> to vector<2x8xf32>
    %1095 = vector.shape_cast %1094 : vector<2x8xf32> to vector<2x8x1xf32>
    %cst_338 = arith.constant 3.200000e+01 : f32
    %1096 = vector.broadcast %cst_338 : f32 to vector<2x8x1xf32>
    %1097 = arith.divf %1095, %1096 : vector<2x8x1xf32>
    %1098 = vector.broadcast %1097 : vector<2x8x1xf32> to vector<2x8x32xf32>
    %1099 = arith.subf %1089, %1098 : vector<2x8x32xf32>
    %1100 = arith.mulf %1099, %1099 : vector<2x8x32xf32>
    %cst_339 = arith.constant dense<0.000000e+00> : vector<2x8xf32>
    %1101 = vector.multi_reduction <add>, %1100, %cst_339 [2] : vector<2x8x32xf32> to vector<2x8xf32>
    %1102 = vector.shape_cast %1101 : vector<2x8xf32> to vector<2x8x1xf32>
    %cst_340 = arith.constant 3.200000e+01 : f32
    %1103 = vector.broadcast %cst_340 : f32 to vector<2x8x1xf32>
    %1104 = arith.divf %1102, %1103 : vector<2x8x1xf32>
    %1105 = vector.broadcast %1097 : vector<2x8x1xf32> to vector<2x8x32xf32>
    %1106 = arith.subf %1089, %1105 : vector<2x8x32xf32>
    %cst_341 = arith.constant 9.99999974E-6 : f32
    %1107 = vector.broadcast %cst_341 : f32 to vector<2x8x1xf32>
    %1108 = arith.addf %1104, %1107 : vector<2x8x1xf32>
    %1109 = math.rsqrt %1108 : vector<2x8x1xf32>
    %1110 = vector.broadcast %1109 : vector<2x8x1xf32> to vector<2x8x32xf32>
    %1111 = arith.mulf %1106, %1110 : vector<2x8x32xf32>
    %1112 = vector.shape_cast %1091 : vector<32xf32> to vector<1x1x32xf32>
    %1113 = vector.broadcast %1112 : vector<1x1x32xf32> to vector<2x8x32xf32>
    %1114 = arith.mulf %1111, %1113 : vector<2x8x32xf32>
    %1115 = vector.shape_cast %1093 : vector<32xf32> to vector<1x1x32xf32>
    %1116 = vector.broadcast %1115 : vector<1x1x32xf32> to vector<2x8x32xf32>
    %1117 = arith.addf %1114, %1116 : vector<2x8x32xf32>
    %1118 = vector.shape_cast %1117 : vector<2x8x32xf32> to vector<16x32xf32>
    %1119 = arith.truncf %1118 : vector<16x32xf32> to vector<16x32xbf16>
    %cst_342 = arith.constant dense<0.000000e+00> : vector<16x32xf32>
    %1120 = tpu.matmul %1119, %9, %cst_342 {dimension_numbers = #tpu.dot_dimension_numbers<[1], [0], [0], [1], [0, 0, 1, 1], [], []>} : vector<16x32xbf16>, vector<32x32xbf16>, vector<16x32xf32> -> vector<16x32xf32>
    %1121 = vector.shape_cast %1120 : vector<16x32xf32> to vector<2x8x32xf32>
    %1122 = vector.shape_cast %10 : vector<1x32xf32> to vector<1x1x32xf32>
    %1123 = vector.broadcast %1122 : vector<1x1x32xf32> to vector<2x8x32xf32>
    %1124 = arith.addf %1121, %1123 : vector<2x8x32xf32>
    %cst_343 = arith.constant 0.000000e+00 : f32
    %1125 = vector.broadcast %cst_343 : f32 to vector<2x8x32xf32>
    %1126 = arith.maximumf %1124, %1125 : vector<2x8x32xf32>
    %1127 = vector.shape_cast %1126 : vector<2x8x32xf32> to vector<16x32xf32>
    %1128 = arith.truncf %1127 : vector<16x32xf32> to vector<16x32xbf16>
    %cst_344 = arith.constant dense<0.000000e+00> : vector<16x32xf32>
    %1129 = tpu.matmul %1128, %11, %cst_344 {dimension_numbers = #tpu.dot_dimension_numbers<[1], [0], [0], [1], [0, 0, 1, 1], [], []>} : vector<16x32xbf16>, vector<32x32xbf16>, vector<16x32xf32> -> vector<16x32xf32>
    %1130 = vector.shape_cast %1129 : vector<16x32xf32> to vector<2x8x32xf32>
    %1131 = vector.shape_cast %12 : vector<1x32xf32> to vector<1x1x32xf32>
    %1132 = vector.broadcast %1131 : vector<1x1x32xf32> to vector<2x8x32xf32>
    %1133 = arith.addf %1130, %1132 : vector<2x8x32xf32>
    %1134 = arith.addf %1133, %1117 : vector<2x8x32xf32>
    %1135 = vector.extract_strided_slice %6 {offsets = [2, 0], sizes = [1, 32], strides = [1, 1]} : vector<4x32xf32> to vector<1x32xf32>
    %1136 = vector.shape_cast %1135 : vector<1x32xf32> to vector<32xf32>
    %1137 = vector.extract_strided_slice %6 {offsets = [3, 0], sizes = [1, 32], strides = [1, 1]} : vector<4x32xf32> to vector<1x32xf32>
    %1138 = vector.shape_cast %1137 : vector<1x32xf32> to vector<32xf32>
    %cst_345 = arith.constant dense<0.000000e+00> : vector<2x8xf32>
    %1139 = vector.multi_reduction <add>, %1134, %cst_345 [2] : vector<2x8x32xf32> to vector<2x8xf32>
    %1140 = vector.shape_cast %1139 : vector<2x8xf32> to vector<2x8x1xf32>
    %cst_346 = arith.constant 3.200000e+01 : f32
    %1141 = vector.broadcast %cst_346 : f32 to vector<2x8x1xf32>
    %1142 = arith.divf %1140, %1141 : vector<2x8x1xf32>
    %1143 = vector.broadcast %1142 : vector<2x8x1xf32> to vector<2x8x32xf32>
    %1144 = arith.subf %1134, %1143 : vector<2x8x32xf32>
    %1145 = arith.mulf %1144, %1144 : vector<2x8x32xf32>
    %cst_347 = arith.constant dense<0.000000e+00> : vector<2x8xf32>
    %1146 = vector.multi_reduction <add>, %1145, %cst_347 [2] : vector<2x8x32xf32> to vector<2x8xf32>
    %1147 = vector.shape_cast %1146 : vector<2x8xf32> to vector<2x8x1xf32>
    %cst_348 = arith.constant 3.200000e+01 : f32
    %1148 = vector.broadcast %cst_348 : f32 to vector<2x8x1xf32>
    %1149 = arith.divf %1147, %1148 : vector<2x8x1xf32>
    %1150 = vector.broadcast %1142 : vector<2x8x1xf32> to vector<2x8x32xf32>
    %1151 = arith.subf %1134, %1150 : vector<2x8x32xf32>
    %cst_349 = arith.constant 9.99999974E-6 : f32
    %1152 = vector.broadcast %cst_349 : f32 to vector<2x8x1xf32>
    %1153 = arith.addf %1149, %1152 : vector<2x8x1xf32>
    %1154 = math.rsqrt %1153 : vector<2x8x1xf32>
    %1155 = vector.broadcast %1154 : vector<2x8x1xf32> to vector<2x8x32xf32>
    %1156 = arith.mulf %1151, %1155 : vector<2x8x32xf32>
    %1157 = vector.shape_cast %1136 : vector<32xf32> to vector<1x1x32xf32>
    %1158 = vector.broadcast %1157 : vector<1x1x32xf32> to vector<2x8x32xf32>
    %1159 = arith.mulf %1156, %1158 : vector<2x8x32xf32>
    %1160 = vector.shape_cast %1138 : vector<32xf32> to vector<1x1x32xf32>
    %1161 = vector.broadcast %1160 : vector<1x1x32xf32> to vector<2x8x32xf32>
    %1162 = arith.addf %1159, %1161 : vector<2x8x32xf32>
    %c0_i32_350 = arith.constant 0 : i32
    %1163 = arith.cmpi eq, %874, %c0_i32_350 : i32
    %1164 = arith.select %1163, %887, %980 : vector<2x8x32xf32>
    %1165 = arith.select %1163, %888, %1071 : vector<2x8x32xf32>
    %1166 = arith.select %1163, %889, %1162 : vector<2x8x32xf32>
    %1167 = vector.shape_cast %1164 : vector<2x8x32xf32> to vector<16x32xf32>
    %cst_351 = arith.constant dense<0.000000e+00> : vector<16x32xf32>
    %1168 = tpu.matmul %1167, %21, %cst_351 {dimension_numbers = #tpu.dot_dimension_numbers<[1], [0], [0], [1], [0, 0, 1, 1], [], []>} : vector<16x32xf32>, vector<32x32xf32>, vector<16x32xf32> -> vector<16x32xf32>
    %1169 = vector.shape_cast %1168 : vector<16x32xf32> to vector<2x8x32xf32>
    %1170 = vector.shape_cast %22 : vector<1x32xf32> to vector<1x1x32xf32>
    %1171 = vector.broadcast %1170 : vector<1x1x32xf32> to vector<2x8x32xf32>
    %1172 = arith.addf %1169, %1171 : vector<2x8x32xf32>
    %1173 = vector.shape_cast %1165 : vector<2x8x32xf32> to vector<16x32xf32>
    %cst_352 = arith.constant dense<0.000000e+00> : vector<16x32xf32>
    %1174 = tpu.matmul %1173, %23, %cst_352 {dimension_numbers = #tpu.dot_dimension_numbers<[1], [0], [0], [1], [0, 0, 1, 1], [], []>} : vector<16x32xf32>, vector<32x32xf32>, vector<16x32xf32> -> vector<16x32xf32>
    %1175 = vector.shape_cast %1174 : vector<16x32xf32> to vector<2x8x32xf32>
    %1176 = vector.shape_cast %24 : vector<1x32xf32> to vector<1x1x32xf32>
    %1177 = vector.broadcast %1176 : vector<1x1x32xf32> to vector<2x8x32xf32>
    %1178 = arith.addf %1175, %1177 : vector<2x8x32xf32>
    %cst_353 = arith.constant 0.000000e+00 : f32
    %1179 = vector.broadcast %cst_353 : f32 to vector<2x8x32xf32>
    %1180 = arith.maximumf %1178, %1179 : vector<2x8x32xf32>
    %cst_354 = arith.constant 9.99999993E-9 : f32
    %cst_355 = arith.constant 1.000000e+00 : f32
    %1181 = vector.broadcast %cst_354 : f32 to vector<2x8x32xf32>
    %1182 = arith.maximumf %1181, %1180 : vector<2x8x32xf32>
    %1183 = vector.broadcast %cst_355 : f32 to vector<2x8x32xf32>
    %1184 = arith.minimumf %1183, %1182 : vector<2x8x32xf32>
    %1185 = math.roundeven %1166 : vector<2x8x32xf32>
    %cst_356 = arith.constant 0.707106769 : f32
    %1186 = vector.broadcast %cst_356 : f32 to vector<2x8x32xf32>
    %1187 = arith.divf %1186, %1184 : vector<2x8x32xf32>
    %cst_357 = arith.constant 5.000000e-01 : f32
    %1188 = vector.broadcast %cst_357 : f32 to vector<2x8x32xf32>
    %1189 = arith.addf %1185, %1188 : vector<2x8x32xf32>
    %1190 = arith.subf %1189, %1172 : vector<2x8x32xf32>
    %1191 = arith.mulf %1190, %1187 : vector<2x8x32xf32>
    %1192 = math.absf %1191 : vector<2x8x32xf32>
    %cst_358 = arith.constant 0.327591091 : f32
    %1193 = vector.broadcast %cst_358 : f32 to vector<2x8x32xf32>
    %1194 = arith.mulf %1193, %1192 : vector<2x8x32xf32>
    %cst_359 = arith.constant 1.000000e+00 : f32
    %1195 = vector.broadcast %cst_359 : f32 to vector<2x8x32xf32>
    %1196 = arith.addf %1195, %1194 : vector<2x8x32xf32>
    %cst_360 = arith.constant 1.000000e+00 : f32
    %1197 = vector.broadcast %cst_360 : f32 to vector<2x8x32xf32>
    %1198 = arith.divf %1197, %1196 : vector<2x8x32xf32>
    %cst_361 = arith.constant 1.06140542 : f32
    %1199 = vector.broadcast %cst_361 : f32 to vector<2x8x32xf32>
    %1200 = arith.mulf %1199, %1198 : vector<2x8x32xf32>
    %cst_362 = arith.constant -1.45315206 : f32
    %1201 = vector.broadcast %cst_362 : f32 to vector<2x8x32xf32>
    %1202 = arith.addf %1200, %1201 : vector<2x8x32xf32>
    %1203 = arith.mulf %1202, %1198 : vector<2x8x32xf32>
    %cst_363 = arith.constant 1.42141378 : f32
    %1204 = vector.broadcast %cst_363 : f32 to vector<2x8x32xf32>
    %1205 = arith.addf %1203, %1204 : vector<2x8x32xf32>
    %1206 = arith.mulf %1205, %1198 : vector<2x8x32xf32>
    %cst_364 = arith.constant -0.284496725 : f32
    %1207 = vector.broadcast %cst_364 : f32 to vector<2x8x32xf32>
    %1208 = arith.addf %1206, %1207 : vector<2x8x32xf32>
    %1209 = arith.mulf %1208, %1198 : vector<2x8x32xf32>
    %cst_365 = arith.constant 0.254829586 : f32
    %1210 = vector.broadcast %cst_365 : f32 to vector<2x8x32xf32>
    %1211 = arith.addf %1209, %1210 : vector<2x8x32xf32>
    %1212 = arith.mulf %1211, %1198 : vector<2x8x32xf32>
    %cst_366 = arith.constant 0.000000e+00 : f32
    %1213 = vector.broadcast %cst_366 : f32 to vector<2x8x32xf32>
    %1214 = arith.subf %1213, %1192 : vector<2x8x32xf32>
    %1215 = arith.mulf %1214, %1192 : vector<2x8x32xf32>
    %1216 = math.exp %1215 : vector<2x8x32xf32>
    %1217 = arith.mulf %1212, %1216 : vector<2x8x32xf32>
    %cst_367 = arith.constant 1.000000e+00 : f32
    %1218 = vector.broadcast %cst_367 : f32 to vector<2x8x32xf32>
    %1219 = arith.subf %1218, %1217 : vector<2x8x32xf32>
    %cst_368 = arith.constant 0.000000e+00 : f32
    %1220 = vector.broadcast %cst_368 : f32 to vector<2x8x32xf32>
    %1221 = arith.cmpf oge, %1191, %1220 : vector<2x8x32xf32>
    %cst_369 = arith.constant 0.000000e+00 : f32
    %1222 = vector.broadcast %cst_369 : f32 to vector<2x8x32xf32>
    %1223 = arith.subf %1222, %1219 : vector<2x8x32xf32>
    %1224 = arith.select %1221, %1219, %1223 : vector<2x8x32xi1>, vector<2x8x32xf32>
    %cst_370 = arith.constant 5.000000e-01 : f32
    %1225 = vector.broadcast %cst_370 : f32 to vector<2x8x32xf32>
    %1226 = arith.subf %1185, %1225 : vector<2x8x32xf32>
    %1227 = arith.subf %1226, %1172 : vector<2x8x32xf32>
    %1228 = arith.mulf %1227, %1187 : vector<2x8x32xf32>
    %1229 = math.absf %1228 : vector<2x8x32xf32>
    %cst_371 = arith.constant 0.327591091 : f32
    %1230 = vector.broadcast %cst_371 : f32 to vector<2x8x32xf32>
    %1231 = arith.mulf %1230, %1229 : vector<2x8x32xf32>
    %cst_372 = arith.constant 1.000000e+00 : f32
    %1232 = vector.broadcast %cst_372 : f32 to vector<2x8x32xf32>
    %1233 = arith.addf %1232, %1231 : vector<2x8x32xf32>
    %cst_373 = arith.constant 1.000000e+00 : f32
    %1234 = vector.broadcast %cst_373 : f32 to vector<2x8x32xf32>
    %1235 = arith.divf %1234, %1233 : vector<2x8x32xf32>
    %cst_374 = arith.constant 1.06140542 : f32
    %1236 = vector.broadcast %cst_374 : f32 to vector<2x8x32xf32>
    %1237 = arith.mulf %1236, %1235 : vector<2x8x32xf32>
    %cst_375 = arith.constant -1.45315206 : f32
    %1238 = vector.broadcast %cst_375 : f32 to vector<2x8x32xf32>
    %1239 = arith.addf %1237, %1238 : vector<2x8x32xf32>
    %1240 = arith.mulf %1239, %1235 : vector<2x8x32xf32>
    %cst_376 = arith.constant 1.42141378 : f32
    %1241 = vector.broadcast %cst_376 : f32 to vector<2x8x32xf32>
    %1242 = arith.addf %1240, %1241 : vector<2x8x32xf32>
    %1243 = arith.mulf %1242, %1235 : vector<2x8x32xf32>
    %cst_377 = arith.constant -0.284496725 : f32
    %1244 = vector.broadcast %cst_377 : f32 to vector<2x8x32xf32>
    %1245 = arith.addf %1243, %1244 : vector<2x8x32xf32>
    %1246 = arith.mulf %1245, %1235 : vector<2x8x32xf32>
    %cst_378 = arith.constant 0.254829586 : f32
    %1247 = vector.broadcast %cst_378 : f32 to vector<2x8x32xf32>
    %1248 = arith.addf %1246, %1247 : vector<2x8x32xf32>
    %1249 = arith.mulf %1248, %1235 : vector<2x8x32xf32>
    %cst_379 = arith.constant 0.000000e+00 : f32
    %1250 = vector.broadcast %cst_379 : f32 to vector<2x8x32xf32>
    %1251 = arith.subf %1250, %1229 : vector<2x8x32xf32>
    %1252 = arith.mulf %1251, %1229 : vector<2x8x32xf32>
    %1253 = math.exp %1252 : vector<2x8x32xf32>
    %1254 = arith.mulf %1249, %1253 : vector<2x8x32xf32>
    %cst_380 = arith.constant 1.000000e+00 : f32
    %1255 = vector.broadcast %cst_380 : f32 to vector<2x8x32xf32>
    %1256 = arith.subf %1255, %1254 : vector<2x8x32xf32>
    %cst_381 = arith.constant 0.000000e+00 : f32
    %1257 = vector.broadcast %cst_381 : f32 to vector<2x8x32xf32>
    %1258 = arith.cmpf oge, %1228, %1257 : vector<2x8x32xf32>
    %cst_382 = arith.constant 0.000000e+00 : f32
    %1259 = vector.broadcast %cst_382 : f32 to vector<2x8x32xf32>
    %1260 = arith.subf %1259, %1256 : vector<2x8x32xf32>
    %1261 = arith.select %1258, %1256, %1260 : vector<2x8x32xi1>, vector<2x8x32xf32>
    %1262 = arith.subf %1224, %1261 : vector<2x8x32xf32>
    %cst_383 = arith.constant 5.000000e-01 : f32
    %1263 = vector.broadcast %cst_383 : f32 to vector<2x8x32xf32>
    %1264 = arith.mulf %1263, %1262 : vector<2x8x32xf32>
    %cst_384 = arith.constant 0.000000e+00 : f32
    %1265 = vector.broadcast %cst_384 : f32 to vector<2x8x32xf32>
    %1266 = arith.maximumf %1264, %1265 : vector<2x8x32xf32>
    %cst_385 = arith.constant 9.99999993E-9 : f32
    %1267 = vector.broadcast %cst_385 : f32 to vector<2x8x32xf32>
    %1268 = arith.addf %1266, %1267 : vector<2x8x32xf32>
    %1269 = math.log %1268 : vector<2x8x32xf32>
    %cst_386 = arith.constant 0.000000e+00 : f32
    %1270 = vector.broadcast %cst_386 : f32 to vector<2x8x32xf32>
    %1271 = arith.subf %1270, %1269 : vector<2x8x32xf32>
    %cst_387 = arith.constant 1.44269502 : f32
    %1272 = vector.broadcast %cst_387 : f32 to vector<2x8x32xf32>
    %1273 = arith.mulf %1271, %1272 : vector<2x8x32xf32>
    %cst_388 = arith.constant 0.000000e+00 : f32
    %cst_389 = arith.constant 5.000000e+01 : f32
    %1274 = vector.broadcast %cst_388 : f32 to vector<2x8x32xf32>
    %1275 = arith.maximumf %1274, %1273 : vector<2x8x32xf32>
    %1276 = vector.broadcast %cst_389 : f32 to vector<2x8x32xf32>
    %1277 = arith.minimumf %1276, %1275 : vector<2x8x32xf32>
    %c2_390 = arith.constant 2 : index
    %c0_391 = arith.constant 0 : index
    %c0_392 = arith.constant 0 : index
    %c0_393 = arith.constant 0 : index
    %1278 = vector.load %arg24[%c2_390, %c0_391, %c0_392, %c0_393] : memref<3x2x8x192xf32, #tpu.memory_space<vmem>>, vector<1x2x8x32xf32>
    %1279 = vector.shape_cast %1278 : vector<1x2x8x32xf32> to vector<2x8x32xf32>
    %1280 = vector.shape_cast %1164 : vector<2x8x32xf32> to vector<1x2x8x32xf32>
    tpu.vector_store %arg24[%c2_390, %c0_391, %c0_392, %c0_393], %1280 {strides = array<i32>} : memref<3x2x8x192xf32, #tpu.memory_space<vmem>>, vector<1x2x8x32xf32>,
    %c2_394 = arith.constant 2 : index
    %c0_395 = arith.constant 0 : index
    %c0_396 = arith.constant 0 : index
    %c32_397 = arith.constant 32 : index
    %1281 = vector.load %arg24[%c2_394, %c0_395, %c0_396, %c32_397] : memref<3x2x8x192xf32, #tpu.memory_space<vmem>>, vector<1x2x8x32xf32>
    %1282 = vector.shape_cast %1281 : vector<1x2x8x32xf32> to vector<2x8x32xf32>
    %1283 = vector.shape_cast %1165 : vector<2x8x32xf32> to vector<1x2x8x32xf32>
    tpu.vector_store %arg24[%c2_394, %c0_395, %c0_396, %c32_397], %1283 {strides = array<i32>} : memref<3x2x8x192xf32, #tpu.memory_space<vmem>>, vector<1x2x8x32xf32>,
    %c2_398 = arith.constant 2 : index
    %c0_399 = arith.constant 0 : index
    %c0_400 = arith.constant 0 : index
    %c64_401 = arith.constant 64 : index
    %1284 = vector.load %arg24[%c2_398, %c0_399, %c0_400, %c64_401] : memref<3x2x8x192xf32, #tpu.memory_space<vmem>>, vector<1x2x8x32xf32>
    %1285 = vector.shape_cast %1284 : vector<1x2x8x32xf32> to vector<2x8x32xf32>
    %1286 = vector.shape_cast %1166 : vector<2x8x32xf32> to vector<1x2x8x32xf32>
    tpu.vector_store %arg24[%c2_398, %c0_399, %c0_400, %c64_401], %1286 {strides = array<i32>} : memref<3x2x8x192xf32, #tpu.memory_space<vmem>>, vector<1x2x8x32xf32>,
    %c2_402 = arith.constant 2 : index
    %c0_403 = arith.constant 0 : index
    %c0_404 = arith.constant 0 : index
    %c96_405 = arith.constant 96 : index
    %1287 = vector.load %arg24[%c2_402, %c0_403, %c0_404, %c96_405] : memref<3x2x8x192xf32, #tpu.memory_space<vmem>>, vector<1x2x8x32xf32>
    %1288 = vector.shape_cast %1287 : vector<1x2x8x32xf32> to vector<2x8x32xf32>
    %1289 = vector.shape_cast %1266 : vector<2x8x32xf32> to vector<1x2x8x32xf32>
    tpu.vector_store %arg24[%c2_402, %c0_403, %c0_404, %c96_405], %1289 {strides = array<i32>} : memref<3x2x8x192xf32, #tpu.memory_space<vmem>>, vector<1x2x8x32xf32>,
    %c2_406 = arith.constant 2 : index
    %c0_407 = arith.constant 0 : index
    %c0_408 = arith.constant 0 : index
    %c128_409 = arith.constant 128 : index
    %1290 = vector.load %arg24[%c2_406, %c0_407, %c0_408, %c128_409] : memref<3x2x8x192xf32, #tpu.memory_space<vmem>>, vector<1x2x8x32xf32>
    %1291 = vector.shape_cast %1290 : vector<1x2x8x32xf32> to vector<2x8x32xf32>
    %1292 = vector.shape_cast %1185 : vector<2x8x32xf32> to vector<1x2x8x32xf32>
    tpu.vector_store %arg24[%c2_406, %c0_407, %c0_408, %c128_409], %1292 {strides = array<i32>} : memref<3x2x8x192xf32, #tpu.memory_space<vmem>>, vector<1x2x8x32xf32>,
    %c2_410 = arith.constant 2 : index
    %c0_411 = arith.constant 0 : index
    %c0_412 = arith.constant 0 : index
    %c160_413 = arith.constant 160 : index
    %1293 = vector.load %arg24[%c2_410, %c0_411, %c0_412, %c160_413] : memref<3x2x8x192xf32, #tpu.memory_space<vmem>>, vector<1x2x8x32xf32>
    %1294 = vector.shape_cast %1293 : vector<1x2x8x32xf32> to vector<2x8x32xf32>
    %1295 = vector.shape_cast %1277 : vector<2x8x32xf32> to vector<1x2x8x32xf32>
    tpu.vector_store %arg24[%c2_410, %c0_411, %c0_412, %c160_413], %1295 {strides = array<i32>} : memref<3x2x8x192xf32, #tpu.memory_space<vmem>>, vector<1x2x8x32xf32>,
    %c0_414 = arith.constant 0 : index
    %c0_415 = arith.constant 0 : index
    %c0_416 = arith.constant 0 : index
    %1296 = vector.load %arg25[%c0_414, %c0_415, %c0_416] : memref<2x8x32xf32, #tpu.memory_space<vmem>>, vector<2x8x32xf32>
    tpu.vector_store %arg25[%c0_414, %c0_415, %c0_416], %1164 {strides = array<i32>} : memref<2x8x32xf32, #tpu.memory_space<vmem>>, vector<2x8x32xf32>,
    %c0_417 = arith.constant 0 : index
    %c0_418 = arith.constant 0 : index
    %c0_419 = arith.constant 0 : index
    %1297 = vector.load %arg26[%c0_417, %c0_418, %c0_419] : memref<2x8x32xf32, #tpu.memory_space<vmem>>, vector<2x8x32xf32>
    tpu.vector_store %arg26[%c0_417, %c0_418, %c0_419], %1165 {strides = array<i32>} : memref<2x8x32xf32, #tpu.memory_space<vmem>>, vector<2x8x32xf32>,
    return
  }
  func.func @transform_0(%arg0: i32) -> (i32, i32, i32, i32) {
    %c0_i32 = arith.constant 0 : i32
    %c0_i32_0 = arith.constant 0 : i32
    %c0_i32_1 = arith.constant 0 : i32
    %c0_i32_2 = arith.constant 0 : i32
    return %arg0, %c0_i32, %c0_i32_0, %c0_i32_1 : i32, i32, i32, i32
  }
  func.func @transform_1(%arg0: i32) -> (i32, i32) {
    %c0_i32 = arith.constant 0 : i32
    %c0_i32_0 = arith.constant 0 : i32
    %c0_i32_1 = arith.constant 0 : i32
    return %c0_i32, %c0_i32_0 : i32, i32
  }
  func.func @transform_2(%arg0: i32) -> (i32, i32) {
    %c0_i32 = arith.constant 0 : i32
    %c0_i32_0 = arith.constant 0 : i32
    %c0_i32_1 = arith.constant 0 : i32
    return %c0_i32, %c0_i32_0 : i32, i32
  }
  func.func @transform_3(%arg0: i32) -> (i32, i32) {
    %c0_i32 = arith.constant 0 : i32
    %c0_i32_0 = arith.constant 0 : i32
    %c0_i32_1 = arith.constant 0 : i32
    return %c0_i32, %c0_i32_0 : i32, i32
  }
  func.func @transform_4(%arg0: i32) -> (i32, i32) {
    %c0_i32 = arith.constant 0 : i32
    %c0_i32_0 = arith.constant 0 : i32
    %c0_i32_1 = arith.constant 0 : i32
    return %c0_i32, %c0_i32_0 : i32, i32
  }
  func.func @transform_5(%arg0: i32) -> (i32, i32) {
    %c0_i32 = arith.constant 0 : i32
    %c0_i32_0 = arith.constant 0 : i32
    %c0_i32_1 = arith.constant 0 : i32
    return %c0_i32, %c0_i32_0 : i32, i32
  }
  func.func @transform_6(%arg0: i32) -> (i32, i32) {
    %c0_i32 = arith.constant 0 : i32
    %c0_i32_0 = arith.constant 0 : i32
    %c0_i32_1 = arith.constant 0 : i32
    return %c0_i32, %c0_i32_0 : i32, i32
  }
  func.func @transform_7(%arg0: i32) -> (i32, i32) {
    %c0_i32 = arith.constant 0 : i32
    %c0_i32_0 = arith.constant 0 : i32
    %c0_i32_1 = arith.constant 0 : i32
    return %c0_i32, %c0_i32_0 : i32, i32
  }
  func.func @transform_8(%arg0: i32) -> (i32, i32) {
    %c0_i32 = arith.constant 0 : i32
    %c0_i32_0 = arith.constant 0 : i32
    %c0_i32_1 = arith.constant 0 : i32
    return %c0_i32, %c0_i32_0 : i32, i32
  }
  func.func @transform_9(%arg0: i32) -> (i32, i32) {
    %c0_i32 = arith.constant 0 : i32
    %c0_i32_0 = arith.constant 0 : i32
    %c0_i32_1 = arith.constant 0 : i32
    return %c0_i32, %c0_i32_0 : i32, i32
  }
  func.func @transform_10(%arg0: i32) -> (i32, i32) {
    %c0_i32 = arith.constant 0 : i32
    %c0_i32_0 = arith.constant 0 : i32
    %c0_i32_1 = arith.constant 0 : i32
    return %c0_i32, %c0_i32_0 : i32, i32
  }
  func.func @transform_11(%arg0: i32) -> (i32, i32) {
    %c0_i32 = arith.constant 0 : i32
    %c0_i32_0 = arith.constant 0 : i32
    %c0_i32_1 = arith.constant 0 : i32
    return %c0_i32, %c0_i32_0 : i32, i32
  }
  func.func @transform_12(%arg0: i32) -> (i32, i32) {
    %c0_i32 = arith.constant 0 : i32
    %c0_i32_0 = arith.constant 0 : i32
    %c0_i32_1 = arith.constant 0 : i32
    return %c0_i32, %c0_i32_0 : i32, i32
  }
  func.func @transform_13(%arg0: i32) -> (i32, i32) {
    %c0_i32 = arith.constant 0 : i32
    %c0_i32_0 = arith.constant 0 : i32
    %c0_i32_1 = arith.constant 0 : i32
    return %c0_i32, %c0_i32_0 : i32, i32
  }
  func.func @transform_14(%arg0: i32) -> (i32, i32) {
    %c0_i32 = arith.constant 0 : i32
    %c0_i32_0 = arith.constant 0 : i32
    %c0_i32_1 = arith.constant 0 : i32
    return %c0_i32, %c0_i32_0 : i32, i32
  }
  func.func @transform_15(%arg0: i32) -> (i32, i32) {
    %c0_i32 = arith.constant 0 : i32
    %c0_i32_0 = arith.constant 0 : i32
    %c0_i32_1 = arith.constant 0 : i32
    return %c0_i32, %c0_i32_0 : i32, i32
  }
  func.func @transform_16(%arg0: i32) -> (i32, i32) {
    %c0_i32 = arith.constant 0 : i32
    %c0_i32_0 = arith.constant 0 : i32
    %c0_i32_1 = arith.constant 0 : i32
    return %c0_i32, %c0_i32_0 : i32, i32
  }
  func.func @transform_17(%arg0: i32) -> (i32, i32) {
    %c0_i32 = arith.constant 0 : i32
    %c0_i32_0 = arith.constant 0 : i32
    %c0_i32_1 = arith.constant 0 : i32
    return %c0_i32, %c0_i32_0 : i32, i32
  }
  func.func @transform_18(%arg0: i32) -> (i32, i32) {
    %c0_i32 = arith.constant 0 : i32
    %c0_i32_0 = arith.constant 0 : i32
    %c0_i32_1 = arith.constant 0 : i32
    return %c0_i32, %c0_i32_0 : i32, i32
  }
  func.func @transform_19(%arg0: i32) -> (i32, i32) {
    %c0_i32 = arith.constant 0 : i32
    %c0_i32_0 = arith.constant 0 : i32
    %c0_i32_1 = arith.constant 0 : i32
    return %c0_i32, %c0_i32_0 : i32, i32
  }
  func.func @transform_20(%arg0: i32) -> (i32, i32) {
    %c0_i32 = arith.constant 0 : i32
    %c0_i32_0 = arith.constant 0 : i32
    %c0_i32_1 = arith.constant 0 : i32
    return %c0_i32, %c0_i32_0 : i32, i32
  }
  func.func @transform_21(%arg0: i32) -> (i32, i32) {
    %c0_i32 = arith.constant 0 : i32
    %c0_i32_0 = arith.constant 0 : i32
    %c0_i32_1 = arith.constant 0 : i32
    return %c0_i32, %c0_i32_0 : i32, i32
  }
  func.func @transform_22(%arg0: i32) -> (i32, i32) {
    %c0_i32 = arith.constant 0 : i32
    %c0_i32_0 = arith.constant 0 : i32
    %c0_i32_1 = arith.constant 0 : i32
    return %c0_i32, %c0_i32_0 : i32, i32
  }
  func.func @transform_23(%arg0: i32) -> (i32, i32, i32, i32) {
    %c0_i32 = arith.constant 0 : i32
    %c0_i32_0 = arith.constant 0 : i32
    %c0_i32_1 = arith.constant 0 : i32
    %c0_i32_2 = arith.constant 0 : i32
    return %arg0, %c0_i32, %c0_i32_0, %c0_i32_1 : i32, i32, i32, i32
  }
}

</mosaic_0001>

<bundles_post_ra>
// kernel: entropy_block_trans_forward.1
= control target key start
LH: loop header
LB: loop body
LE: loop exit
PB: predicated region body
PF: predicated region fallthrough
CT: control target
= control target key end

     0   :  { %s8165_s0 = inlined_call_operand.vmem [shape: f32[3,2,8,32], index: 0, kind: input, shape index: {}]   ;;  %s8166_s1 = inlined_call_operand.hbm [shape: f32[8,32], index: 1, kind: input, shape index: {}]   ;;  %s8167_s2 = inlined_call_operand.vmem [shape: bf16[32,128], index: 2, kind: input, shape index: {}]   ;;  %s8168_s3 = inlined_call_operand.vmem [shape: f32[1,128], index: 3, kind: input, shape index: {}]   ;;  %s8169_s4 = inlined_call_operand.vmem [shape: f32[4,32], index: 4, kind: input, shape index: {}]   ;;  %s8170_s5 = inlined_call_operand.vmem [shape: f32[4,32], index: 5, kind: input, shape index: {}]   ;;  %s8171_s6 = inlined_call_operand.vmem [shape: f32[4,32], index: 6, kind: input, shape index: {}]   ;;  %s8172_s7 = inlined_call_operand.vmem [shape: bf16[32,32], index: 7, kind: input, shape index: {}]   ;;  %s8173_s8 = inlined_call_operand.vmem [shape: f32[1,32], index: 8, kind: input, shape index: {}]   ;;  %s8174_s9 = inlined_call_operand.vmem [shape: bf16[32,32], index: 9, kind: input, shape index: {}]   ;;  %s8175_s10 = inlined_call_operand.vmem [shape: f32[1,32], index: 10, kind: input, shape index: {}]   ;;  %s8176_s11 = inlined_call_operand.hbm [shape: bf16[32,32], index: 11, kind: input, shape index: {}]   ;;  %s8177_s12 = inlined_call_operand.hbm [shape: f32[1,32], index: 12, kind: input, shape index: {}]   ;;  %s8178_s13 = inlined_call_operand.hbm [shape: bf16[32,32], index: 13, kind: input, shape index: {}]   ;;  %s8179_s14 = inlined_call_operand.hbm [shape: f32[1,32], index: 14, kind: input, shape index: {}]   ;;  %s8180_s15 = inlined_call_operand.vmem [shape: bf16[32,32], index: 15, kind: input, shape index: {}]   ;;  %s8181_s16 = inlined_call_operand.hbm [shape: f32[1,32], index: 16, kind: input, shape index: {}]   ;;  %s8182_s17 = inlined_call_operand.hbm [shape: bf16[32,32], index: 17, kind: input, shape index: {}]   ;;  %s8183_s18 = inlined_call_operand.hbm [shape: f32[1,32], index: 18, kind: input, shape index: {}]   ;;  %s8184_s19 = inlined_call_operand.vmem [shape: f32[32,32], index: 19, kind: input, shape index: {}]   ;;  %s8185_s20 = inlined_call_operand.hbm [shape: f32[1,32], index: 20, kind: input, shape index: {}]   ;;  %s8186_s21 = inlined_call_operand.vmem [shape: f32[32,32], index: 21, kind: input, shape index: {}]   ;;  %s8187_s22 = inlined_call_operand.hbm [shape: f32[1,32], index: 22, kind: input, shape index: {}]   ;;  %s8188_s23 = inlined_call_operand.vmem [shape: f32[3,2,8,192], index: 23, kind: output, shape index: {}]  }
   0x1   :  { %8195 = sst [smem:[#allocation26_spill]] %s8165_s0 }
   0x2   :  { %8196 = sst [smem:[#allocation27_spill]] %s8166_s1 }
   0x3   :  { %8197 = sst [smem:[#allocation28_spill]] %s8167_s2 }
   0x4   :  { %8198 = sst [smem:[#allocation29_spill]] %s8168_s3 }
   0x5   :  { %8199 = sst [smem:[#allocation30_spill]] %s8169_s4 }
   0x6   :  { %8200 = sst [smem:[#allocation31_spill]] %s8170_s5 }
   0x7   :  { %8201 = sst [smem:[#allocation32_spill]] %s8171_s6 }
   0x8   :  { %8202 = sst [smem:[#allocation33_spill]] %s8172_s7 }
   0x9   :  { %8203 = sst [smem:[#allocation34_spill]] %s8175_s10 }
   0xa   :  { %28 = vsyncpa [#allocation5], 0 }
   0xb   :  { %29 = vsyncpa [#allocation7], 0 }
   0xc   :  { %30 = vsyncpa [#allocation10], 0 }
   0xd   :  { %31 = vsyncpa [#allocation13], 0 }
   0xe   :  { %32 = vsyncpa [#allocation16], 0 }
   0xf   :  { %33 = vsyncpa [#allocation19], 0  ;;  %s6503_s4 = smov [#allocation6]   ;;  %s6271_s5 = scalar_lea.hbm %s8176_s11, 256 }
  0x10   :  { %s69_s30 = sshll.u32 %s6503_s4, 4  ;;  %p6272_p0 = scmp.ne.s32.totalorder %s8176_s11, %s6271_s5  ;;  %s70_s30 = int_to_ptr.vmem [resolvable:$true] %s69_s30 }
  0x11   :  { %p6275_p1 = scmp.lt.u32.totalorder %s6271_s5, %s8176_s11 }
  0x13   :  { %p6277_p2 = pnand %p6275_p1, %p6272_p0 }
  0x15   :  { %6280 = shalt.err (!%p6277_p2)
}
  0x16   :  { %s6281_s27 = scalar_lea.vmem %s70_s30, 256  ;;  %p6286_p4 = scmp.lt.s32.totalorder %s70_s30, %s70_s30 }
  0x17   :  { %p6282_p3 = scmp.ne.s32.totalorder %s70_s30, %s6281_s27  ;;  %p6287_p5 = scmp.lt.s32.totalorder %s6281_s27, %s6281_s27 }
  0x19   :  { %p6288_p6 = por %p6287_p5, %p6286_p4 }
  0x1b   :  { %p6289_p7 = pnand %p6288_p6, %p6282_p3 }
  0x1d   :  { %6292 = shalt.err (!%p6289_p7)
}
  0x1e   :  { %s6504_s7 = smov 64   ;;  %s6505_s28 = smov 4  }
  0x1f   :  { %75 = dma.hbm_to_vmem [thread:$0]  %s8176_s11, 256, %s70_s30, [#allocation7], %s6504_s7, %s6504_s7, %s6505_s28  }
  0x20   :  { %s6506_s0 = smov [#allocation9]   ;;  %s6507_s24 = smov [#allocation12]  }
  0x21   :  { %s91_s4 = sshll.u32 %s6506_s0, 4  ;;  %s116_s25 = sshll.u32 %s6507_s24, 4  ;;  %s92_s4 = int_to_ptr.vmem [resolvable:$true] %s91_s4  ;;  %s117_s25 = int_to_ptr.vmem [resolvable:$true] %s116_s25 }
  0x22   :  { %s6293_s26 = scalar_lea.hbm %s8178_s13, 256 }
  0x23   :  { %p6294_p8 = scmp.ne.s32.totalorder %s8178_s13, %s6293_s26  ;;  %p6297_p9 = scmp.lt.u32.totalorder %s6293_s26, %s8178_s13 }
  0x25   :  { %p6299_p10 = pnand %p6297_p9, %p6294_p8 }
  0x27   :  { %6302 = shalt.err (!%p6299_p10)
}
  0x28   :  { %s6303_s11 = scalar_lea.vmem %s92_s4, 256  ;;  %p6308_p12 = scmp.lt.s32.totalorder %s92_s4, %s92_s4 }
  0x29   :  { %p6304_p11 = scmp.ne.s32.totalorder %s92_s4, %s6303_s11  ;;  %p6309_p13 = scmp.lt.s32.totalorder %s6303_s11, %s6303_s11 }
  0x2b   :  { %p6310_p0 = por %p6309_p13, %p6308_p12 }
  0x2d   :  { %p6311_p1 = pnand %p6310_p0, %p6304_p11 }
  0x2f   :  { %6314 = shalt.err (!%p6311_p1)
}
  0x30   :  { %97 = dma.hbm_to_vmem [thread:$0]  %s8178_s13, 256, %s92_s4, [#allocation10], %s6504_s7, %s6504_s7, %s6505_s28  }
  0x31   :  { %s6315_s0 = scalar_lea.hbm %s8181_s16, 16 }
  0x32   :  { %p6316_p2 = scmp.ne.s32.totalorder %s8181_s16, %s6315_s0  ;;  %p6319_p3 = scmp.lt.u32.totalorder %s6315_s0, %s8181_s16 }
  0x34   :  { %p6321_p4 = pnand %p6319_p3, %p6316_p2 }
  0x36   :  { %6324 = shalt.err (!%p6321_p4)
}
  0x37   :  { %s6325_s2 = scalar_lea.vmem %s117_s25, 16  ;;  %s6329_s6 = scalar_lea.vmem %s117_s25, 32 }
  0x38   :  { %p6326_p5 = scmp.ne.s32.totalorder %s117_s25, %s6325_s2  ;;  %p6330_p6 = scmp.lt.s32.totalorder %s117_s25, %s117_s25 }
  0x39   :  { %p6331_p7 = scmp.lt.s32.totalorder %s6329_s6, %s6325_s2 }
  0x3b   :  { %p6332_p8 = por %p6331_p7, %p6330_p6 }
  0x3d   :  { %p6333_p9 = pnand %p6332_p8, %p6326_p5 }
  0x3f   :  { %6336 = shalt.err (!%p6333_p9)
}
  0x40   :  { %119 = dma.hbm_to_vmem [thread:$0]  %s8181_s16, 16, %s117_s25, [#allocation13]  }
  0x41   :  { %s6508_s27 = smov [#allocation15]   ;;  %s6509_s30 = smov [#allocation4]  }
  0x42   :  { %s138_s11 = sshll.u32 %s6508_s27, 4  ;;  %s42_s29 = sshll.u32 %s6509_s30, 4  ;;  %s139_s11 = int_to_ptr.vmem [resolvable:$true] %s138_s11  ;;  %s43_s29 = int_to_ptr.vmem [resolvable:$true] %s42_s29 }
  0x43   :  { %s6337_s0 = scalar_lea.hbm %s8183_s18, 16 }
  0x44   :  { %p6338_p10 = scmp.ne.s32.totalorder %s8183_s18, %s6337_s0  ;;  %p6341_p11 = scmp.lt.u32.totalorder %s6337_s0, %s8183_s18 }
  0x46   :  { %p6343_p12 = pnand %p6341_p11, %p6338_p10 }
  0x48   :  { %6346 = shalt.err (!%p6343_p12)
}
  0x49   :  { %s6347_s16 = scalar_lea.vmem %s139_s11, 16  ;;  %s6351_s25 = scalar_lea.vmem %s139_s11, 32 }
  0x4a   :  { %p6348_p13 = scmp.ne.s32.totalorder %s139_s11, %s6347_s16  ;;  %p6352_p0 = scmp.lt.s32.totalorder %s139_s11, %s139_s11 }
  0x4b   :  { %p6353_p1 = scmp.lt.s32.totalorder %s6351_s25, %s6347_s16 }
  0x4d   :  { %p6354_p2 = por %p6353_p1, %p6352_p0 }
  0x4f   :  { %p6355_p3 = pnand %p6354_p2, %p6348_p13 }
  0x51   :  { %6358 = shalt.err (!%p6355_p3)
}
  0x52   :  { %141 = dma.hbm_to_vmem [thread:$0]  %s8183_s18, 16, %s139_s11, [#allocation16]  }
  0x53   :  { %s8204_s27 = sld [smem:[#allocation27_spill]] }
  0x59   :  { %s6359_s30 = scalar_lea.hbm %s8204_s27, 128 }
  0x5a   :  { %p6360_p4 = scmp.ne.s32.totalorder %s8204_s27, %s6359_s30  ;;  %p6363_p5 = scmp.lt.u32.totalorder %s6359_s30, %s8204_s27 }
  0x5c   :  { %p6365_p6 = pnand %p6363_p5, %p6360_p4 }
  0x5e   :  { %6368 = shalt.err (!%p6365_p6)
}
  0x5f   :  { %s6369_s5 = scalar_lea.vmem %s43_s29, 128  ;;  %p6374_p8 = scmp.lt.s32.totalorder %s43_s29, %s43_s29 }
  0x60   :  { %p6370_p7 = scmp.ne.s32.totalorder %s43_s29, %s6369_s5  ;;  %p6375_p9 = scmp.lt.s32.totalorder %s6369_s5, %s6369_s5 }
  0x62   :  { %p6376_p10 = por %p6375_p9, %p6374_p8 }
  0x64   :  { %p6377_p11 = pnand %p6376_p10, %p6370_p7 }
  0x66   :  { %6380 = shalt.err (!%p6377_p11)
}
  0x67   :  { %45 = dma.hbm_to_vmem [thread:$0]  %s8204_s27, 128, %s43_s29, [#allocation5]  }
  0x68   :  { %s6510_s1 = smov [#allocation8]   ;;  %s6511_s16 = smov [#allocation11]  }
  0x69   :  { %s82_s26 = sshll.u32 %s6510_s1, 4  ;;  %s104_s25 = sshll.u32 %s6511_s16, 4  ;;  %s83_s26 = int_to_ptr.vmem [resolvable:$true] %s82_s26  ;;  %s105_s25 = int_to_ptr.vmem [resolvable:$true] %s104_s25 }
  0x6a   :  { %s6381_s13 = scalar_lea.hbm %s8177_s12, 16 }
  0x6b   :  { %p6382_p12 = scmp.ne.s32.totalorder %s8177_s12, %s6381_s13  ;;  %p6385_p13 = scmp.lt.u32.totalorder %s6381_s13, %s8177_s12 }
  0x6d   :  { %p6387_p0 = pnand %p6385_p13, %p6382_p12 }
  0x6f   :  { %6390 = shalt.err (!%p6387_p0)
}
  0x70   :  { %s6391_s29 = scalar_lea.vmem %s83_s26, 16  ;;  %s6395_s27 = scalar_lea.vmem %s83_s26, 32 }
  0x71   :  { %p6392_p1 = scmp.ne.s32.totalorder %s83_s26, %s6391_s29  ;;  %p6396_p2 = scmp.lt.s32.totalorder %s83_s26, %s83_s26 }
  0x72   :  { %p6397_p3 = scmp.lt.s32.totalorder %s6395_s27, %s6391_s29 }
  0x74   :  { %p6398_p4 = por %p6397_p3, %p6396_p2 }
  0x76   :  { %p6399_p5 = pnand %p6398_p4, %p6392_p1 }
  0x78   :  { %6402 = shalt.err (!%p6399_p5)
}
  0x79   :  { %85 = dma.hbm_to_vmem [thread:$0]  %s8177_s12, 16, %s83_s26, [#allocation7]  }
  0x7a   :  { %s6403_s11 = scalar_lea.hbm %s8179_s14, 16 }
  0x7b   :  { %p6404_p6 = scmp.ne.s32.totalorder %s8179_s14, %s6403_s11  ;;  %p6407_p7 = scmp.lt.u32.totalorder %s6403_s11, %s8179_s14 }
  0x7d   :  { %p6409_p8 = pnand %p6407_p7, %p6404_p6 }
  0x7f   :  { %6412 = shalt.err (!%p6409_p8)
}
  0x80   :  { %s6413_s13 = scalar_lea.vmem %s105_s25, 16  ;;  %s6417_s4 = scalar_lea.vmem %s105_s25, 32 }
  0x81   :  { %p6414_p9 = scmp.ne.s32.totalorder %s105_s25, %s6413_s13  ;;  %p6418_p10 = scmp.lt.s32.totalorder %s105_s25, %s105_s25 }
  0x82   :  { %p6419_p11 = scmp.lt.s32.totalorder %s6417_s4, %s6413_s13 }
  0x84   :  { %p6420_p12 = por %p6419_p11, %p6418_p10 }
  0x86   :  { %p6421_p13 = pnand %p6420_p12, %p6414_p9 }
  0x88   :  { %6424 = shalt.err (!%p6421_p13)
}
  0x89   :  { %107 = dma.hbm_to_vmem [thread:$0]  %s8179_s14, 16, %s105_s25, [#allocation10]  }
  0x8a   :  { %s6512_s30 = smov [#allocation14]   ;;  %s6513_s10 = smov [#allocation17]  }
  0x8b   :  { %s125_s3 = sshll.u32 %s6512_s30, 4  ;;  %s150_s29 = sshll.u32 %s6513_s10, 4  ;;  %s126_s3 = int_to_ptr.vmem [resolvable:$true] %s125_s3  ;;  %s151_s29 = int_to_ptr.vmem [resolvable:$true] %s150_s29 }
  0x8c   :  { %s6425_s24 = scalar_lea.hbm %s8182_s17, 256 }
  0x8d   :  { %p6426_p0 = scmp.ne.s32.totalorder %s8182_s17, %s6425_s24  ;;  %p6429_p1 = scmp.lt.u32.totalorder %s6425_s24, %s8182_s17 }
  0x8f   :  { %p6431_p2 = pnand %p6429_p1, %p6426_p0 }
  0x91   :  { %6434 = shalt.err (!%p6431_p2)
}
  0x92   :  { %s6435_s14 = scalar_lea.vmem %s126_s3, 256  ;;  %p6440_p4 = scmp.lt.s32.totalorder %s126_s3, %s126_s3 }
  0x93   :  { %p6436_p3 = scmp.ne.s32.totalorder %s126_s3, %s6435_s14  ;;  %p6441_p5 = scmp.lt.s32.totalorder %s6435_s14, %s6435_s14 }
  0x95   :  { %p6442_p6 = por %p6441_p5, %p6440_p4 }
  0x97   :  { %p6443_p7 = pnand %p6442_p6, %p6436_p3 }
  0x99   :  { %6446 = shalt.err (!%p6443_p7)
}
  0x9a   :  { %131 = dma.hbm_to_vmem [thread:$0]  %s8182_s17, 256, %s126_s3, [#allocation13], %s6504_s7, %s6504_s7, %s6505_s28  }
  0x9b   :  { %s6447_s13 = scalar_lea.hbm %s8185_s20, 16 }
  0x9c   :  { %p6448_p8 = scmp.ne.s32.totalorder %s8185_s20, %s6447_s13  ;;  %p6451_p9 = scmp.lt.u32.totalorder %s6447_s13, %s8185_s20 }
  0x9e   :  { %p6453_p10 = pnand %p6451_p9, %p6448_p8 }
  0xa0   :  { %6456 = shalt.err (!%p6453_p10)
}
  0xa1   :  { %s6457_s10 = scalar_lea.vmem %s151_s29, 16  ;;  %s6461_s27 = scalar_lea.vmem %s151_s29, 32 }
  0xa2   :  { %p6458_p11 = scmp.ne.s32.totalorder %s151_s29, %s6457_s10  ;;  %p6462_p12 = scmp.lt.s32.totalorder %s151_s29, %s151_s29 }
  0xa3   :  { %p6463_p13 = scmp.lt.s32.totalorder %s6461_s27, %s6457_s10 }
  0xa5   :  { %p6464_p0 = por %p6463_p13, %p6462_p12 }
  0xa7   :  { %p6465_p1 = pnand %p6464_p0, %p6458_p11 }
  0xa9   :  { %6468 = shalt.err (!%p6465_p1)
}
  0xaa   :  { %153 = dma.hbm_to_vmem [thread:$0]  %s8185_s20, 16, %s151_s29, [#allocation16]  }
  0xab   :  { %s6514_s3 = smov [#allocation18]   ;;  %s6469_s18 = scalar_lea.hbm %s8187_s22, 16 }
  0xac   :  { %s162_s0 = sshll.u32 %s6514_s3, 4  ;;  %p6470_p2 = scmp.ne.s32.totalorder %s8187_s22, %s6469_s18  ;;  %s163_s0 = int_to_ptr.vmem [resolvable:$true] %s162_s0 }
  0xad   :  { %p6473_p3 = scmp.lt.u32.totalorder %s6469_s18, %s8187_s22 }
  0xaf   :  { %p6475_p4 = pnand %p6473_p3, %p6470_p2 }
  0xb1   :  { %6478 = shalt.err (!%p6475_p4)
}
  0xb2   :  { %s6479_s16 = scalar_lea.vmem %s163_s0, 16  ;;  %s6483_s20 = scalar_lea.vmem %s163_s0, 32 }
  0xb3   :  { %p6480_p5 = scmp.ne.s32.totalorder %s163_s0, %s6479_s16  ;;  %p6484_p6 = scmp.lt.s32.totalorder %s163_s0, %s163_s0 }
  0xb4   :  { %p6485_p7 = scmp.lt.s32.totalorder %s6483_s20, %s6479_s16 }
  0xb6   :  { %p6486_p8 = por %p6485_p7, %p6484_p6 }
  0xb8   :  { %p6487_p9 = pnand %p6486_p8, %p6480_p5 }
  0xba   :  { %6490 = shalt.err (!%p6487_p9)
}
  0xbb   :  { %165 = dma.hbm_to_vmem [thread:$0]  %s8187_s22, 16, %s163_s0, [#allocation19]  }
  0xbc   :  { %6491 = dma.done.wait [#allocation5], 128  }
  0xbd   :  { %6492 = vsyncadd [#allocation5], 4294967168 }
  0xbe   :  { %6493 = dma.done.wait [#allocation7], 272  }
  0xbf   :  { %6494 = vsyncadd [#allocation7], 4294967024 }
  0xc0   :  { %6495 = dma.done.wait [#allocation10], 272  }
  0xc1   :  { %6496 = vsyncadd [#allocation10], 4294967024 }
  0xc2   :  { %6497 = dma.done.wait [#allocation13], 272  }
  0xc3   :  { %6498 = vsyncadd [#allocation13], 4294967024 }
  0xc4   :  { %6499 = dma.done.wait [#allocation16], 32  }
  0xc5   :  { %6500 = vsyncadd [#allocation16], 4294967264 }
  0xc6   :  { %6501 = dma.done.wait [#allocation19], 16  }
  0xc7   :  { %6502 = vsyncadd [#allocation19], 4294967280  ;;  %vm201_vm0 = vcmask 261120   ;;  %v6515_v0 = vmov 0.0   ;;  %vm6516_vm1 = vmmov 0   ;;  %s8205_s13 = sld [smem:[#allocation28_spill]] }
  0xc8   :  { %5491 = vmatprep.subr.bf16.mxu0 %v6515_v0  ;;  %5495 = vmatprep.mubr.msk.bf16.mxu0 %vm6516_vm1, %v6515_v0  ;;  %202 = vst.msk [vmem:[#allocation2] sm:$0xff] %vm201_vm0, %v6515_v0  ;;  %203 = vst.msk [vmem:[#allocation2 + $0x8] sm:$0xff] %vm201_vm0, %v6515_v0  ;;  %v206_v3 = vld [vmem:[#allocation4] sm:$0xff]  ;;  %s8206_s10 = sld [smem:[#allocation26_spill]]  ;;  %s8207_s0 = sld [smem:[#allocation29_spill]]  ;;  %vm1985_vm2 = vcmask 523520  }
  0xc9   :  { %204 = vst.msk [vmem:[#allocation3] sm:$0xff] %vm201_vm0, %v6515_v0  ;;  %205 = vst.msk [vmem:[#allocation3 + $0x8] sm:$0xff] %vm201_vm0, %v6515_v0  ;;  %5499 = vmatprep.subr.bf16.mxu1 %v6515_v0  ;;  %5501 = vmatprep.mubr.msk.bf16.mxu1 %vm6516_vm1, %v6515_v0  ;;  %vm1988_vm3 = vcmask 785920   ;;  %vm456_vm4 = vcmask 1043456   ;;  %vm426_vm5 = vcmask 64512   ;;  %s6517_s6 = smov 96  }
  0xca   :  { %s8208_s26 = sld [smem:[#allocation31_spill]]  ;;  %s8209_s5 = sld [smem:[#allocation32_spill]]  ;;  %vm1999_vm12 = vcmask 1048320  }
  0xcb   :  { %s8210_s1 = sld [smem:[#allocation33_spill]]  ;;  %s8211_s12 = sld [smem:[#allocation30_spill]] }
  0xcc   :  { %s6518_s25 = smov 32   ;;  %s8212_s28 = sld [smem:[#allocation34_spill]] }
  0xcd   :  { %v6011_v1 = vld [vmem:[%s8205_s13] sm:$0xff]   ;;  %v6012_v2 = vld [vmem:[%s8205_s13 + $0x8] sm:$0xff]  }
  0xce   :  { %5492 = vmatpush3.bf16.msra.mxu0 %v6011_v1  ;;  %v260_v4 = vld [vmem:[%s8206_s10] sm:$0xff]  ;;  %v261_v5 = vld [vmem:[%s8206_s10 + $0x8] sm:$0xff] }
  0xcf   :  { %5493 = vmatprep.subr.bf16.mxu0 %v6515_v0  ;;  %v262_v6 = vadd.f32 %v260_v4, %v206_v3  ;;  %v263_v7 = vadd.f32 %v261_v5, %v206_v3  ;;  %v5197_v9 = vld [vmem:[%s8207_s0] ss:$0 sm:$0xff] }
  0xd0   :  { %v257_v19 = vld [vmem:[#allocation3] sm:$0xff]  ;;  %v258_v21 = vld [vmem:[#allocation3 + $0x8] sm:$0xff] }
  0xd1   :  { %v264_v8 = vpack.c.bf16 %v263_v7, %v262_v6  ;;  %v330_v22 = vpack.c.bf16 %v257_v19, %v257_v19  ;;  %v331_v23 = vpack.c.bf16 %v258_v21, %v258_v21  ;;  %v6013_v21 = vld [vmem:[#allocation6] sm:$0xff]  }
  0xd2   :  { %5494 = vmatpush3.bf16.msra.mxu0 %v6012_v2 }
  0xd3   :  { %5505 = vmatprep.subr.bf16.mxu0 %v6515_v0 }
  0xd5   :  { %5496 = vmatmul.mubr.msk.bf16.vlgmr.msra.gmra.mrb[0].mxu0 %vm201_vm0, %v264_v8 }
  0xd6   :  { %5507 = vmatprep.mubr.msk.bf16.mxu0 %vm6516_vm1, %v6515_v0 }
 0x1a8   :  { %v315_v10 = vpop.f32.mrb[0].mxu0 }
 0x1a9   :  { %v6802_v11 = vadd.f32 %v5197_v9, %v315_v10  ;;  %v5497_v12 = vpop.f32.mrb[1].mxu0 }
 0x1aa   :  { %v318_v13 = vpop.f32.mrb[2].mxu0 }
 0x1ab   :  { %1983 = vst.msk [vmem:[%s8188_s23] sm:$0xff] %vm201_vm0, %v6802_v11  ;;  %v6809_v14 = vadd.f32 %v5197_v9, %v318_v13  ;;  %v5498_v15 = vpop.f32.mrb[3].mxu0  ;;  %v6813_v16 = vpack.c.bf16 %v6802_v11, %v6802_v11 }
 0x1ac   :  { %1986 = vst.msk [vmem:[%s8188_s23] sm:$0xff] %vm1985_vm2, %v6802_v11 }
 0x1ad   :  { %1984 = vst.msk [vmem:[%s8188_s23 + $0x10] sm:$0xff] %vm201_vm0, %v6809_v14  ;;  %v6827_v17 = vsel %vm201_vm0, %v6813_v16, 0  ;;  %v6831_v18 = vpack.c.bf16 %v6809_v14, %v6809_v14  ;;  %v457_v24 = vsel %vm456_vm4, %v6813_v16, 0 }
 0x1ae   :  { %1989 = vst.msk [vmem:[%s8188_s23] sm:$0xff] %vm1988_vm3, %v6802_v11  ;;  %5500 = vmatpush3.bf16.xpose.msra.mxu1 %v6827_v17 }
 0x1af   :  { %1987 = vst.msk [vmem:[%s8188_s23 + $0x10] sm:$0xff] %vm1985_vm2, %v6809_v14  ;;  %v6846_v20 = vsel %vm201_vm0, %v6831_v18, 0  ;;  %5511 = vmatprep.subr.bf16.mxu1 %v6515_v0  ;;  %v502_v25 = vsel %vm456_vm4, %v6831_v18, 0 }
 0x1b0   :  { %1990 = vst.msk [vmem:[%s8188_s23 + $0x10] sm:$0xff] %vm1988_vm3, %v6809_v14  ;;  %5506 = vmatpush3.bf16.xpose.msra.mxu0 %v6846_v20 }
 0x1b1   :  { %5517 = vmatprep.subr.bf16.mxu0 %v6515_v0 }
 0x1b5   :  { %5502 = vmatmul.mubr.msk.bf16.vlgmr.msra.gmra.mrb[0].mxu1 %vm201_vm0, %v330_v22  ;;  %v6014_v22 = vld [vmem:[#allocation6 + $0x8] sm:$0xff]  }
 0x1b6   :  { %5512 = vmatpush3.bf16.msra.mxu1 %v457_v24  ;;  %5513 = vmatprep.mubr.msk.bf16.mxu1 %vm6516_vm1, %v6515_v0 }
 0x1b7   :  { %5508 = vmatmul.mubr.msk.bf16.vlgmr.msra.gmra.mrb[4].mxu0 %vm201_vm0, %v331_v23  ;;  %5523 = vmatprep.subr.bf16.mxu1 %v6515_v0  ;;  %v6015_v23 = vld [vmem:[#allocation9] sm:$0xff]  }
 0x1b8   :  { %5518 = vmatpush3.bf16.msra.mxu0 %v502_v25  ;;  %5519 = vmatprep.mubr.msk.bf16.mxu0 %vm6516_vm1, %v6515_v0 }
 0x1b9   :  { %5531 = vmatprep.subr.bf16.mxu0 %v6515_v0 }
 0x288   :  { %v374_v26 = vpop.f32.mrb[0].mxu1 }
 0x289   :  { %v5503_v27 = vpop.f32.mrb[1].mxu1  ;;  %v427_v28 = vsel %vm426_vm5, %v374_v26, -inf }
 0x28a   :  { %v420_v29 = vpop.f32.mrb[4].mxu0  ;;  %428 = vmax.xlane.f32.xlu0 %v427_v28  ;;  %v377_v30 = vpop.f32.mrb[2].mxu1  ;;  %v571_v27 = vlaneseq }
 0x28b   :  { %v5504_v31 = vpop.f32.mrb[3].mxu1  ;;  %v5509_v32 = vpop.f32.mrb[5].mxu0  ;;  %v430_v33 = vsel %vm426_vm5, %v420_v29, -inf }
 0x28c   :  { %v423_v34 = vpop.f32.mrb[6].mxu0  ;;  %v6891_v31 = vshrl.u32 %v571_v27, 7 }
 0x28d   :  { %v5510_v35 = vpop.f32.mrb[7].mxu0 }
 0x28e   :  { %431 = vmax.xlane.f32.xlu0 %v430_v33  ;;  %v6894_v32 = vsub.s32 0, %v6891_v31  ;;  %v6899_v33 = vld [vmem:[%s8208_s26] sm:$0xf] }
 0x290   :  { %v6903_v35 = vrot.slane %v6899_v33, %v6894_v32 }
 0x317   :  { %v429_v36 = vpop.xlane.xlu0 %428 }
 0x318   :  { %v433_v37 = vsub.f32 %v374_v26, %v429_v36 }
 0x31a   :  { %v435_v38 = vmul.f32 1.442695, %v433_v37  ;;  %v6906_v37 = vsub.s32 1, %v6891_v31 }
 0x31b   :  { %v432_v39 = vpop.xlane.xlu0 %431 }
 0x31c   :  { %6025 = vpow2.f32 %v435_v38  ;;  %v434_v40 = vsub.f32 %v420_v29, %v432_v39  ;;  %v255_v39 = vld [vmem:[#allocation2] sm:$0xff] }
 0x31e   :  { %v437_v41 = vmul.f32 1.442695, %v434_v40 }
 0x320   :  { %6027 = vpow2.f32 %v437_v41 }
 0x326   :  { %v6026_v42 = vpop.eup %6025 }
 0x327   :  { %v439_v43 = vsel %vm426_vm5, %v6026_v42, 0.0 }
 0x328   :  { %440 = vadd.xlane.f32.xlu1 %v439_v43 }
 0x32a   :  { %v6028_v44 = vpop.eup %6027 }
 0x32b   :  { %v442_v45 = vsel %vm426_vm5, %v6028_v44, 0.0 }
 0x32c   :  { %443 = vadd.xlane.f32.xlu1 %v442_v45 }
 0x3b5   :  { %v441_v46 = vpop.xlane.xlu1 %440 }
 0x3b6   :  { %6029 = vrcp.f32 %v441_v46 }
 0x3b9   :  { %v444_v47 = vpop.xlane.xlu1 %443 }
 0x3ba   :  { %6031 = vrcp.f32 %v444_v47 }
 0x3c0   :  { %v6030_v48 = vpop.eup %6029 }
 0x3c1   :  { %v446_v49 = vmul.f32 0.17677669, %v6030_v48 }
 0x3c3   :  { %v449_v50 = vmul.f32 %v6026_v42, %v446_v49  ;;  %v6911_v42 = vrot.slane %v6899_v33, %v6906_v37 }
 0x3c4   :  { %v6032_v51 = vpop.eup %6031 }
 0x3c5   :  { %v451_v52 = vpack.c.bf16 %v449_v50, %v449_v50  ;;  %v448_v53 = vmul.f32 0.17677669, %v6032_v51  ;;  %v6932_v51 = vld [vmem:[#allocation9 + $0x8] sm:$0xff]  }
 0x3c7   :  { %v450_v54 = vmul.f32 %v6028_v44, %v448_v53  ;;  %5514 = vmatmul.mubr.msk.bf16.vlgmr.msra.gmra.mrb[4].mxu1 %vm426_vm5, %v451_v52  ;;  %v755_v44 = vpack.c.bf16 %v255_v39, %v255_v39  ;;  %v5205_v52 = vld [vmem:[#allocation8] ss:$0 sm:$0xff] }
 0x3c8   :  { %5527 = vmatprep.mubr.msk.bf16.mxu1 %vm6516_vm1, %v6515_v0  ;;  %5524 = vmatpush3.bf16.msra.mxu1 %v6013_v21 }
 0x3c9   :  { %v452_v55 = vpack.c.bf16 %v450_v54, %v450_v54  ;;  %5525 = vmatprep.subr.bf16.mxu1 %v6515_v0  ;;  %v764_v48 = vsel %vm201_vm0, %v755_v44, 0  ;;  %v256_v54 = vld [vmem:[#allocation2 + $0x8] sm:$0xff] }
 0x3cb   :  { %5520 = vmatmul.mubr.msk.bf16.vlgmr.msra.gmra.mrb[8].mxu0 %vm426_vm5, %v452_v55 }
 0x3cc   :  { %5535 = vmatprep.mubr.msk.bf16.mxu0 %vm6516_vm1, %v6515_v0  ;;  %5526 = vmatpush3.bf16.msra.mxu1 %v6014_v22 }
 0x3cd   :  { %5539 = vmatprep.subr.bf16.mxu1 %v6515_v0  ;;  %5532 = vmatpush3.bf16.msra.mxu0 %v6015_v23 }
 0x3ce   :  { %5533 = vmatprep.subr.bf16.mxu0 %v6515_v0 }
 0x3d1   :  { %5534 = vmatpush3.bf16.msra.mxu0 %v6932_v51 }
 0x3d2   :  { %5545 = vmatprep.subr.bf16.mxu0 %v6515_v0 }
 0x49a   :  { %v493_v56 = vpop.f32.mrb[4].mxu1 }
 0x49b   :  { %v494_v57 = vadd.f32 %v493_v56, %v6802_v11  ;;  %v5515_v58 = vpop.f32.mrb[5].mxu1 }
 0x49c   :  { %v496_v59 = vpop.f32.mrb[6].mxu1 }
 0x49d   :  { %v5516_v60 = vpop.f32.mrb[7].mxu1  ;;  %v544_v61 = vsel %vm201_vm0, %v494_v57, 0.0 }
 0x49e   :  { %v538_v62 = vpop.f32.mrb[8].mxu0  ;;  %545 = vadd.xlane.f32.xlu0 %v544_v61  ;;  %v756_v60 = vpack.c.bf16 %v256_v54, %v256_v54 }
 0x49f   :  { %v539_v63 = vadd.f32 %v538_v62, %v6809_v14  ;;  %v5521_v1 = vpop.f32.mrb[9].mxu0 }
 0x4a0   :  { %v541_v2 = vpop.f32.mrb[10].mxu0  ;;  %v813_v1 = vsel %vm201_vm0, %v756_v60, 0 }
 0x4a1   :  { %v5522_v3 = vpop.f32.mrb[11].mxu0  ;;  %v547_v4 = vsel %vm201_vm0, %v539_v63, 0.0 }
 0x4a2   :  { %548 = vadd.xlane.f32.xlu1 %v547_v4 }
 0x52b   :  { %v546_v5 = vpop.xlane.xlu0 %545 }
 0x52c   :  { %v551_v6 = vmul.f32 0.03125, %v546_v5 }
 0x52e   :  { %v553_v7 = vsub.f32 %v494_v57, %v551_v6 }
 0x52f   :  { %v549_v8 = vpop.xlane.xlu1 %548 }
 0x530   :  { %v552_v9 = vmul.f32 0.03125, %v549_v8  ;;  %v555_v10 = vmul.f32 %v553_v7, %v553_v7 }
 0x532   :  { %v554_v12 = vsub.f32 %v539_v63, %v552_v9  ;;  %v557_v13 = vsel %vm201_vm0, %v555_v10, 0.0 }
 0x533   :  { %558 = vadd.xlane.f32.xlu0 %v557_v13 }
 0x534   :  { %v556_v15 = vmul.f32 %v554_v12, %v554_v12 }
 0x536   :  { %v560_v19 = vsel %vm201_vm0, %v556_v15, 0.0 }
 0x537   :  { %561 = vadd.xlane.f32.xlu1 %v560_v19 }
 0x548   :  { %807 = vrot.lane.b32.xlu1 %v6831_v18, %s6517_s6 }
 0x549   :  { %758 = vrot.lane.b32.xlu0 %v6813_v16, %s6517_s6 }
 0x5c0   :  { %v559_v24 = vpop.xlane.xlu0 %558 }
 0x5c1   :  { %v563_v25 = vmul.f32 0.03125, %v559_v24 }
 0x5c3   :  { %v565_v26 = vadd.f32 1e-05, %v563_v25 }
 0x5c4   :  { %v562_v28 = vpop.xlane.xlu1 %561  ;;  %v759_v49 = vpop.permute.xlu0 %758 }
 0x5c5   :  { %6033 = vrsqrt.f32 %v565_v26  ;;  %v564_v29 = vmul.f32 0.03125, %v562_v28  ;;  %v888_v50 = vsel %vm456_vm4, %v759_v49, 0 }
 0x5c7   :  { %v566_v30 = vadd.f32 1e-05, %v564_v29 }
 0x5c9   :  { %6035 = vrsqrt.f32 %v566_v30 }
 0x5cf   :  { %v6034_v34 = vpop.eup %6033 }
 0x5d0   :  { %v569_v36 = vmul.f32 %v6034_v34, %v553_v7  ;;  %v808_v7 = vpop.permute.xlu1 %807 }
 0x5d1   :  { %v937_v8 = vsel %vm456_vm4, %v808_v7, 0 }
 0x5d2   :  { %v575_v40 = vmul.f32 %v6903_v35, %v569_v36 }
 0x5d3   :  { %v6036_v38 = vpop.eup %6035 }
 0x5d4   :  { %v570_v41 = vmul.f32 %v6036_v38, %v554_v12  ;;  %v6915_v45 = vadd.f32 %v6911_v42, %v575_v40 }
 0x5d6   :  { %v576_v43 = vmul.f32 %v6903_v35, %v570_v41 }
 0x5d8   :  { %v6918_v46 = vadd.f32 %v6911_v42, %v576_v43 }
 0x5da   :  { %v583_v47 = vpack.c.bf16 %v6918_v46, %v6915_v45 }
 0x5dc   :  { %5528 = vmatmul.mubr.msk.bf16.vlgmr.msra.gmra.mrb[8].mxu1 %vm201_vm0, %v583_v47 }
 0x5dd   :  { %5540 = vmatpush3.bf16.xpose.msra.mxu1 %v764_v48  ;;  %5541 = vmatprep.mubr.msk.bf16.mxu1 %vm6516_vm1, %v6515_v0 }
 0x5de   :  { %5551 = vmatprep.subr.bf16.mxu1 %v6515_v0 }
 0x5e4   :  { %5542 = vmatmul.mubr.msk.bf16.vlgmr.msra.gmra.mrb[12].mxu1 %vm201_vm0, %v759_v49 }
 0x5e5   :  { %5552 = vmatpush3.bf16.msra.mxu1 %v888_v50  ;;  %5553 = vmatprep.mubr.msk.bf16.mxu1 %vm6516_vm1, %v6515_v0 }
 0x5e6   :  { %5563 = vmatprep.subr.bf16.mxu1 %v6515_v0 }
 0x6af   :  { %v633_v53 = vpop.f32.mrb[8].mxu1 }
 0x6b0   :  { %v646_v55 = vadd.f32 %v5205_v52, %v633_v53  ;;  %v5529_v56 = vpop.f32.mrb[9].mxu1 }
 0x6b1   :  { %v636_v57 = vpop.f32.mrb[10].mxu1 }
 0x6b2   :  { %v647_v58 = vadd.f32 %v5205_v52, %v636_v57  ;;  %v5530_v59 = vpop.f32.mrb[11].mxu1  ;;  %v648_v61 = vmax.f32 %v646_v55, 0.0 }
 0x6b4   :  { %v649_v62 = vmax.f32 %v647_v58, 0.0 }
 0x6b6   :  { %v650_v63 = vpack.c.bf16 %v649_v62, %v648_v61 }
 0x6b7   :  { %v800_v2 = vpop.f32.mrb[12].mxu1 }
 0x6b8   :  { %5536 = vmatmul.mubr.msk.bf16.vlgmr.msra.gmra.mrb[12].mxu0 %vm201_vm0, %v650_v63  ;;  %v5543_v3 = vpop.f32.mrb[13].mxu1  ;;  %v855_v4 = vsel %vm426_vm5, %v800_v2, -inf }
 0x6b9   :  { %5546 = vmatpush3.bf16.xpose.msra.mxu0 %v813_v1  ;;  %856 = vmax.xlane.f32.xlu1 %v855_v4  ;;  %v803_v5 = vpop.f32.mrb[14].mxu1  ;;  %v5209_v1 = vld [vmem:[#allocation11] ss:$0 sm:$0xff] }
 0x6ba   :  { %v5544_v6 = vpop.f32.mrb[15].mxu1  ;;  %5547 = vmatprep.mubr.msk.bf16.mxu0 %vm6516_vm1, %v6515_v0  ;;  %5557 = vmatprep.subr.bf16.mxu0 %v6515_v0 }
 0x6c0   :  { %5548 = vmatmul.mubr.msk.bf16.vlgmr.msra.gmra.mrb[16].mxu0 %vm201_vm0, %v808_v7 }
 0x6c1   :  { %5558 = vmatpush3.bf16.msra.mxu0 %v937_v8  ;;  %5559 = vmatprep.mubr.msk.bf16.mxu0 %vm6516_vm1, %v6515_v0 }
 0x6c2   :  { %5571 = vmatprep.subr.bf16.mxu0 %v6515_v0 }
 0x746   :  { %v857_v9 = vpop.xlane.xlu1 %856 }
 0x747   :  { %v861_v10 = vsub.f32 %v800_v2, %v857_v9 }
 0x749   :  { %v863_v12 = vmul.f32 1.442695, %v861_v10 }
 0x74b   :  { %6037 = vpow2.f32 %v863_v12 }
 0x755   :  { %v6038_v25 = vpop.eup %6037 }
 0x756   :  { %v867_v28 = vsel %vm426_vm5, %v6038_v25, 0.0 }
 0x78b   :  { %v700_v13 = vpop.f32.mrb[12].mxu0 }
 0x78c   :  { %v5537_v15 = vpop.f32.mrb[13].mxu0  ;;  %v713_v6 = vadd.f32 %v5209_v1, %v700_v13 }
 0x78d   :  { %v6947_v19 = vpop.f32.mrb[14].mxu0 }
 0x78e   :  { %v5538_v21 = vpop.f32.mrb[15].mxu0  ;;  %v6966_v12 = vadd.f32 %v713_v6, %v6915_v45  ;;  %v6977_v45 = vld [vmem:[%s8180_s15] sm:$0xff]   ;;  %v5221_v6 = vld [vmem:[#allocation15] ss:$0 sm:$0xff] }
 0x790   :  { %v717_v15 = vsel %vm201_vm0, %v6966_v12, 0.0 }
 0x793   :  { %v849_v22 = vpop.f32.mrb[16].mxu0 }
 0x794   :  { %v5549_v23 = vpop.f32.mrb[17].mxu0  ;;  %v858_v24 = vsel %vm426_vm5, %v849_v22, -inf }
 0x795   :  { %859 = vmax.xlane.f32.xlu0 %v858_v24  ;;  %v852_v26 = vpop.f32.mrb[18].mxu0  ;;  %v714_v23 = vadd.f32 %v5209_v1, %v6947_v19  ;;  %v6983_v19 = vld [vmem:[%s8180_s15 + $0x8] sm:$0xff]  }
 0x796   :  { %v5550_v27 = vpop.f32.mrb[19].mxu0 }
 0x797   :  { %v716_v26 = vadd.f32 %v714_v23, %v6918_v46 }
 0x799   :  { %868 = vadd.xlane.f32.xlu0 %v867_v28  ;;  %v720_v27 = vsel %vm201_vm0, %v716_v26, 0.0 }
 0x7af   :  { %882 = vrot.lane.b32.xlu0 %v6802_v11, %s6517_s6 }
 0x822   :  { %v860_v29 = vpop.xlane.xlu0 %859 }
 0x823   :  { %v862_v30 = vsub.f32 %v849_v22, %v860_v29 }
 0x825   :  { %v865_v34 = vmul.f32 1.442695, %v862_v30 }
 0x826   :  { %v869_v36 = vpop.xlane.xlu0 %868 }
 0x827   :  { %6039 = vpow2.f32 %v865_v34 }
 0x828   :  { %6041 = vrcp.f32 %v869_v36 }
 0x82a   :  { %v883_v53 = vpop.permute.xlu0 %882 }
 0x831   :  { %v6040_v38 = vpop.eup %6039 }
 0x832   :  { %v6042_v39 = vpop.eup %6041  ;;  %v870_v40 = vsel %vm426_vm5, %v6040_v38, 0.0 }
 0x833   :  { %v874_v41 = vmul.f32 0.17677669, %v6042_v39  ;;  %871 = vadd.xlane.f32.xlu1 %v870_v40  ;;  %v6991_v39 = vld [vmem:[%s8209_s5] sm:$0xf] }
 0x834   :  { %v6995_v40 = vrot.slane %v6991_v39, %v6894_v32 }
 0x835   :  { %v877_v43 = vmul.f32 %v6038_v25, %v874_v41 }
 0x837   :  { %v879_v44 = vpack.c.bf16 %v877_v43, %v877_v43 }
 0x839   :  { %5554 = vmatmul.mubr.msk.bf16.vlgmr.msra.gmra.mrb[16].mxu1 %vm426_vm5, %v879_v44 }
 0x83a   :  { %5567 = vmatprep.mubr.msk.bf16.mxu1 %vm6516_vm1, %v6515_v0  ;;  %5564 = vmatpush3.bf16.msra.mxu1 %v6977_v45 }
 0x83b   :  { %5565 = vmatprep.subr.bf16.mxu1 %v6515_v0 }
 0x83e   :  { %5566 = vmatpush3.bf16.msra.mxu1 %v6983_v19 }
 0x83f   :  { %5579 = vmatprep.subr.bf16.mxu1 %v6515_v0 }
 0x844   :  { %931 = vrot.lane.b32.xlu1 %v6809_v14, %s6517_s6 }
 0x8c0   :  { %v872_v47 = vpop.xlane.xlu1 %871 }
 0x8c1   :  { %6043 = vrcp.f32 %v872_v47 }
 0x8c4   :  { %v932_v60 = vpop.permute.xlu1 %931 }
 0x8cb   :  { %v6044_v48 = vpop.eup %6043 }
 0x8cc   :  { %v876_v49 = vmul.f32 0.17677669, %v6044_v48  ;;  %v7000_v48 = vrot.slane %v6991_v39, %v6906_v37 }
 0x8ce   :  { %v878_v50 = vmul.f32 %v6040_v38, %v876_v49 }
 0x8d0   :  { %v880_v52 = vpack.c.bf16 %v878_v50, %v878_v50 }
 0x8d2   :  { %5560 = vmatmul.mubr.msk.bf16.vlgmr.msra.gmra.mrb[20].mxu0 %vm426_vm5, %v880_v52 }
 0x8d3   :  { %5575 = vmatprep.mubr.msk.bf16.mxu0 %vm6516_vm1, %v6515_v0 }
 0x90c   :  { %v924_v54 = vpop.f32.mrb[16].mxu1 }
 0x90d   :  { %v925_v55 = vadd.f32 %v924_v54, %v883_v53  ;;  %v5555_v56 = vpop.f32.mrb[17].mxu1  ;;  %v7008_v54 = vld [vmem:[#allocation14] sm:$0xff]  }
 0x90e   :  { %v927_v57 = vpop.f32.mrb[18].mxu1  ;;  %5572 = vmatpush3.bf16.msra.mxu0 %v7008_v54  ;;  %v5217_v56 = vld [vmem:[#allocation12] ss:$0 sm:$0xff] }
 0x90f   :  { %v5556_v58 = vpop.f32.mrb[19].mxu1  ;;  %v979_v59 = vsel %vm201_vm0, %v925_v55, 0.0  ;;  %5573 = vmatprep.subr.bf16.mxu0 %v6515_v0 }
 0x910   :  { %980 = vadd.xlane.f32.xlu1 %v979_v59 }
 0x99d   :  { %v981_v61 = vpop.xlane.xlu1 %980 }
 0x99e   :  { %v985_v62 = vmul.f32 0.03125, %v981_v61 }
 0x9a0   :  { %v987_v63 = vsub.f32 %v925_v55, %v985_v62  ;;  %v7012_v55 = vld [vmem:[#allocation14 + $0x8] sm:$0xff]  }
 0x9a1   :  { %5574 = vmatpush3.bf16.msra.mxu0 %v7012_v55 }
 0x9a2   :  { %v989_v9 = vmul.f32 %v987_v63, %v987_v63  ;;  %5585 = vmatprep.subr.bf16.mxu0 %v6515_v0 }
 0x9a4   :  { %v991_v10 = vsel %vm201_vm0, %v989_v9, 0.0 }
 0x9a5   :  { %v973_v2 = vpop.f32.mrb[20].mxu0 }
 0x9a6   :  { %v974_v3 = vadd.f32 %v973_v2, %v932_v60  ;;  %v5561_v4 = vpop.f32.mrb[21].mxu0 }
 0x9a7   :  { %v976_v5 = vpop.f32.mrb[22].mxu0 }
 0x9a8   :  { %v5562_v7 = vpop.f32.mrb[23].mxu0  ;;  %v982_v8 = vsel %vm201_vm0, %v974_v3, 0.0 }
 0x9a9   :  { %983 = vadd.xlane.f32.xlu0 %v982_v8 }
 0x9ad   :  { %992 = vadd.xlane.f32.xlu0 %v991_v10 }
 0x9b1   :  { %718 = vadd.xlane.f32.xlu0 %v717_v15 }
 0xa36   :  { %v984_v21 = vpop.xlane.xlu0 %983 }
 0xa37   :  { %v986_v22 = vmul.f32 0.03125, %v984_v21 }
 0xa39   :  { %v988_v13 = vsub.f32 %v974_v3, %v986_v22 }
 0xa3a   :  { %v993_v46 = vpop.xlane.xlu0 %992 }
 0xa3b   :  { %v990_v24 = vmul.f32 %v988_v13, %v988_v13  ;;  %v997_v28 = vmul.f32 0.03125, %v993_v46 }
 0xa3d   :  { %v994_v25 = vsel %vm201_vm0, %v990_v24, 0.0  ;;  %v999_v29 = vadd.f32 1e-05, %v997_v28 }
 0xa3e   :  { %995 = vadd.xlane.f32.xlu1 %v994_v25  ;;  %v719_v3 = vpop.xlane.xlu0 %718 }
 0xa3f   :  { %6045 = vrsqrt.f32 %v999_v29  ;;  %v723_v5 = vmul.f32 0.03125, %v719_v3 }
 0xa41   :  { %v725_v9 = vsub.f32 %v6966_v12, %v723_v5 }
 0xa42   :  { %721 = vadd.xlane.f32.xlu1 %v720_v27 }
 0xa43   :  { %v727_v46 = vmul.f32 %v725_v9, %v725_v9 }
 0xa49   :  { %v6046_v38 = vpop.eup %6045 }
 0xa4a   :  { %v1003_v41 = vmul.f32 %v6046_v38, %v987_v63 }
 0xa4c   :  { %v1009_v44 = vmul.f32 %v6995_v40, %v1003_v41 }
 0xa4e   :  { %v1015_v50 = vadd.f32 %v7000_v48, %v1009_v44 }
 0xacb   :  { %v996_v30 = vpop.xlane.xlu1 %995 }
 0xacc   :  { %v998_v34 = vmul.f32 0.03125, %v996_v30  ;;  %v729_v30 = vsel %vm201_vm0, %v727_v46, 0.0 }
 0xace   :  { %v1000_v36 = vadd.f32 1e-05, %v998_v34 }
 0xacf   :  { %v722_v4 = vpop.xlane.xlu1 %721 }
 0xad0   :  { %6047 = vrsqrt.f32 %v1000_v36  ;;  %v724_v7 = vmul.f32 0.03125, %v722_v4 }
 0xad2   :  { %v726_v22 = vsub.f32 %v716_v26, %v724_v7 }
 0xad4   :  { %v728_v29 = vmul.f32 %v726_v22, %v726_v22 }
 0xad6   :  { %v732_v12 = vsel %vm201_vm0, %v728_v29, 0.0 }
 0xada   :  { %v6048_v43 = vpop.eup %6047 }
 0xadb   :  { %v1004_v47 = vmul.f32 %v6048_v43, %v988_v13 }
 0xadd   :  { %v1010_v49 = vmul.f32 %v6995_v40, %v1004_v47 }
 0xadf   :  { %v1016_v52 = vadd.f32 %v7000_v48, %v1010_v49 }
 0xae1   :  { %v1017_v53 = vpack.c.bf16 %v1016_v52, %v1015_v50 }
 0xae3   :  { %5568 = vmatmul.mubr.msk.bf16.vlgmr.msra.gmra.mrb[20].mxu1 %vm201_vm0, %v1017_v53 }
 0xae4   :  { %5581 = vmatprep.mubr.msk.bf16.mxu1 %vm6516_vm1, %v6515_v0 }
 0xbb6   :  { %v1067_v57 = vpop.f32.mrb[20].mxu1 }
 0xbb7   :  { %v1080_v58 = vadd.f32 %v5217_v56, %v1067_v57  ;;  %v5569_v59 = vpop.f32.mrb[21].mxu1 }
 0xbb8   :  { %v1070_v60 = vpop.f32.mrb[22].mxu1 }
 0xbb9   :  { %v1081_v61 = vadd.f32 %v5217_v56, %v1070_v60  ;;  %v5570_v62 = vpop.f32.mrb[23].mxu1  ;;  %v1082_v63 = vmax.f32 %v1080_v58, 0.0  ;;  %v7027_v60 = vsub.s32 2, %v6891_v31 }
 0xbbb   :  { %v1083_v1 = vmax.f32 %v1081_v61, 0.0  ;;  %v7030_v61 = vsub.s32 3, %v6891_v31  ;;  %v7034_v62 = vrot.slane %v6899_v33, %v7027_v60 }
 0xbbd   :  { %v1084_v2 = vpack.c.bf16 %v1083_v1, %v1082_v63 }
 0xbbf   :  { %5576 = vmatmul.mubr.msk.bf16.vlgmr.msra.gmra.mrb[24].mxu0 %vm201_vm0, %v1084_v2  ;;  %v7038_v2 = vrot.slane %v6899_v33, %v7030_v61 }
 0xbc0   :  { %5587 = vmatprep.mubr.msk.bf16.mxu0 %vm6516_vm1, %v6515_v0 }
 0xc92   :  { %v1134_v8 = vpop.f32.mrb[24].mxu0 }
 0xc93   :  { %v1147_v10 = vadd.f32 %v5221_v6, %v1134_v8  ;;  %v5577_v15 = vpop.f32.mrb[25].mxu0 }
 0xc94   :  { %v1137_v21 = vpop.f32.mrb[26].mxu0 }
 0xc95   :  { %v1148_v23 = vadd.f32 %v5221_v6, %v1137_v21  ;;  %v5578_v13 = vpop.f32.mrb[27].mxu0  ;;  %v1149_v24 = vadd.f32 %v1147_v10, %v1015_v50 }
 0xc97   :  { %v1151_v25 = vsel %vm201_vm0, %v1149_v24, 0.0  ;;  %v1150_v27 = vadd.f32 %v1148_v23, %v1016_v52 }
 0xc98   :  { %1152 = vadd.xlane.f32.xlu0 %v1151_v25  ;;  %v7050_v25 = vrot.slane %v6991_v39, %v7027_v60 }
 0xc99   :  { %v1154_v28 = vsel %vm201_vm0, %v1150_v27, 0.0 }
 0xc9a   :  { %1155 = vadd.xlane.f32.xlu1 %v1154_v28  ;;  %v7054_v28 = vrot.slane %v6991_v39, %v7030_v61 }
 0xc9c   :  { %730 = vadd.xlane.f32.xlu0 %v729_v30 }
 0xc9e   :  { %733 = vadd.xlane.f32.xlu1 %v732_v12 }
 0xd25   :  { %v1153_v34 = vpop.xlane.xlu0 %1152 }
 0xd26   :  { %v1157_v26 = vmul.f32 0.03125, %v1153_v34 }
 0xd27   :  { %v1156_v36 = vpop.xlane.xlu1 %1155 }
 0xd28   :  { %v1159_v38 = vsub.f32 %v1149_v24, %v1157_v26  ;;  %v1158_v41 = vmul.f32 0.03125, %v1156_v36 }
 0xd29   :  { %v731_v43 = vpop.xlane.xlu0 %730 }
 0xd2a   :  { %v1160_v44 = vsub.f32 %v1150_v27, %v1158_v41  ;;  %v735_v47 = vmul.f32 0.03125, %v731_v43  ;;  %v1161_v49 = vmul.f32 %v1159_v38, %v1159_v38 }
 0xd2b   :  { %v734_v50 = vpop.xlane.xlu1 %733 }
 0xd2c   :  { %v737_v52 = vadd.f32 1e-05, %v735_v47  ;;  %v736_v53 = vmul.f32 0.03125, %v734_v50  ;;  %v1163_v56 = vsel %vm201_vm0, %v1161_v49, 0.0  ;;  %v1162_v57 = vmul.f32 %v1160_v44, %v1160_v44 }
 0xd2d   :  { %1164 = vadd.xlane.f32.xlu0 %v1163_v56 }
 0xd2e   :  { %6049 = vrsqrt.f32 %v737_v52  ;;  %v738_v58 = vadd.f32 1e-05, %v736_v53  ;;  %v1166_v59 = vsel %vm201_vm0, %v1162_v57, 0.0 }
 0xd2f   :  { %1167 = vadd.xlane.f32.xlu1 %v1166_v59 }
 0xd30   :  { %6051 = vrsqrt.f32 %v738_v58 }
 0xd38   :  { %v6050_v63 = vpop.eup %6049 }
 0xd39   :  { %v741_v1 = vmul.f32 %v6050_v63, %v725_v9 }
 0xd3a   :  { %v6052_v3 = vpop.eup %6051 }
 0xd3b   :  { %v747_v4 = vmul.f32 %v7034_v62, %v741_v1  ;;  %v742_v5 = vmul.f32 %v6052_v3, %v726_v22 }
 0xd3d   :  { %v753_v6 = vadd.f32 %v7038_v2, %v747_v4  ;;  %v748_v7 = vmul.f32 %v7034_v62, %v742_v5 }
 0xd3f   :  { %v1191_v31 = vpack.c.bf16 %v753_v6, %v753_v6  ;;  %v754_v8 = vadd.f32 %v7038_v2, %v748_v7 }
 0xd41   :  { %v1197_v10 = vsel %vm201_vm0, %v1191_v31, 0  ;;  %v1192_v15 = vpack.c.bf16 %v754_v8, %v754_v8 }
 0xd42   :  { %5580 = vmatpush3.bf16.xpose.msra.mxu1 %v1197_v10 }
 0xd43   :  { %v1243_v9 = vsel %vm201_vm0, %v1192_v15, 0  ;;  %5591 = vmatprep.subr.bf16.mxu1 %v6515_v0 }
 0xd44   :  { %5586 = vmatpush3.bf16.xpose.msra.mxu0 %v1243_v9 }
 0xd45   :  { %5597 = vmatprep.subr.bf16.mxu0 %v6515_v0 }
 0xdba   :  { %v1165_v33 = vpop.xlane.xlu0 %1164 }
 0xdbb   :  { %v1169_v21 = vmul.f32 0.03125, %v1165_v33 }
 0xdbc   :  { %v1168_v22 = vpop.xlane.xlu1 %1167 }
 0xdbd   :  { %v1171_v23 = vadd.f32 1e-05, %v1169_v21  ;;  %v1170_v13 = vmul.f32 0.03125, %v1168_v22 }
 0xdbf   :  { %6053 = vrsqrt.f32 %v1171_v23  ;;  %v1172_v24 = vadd.f32 1e-05, %v1170_v13 }
 0xdc1   :  { %6055 = vrsqrt.f32 %v1172_v24 }
 0xdc9   :  { %v6054_v27 = vpop.eup %6053 }
 0xdca   :  { %v1175_v46 = vmul.f32 %v6054_v27, %v1159_v38 }
 0xdcb   :  { %v6056_v29 = vpop.eup %6055 }
 0xdcc   :  { %v1176_v30 = vmul.f32 %v6056_v29, %v1160_v44  ;;  %v1181_v12 = vmul.f32 %v7050_v25, %v1175_v46 }
 0xdce   :  { %v1187_v34 = vadd.f32 %v7054_v28, %v1181_v12  ;;  %v1182_v26 = vmul.f32 %v7050_v25, %v1176_v30 }
 0xdd0   :  { %v1189_v36 = vpack.c.bf16 %v1187_v34, %v1187_v34  ;;  %v1188_v41 = vadd.f32 %v7054_v28, %v1182_v26 }
 0xdd2   :  { %5582 = vmatmul.mubr.msk.bf16.vlgmr.msra.gmra.mrb[24].mxu1 %vm201_vm0, %v1189_v36  ;;  %v1190_v43 = vpack.c.bf16 %v1188_v41, %v1188_v41 }
 0xdd3   :  { %5593 = vmatprep.mubr.msk.bf16.mxu1 %vm6516_vm1, %v6515_v0 }
 0xdd4   :  { %5588 = vmatmul.mubr.msk.bf16.vlgmr.msra.gmra.mrb[28].mxu0 %vm201_vm0, %v1190_v43 }
 0xdd5   :  { %5599 = vmatprep.mubr.msk.bf16.mxu0 %vm6516_vm1, %v6515_v0 }
 0xea5   :  { %v1233_v39 = vpop.f32.mrb[24].mxu1 }
 0xea6   :  { %v5583_v38 = vpop.f32.mrb[25].mxu1  ;;  %v1285_v44 = vsel %vm426_vm5, %v1233_v39, -inf }
 0xea7   :  { %v1279_v47 = vpop.f32.mrb[28].mxu0  ;;  %1286 = vmax.xlane.f32.xlu0 %v1285_v44  ;;  %v1236_v49 = vpop.f32.mrb[26].mxu1 }
 0xea8   :  { %v5584_v50 = vpop.f32.mrb[27].mxu1  ;;  %v5589_v52 = vpop.f32.mrb[29].mxu0  ;;  %v1288_v53 = vsel %vm426_vm5, %v1279_v47, -inf }
 0xea9   :  { %1289 = vmax.xlane.f32.xlu1 %v1288_v53  ;;  %v1282_v56 = vpop.f32.mrb[30].mxu0 }
 0xeaa   :  { %v5590_v57 = vpop.f32.mrb[31].mxu0 }
 0xf34   :  { %v1287_v58 = vpop.xlane.xlu0 %1286 }
 0xf35   :  { %v1291_v59 = vsub.f32 %v1233_v39, %v1287_v58 }
 0xf36   :  { %v1290_v63 = vpop.xlane.xlu1 %1289 }
 0xf37   :  { %v1293_v1 = vmul.f32 1.442695, %v1291_v59  ;;  %v1292_v3 = vsub.f32 %v1279_v47, %v1290_v63 }
 0xf39   :  { %6057 = vpow2.f32 %v1293_v1  ;;  %v1295_v4 = vmul.f32 1.442695, %v1292_v3 }
 0xf3b   :  { %6059 = vpow2.f32 %v1295_v4 }
 0xf43   :  { %v6058_v5 = vpop.eup %6057 }
 0xf44   :  { %v1297_v6 = vsel %vm426_vm5, %v6058_v5, 0.0 }
 0xf45   :  { %v6060_v7 = vpop.eup %6059  ;;  %1298 = vadd.xlane.f32.xlu0 %v1297_v6 }
 0xf46   :  { %v1300_v31 = vsel %vm426_vm5, %v6060_v7, 0.0 }
 0xf47   :  { %1301 = vadd.xlane.f32.xlu1 %v1300_v31  ;;  %v246_v31 = vld [vmem:[%s8184_s19 + $0x8] sm:$0xff] }
 0xf58   :  { %1362 = vrot.lane.b32.xlu1 %v6831_v18, %s6504_s7 }
 0xf5b   :  { %1311 = vrot.lane.b32.xlu0 %v6813_v16, %s6504_s7 }
 0xf5c   :  { %1313 = vrot.lane.b32.xlu1 %v6802_v11, %s6504_s7 }
 0xf60   :  { %1364 = vrot.lane.b32.xlu1 %v6809_v14, %s6504_s7 }
 0xfd2   :  { %v1299_v8 = vpop.xlane.xlu0 %1298 }
 0xfd3   :  { %6061 = vrcp.f32 %v1299_v8 }
 0xfd4   :  { %v1302_v10 = vpop.xlane.xlu1 %1301 }
 0xfd5   :  { %6063 = vrcp.f32 %v1302_v10 }
 0xfd6   :  { %v1312_v15 = vpop.permute.xlu0 %1311 }
 0xfd7   :  { %v1320_v9 = vsel %vm456_vm4, %v1312_v15, 0 }
 0xfd8   :  { %v1363_v33 = vpop.permute.xlu1 %1362  ;;  %5592 = vmatpush3.bf16.msra.mxu1 %v1320_v9 }
 0xfd9   :  { %v1371_v21 = vsel %vm456_vm4, %v1363_v33, 0  ;;  %5603 = vmatprep.subr.bf16.mxu1 %v6515_v0 }
 0xfda   :  { %5598 = vmatpush3.bf16.msra.mxu0 %v1371_v21 }
 0xfdb   :  { %5611 = vmatprep.subr.bf16.mxu0 %v6515_v0 }
 0xfdc   :  { %v1314_v12 = vpop.permute.xlu1 %1313 }
 0xfdd   :  { %v6062_v22 = vpop.eup %6061 }
 0xfde   :  { %v1304_v23 = vmul.f32 0.17677669, %v6062_v22 }
 0xfdf   :  { %v6064_v13 = vpop.eup %6063 }
 0xfe0   :  { %v1307_v24 = vmul.f32 %v6058_v5, %v1304_v23  ;;  %v1306_v27 = vmul.f32 0.17677669, %v6064_v13  ;;  %v1365_v26 = vpop.permute.xlu1 %1364  ;;  %v212_v23 = vld [vmem:[%s8211_s12] sm:$0xf] }
 0xfe2   :  { %v1309_v46 = vpack.c.bf16 %v1307_v24, %v1307_v24  ;;  %v1308_v29 = vmul.f32 %v6060_v7, %v1306_v27  ;;  %v245_v7 = vld [vmem:[%s8184_s19] sm:$0xff]  ;;  %v7126_v24 = vrot.slane %v212_v23, %v6894_v32 }
 0xfe3   :  { %v7118_v8 = vpack.c.bf16 %v246_v31, %v245_v7 }
 0xfe4   :  { %v1310_v30 = vpack.c.bf16 %v1308_v29, %v1308_v29  ;;  %5594 = vmatmul.mubr.msk.bf16.vlgmr.msra.gmra.mrb[28].mxu1 %vm426_vm5, %v1309_v46 }
 0xfe5   :  { %5607 = vmatprep.mubr.msk.bf16.mxu1 %vm6516_vm1, %v6515_v0 }
 0xfe6   :  { %5600 = vmatmul.mubr.msk.bf16.vlgmr.msra.gmra.mrb[32].mxu0 %vm426_vm5, %v1310_v30 }
 0xfe7   :  { %5615 = vmatprep.mubr.msk.bf16.mxu0 %vm6516_vm1, %v6515_v0 }
0x10b7   :  { %v1356_v34 = vpop.f32.mrb[28].mxu1 }
0x10b8   :  { %v1357_v36 = vadd.f32 %v1356_v34, %v1314_v12  ;;  %v5595_v41 = vpop.f32.mrb[29].mxu1  ;;  %v7130_v12 = vrot.slane %v212_v23, %v6906_v37  ;;  %v5242_v37 = vld [vmem:[%s8206_s10 + $0x10] sm:$0xff] }
0x10b9   :  { %v1359_v43 = vpop.f32.mrb[30].mxu1  ;;  %v1407_v39 = vpop.f32.mrb[32].mxu0 }
0x10ba   :  { %v1408_v38 = vadd.f32 %v1407_v39, %v1365_v26  ;;  %v5596_v44 = vpop.f32.mrb[31].mxu1  ;;  %v5601_v47 = vpop.f32.mrb[33].mxu0  ;;  %v1413_v49 = vsel %vm201_vm0, %v1357_v36, 0.0  ;;  %v247_v26 = vld [vmem:[%s8184_s19 + $0x10] sm:$0xff] }
0x10bb   :  { %v1410_v50 = vpop.f32.mrb[34].mxu0  ;;  %1414 = vadd.xlane.f32.xlu0 %v1413_v49  ;;  %v6237_v44 = vld [vmem:[#allocation4] sm:$0xff] }
0x10bc   :  { %v5602_v52 = vpop.f32.mrb[35].mxu0  ;;  %v1416_v53 = vsel %vm201_vm0, %v1408_v38, 0.0  ;;  %v2026_v47 = vadd.f32 %v6237_v44, %v5242_v37  ;;  %v6238_v50 = vld [vmem:[%s8205_s13] sm:$0xff]  }
0x10bd   :  { %1417 = vadd.xlane.f32.xlu1 %v1416_v53  ;;  %v6239_v53 = vld [vmem:[%s8205_s13 + $0x8] sm:$0xff]  }
0x10ce   :  { %1742 = vrot.lane.b32.xlu1 %v6809_v14, %s6517_s6 }
0x10d2   :  { %2080 = vrot.lane.b32.xlu1 %v6813_v16, %s6517_s6  ;;  %v7103_v16 = vld [vmem:[%s8210_s1] sm:$0xff]  }
0x10d3   :  { %5604 = vmatpush3.bf16.msra.mxu1 %v7103_v16 }
0x10d4   :  { %5605 = vmatprep.subr.bf16.mxu1 %v6515_v0 }
0x10d6   :  { %2129 = vrot.lane.b32.xlu1 %v6831_v18, %s6517_s6  ;;  %v7110_v18 = vld [vmem:[%s8210_s1 + $0x8] sm:$0xff]  }
0x10d7   :  { %5606 = vmatpush3.bf16.msra.mxu1 %v7110_v18 }
0x10d8   :  { %5942 = vmatprep.subr.bf16.mxu1 %v7118_v8 }
0x1148   :  { %v1415_v56 = vpop.xlane.xlu0 %1414 }
0x1149   :  { %v1419_v57 = vmul.f32 0.03125, %v1415_v56  ;;  %v7174_v56 = vld [vmem:[%s8174_s9] sm:$0xff]  }
0x114a   :  { %v1418_v58 = vpop.xlane.xlu1 %1417  ;;  %5612 = vmatpush3.bf16.msra.mxu0 %v7174_v56 }
0x114b   :  { %v1421_v59 = vsub.f32 %v1357_v36, %v1419_v57  ;;  %v1420_v63 = vmul.f32 0.03125, %v1418_v58  ;;  %v248_v36 = vld [vmem:[%s8184_s19 + $0x18] sm:$0xff]  ;;  %5613 = vmatprep.subr.bf16.mxu0 %v6515_v0  ;;  %v7181_v57 = vld [vmem:[%s8174_s9 + $0x8] sm:$0xff]   ;;  %v250_v58 = vld [vmem:[%s8186_s21] sm:$0xff] }
0x114c   :  { %v7141_v39 = vpack.c.bf16 %v248_v36, %v247_v26 }
0x114d   :  { %v1422_v1 = vsub.f32 %v1408_v38, %v1420_v63  ;;  %v1423_v3 = vmul.f32 %v1421_v59, %v1421_v59  ;;  %v5243_v38 = vld [vmem:[%s8206_s10 + $0x18] sm:$0xff] }
0x114e   :  { %v2027_v49 = vadd.f32 %v6237_v44, %v5243_v38  ;;  %5614 = vmatpush3.bf16.msra.mxu0 %v7181_v57 }
0x114f   :  { %v1425_v4 = vsel %vm201_vm0, %v1423_v3, 0.0  ;;  %v1424_v5 = vmul.f32 %v1422_v1, %v1422_v1 }
0x1150   :  { %1426 = vadd.xlane.f32.xlu0 %v1425_v4  ;;  %v2028_v52 = vpack.c.bf16 %v2027_v49, %v2026_v47 }
0x1151   :  { %v1428_v6 = vsel %vm201_vm0, %v1424_v5, 0.0 }
0x1154   :  { %1429 = vadd.xlane.f32.xlu0 %v1428_v6 }
0x116a   :  { %1740 = vrot.lane.b32.xlu0 %v6802_v11, %s6517_s6 }
0x11dd   :  { %v1427_v10 = vpop.xlane.xlu0 %1426 }
0x11de   :  { %v1431_v15 = vmul.f32 0.03125, %v1427_v10  ;;  %v252_v10 = vld [vmem:[%s8186_s21 + $0x10] sm:$0xff] }
0x11e0   :  { %v1433_v9 = vadd.f32 1e-05, %v1431_v15  ;;  %v253_v15 = vld [vmem:[%s8186_s21 + $0x18] sm:$0xff] }
0x11e1   :  { %v1430_v33 = vpop.xlane.xlu0 %1429 }
0x11e2   :  { %6065 = vrsqrt.f32 %v1433_v9  ;;  %v1432_v21 = vmul.f32 0.03125, %v1430_v33 }
0x11e4   :  { %v1434_v22 = vadd.f32 1e-05, %v1432_v21 }
0x11e6   :  { %6067 = vrsqrt.f32 %v1434_v22  ;;  %v7202_v22 = vpack.c.bf16 %v253_v15, %v252_v10 }
0x11ec   :  { %v6066_v13 = vpop.eup %6065 }
0x11ed   :  { %v1437_v27 = vmul.f32 %v6066_v13, %v1421_v59  ;;  %v251_v59 = vld [vmem:[%s8186_s21 + $0x8] sm:$0xff]  ;;  %v1741_v13 = vpop.permute.xlu0 %1740 }
0x11ee   :  { %v7190_v63 = vpack.c.bf16 %v251_v59, %v250_v58 }
0x11ef   :  { %v1443_v29 = vmul.f32 %v7126_v24, %v1437_v27 }
0x11f0   :  { %v6068_v46 = vpop.eup %6067  ;;  %5950 = vmatprep.subr.bf16.mxu0 %v7190_v63 }
0x11f1   :  { %v1438_v30 = vmul.f32 %v6068_v46, %v1422_v1  ;;  %v1449_v32 = vadd.f32 %v7130_v12, %v1443_v29  ;;  %v5229_v1 = vld [vmem:[%s8173_s8] ss:$0 sm:$0xff]  ;;  %v1743_v46 = vpop.permute.xlu1 %1742 }
0x11f3   :  { %v1444_v34 = vmul.f32 %v7126_v24, %v1438_v30  ;;  %v6240_v30 = vld [vmem:[%s8207_s0] ss:$0 sm:$0xff] }
0x11f5   :  { %v1450_v41 = vadd.f32 %v7130_v12, %v1444_v34  ;;  %v2081_v47 = vpop.permute.xlu1 %2080 }
0x11f7   :  { %v1451_v43 = vpack.c.bf16 %v1450_v41, %v1449_v32 }
0x11f9   :  { %5608 = vmatmul.mubr.msk.bf16.vlgmr.msra.gmra.mrb[32].mxu1 %vm201_vm0, %v1451_v43  ;;  %v2130_v49 = vpop.permute.xlu1 %2129 }
0x11fa   :  { %5944 = vmatpush3.bf16.msra.mxu1 %v7118_v8  ;;  %5627 = vmatprep.mubr.msk.f32.mxu1 %vm201_vm0, %v6802_v11 }
0x11fb   :  { %5946 = vmatprep.subr.bf16.mxu1 %v7141_v39 }
0x11fe   :  { %5948 = vmatpush3.bf16.msra.mxu1 %v7141_v39 }
0x11ff   :  { %5641 = vmatprep.subr.bf16.mxu1 %v6515_v0 }
0x1201   :  { %5628 = vmatmul.mubr.msk.f32.vlgmr.msra.gmra.mrb[36].mxu1 %vm201_vm0, %v6809_v14 }
0x1202   :  { %5642 = vmatpush3.bf16.msra.mxu1 %v6238_v50  ;;  %5645 = vmatprep.mubr.msk.bf16.mxu1 %vm6516_vm1, %v6515_v0 }
0x1203   :  { %5643 = vmatprep.subr.bf16.mxu1 %v6515_v0 }
0x1206   :  { %5644 = vmatpush3.bf16.msra.mxu1 %v6239_v53 }
0x1207   :  { %5655 = vmatprep.subr.bf16.mxu1 %v6515_v0 }
0x1209   :  { %5646 = vmatmul.mubr.msk.bf16.vlgmr.msra.gmra.mrb[40].mxu1 %vm201_vm0, %v2028_v52 }
0x120a   :  { %5657 = vmatprep.mubr.msk.bf16.mxu1 %vm6516_vm1, %v6515_v0 }
0x12cc   :  { %v1501_v3 = vpop.f32.mrb[32].mxu1 }
0x12cd   :  { %v1514_v4 = vadd.f32 %v5229_v1, %v1501_v3  ;;  %v5609_v5 = vpop.f32.mrb[33].mxu1 }
0x12ce   :  { %v1504_v6 = vpop.f32.mrb[34].mxu1 }
0x12cf   :  { %v1515_v7 = vadd.f32 %v5229_v1, %v1504_v6  ;;  %v5610_v31 = vpop.f32.mrb[35].mxu1  ;;  %v1516_v9 = vmax.f32 %v1514_v4, 0.0 }
0x12d1   :  { %v1517_v33 = vmax.f32 %v1515_v7, 0.0 }
0x12d3   :  { %v1518_v21 = vpack.c.bf16 %v1517_v33, %v1516_v9 }
0x12d4   :  { %v7204_v23 = vpop.f32.mrb[36].mxu1 }
0x12d5   :  { %5616 = vmatmul.mubr.msk.bf16.vlgmr.msra.gmra.mrb[36].mxu0 %vm201_vm0, %v1518_v21  ;;  %v7207_v27 = vpop.f32.mrb[37].mxu1 }
0x12d6   :  { %5952 = vmatpush3.bf16.msra.mxu0 %v7190_v63  ;;  %5638 = vmatprep.mubr.msk.f32.mxu0 %vm201_vm0, %v1741_v13 }
0x12d7   :  { %5954 = vmatprep.subr.bf16.mxu0 %v7202_v22 }
0x12da   :  { %5956 = vmatpush3.bf16.msra.mxu0 %v7202_v22 }
0x12db   :  { %5649 = vmatprep.subr.bf16.mxu0 %v6515_v0 }
0x12dc   :  { %v2066_v29 = vpop.f32.mrb[40].mxu1 }
0x12dd   :  { %v7217_v34 = vadd.f32 %v6240_v30, %v2066_v29  ;;  %v5647_v26 = vpop.f32.mrb[41].mxu1  ;;  %5639 = vmatmul.mubr.msk.f32.vlgmr.msra.gmra.mrb[40].mxu0 %vm201_vm0, %v1743_v46 }
0x12de   :  { %v2069_v36 = vpop.f32.mrb[42].mxu1  ;;  %5651 = vmatprep.mubr.msk.bf16.mxu0 %vm6516_vm1, %v6515_v0 }
0x12df   :  { %v7224_v32 = vpack.c.bf16 %v7217_v34, %v7217_v34  ;;  %v7226_v41 = vadd.f32 %v6240_v30, %v2069_v36  ;;  %v5648_v43 = vpop.f32.mrb[43].mxu1 }
0x12e1   :  { %v7230_v37 = vpack.c.bf16 %v7226_v41, %v7226_v41  ;;  %v2086_v38 = vsel %vm201_vm0, %v7224_v32, 0  ;;  %v2206_v50 = vsel %vm456_vm4, %v7224_v32, 0 }
0x12e3   :  { %5650 = vmatpush3.bf16.xpose.msra.mxu0 %v2086_v38  ;;  %v2135_v44 = vsel %vm201_vm0, %v7230_v37, 0  ;;  %v2251_v52 = vsel %vm456_vm4, %v7230_v37, 0 }
0x12e4   :  { %5656 = vmatpush3.bf16.xpose.msra.mxu1 %v2135_v44  ;;  %5661 = vmatprep.subr.bf16.mxu0 %v6515_v0 }
0x12e5   :  { %5667 = vmatprep.subr.bf16.mxu1 %v6515_v0 }
0x12ea   :  { %5652 = vmatmul.mubr.msk.bf16.vlgmr.msra.gmra.mrb[44].mxu0 %vm201_vm0, %v2081_v47 }
0x12eb   :  { %5658 = vmatmul.mubr.msk.bf16.vlgmr.msra.gmra.mrb[44].mxu1 %vm201_vm0, %v2130_v49  ;;  %5662 = vmatpush3.bf16.msra.mxu0 %v2206_v50 }
0x12ec   :  { %5668 = vmatpush3.bf16.msra.mxu1 %v2251_v52  ;;  %5663 = vmatprep.mubr.msk.bf16.mxu0 %vm6516_vm1, %v6515_v0 }
0x12ed   :  { %5669 = vmatprep.mubr.msk.bf16.mxu1 %vm6516_vm1, %v6515_v0  ;;  %5673 = vmatprep.subr.bf16.mxu0 %v6515_v0 }
0x12ee   :  { %5681 = vmatprep.subr.bf16.mxu1 %v6515_v0 }
0x13a8   :  { %v1568_v53 = vpop.f32.mrb[36].mxu0 }
0x13a9   :  { %v5617_v58 = vpop.f32.mrb[37].mxu0 }
0x13aa   :  { %v1571_v59 = vpop.f32.mrb[38].mxu0 }
0x13ab   :  { %v5618_v1 = vpop.f32.mrb[39].mxu0 }
0x13b0   :  { %v7250_v3 = vpop.f32.mrb[40].mxu0 }
0x13b1   :  { %v7252_v4 = vpop.f32.mrb[41].mxu0 }
0x13bd   :  { %v2122_v5 = vpop.f32.mrb[44].mxu0 }
0x13be   :  { %v5653_v6 = vpop.f32.mrb[45].mxu0  ;;  %v2171_v7 = vpop.f32.mrb[44].mxu1  ;;  %v2177_v31 = vsel %vm426_vm5, %v2122_v5, -inf }
0x13bf   :  { %2178 = vmax.xlane.f32.xlu0 %v2177_v31  ;;  %v2125_v10 = vpop.f32.mrb[46].mxu0  ;;  %v5659_v15 = vpop.f32.mrb[45].mxu1  ;;  %v2180_v9 = vsel %vm426_vm5, %v2171_v7, -inf  ;;  %v6241_v31 = vld [vmem:[#allocation6] sm:$0xff]  }
0x13c0   :  { %v5654_v33 = vpop.f32.mrb[47].mxu0  ;;  %2181 = vmax.xlane.f32.xlu1 %v2180_v9  ;;  %v2174_v21 = vpop.f32.mrb[46].mxu1  ;;  %v6242_v15 = vld [vmem:[#allocation6 + $0x8] sm:$0xff]   ;;  %v6243_v9 = vld [vmem:[#allocation9] sm:$0xff]  }
0x13c1   :  { %v5660_v13 = vpop.f32.mrb[47].mxu1 }
0x144c   :  { %v2179_v46 = vpop.xlane.xlu0 %2178 }
0x144d   :  { %v2183_v29 = vsub.f32 %v2122_v5, %v2179_v46  ;;  %v2182_v30 = vpop.xlane.xlu1 %2181 }
0x144e   :  { %v2184_v26 = vsub.f32 %v2171_v7, %v2182_v30 }
0x144f   :  { %v2185_v36 = vmul.f32 1.442695, %v2183_v29 }
0x1450   :  { %v2187_v43 = vmul.f32 1.442695, %v2184_v26 }
0x1451   :  { %6069 = vpow2.f32 %v2185_v36 }
0x1452   :  { %6071 = vpow2.f32 %v2187_v43 }
0x145b   :  { %v6070_v38 = vpop.eup %6069 }
0x145c   :  { %v2189_v44 = vsel %vm426_vm5, %v6070_v38, 0.0  ;;  %v6072_v47 = vpop.eup %6071 }
0x145d   :  { %2190 = vadd.xlane.f32.xlu0 %v2189_v44  ;;  %v2192_v49 = vsel %vm426_vm5, %v6072_v47, 0.0 }
0x1461   :  { %2193 = vadd.xlane.f32.xlu0 %v2192_v49 }
0x14ea   :  { %v2191_v50 = vpop.xlane.xlu0 %2190 }
0x14eb   :  { %6073 = vrcp.f32 %v2191_v50 }
0x14ee   :  { %v2194_v52 = vpop.xlane.xlu0 %2193 }
0x14ef   :  { %6075 = vrcp.f32 %v2194_v52 }
0x14f5   :  { %v6074_v53 = vpop.eup %6073 }
0x14f6   :  { %v2196_v58 = vmul.f32 0.17677669, %v6074_v53 }
0x14f8   :  { %v2199_v59 = vmul.f32 %v6070_v38, %v2196_v58 }
0x14f9   :  { %v6076_v1 = vpop.eup %6075 }
0x14fa   :  { %v2201_v5 = vpack.c.bf16 %v2199_v59, %v2199_v59  ;;  %v2198_v6 = vmul.f32 0.17677669, %v6076_v1 }
0x14fc   :  { %v2200_v7 = vmul.f32 %v6072_v47, %v2198_v6  ;;  %5664 = vmatmul.mubr.msk.bf16.vlgmr.msra.gmra.mrb[48].mxu0 %vm426_vm5, %v2201_v5 }
0x14fd   :  { %5674 = vmatpush3.bf16.msra.mxu0 %v6241_v31  ;;  %5677 = vmatprep.mubr.msk.bf16.mxu0 %vm6516_vm1, %v6515_v0 }
0x14fe   :  { %v2202_v10 = vpack.c.bf16 %v2200_v7, %v2200_v7  ;;  %5675 = vmatprep.subr.bf16.mxu0 %v6515_v0 }
0x1500   :  { %5670 = vmatmul.mubr.msk.bf16.vlgmr.msra.gmra.mrb[48].mxu1 %vm426_vm5, %v2202_v10 }
0x1501   :  { %5676 = vmatpush3.bf16.msra.mxu0 %v6242_v15  ;;  %5682 = vmatpush3.bf16.msra.mxu1 %v6243_v9 }
0x1502   :  { %5689 = vmatprep.subr.bf16.mxu0 %v6515_v0  ;;  %5683 = vmatprep.subr.bf16.mxu1 %v6515_v0 }
0x1503   :  { %5685 = vmatprep.mubr.msk.bf16.mxu1 %vm6516_vm1, %v6515_v0 }
0x1505   :  { %5684 = vmatpush3.bf16.msra.mxu1 %v6932_v51 }
0x1506   :  { %5695 = vmatprep.subr.bf16.mxu1 %v6515_v0 }
0x15cf   :  { %v2242_v33 = vpop.f32.mrb[48].mxu0 }
0x15d0   :  { %v2243_v21 = vadd.f32 %v2242_v33, %v7217_v34  ;;  %v5665_v13 = vpop.f32.mrb[49].mxu0 }
0x15d1   :  { %v2245_v46 = vpop.f32.mrb[50].mxu0 }
0x15d2   :  { %v5666_v29 = vpop.f32.mrb[51].mxu0  ;;  %v2293_v30 = vsel %vm201_vm0, %v2243_v21, 0.0 }
0x15d3   :  { %2294 = vadd.xlane.f32.xlu0 %v2293_v30  ;;  %v2287_v26 = vpop.f32.mrb[48].mxu1 }
0x15d4   :  { %v2288_v36 = vadd.f32 %v2287_v26, %v7226_v41  ;;  %v5671_v43 = vpop.f32.mrb[49].mxu1 }
0x15d5   :  { %v2290_v38 = vpop.f32.mrb[50].mxu1 }
0x15d6   :  { %v5672_v44 = vpop.f32.mrb[51].mxu1  ;;  %v2296_v47 = vsel %vm201_vm0, %v2288_v36, 0.0 }
0x15d7   :  { %2297 = vadd.xlane.f32.xlu1 %v2296_v47 }
0x1660   :  { %v2295_v51 = vpop.xlane.xlu0 %2294 }
0x1661   :  { %v2299_v49 = vmul.f32 0.03125, %v2295_v51 }
0x1663   :  { %v2301_v50 = vsub.f32 %v2243_v21, %v2299_v49  ;;  %v6244_v49 = vld [vmem:[#allocation8] ss:$0 sm:$0xff] }
0x1664   :  { %v2298_v52 = vpop.xlane.xlu1 %2297 }
0x1665   :  { %v2300_v53 = vmul.f32 0.03125, %v2298_v52  ;;  %v2303_v58 = vmul.f32 %v2301_v50, %v2301_v50 }
0x1667   :  { %v2302_v59 = vsub.f32 %v2288_v36, %v2300_v53  ;;  %v2305_v1 = vsel %vm201_vm0, %v2303_v58, 0.0 }
0x1668   :  { %2306 = vadd.xlane.f32.xlu0 %v2305_v1 }
0x1669   :  { %v2304_v5 = vmul.f32 %v2302_v59, %v2302_v59 }
0x166b   :  { %v2308_v6 = vsel %vm201_vm0, %v2304_v5, 0.0 }
0x166c   :  { %2309 = vadd.xlane.f32.xlu1 %v2308_v6 }
0x167d   :  { %2503 = vrot.lane.b32.xlu1 %v7230_v37, %s6517_s6 }
0x167e   :  { %2454 = vrot.lane.b32.xlu0 %v7224_v32, %s6517_s6 }
0x16f5   :  { %v2307_v7 = vpop.xlane.xlu0 %2306 }
0x16f6   :  { %v2311_v31 = vmul.f32 0.03125, %v2307_v7 }
0x16f8   :  { %v2313_v10 = vadd.f32 1e-05, %v2311_v31 }
0x16f9   :  { %v2310_v15 = vpop.xlane.xlu1 %2309  ;;  %v2455_v44 = vpop.permute.xlu0 %2454 }
0x16fa   :  { %6077 = vrsqrt.f32 %v2313_v10  ;;  %v2312_v9 = vmul.f32 0.03125, %v2310_v15  ;;  %v2584_v47 = vsel %vm456_vm4, %v2455_v44, 0 }
0x16fc   :  { %v2314_v33 = vadd.f32 1e-05, %v2312_v9 }
0x16fd   :  { %v2504_v9 = vpop.permute.xlu1 %2503 }
0x16fe   :  { %6079 = vrsqrt.f32 %v2314_v33  ;;  %v2633_v33 = vsel %vm456_vm4, %v2504_v9, 0 }
0x1704   :  { %v6078_v21 = vpop.eup %6077 }
0x1705   :  { %v2317_v13 = vmul.f32 %v6078_v21, %v2301_v50 }
0x1707   :  { %v2319_v29 = vmul.f32 %v2317_v13, %v6903_v35 }
0x1708   :  { %v6080_v46 = vpop.eup %6079 }
0x1709   :  { %v2318_v30 = vmul.f32 %v6080_v46, %v2302_v59  ;;  %v7282_v36 = vadd.f32 %v2319_v29, %v6911_v42 }
0x170b   :  { %v2320_v26 = vmul.f32 %v2318_v30, %v6903_v35 }
0x170d   :  { %v7285_v43 = vadd.f32 %v2320_v26, %v6911_v42 }
0x170f   :  { %v2323_v38 = vpack.c.bf16 %v7285_v43, %v7282_v36 }
0x1711   :  { %5678 = vmatmul.mubr.msk.bf16.vlgmr.msra.gmra.mrb[52].mxu0 %vm201_vm0, %v2323_v38 }
0x1712   :  { %5690 = vmatpush3.bf16.xpose.msra.mxu0 %v6827_v17  ;;  %5691 = vmatprep.mubr.msk.bf16.mxu0 %vm6516_vm1, %v6515_v0 }
0x1713   :  { %5701 = vmatprep.subr.bf16.mxu0 %v6515_v0 }
0x1719   :  { %5692 = vmatmul.mubr.msk.bf16.vlgmr.msra.gmra.mrb[56].mxu0 %vm201_vm0, %v2455_v44 }
0x171a   :  { %5702 = vmatpush3.bf16.msra.mxu0 %v2584_v47  ;;  %5703 = vmatprep.mubr.msk.bf16.mxu0 %vm6516_vm1, %v6515_v0 }
0x171b   :  { %5713 = vmatprep.subr.bf16.mxu0 %v6515_v0 }
0x17e4   :  { %v2361_v51 = vpop.f32.mrb[52].mxu0 }
0x17e5   :  { %v2368_v50 = vadd.f32 %v6244_v49, %v2361_v51  ;;  %v5679_v17 = vpop.f32.mrb[53].mxu0 }
0x17e6   :  { %v2364_v52 = vpop.f32.mrb[54].mxu0 }
0x17e7   :  { %v2369_v53 = vadd.f32 %v6244_v49, %v2364_v52  ;;  %v5680_v58 = vpop.f32.mrb[55].mxu0  ;;  %v2370_v59 = vmax.f32 %v2368_v50, 0.0 }
0x17e9   :  { %v2371_v1 = vmax.f32 %v2369_v53, 0.0 }
0x17eb   :  { %v2372_v5 = vpack.c.bf16 %v2371_v1, %v2370_v59 }
0x17ec   :  { %v2496_v6 = vpop.f32.mrb[56].mxu0 }
0x17ed   :  { %5686 = vmatmul.mubr.msk.bf16.vlgmr.msra.gmra.mrb[52].mxu1 %vm201_vm0, %v2372_v5  ;;  %v5693_v7 = vpop.f32.mrb[57].mxu0  ;;  %v2551_v31 = vsel %vm426_vm5, %v2496_v6, -inf }
0x17ee   :  { %5696 = vmatpush3.bf16.xpose.msra.mxu1 %v6846_v20  ;;  %2552 = vmax.xlane.f32.xlu1 %v2551_v31  ;;  %v2499_v10 = vpop.f32.mrb[58].mxu0 }
0x17ef   :  { %v5694_v15 = vpop.f32.mrb[59].mxu0  ;;  %5697 = vmatprep.mubr.msk.bf16.mxu1 %vm6516_vm1, %v6515_v0  ;;  %5707 = vmatprep.subr.bf16.mxu1 %v6515_v0 }
0x17f5   :  { %5698 = vmatmul.mubr.msk.bf16.vlgmr.msra.gmra.mrb[56].mxu1 %vm201_vm0, %v2504_v9 }
0x17f6   :  { %5708 = vmatpush3.bf16.msra.mxu1 %v2633_v33  ;;  %5709 = vmatprep.mubr.msk.bf16.mxu1 %vm6516_vm1, %v6515_v0 }
0x17f7   :  { %5721 = vmatprep.subr.bf16.mxu1 %v6515_v0 }
0x187b   :  { %v2553_v20 = vpop.xlane.xlu1 %2552 }
0x187c   :  { %v2557_v21 = vsub.f32 %v2496_v6, %v2553_v20 }
0x187e   :  { %v2559_v13 = vmul.f32 1.442695, %v2557_v21 }
0x1880   :  { %6081 = vpow2.f32 %v2559_v13 }
0x188a   :  { %v6082_v51 = vpop.eup %6081 }
0x188b   :  { %v2563_v17 = vsel %vm426_vm5, %v6082_v51, 0.0 }
0x18c0   :  { %v7310_v46 = vpop.f32.mrb[52].mxu1 }
0x18c1   :  { %v5687_v29 = vpop.f32.mrb[53].mxu1 }
0x18c2   :  { %v7312_v30 = vpop.f32.mrb[54].mxu1 }
0x18c3   :  { %v5688_v26 = vpop.f32.mrb[55].mxu1 }
0x18c8   :  { %v2545_v38 = vpop.f32.mrb[56].mxu1 }
0x18c9   :  { %v5699_v44 = vpop.f32.mrb[57].mxu1  ;;  %v2554_v47 = vsel %vm426_vm5, %v2545_v38, -inf }
0x18ca   :  { %2555 = vmax.xlane.f32.xlu0 %v2554_v47  ;;  %v2548_v49 = vpop.f32.mrb[58].mxu1 }
0x18cb   :  { %v5700_v50 = vpop.f32.mrb[59].mxu1 }
0x18ce   :  { %2564 = vadd.xlane.f32.xlu0 %v2563_v17 }
0x18e4   :  { %2578 = vrot.lane.b32.xlu0 %v7217_v34, %s6517_s6 }
0x1957   :  { %v2556_v52 = vpop.xlane.xlu0 %2555 }
0x1958   :  { %v2558_v53 = vsub.f32 %v2545_v38, %v2556_v52 }
0x195a   :  { %v2561_v58 = vmul.f32 1.442695, %v2558_v53 }
0x195b   :  { %v2565_v59 = vpop.xlane.xlu0 %2564 }
0x195c   :  { %6083 = vpow2.f32 %v2561_v58 }
0x195d   :  { %6085 = vrcp.f32 %v2565_v59 }
0x1966   :  { %v6084_v1 = vpop.eup %6083 }
0x1967   :  { %v6086_v5 = vpop.eup %6085  ;;  %v2566_v6 = vsel %vm426_vm5, %v6084_v1, 0.0 }
0x1968   :  { %v2570_v7 = vmul.f32 0.17677669, %v6086_v5  ;;  %2567 = vadd.xlane.f32.xlu1 %v2566_v6 }
0x196a   :  { %v2573_v31 = vmul.f32 %v6082_v51, %v2570_v7 }
0x196c   :  { %v2575_v10 = vpack.c.bf16 %v2573_v31, %v2573_v31 }
0x196e   :  { %5704 = vmatmul.mubr.msk.bf16.vlgmr.msra.gmra.mrb[60].mxu0 %vm426_vm5, %v2575_v10 }
0x196f   :  { %5714 = vmatpush3.bf16.msra.mxu0 %v6977_v45  ;;  %5717 = vmatprep.mubr.msk.bf16.mxu0 %vm6516_vm1, %v6515_v0  ;;  %v2579_v45 = vpop.permute.xlu0 %2578 }
0x1970   :  { %5715 = vmatprep.subr.bf16.mxu0 %v6515_v0 }
0x1973   :  { %5716 = vmatpush3.bf16.msra.mxu0 %v6983_v19 }
0x1974   :  { %5729 = vmatprep.subr.bf16.mxu0 %v6515_v0 }
0x1979   :  { %2627 = vrot.lane.b32.xlu1 %v7226_v41, %s6517_s6 }
0x19f5   :  { %v2568_v15 = vpop.xlane.xlu1 %2567 }
0x19f6   :  { %6087 = vrcp.f32 %v2568_v15 }
0x19f9   :  { %v2628_v47 = vpop.permute.xlu1 %2627 }
0x1a00   :  { %v6088_v9 = vpop.eup %6087 }
0x1a01   :  { %v2572_v33 = vmul.f32 0.17677669, %v6088_v9 }
0x1a03   :  { %v2574_v20 = vmul.f32 %v6084_v1, %v2572_v33 }
0x1a05   :  { %v2576_v21 = vpack.c.bf16 %v2574_v20, %v2574_v20 }
0x1a07   :  { %5710 = vmatmul.mubr.msk.bf16.vlgmr.msra.gmra.mrb[60].mxu1 %vm426_vm5, %v2576_v21 }
0x1a08   :  { %5722 = vmatpush3.bf16.msra.mxu1 %v7008_v54  ;;  %5725 = vmatprep.mubr.msk.bf16.mxu1 %vm6516_vm1, %v6515_v0 }
0x1a09   :  { %5723 = vmatprep.subr.bf16.mxu1 %v6515_v0 }
0x1a0c   :  { %5724 = vmatpush3.bf16.msra.mxu1 %v7012_v55  ;;  %v6245_v55 = vld [vmem:[#allocation11] ss:$0 sm:$0xff] }
0x1a0d   :  { %5735 = vmatprep.subr.bf16.mxu1 %v6515_v0  ;;  %v2417_v58 = vadd.f32 %v6245_v55, %v7310_v46  ;;  %v2418_v9 = vadd.f32 %v6245_v55, %v7312_v30  ;;  %v6246_v55 = vld [vmem:[#allocation12] ss:$0 sm:$0xff] }
0x1a0f   :  { %v2419_v7 = vadd.f32 %v2417_v58, %v7282_v36  ;;  %v2420_v21 = vadd.f32 %v2418_v9, %v7285_v43 }
0x1a11   :  { %v2421_v31 = vsel %vm201_vm0, %v2419_v7, 0.0 }
0x1a41   :  { %v2620_v19 = vpop.f32.mrb[60].mxu0 }
0x1a42   :  { %v2621_v13 = vadd.f32 %v2620_v19, %v2579_v45  ;;  %v5705_v29 = vpop.f32.mrb[61].mxu0  ;;  %v2424_v45 = vsel %vm201_vm0, %v2420_v21, 0.0 }
0x1a43   :  { %v2623_v26 = vpop.f32.mrb[62].mxu0 }
0x1a44   :  { %v5706_v38 = vpop.f32.mrb[63].mxu0  ;;  %v2675_v44 = vsel %vm201_vm0, %v2621_v13, 0.0 }
0x1a45   :  { %2676 = vadd.xlane.f32.xlu1 %v2675_v44 }
0x1ad2   :  { %v2677_v54 = vpop.xlane.xlu1 %2676 }
0x1ad3   :  { %v2681_v51 = vmul.f32 0.03125, %v2677_v54 }
0x1ad5   :  { %v2683_v49 = vsub.f32 %v2621_v13, %v2681_v51 }
0x1ad7   :  { %v2685_v5 = vmul.f32 %v2683_v49, %v2683_v49 }
0x1ad9   :  { %v2687_v6 = vsel %vm201_vm0, %v2685_v5, 0.0 }
0x1ada   :  { %v2669_v50 = vpop.f32.mrb[60].mxu1 }
0x1adb   :  { %v2670_v17 = vadd.f32 %v2669_v50, %v2628_v47  ;;  %v5711_v52 = vpop.f32.mrb[61].mxu1 }
0x1adc   :  { %v2672_v53 = vpop.f32.mrb[62].mxu1 }
0x1add   :  { %v5712_v59 = vpop.f32.mrb[63].mxu1  ;;  %v2678_v1 = vsel %vm201_vm0, %v2670_v17, 0.0 }
0x1ade   :  { %2679 = vadd.xlane.f32.xlu0 %v2678_v1 }
0x1ae2   :  { %2688 = vadd.xlane.f32.xlu0 %v2687_v6 }
0x1ae6   :  { %2422 = vadd.xlane.f32.xlu0 %v2421_v31 }
0x1b6b   :  { %v2680_v10 = vpop.xlane.xlu0 %2679 }
0x1b6c   :  { %v2682_v15 = vmul.f32 0.03125, %v2680_v10 }
0x1b6e   :  { %v2684_v33 = vsub.f32 %v2670_v17, %v2682_v15 }
0x1b6f   :  { %v2689_v19 = vpop.xlane.xlu0 %2688 }
0x1b70   :  { %v2686_v20 = vmul.f32 %v2684_v33, %v2684_v33  ;;  %v2693_v36 = vmul.f32 0.03125, %v2689_v19  ;;  %v6247_v19 = vld [vmem:[#allocation15] ss:$0 sm:$0xff] }
0x1b72   :  { %v2690_v46 = vsel %vm201_vm0, %v2686_v20, 0.0  ;;  %v2695_v13 = vadd.f32 1e-05, %v2693_v36 }
0x1b73   :  { %2691 = vadd.xlane.f32.xlu1 %v2690_v46  ;;  %v2423_v15 = vpop.xlane.xlu0 %2422 }
0x1b74   :  { %6089 = vrsqrt.f32 %v2695_v13 }
0x1b77   :  { %2425 = vadd.xlane.f32.xlu1 %v2424_v45 }
0x1b7e   :  { %v6090_v44 = vpop.eup %6089 }
0x1b7f   :  { %v2699_v30 = vmul.f32 %v6090_v44, %v2683_v49 }
0x1b81   :  { %v2701_v54 = vmul.f32 %v2699_v30, %v6995_v40 }
0x1b83   :  { %v2703_v50 = vadd.f32 %v2701_v54, %v7000_v48 }
0x1c00   :  { %v2692_v29 = vpop.xlane.xlu1 %2691 }
0x1c01   :  { %v2694_v26 = vmul.f32 0.03125, %v2692_v29 }
0x1c03   :  { %v2696_v38 = vadd.f32 1e-05, %v2694_v26 }
0x1c04   :  { %v2426_v9 = vpop.xlane.xlu1 %2425 }
0x1c05   :  { %6091 = vrsqrt.f32 %v2696_v38  ;;  %v2428_v20 = vmul.f32 0.03125, %v2426_v9 }
0x1c07   :  { %v2430_v26 = vsub.f32 %v2420_v21, %v2428_v20 }
0x1c0f   :  { %v6092_v47 = vpop.eup %6091 }
0x1c10   :  { %v2700_v51 = vmul.f32 %v6092_v47, %v2684_v33  ;;  %v2427_v33 = vmul.f32 0.03125, %v2423_v15 }
0x1c12   :  { %v2702_v43 = vmul.f32 %v2700_v51, %v6995_v40  ;;  %v2429_v45 = vsub.f32 %v2419_v7, %v2427_v33 }
0x1c14   :  { %v2704_v17 = vadd.f32 %v2702_v43, %v7000_v48  ;;  %v2431_v51 = vmul.f32 %v2429_v45, %v2429_v45 }
0x1c16   :  { %v2705_v52 = vpack.c.bf16 %v2704_v17, %v2703_v50 }
0x1c18   :  { %5718 = vmatmul.mubr.msk.bf16.vlgmr.msra.gmra.mrb[64].mxu0 %vm201_vm0, %v2705_v52  ;;  %v2432_v52 = vmul.f32 %v2430_v26, %v2430_v26 }
0x1c19   :  { %5731 = vmatprep.mubr.msk.bf16.mxu0 %vm6516_vm1, %v6515_v0 }
0x1c1a   :  { %v2436_v7 = vsel %vm201_vm0, %v2432_v52, 0.0 }
0x1ceb   :  { %v2743_v53 = vpop.f32.mrb[64].mxu0 }
0x1cec   :  { %v2750_v58 = vadd.f32 %v6246_v55, %v2743_v53  ;;  %v5719_v49 = vpop.f32.mrb[65].mxu0  ;;  %v2433_v53 = vsel %vm201_vm0, %v2431_v51, 0.0 }
0x1ced   :  { %v2746_v59 = vpop.f32.mrb[66].mxu0 }
0x1cee   :  { %v2751_v1 = vadd.f32 %v6246_v55, %v2746_v59  ;;  %v5720_v5 = vpop.f32.mrb[67].mxu0  ;;  %v2752_v6 = vmax.f32 %v2750_v58, 0.0 }
0x1cf0   :  { %v2753_v31 = vmax.f32 %v2751_v1, 0.0 }
0x1cf2   :  { %v2754_v10 = vpack.c.bf16 %v2753_v31, %v2752_v6 }
0x1cf4   :  { %5726 = vmatmul.mubr.msk.bf16.vlgmr.msra.gmra.mrb[64].mxu1 %vm201_vm0, %v2754_v10 }
0x1cf5   :  { %5737 = vmatprep.mubr.msk.bf16.mxu1 %vm6516_vm1, %v6515_v0 }
0x1dc7   :  { %v2792_v46 = vpop.f32.mrb[64].mxu1 }
0x1dc8   :  { %v2799_v36 = vadd.f32 %v6247_v19, %v2792_v46  ;;  %v5727_v13 = vpop.f32.mrb[65].mxu1 }
0x1dc9   :  { %v2795_v29 = vpop.f32.mrb[66].mxu1 }
0x1dca   :  { %v2800_v38 = vadd.f32 %v6247_v19, %v2795_v29  ;;  %v5728_v44 = vpop.f32.mrb[67].mxu1  ;;  %v2801_v30 = vadd.f32 %v2799_v36, %v2703_v50 }
0x1dcc   :  { %v2803_v47 = vsel %vm201_vm0, %v2801_v30, 0.0  ;;  %v2802_v54 = vadd.f32 %v2800_v38, %v2704_v17 }
0x1dcd   :  { %2804 = vadd.xlane.f32.xlu0 %v2803_v47 }
0x1dce   :  { %v2806_v43 = vsel %vm201_vm0, %v2802_v54, 0.0 }
0x1dcf   :  { %2807 = vadd.xlane.f32.xlu1 %v2806_v43 }
0x1dd1   :  { %2434 = vadd.xlane.f32.xlu0 %v2433_v53 }
0x1dd3   :  { %2437 = vadd.xlane.f32.xlu1 %v2436_v7 }
0x1e5a   :  { %v2805_v55 = vpop.xlane.xlu0 %2804 }
0x1e5b   :  { %v2809_v21 = vmul.f32 0.03125, %v2805_v55 }
0x1e5c   :  { %v2808_v58 = vpop.xlane.xlu1 %2807 }
0x1e5d   :  { %v2811_v49 = vsub.f32 %v2801_v30, %v2809_v21  ;;  %v2810_v50 = vmul.f32 0.03125, %v2808_v58 }
0x1e5e   :  { %v2435_v59 = vpop.xlane.xlu0 %2434 }
0x1e5f   :  { %v2812_v1 = vsub.f32 %v2802_v54, %v2810_v50  ;;  %v2439_v17 = vmul.f32 0.03125, %v2435_v59  ;;  %v2813_v5 = vmul.f32 %v2811_v49, %v2811_v49 }
0x1e60   :  { %v2438_v6 = vpop.xlane.xlu1 %2437 }
0x1e61   :  { %v2441_v31 = vadd.f32 1e-05, %v2439_v17  ;;  %v2440_v10 = vmul.f32 0.03125, %v2438_v6  ;;  %v2815_v15 = vsel %vm201_vm0, %v2813_v5, 0.0  ;;  %v2814_v9 = vmul.f32 %v2812_v1, %v2812_v1 }
0x1e62   :  { %2816 = vadd.xlane.f32.xlu0 %v2815_v15 }
0x1e63   :  { %6093 = vrsqrt.f32 %v2441_v31  ;;  %v2442_v33 = vadd.f32 1e-05, %v2440_v10  ;;  %v2818_v20 = vsel %vm201_vm0, %v2814_v9, 0.0 }
0x1e64   :  { %2819 = vadd.xlane.f32.xlu1 %v2818_v20 }
0x1e65   :  { %6095 = vrsqrt.f32 %v2442_v33 }
0x1e6d   :  { %v6094_v46 = vpop.eup %6093 }
0x1e6e   :  { %v2445_v19 = vmul.f32 %v6094_v46, %v2429_v45 }
0x1e6f   :  { %v6096_v36 = vpop.eup %6095 }
0x1e70   :  { %v2446_v13 = vmul.f32 %v6096_v36, %v2430_v26  ;;  %v2447_v29 = vmul.f32 %v2445_v19, %v7034_v62 }
0x1e72   :  { %v7363_v38 = vadd.f32 %v2447_v29, %v7038_v2  ;;  %v2448_v44 = vmul.f32 %v2446_v13, %v7034_v62 }
0x1e74   :  { %v2835_v30 = vpack.c.bf16 %v7363_v38, %v7363_v38  ;;  %5269 = vst.msk [vmem:[%s8188_s23 + $0x20] sm:$0xff] %vm201_vm0, %v7363_v38  ;;  %v7374_v45 = vadd.f32 %v2448_v44, %v7038_v2 }
0x1e76   :  { %v7377_v26 = vsel %vm201_vm0, %v2835_v30, 0  ;;  %v2836_v47 = vpack.c.bf16 %v7374_v45, %v7374_v45  ;;  %5270 = vst.msk [vmem:[%s8188_s23 + $0x30] sm:$0xff] %vm201_vm0, %v7374_v45 }
0x1e77   :  { %5730 = vmatpush3.bf16.xpose.msra.mxu0 %v7377_v26 }
0x1e78   :  { %v7388_v54 = vsel %vm201_vm0, %v2836_v47, 0  ;;  %5741 = vmatprep.subr.bf16.mxu0 %v6515_v0 }
0x1e79   :  { %5736 = vmatpush3.bf16.xpose.msra.mxu1 %v7388_v54 }
0x1e7a   :  { %5747 = vmatprep.subr.bf16.mxu1 %v6515_v0 }
0x1eef   :  { %v2817_v51 = vpop.xlane.xlu0 %2816 }
0x1ef0   :  { %v2821_v43 = vmul.f32 0.03125, %v2817_v51 }
0x1ef1   :  { %v2820_v52 = vpop.xlane.xlu1 %2819 }
0x1ef2   :  { %v2823_v53 = vadd.f32 1e-05, %v2821_v43  ;;  %v2822_v7 = vmul.f32 0.03125, %v2820_v52 }
0x1ef4   :  { %6097 = vrsqrt.f32 %v2823_v53  ;;  %v2824_v55 = vadd.f32 1e-05, %v2822_v7 }
0x1ef6   :  { %6099 = vrsqrt.f32 %v2824_v55 }
0x1efe   :  { %v6098_v21 = vpop.eup %6097 }
0x1eff   :  { %v2827_v58 = vmul.f32 %v6098_v21, %v2811_v49 }
0x1f00   :  { %v6100_v50 = vpop.eup %6099 }
0x1f01   :  { %v2829_v59 = vmul.f32 %v2827_v58, %v7050_v25  ;;  %v2828_v17 = vmul.f32 %v6100_v50, %v2812_v1 }
0x1f03   :  { %v2830_v5 = vmul.f32 %v2828_v17, %v7050_v25  ;;  %v7396_v6 = vadd.f32 %v2829_v59, %v7054_v28 }
0x1f05   :  { %v2833_v31 = vpack.c.bf16 %v7396_v6, %v7396_v6  ;;  %v7401_v10 = vadd.f32 %v2830_v5, %v7054_v28 }
0x1f07   :  { %5732 = vmatmul.mubr.msk.bf16.vlgmr.msra.gmra.mrb[68].mxu0 %vm201_vm0, %v2833_v31  ;;  %v2834_v49 = vpack.c.bf16 %v7401_v10, %v7401_v10 }
0x1f08   :  { %5743 = vmatprep.mubr.msk.bf16.mxu0 %vm6516_vm1, %v6515_v0 }
0x1f09   :  { %5738 = vmatmul.mubr.msk.bf16.vlgmr.msra.gmra.mrb[68].mxu1 %vm201_vm0, %v2834_v49 }
0x1f0a   :  { %5749 = vmatprep.mubr.msk.bf16.mxu1 %vm6516_vm1, %v6515_v0 }
0x1fda   :  { %v2877_v1 = vpop.f32.mrb[68].mxu0 }
0x1fdb   :  { %v5733_v15 = vpop.f32.mrb[69].mxu0  ;;  %v2929_v9 = vsel %vm426_vm5, %v2877_v1, -inf }
0x1fdc   :  { %2930 = vmax.xlane.f32.xlu0 %v2929_v9  ;;  %v2880_v33 = vpop.f32.mrb[70].mxu0  ;;  %v2923_v20 = vpop.f32.mrb[68].mxu1 }
0x1fdd   :  { %v5734_v46 = vpop.f32.mrb[71].mxu0  ;;  %v5739_v19 = vpop.f32.mrb[69].mxu1  ;;  %v2932_v36 = vsel %vm426_vm5, %v2923_v20, -inf }
0x1fde   :  { %2933 = vmax.xlane.f32.xlu1 %v2932_v36  ;;  %v2926_v13 = vpop.f32.mrb[70].mxu1 }
0x1fdf   :  { %v5740_v29 = vpop.f32.mrb[71].mxu1 }
0x2069   :  { %v2931_v44 = vpop.xlane.xlu0 %2930 }
0x206a   :  { %v2935_v30 = vsub.f32 %v2877_v1, %v2931_v44 }
0x206b   :  { %v2934_v47 = vpop.xlane.xlu1 %2933 }
0x206c   :  { %v2937_v51 = vmul.f32 1.442695, %v2935_v30  ;;  %v2936_v43 = vsub.f32 %v2923_v20, %v2934_v47 }
0x206e   :  { %6101 = vpow2.f32 %v2937_v51  ;;  %v2939_v52 = vmul.f32 1.442695, %v2936_v43 }
0x2070   :  { %6103 = vpow2.f32 %v2939_v52 }
0x2078   :  { %v6102_v53 = vpop.eup %6101 }
0x2079   :  { %v2941_v7 = vsel %vm426_vm5, %v6102_v53, 0.0 }
0x207a   :  { %v6104_v55 = vpop.eup %6103  ;;  %2942 = vadd.xlane.f32.xlu0 %v2941_v7 }
0x207b   :  { %v2944_v21 = vsel %vm426_vm5, %v6104_v55, 0.0 }
0x207c   :  { %2945 = vadd.xlane.f32.xlu1 %v2944_v21 }
0x208d   :  { %3006 = vrot.lane.b32.xlu1 %v7230_v37, %s6504_s7 }
0x2090   :  { %2955 = vrot.lane.b32.xlu0 %v7224_v32, %s6504_s7 }
0x2091   :  { %2957 = vrot.lane.b32.xlu1 %v7217_v34, %s6504_s7 }
0x2095   :  { %3008 = vrot.lane.b32.xlu1 %v7226_v41, %s6504_s7 }
0x2107   :  { %v2943_v58 = vpop.xlane.xlu0 %2942 }
0x2108   :  { %6105 = vrcp.f32 %v2943_v58 }
0x2109   :  { %v2946_v50 = vpop.xlane.xlu1 %2945 }
0x210a   :  { %6107 = vrcp.f32 %v2946_v50 }
0x210b   :  { %v2956_v59 = vpop.permute.xlu0 %2955 }
0x210c   :  { %v2964_v17 = vsel %vm456_vm4, %v2956_v59, 0 }
0x210d   :  { %5742 = vmatpush3.bf16.msra.mxu0 %v2964_v17  ;;  %v3007_v5 = vpop.permute.xlu1 %3006 }
0x210e   :  { %v3015_v37 = vsel %vm456_vm4, %v3007_v5, 0  ;;  %5753 = vmatprep.subr.bf16.mxu0 %v6515_v0 }
0x210f   :  { %5748 = vmatpush3.bf16.msra.mxu1 %v3015_v37 }
0x2110   :  { %5761 = vmatprep.subr.bf16.mxu1 %v6515_v0 }
0x2112   :  { %v6106_v34 = vpop.eup %6105 }
0x2113   :  { %v2948_v32 = vmul.f32 0.17677669, %v6106_v34 }
0x2114   :  { %v6108_v31 = vpop.eup %6107 }
0x2115   :  { %v2951_v41 = vmul.f32 %v6102_v53, %v2948_v32  ;;  %v2950_v49 = vmul.f32 0.17677669, %v6108_v31 }
0x2117   :  { %v2953_v1 = vpack.c.bf16 %v2951_v41, %v2951_v41  ;;  %v2952_v15 = vmul.f32 %v6104_v55, %v2950_v49 }
0x2119   :  { %v2954_v9 = vpack.c.bf16 %v2952_v15, %v2952_v15  ;;  %5744 = vmatmul.mubr.msk.bf16.vlgmr.msra.gmra.mrb[72].mxu0 %vm426_vm5, %v2953_v1 }
0x211a   :  { %5754 = vmatpush3.bf16.msra.mxu0 %v7103_v16  ;;  %5757 = vmatprep.mubr.msk.bf16.mxu0 %vm6516_vm1, %v6515_v0  ;;  %v2958_v16 = vpop.permute.xlu1 %2957 }
0x211b   :  { %5750 = vmatmul.mubr.msk.bf16.vlgmr.msra.gmra.mrb[72].mxu1 %vm426_vm5, %v2954_v9  ;;  %5755 = vmatprep.subr.bf16.mxu0 %v6515_v0 }
0x211c   :  { %5762 = vmatpush3.bf16.msra.mxu1 %v7174_v56  ;;  %5765 = vmatprep.mubr.msk.bf16.mxu1 %vm6516_vm1, %v6515_v0 }
0x211d   :  { %5763 = vmatprep.subr.bf16.mxu1 %v6515_v0 }
0x211e   :  { %5756 = vmatpush3.bf16.msra.mxu0 %v7110_v18  ;;  %v3009_v20 = vpop.permute.xlu1 %3008 }
0x211f   :  { %5958 = vmatprep.subr.bf16.mxu0 %v7118_v8 }
0x2120   :  { %5764 = vmatpush3.bf16.msra.mxu1 %v7181_v57 }
0x2121   :  { %5966 = vmatprep.subr.bf16.mxu1 %v7190_v63 }
0x21ec   :  { %v3000_v33 = vpop.f32.mrb[72].mxu0 }
0x21ed   :  { %v3001_v46 = vadd.f32 %v3000_v33, %v2958_v16  ;;  %v5745_v19 = vpop.f32.mrb[73].mxu0 }
0x21ee   :  { %v3003_v36 = vpop.f32.mrb[74].mxu0  ;;  %v3051_v56 = vpop.f32.mrb[72].mxu1 }
0x21ef   :  { %v3052_v13 = vadd.f32 %v3051_v56, %v3009_v20  ;;  %v5746_v29 = vpop.f32.mrb[75].mxu0  ;;  %v5751_v44 = vpop.f32.mrb[73].mxu1  ;;  %v3057_v30 = vsel %vm201_vm0, %v3001_v46, 0.0  ;;  %v5281_v56 = vld [vmem:[%s8206_s10 + $0x20] sm:$0xff] }
0x21f0   :  { %3058 = vadd.xlane.f32.xlu0 %v3057_v30  ;;  %v3054_v18 = vpop.f32.mrb[74].mxu1  ;;  %v6248_v29 = vld [vmem:[#allocation4] sm:$0xff] }
0x21f1   :  { %v5752_v47 = vpop.f32.mrb[75].mxu1  ;;  %v3060_v51 = vsel %vm201_vm0, %v3052_v13, 0.0  ;;  %v3604_v44 = vadd.f32 %v6248_v29, %v5281_v56  ;;  %v6249_v30 = vld [vmem:[%s8205_s13] sm:$0xff]  }
0x21f2   :  { %3061 = vadd.xlane.f32.xlu1 %v3060_v51  ;;  %v6250_v47 = vld [vmem:[%s8205_s13 + $0x8] sm:$0xff]   ;;  %v6251_v51 = vld [vmem:[%s8173_s8] ss:$0 sm:$0xff] }
0x2203   :  { %3225 = vrot.lane.b32.xlu1 %v7401_v10, %s6518_s25 }
0x227d   :  { %v3059_v57 = vpop.xlane.xlu0 %3058 }
0x227e   :  { %v3063_v43 = vmul.f32 0.03125, %v3059_v57 }
0x227f   :  { %v3062_v52 = vpop.xlane.xlu1 %3061 }
0x2280   :  { %v3065_v53 = vsub.f32 %v3001_v46, %v3063_v43  ;;  %v3064_v7 = vmul.f32 0.03125, %v3062_v52 }
0x2282   :  { %v3066_v55 = vsub.f32 %v3052_v13, %v3064_v7  ;;  %v3067_v21 = vmul.f32 %v3065_v53, %v3065_v53  ;;  %v5282_v13 = vld [vmem:[%s8206_s10 + $0x28] sm:$0xff] }
0x2283   :  { %v3226_v58 = vpop.permute.xlu1 %3225 }
0x2284   :  { %5272 = vst.msk [vmem:[%s8188_s23 + $0x30] sm:$0xff] %vm1985_vm2, %v3226_v58  ;;  %v3069_v50 = vsel %vm201_vm0, %v3067_v21, 0.0  ;;  %v3068_v59 = vmul.f32 %v3066_v55, %v3066_v55  ;;  %v3654_v1 = vpack.c.bf16 %v3226_v58, %v3226_v58 }
0x2285   :  { %3070 = vadd.xlane.f32.xlu0 %v3069_v50 }
0x2286   :  { %v3072_v17 = vsel %vm201_vm0, %v3068_v59, 0.0 }
0x2289   :  { %3073 = vadd.xlane.f32.xlu0 %v3072_v17 }
0x229f   :  { %3223 = vrot.lane.b32.xlu0 %v7396_v6, %s6518_s25 }
0x2312   :  { %v3071_v10 = vpop.xlane.xlu0 %3070 }
0x2313   :  { %v3075_v5 = vmul.f32 0.03125, %v3071_v10 }
0x2315   :  { %v3077_v37 = vadd.f32 1e-05, %v3075_v5 }
0x2316   :  { %v3074_v34 = vpop.xlane.xlu0 %3073 }
0x2317   :  { %6109 = vrsqrt.f32 %v3077_v37  ;;  %v3076_v32 = vmul.f32 0.03125, %v3074_v34  ;;  %v6252_v37 = vld [vmem:[%s8207_s0] ss:$0 sm:$0xff] }
0x2319   :  { %v3078_v31 = vadd.f32 1e-05, %v3076_v32 }
0x231a   :  { %v3224_v41 = vpop.permute.xlu0 %3223 }
0x231b   :  { %6111 = vrsqrt.f32 %v3078_v31  ;;  %5271 = vst.msk [vmem:[%s8188_s23 + $0x20] sm:$0xff] %vm1985_vm2, %v3224_v41  ;;  %v3653_v49 = vpack.c.bf16 %v3224_v41, %v3224_v41  ;;  %3326 = vrot.lane.b32.xlu1 %v3224_v41, %s6517_s6 }
0x231d   :  { %3658 = vrot.lane.b32.xlu0 %v3653_v49, %s6517_s6 }
0x231f   :  { %3328 = vrot.lane.b32.xlu1 %v3226_v58, %s6517_s6 }
0x2321   :  { %v6110_v6 = vpop.eup %6109 }
0x2322   :  { %v3081_v15 = vmul.f32 %v6110_v6, %v3065_v53 }
0x2323   :  { %3707 = vrot.lane.b32.xlu1 %v3654_v1, %s6517_s6 }
0x2324   :  { %v3083_v16 = vmul.f32 %v3081_v15, %v7126_v24 }
0x2325   :  { %v6112_v9 = vpop.eup %6111 }
0x2326   :  { %v3082_v33 = vmul.f32 %v6112_v9, %v3066_v55  ;;  %v7464_v46 = vadd.f32 %v3083_v16, %v7130_v12 }
0x2328   :  { %v3084_v20 = vmul.f32 %v3082_v33, %v7126_v24 }
0x232a   :  { %v7467_v19 = vadd.f32 %v3084_v20, %v7130_v12 }
0x232c   :  { %v3087_v36 = vpack.c.bf16 %v7467_v19, %v7464_v46 }
0x232e   :  { %5758 = vmatmul.mubr.msk.bf16.vlgmr.msra.gmra.mrb[76].mxu0 %vm201_vm0, %v3087_v36 }
0x232f   :  { %5960 = vmatpush3.bf16.msra.mxu0 %v7118_v8  ;;  %5777 = vmatprep.mubr.msk.f32.mxu0 %vm201_vm0, %v7363_v38  ;;  %v3605_v38 = vadd.f32 %v6248_v29, %v5282_v13 }
0x2330   :  { %5962 = vmatprep.subr.bf16.mxu0 %v7141_v39 }
0x2331   :  { %v3606_v18 = vpack.c.bf16 %v3605_v38, %v3604_v44 }
0x2333   :  { %5964 = vmatpush3.bf16.msra.mxu0 %v7141_v39 }
0x2334   :  { %5791 = vmatprep.subr.bf16.mxu0 %v6515_v0 }
0x2336   :  { %5778 = vmatmul.mubr.msk.f32.vlgmr.msra.gmra.mrb[42].mxu0 %vm201_vm0, %v7374_v45 }
0x2337   :  { %5792 = vmatpush3.bf16.msra.mxu0 %v6249_v30  ;;  %5795 = vmatprep.mubr.msk.bf16.mxu0 %vm6516_vm1, %v6515_v0 }
0x2338   :  { %5793 = vmatprep.subr.bf16.mxu0 %v6515_v0 }
0x233b   :  { %5794 = vmatpush3.bf16.msra.mxu0 %v6250_v47 }
0x233c   :  { %5805 = vmatprep.subr.bf16.mxu0 %v6515_v0 }
0x233e   :  { %5796 = vmatmul.mubr.msk.bf16.vlgmr.msra.gmra.mrb[80].mxu0 %vm201_vm0, %v3606_v18 }
0x233f   :  { %5807 = vmatprep.mubr.msk.bf16.mxu0 %vm6516_vm1, %v6515_v0 }
0x238d   :  { %v3327_v59 = vpop.permute.xlu1 %3326 }
0x238f   :  { %v3659_v16 = vpop.permute.xlu0 %3658 }
0x2391   :  { %v3329_v10 = vpop.permute.xlu1 %3328 }
0x2395   :  { %v3708_v33 = vpop.permute.xlu1 %3707 }
0x2401   :  { %v3125_v45 = vpop.f32.mrb[76].mxu0 }
0x2402   :  { %v3132_v57 = vadd.f32 %v6251_v51, %v3125_v45  ;;  %v5759_v43 = vpop.f32.mrb[77].mxu0 }
0x2403   :  { %v3128_v52 = vpop.f32.mrb[78].mxu0 }
0x2404   :  { %v3133_v53 = vadd.f32 %v6251_v51, %v3128_v52  ;;  %v5760_v7 = vpop.f32.mrb[79].mxu0  ;;  %v3134_v55 = vmax.f32 %v3132_v57, 0.0 }
0x2406   :  { %v3135_v21 = vmax.f32 %v3133_v53, 0.0 }
0x2408   :  { %v3136_v58 = vpack.c.bf16 %v3135_v21, %v3134_v55 }
0x2409   :  { %v7502_v50 = vpop.f32.mrb[42].mxu0 }
0x240a   :  { %5766 = vmatmul.mubr.msk.bf16.vlgmr.msra.gmra.mrb[76].mxu1 %vm201_vm0, %v3136_v58  ;;  %v7505_v17 = vpop.f32.mrb[43].mxu0 }
0x240b   :  { %5968 = vmatpush3.bf16.msra.mxu1 %v7190_v63  ;;  %5788 = vmatprep.mubr.msk.f32.mxu1 %vm201_vm0, %v3327_v59 }
0x240c   :  { %5970 = vmatprep.subr.bf16.mxu1 %v7202_v22 }
0x240f   :  { %5972 = vmatpush3.bf16.msra.mxu1 %v7202_v22 }
0x2410   :  { %5799 = vmatprep.subr.bf16.mxu1 %v6515_v0 }
0x2411   :  { %v3644_v5 = vpop.f32.mrb[80].mxu0 }
0x2412   :  { %v7515_v34 = vadd.f32 %v6252_v37, %v3644_v5  ;;  %v5797_v32 = vpop.f32.mrb[81].mxu0  ;;  %5789 = vmatmul.mubr.msk.f32.vlgmr.msra.gmra.mrb[38].mxu1 %vm201_vm0, %v3329_v10 }
0x2413   :  { %v3647_v31 = vpop.f32.mrb[82].mxu0  ;;  %5801 = vmatprep.mubr.msk.bf16.mxu1 %vm6516_vm1, %v6515_v0 }
0x2414   :  { %v7522_v41 = vpack.c.bf16 %v7515_v34, %v7515_v34  ;;  %v7524_v49 = vadd.f32 %v6252_v37, %v3647_v31  ;;  %v5798_v6 = vpop.f32.mrb[83].mxu0 }
0x2416   :  { %v7528_v1 = vpack.c.bf16 %v7524_v49, %v7524_v49  ;;  %v3664_v15 = vsel %vm201_vm0, %v7522_v41, 0  ;;  %v3784_v20 = vsel %vm456_vm4, %v7522_v41, 0 }
0x2418   :  { %5800 = vmatpush3.bf16.xpose.msra.mxu1 %v3664_v15  ;;  %v3713_v9 = vsel %vm201_vm0, %v7528_v1, 0  ;;  %v3829_v36 = vsel %vm456_vm4, %v7528_v1, 0 }
0x2419   :  { %5806 = vmatpush3.bf16.xpose.msra.mxu0 %v3713_v9  ;;  %5811 = vmatprep.subr.bf16.mxu1 %v6515_v0 }
0x241a   :  { %5817 = vmatprep.subr.bf16.mxu0 %v6515_v0 }
0x241f   :  { %5802 = vmatmul.mubr.msk.bf16.vlgmr.msra.gmra.mrb[80].mxu1 %vm201_vm0, %v3659_v16 }
0x2420   :  { %5808 = vmatmul.mubr.msk.bf16.vlgmr.msra.gmra.mrb[84].mxu0 %vm201_vm0, %v3708_v33  ;;  %5812 = vmatpush3.bf16.msra.mxu1 %v3784_v20 }
0x2421   :  { %5818 = vmatpush3.bf16.msra.mxu0 %v3829_v36  ;;  %5813 = vmatprep.mubr.msk.bf16.mxu1 %vm6516_vm1, %v6515_v0 }
0x2422   :  { %5819 = vmatprep.mubr.msk.bf16.mxu0 %vm6516_vm1, %v6515_v0  ;;  %5823 = vmatprep.subr.bf16.mxu1 %v6515_v0 }
0x2423   :  { %5831 = vmatprep.subr.bf16.mxu0 %v6515_v0 }
0x24dd   :  { %v7548_v56 = vpop.f32.mrb[76].mxu1 }
0x24de   :  { %v5767_v13 = vpop.f32.mrb[77].mxu1 }
0x24df   :  { %v7550_v29 = vpop.f32.mrb[78].mxu1 }
0x24e0   :  { %v5768_v44 = vpop.f32.mrb[79].mxu1 }
0x24e5   :  { %v7552_v38 = vpop.f32.mrb[38].mxu1 }
0x24e6   :  { %v7554_v30 = vpop.f32.mrb[39].mxu1 }
0x24f2   :  { %v3700_v18 = vpop.f32.mrb[80].mxu1 }
0x24f3   :  { %v5803_v47 = vpop.f32.mrb[81].mxu1  ;;  %v3749_v45 = vpop.f32.mrb[84].mxu0  ;;  %v3755_v51 = vsel %vm426_vm5, %v3700_v18, -inf }
0x24f4   :  { %v5809_v57 = vpop.f32.mrb[85].mxu0  ;;  %3756 = vmax.xlane.f32.xlu0 %v3755_v51  ;;  %v3703_v43 = vpop.f32.mrb[82].mxu1  ;;  %v3758_v52 = vsel %vm426_vm5, %v3749_v45, -inf }
0x24f5   :  { %3759 = vmax.xlane.f32.xlu1 %v3758_v52  ;;  %v5804_v53 = vpop.f32.mrb[83].mxu1  ;;  %v3752_v7 = vpop.f32.mrb[86].mxu0  ;;  %v6254_v57 = vld [vmem:[#allocation6 + $0x8] sm:$0xff]   ;;  %v6255_v43 = vld [vmem:[#allocation9] sm:$0xff]   ;;  %v6256_v52 = vld [vmem:[#allocation9 + $0x8] sm:$0xff]  }
0x24f6   :  { %v5810_v55 = vpop.f32.mrb[87].mxu0 }
0x2581   :  { %v3757_v21 = vpop.xlane.xlu0 %3756 }
0x2582   :  { %v3761_v58 = vsub.f32 %v3700_v18, %v3757_v21  ;;  %v3760_v59 = vpop.xlane.xlu1 %3759 }
0x2583   :  { %v3762_v10 = vsub.f32 %v3749_v45, %v3760_v59  ;;  %v6253_v45 = vld [vmem:[#allocation6] sm:$0xff]  }
0x2584   :  { %v3763_v5 = vmul.f32 1.442695, %v3761_v58 }
0x2585   :  { %v3765_v37 = vmul.f32 1.442695, %v3762_v10 }
0x2586   :  { %6113 = vpow2.f32 %v3763_v5 }
0x2587   :  { %6115 = vpow2.f32 %v3765_v37 }
0x2590   :  { %v6114_v32 = vpop.eup %6113 }
0x2591   :  { %v3767_v31 = vsel %vm426_vm5, %v6114_v32, 0.0  ;;  %v6116_v6 = vpop.eup %6115 }
0x2592   :  { %3768 = vadd.xlane.f32.xlu0 %v3767_v31  ;;  %v3770_v15 = vsel %vm426_vm5, %v6116_v6, 0.0 }
0x2596   :  { %3771 = vadd.xlane.f32.xlu0 %v3770_v15 }
0x261f   :  { %v3769_v9 = vpop.xlane.xlu0 %3768 }
0x2620   :  { %6117 = vrcp.f32 %v3769_v9 }
0x2623   :  { %v3772_v16 = vpop.xlane.xlu0 %3771 }
0x2624   :  { %6119 = vrcp.f32 %v3772_v16 }
0x262a   :  { %v6118_v33 = vpop.eup %6117 }
0x262b   :  { %v3774_v20 = vmul.f32 0.17677669, %v6118_v33 }
0x262d   :  { %v3777_v36 = vmul.f32 %v6114_v32, %v3774_v20 }
0x262e   :  { %v6120_v13 = vpop.eup %6119 }
0x262f   :  { %v3779_v44 = vpack.c.bf16 %v3777_v36, %v3777_v36  ;;  %v3776_v18 = vmul.f32 0.17677669, %v6120_v13 }
0x2631   :  { %v3778_v47 = vmul.f32 %v6116_v6, %v3776_v18  ;;  %5814 = vmatmul.mubr.msk.bf16.vlgmr.msra.gmra.mrb[84].mxu1 %vm426_vm5, %v3779_v44 }
0x2632   :  { %5824 = vmatpush3.bf16.msra.mxu1 %v6253_v45  ;;  %5827 = vmatprep.mubr.msk.bf16.mxu1 %vm6516_vm1, %v6515_v0 }
0x2633   :  { %v3780_v51 = vpack.c.bf16 %v3778_v47, %v3778_v47  ;;  %5825 = vmatprep.subr.bf16.mxu1 %v6515_v0 }
0x2635   :  { %5820 = vmatmul.mubr.msk.bf16.vlgmr.msra.gmra.mrb[88].mxu0 %vm426_vm5, %v3780_v51 }
0x2636   :  { %5826 = vmatpush3.bf16.msra.mxu1 %v6254_v57  ;;  %5832 = vmatpush3.bf16.msra.mxu0 %v6255_v43 }
0x2637   :  { %5839 = vmatprep.subr.bf16.mxu1 %v6515_v0  ;;  %5833 = vmatprep.subr.bf16.mxu0 %v6515_v0 }
0x2638   :  { %5835 = vmatprep.mubr.msk.bf16.mxu0 %vm6516_vm1, %v6515_v0 }
0x263a   :  { %5834 = vmatpush3.bf16.msra.mxu0 %v6256_v52 }
0x263b   :  { %5845 = vmatprep.subr.bf16.mxu0 %v6515_v0 }
0x2704   :  { %v3820_v53 = vpop.f32.mrb[84].mxu1 }
0x2705   :  { %v3821_v7 = vadd.f32 %v3820_v53, %v7515_v34  ;;  %v5815_v55 = vpop.f32.mrb[85].mxu1 }
0x2706   :  { %v3823_v21 = vpop.f32.mrb[86].mxu1 }
0x2707   :  { %v5816_v58 = vpop.f32.mrb[87].mxu1  ;;  %v3871_v59 = vsel %vm201_vm0, %v3821_v7, 0.0 }
0x2708   :  { %v3865_v10 = vpop.f32.mrb[88].mxu0  ;;  %3872 = vadd.xlane.f32.xlu0 %v3871_v59 }
0x2709   :  { %v3866_v5 = vadd.f32 %v3865_v10, %v7524_v49  ;;  %v5821_v37 = vpop.f32.mrb[89].mxu0 }
0x270a   :  { %v3868_v32 = vpop.f32.mrb[90].mxu0 }
0x270b   :  { %v5822_v31 = vpop.f32.mrb[91].mxu0  ;;  %v3874_v6 = vsel %vm201_vm0, %v3866_v5, 0.0 }
0x270c   :  { %3875 = vadd.xlane.f32.xlu1 %v3874_v6  ;;  %v6257_v6 = vld [vmem:[#allocation8] ss:$0 sm:$0xff] }
0x2795   :  { %v3873_v15 = vpop.xlane.xlu0 %3872 }
0x2796   :  { %v3877_v9 = vmul.f32 0.03125, %v3873_v15 }
0x2798   :  { %v3879_v16 = vsub.f32 %v3821_v7, %v3877_v9 }
0x2799   :  { %v3876_v33 = vpop.xlane.xlu1 %3875 }
0x279a   :  { %v3878_v20 = vmul.f32 0.03125, %v3876_v33  ;;  %v3881_v36 = vmul.f32 %v3879_v16, %v3879_v16 }
0x279c   :  { %v3880_v13 = vsub.f32 %v3866_v5, %v3878_v20  ;;  %v3883_v44 = vsel %vm201_vm0, %v3881_v36, 0.0 }
0x279d   :  { %3884 = vadd.xlane.f32.xlu0 %v3883_v44 }
0x279e   :  { %v3882_v18 = vmul.f32 %v3880_v13, %v3880_v13 }
0x27a0   :  { %v3886_v47 = vsel %vm201_vm0, %v3882_v18, 0.0 }
0x27a1   :  { %3887 = vadd.xlane.f32.xlu1 %v3886_v47 }
0x27b2   :  { %4081 = vrot.lane.b32.xlu1 %v7528_v1, %s6517_s6 }
0x27b3   :  { %4032 = vrot.lane.b32.xlu0 %v7522_v41, %s6517_s6 }
0x282a   :  { %v3885_v45 = vpop.xlane.xlu0 %3884 }
0x282b   :  { %v3889_v51 = vmul.f32 0.03125, %v3885_v45 }
0x282d   :  { %v3891_v57 = vadd.f32 1e-05, %v3889_v51 }
0x282e   :  { %v3888_v43 = vpop.xlane.xlu1 %3887  ;;  %v4033_v31 = vpop.permute.xlu0 %4032 }
0x282f   :  { %6121 = vrsqrt.f32 %v3891_v57  ;;  %v3890_v52 = vmul.f32 0.03125, %v3888_v43 }
0x2831   :  { %v3892_v53 = vadd.f32 1e-05, %v3890_v52 }
0x2832   :  { %v4082_v57 = vpop.permute.xlu1 %4081 }
0x2833   :  { %6123 = vrsqrt.f32 %v3892_v53  ;;  %v4211_v43 = vsel %vm456_vm4, %v4082_v57, 0 }
0x2839   :  { %v6122_v7 = vpop.eup %6121 }
0x283a   :  { %v3895_v55 = vmul.f32 %v6122_v7, %v3879_v16 }
0x283c   :  { %v3897_v58 = vmul.f32 %v3895_v55, %v6903_v35 }
0x283d   :  { %v6124_v21 = vpop.eup %6123 }
0x283e   :  { %v3896_v59 = vmul.f32 %v6124_v21, %v3880_v13  ;;  %v7583_v5 = vadd.f32 %v3897_v58, %v6911_v42 }
0x2840   :  { %v3898_v10 = vmul.f32 %v3896_v59, %v6903_v35  ;;  %v4162_v35 = vsel %vm456_vm4, %v4033_v31, 0 }
0x2842   :  { %v7586_v37 = vadd.f32 %v3898_v10, %v6911_v42 }
0x2844   :  { %v3901_v32 = vpack.c.bf16 %v7586_v37, %v7583_v5 }
0x2846   :  { %5828 = vmatmul.mubr.msk.bf16.vlgmr.msra.gmra.mrb[88].mxu1 %vm201_vm0, %v3901_v32 }
0x2847   :  { %5840 = vmatpush3.bf16.xpose.msra.mxu1 %v7377_v26  ;;  %5841 = vmatprep.mubr.msk.bf16.mxu1 %vm6516_vm1, %v6515_v0 }
0x2848   :  { %5851 = vmatprep.subr.bf16.mxu1 %v6515_v0 }
0x284e   :  { %5842 = vmatmul.mubr.msk.bf16.vlgmr.msra.gmra.mrb[92].mxu1 %vm201_vm0, %v4033_v31 }
0x284f   :  { %5852 = vmatpush3.bf16.msra.mxu1 %v4162_v35  ;;  %5853 = vmatprep.mubr.msk.bf16.mxu1 %vm6516_vm1, %v6515_v0 }
0x2850   :  { %5863 = vmatprep.subr.bf16.mxu1 %v6515_v0 }
0x2919   :  { %v3939_v42 = vpop.f32.mrb[88].mxu1 }
0x291a   :  { %v3946_v15 = vadd.f32 %v6257_v6, %v3939_v42  ;;  %v5829_v26 = vpop.f32.mrb[89].mxu1 }
0x291b   :  { %v3942_v9 = vpop.f32.mrb[90].mxu1 }
0x291c   :  { %v3947_v16 = vadd.f32 %v6257_v6, %v3942_v9  ;;  %v5830_v33 = vpop.f32.mrb[91].mxu1  ;;  %v3948_v20 = vmax.f32 %v3946_v15, 0.0 }
0x291e   :  { %v3949_v36 = vmax.f32 %v3947_v16, 0.0 }
0x2920   :  { %v3950_v13 = vpack.c.bf16 %v3949_v36, %v3948_v20 }
0x2921   :  { %v4074_v44 = vpop.f32.mrb[92].mxu1 }
0x2922   :  { %5836 = vmatmul.mubr.msk.bf16.vlgmr.msra.gmra.mrb[92].mxu0 %vm201_vm0, %v3950_v13  ;;  %v5843_v18 = vpop.f32.mrb[93].mxu1  ;;  %v4129_v47 = vsel %vm426_vm5, %v4074_v44, -inf }
0x2923   :  { %5846 = vmatpush3.bf16.xpose.msra.mxu0 %v7388_v54  ;;  %4130 = vmax.xlane.f32.xlu1 %v4129_v47  ;;  %v4077_v45 = vpop.f32.mrb[94].mxu1  ;;  %v6258_v47 = vld [vmem:[%s8180_s15] sm:$0xff]  }
0x2924   :  { %v5844_v51 = vpop.f32.mrb[95].mxu1  ;;  %5847 = vmatprep.mubr.msk.bf16.mxu0 %vm6516_vm1, %v6515_v0  ;;  %5857 = vmatprep.subr.bf16.mxu0 %v6515_v0  ;;  %v6259_v45 = vld [vmem:[%s8180_s15 + $0x8] sm:$0xff]  }
0x292a   :  { %5848 = vmatmul.mubr.msk.bf16.vlgmr.msra.gmra.mrb[96].mxu0 %vm201_vm0, %v4082_v57 }
0x292b   :  { %5858 = vmatpush3.bf16.msra.mxu0 %v4211_v43  ;;  %5859 = vmatprep.mubr.msk.bf16.mxu0 %vm6516_vm1, %v6515_v0 }
0x292c   :  { %5871 = vmatprep.subr.bf16.mxu0 %v6515_v0 }
0x29b0   :  { %v4131_v54 = vpop.xlane.xlu1 %4130 }
0x29b1   :  { %v4135_v52 = vsub.f32 %v4074_v44, %v4131_v54 }
0x29b3   :  { %v4137_v53 = vmul.f32 1.442695, %v4135_v52 }
0x29b5   :  { %6125 = vpow2.f32 %v4137_v53  ;;  %v6260_v53 = vld [vmem:[#allocation14] sm:$0xff]  }
0x29bf   :  { %v6126_v31 = vpop.eup %6125 }
0x29c0   :  { %v4141_v6 = vsel %vm426_vm5, %v6126_v31, 0.0 }
0x29f5   :  { %v7611_v7 = vpop.f32.mrb[92].mxu0 }
0x29f6   :  { %v5837_v55 = vpop.f32.mrb[93].mxu0 }
0x29f7   :  { %v7613_v21 = vpop.f32.mrb[94].mxu0  ;;  %v6261_v55 = vld [vmem:[#allocation14 + $0x8] sm:$0xff]  }
0x29f8   :  { %v5838_v58 = vpop.f32.mrb[95].mxu0 }
0x29fd   :  { %v4123_v59 = vpop.f32.mrb[96].mxu0 }
0x29fe   :  { %v5849_v10 = vpop.f32.mrb[97].mxu0  ;;  %v4132_v32 = vsel %vm426_vm5, %v4123_v59, -inf }
0x29ff   :  { %4133 = vmax.xlane.f32.xlu0 %v4132_v32  ;;  %v4126_v35 = vpop.f32.mrb[98].mxu0 }
0x2a00   :  { %v5850_v42 = vpop.f32.mrb[99].mxu0 }
0x2a03   :  { %4142 = vadd.xlane.f32.xlu0 %v4141_v6 }
0x2a19   :  { %4156 = vrot.lane.b32.xlu0 %v7515_v34, %s6517_s6 }
0x2a8c   :  { %v4134_v15 = vpop.xlane.xlu0 %4133 }
0x2a8d   :  { %v4136_v26 = vsub.f32 %v4123_v59, %v4134_v15 }
0x2a8f   :  { %v4139_v9 = vmul.f32 1.442695, %v4136_v26 }
0x2a90   :  { %v4143_v16 = vpop.xlane.xlu0 %4142 }
0x2a91   :  { %6127 = vpow2.f32 %v4139_v9 }
0x2a92   :  { %6129 = vrcp.f32 %v4143_v16 }
0x2a94   :  { %v4157_v58 = vpop.permute.xlu0 %4156 }
0x2a9b   :  { %v6128_v33 = vpop.eup %6127 }
0x2a9c   :  { %v6130_v20 = vpop.eup %6129  ;;  %v4144_v36 = vsel %vm426_vm5, %v6128_v33, 0.0 }
0x2a9d   :  { %v4148_v13 = vmul.f32 0.17677669, %v6130_v20  ;;  %4145 = vadd.xlane.f32.xlu1 %v4144_v36 }
0x2a9f   :  { %v4151_v44 = vmul.f32 %v6126_v31, %v4148_v13  ;;  %v6262_v13 = vld [vmem:[#allocation11] ss:$0 sm:$0xff] }
0x2aa1   :  { %v4153_v18 = vpack.c.bf16 %v4151_v44, %v4151_v44  ;;  %v3995_v44 = vadd.f32 %v6262_v13, %v7611_v7 }
0x2aa3   :  { %5854 = vmatmul.mubr.msk.bf16.vlgmr.msra.gmra.mrb[96].mxu1 %vm426_vm5, %v4153_v18 }
0x2aa4   :  { %5864 = vmatpush3.bf16.msra.mxu1 %v6258_v47  ;;  %5867 = vmatprep.mubr.msk.bf16.mxu1 %vm6516_vm1, %v6515_v0 }
0x2aa5   :  { %5865 = vmatprep.subr.bf16.mxu1 %v6515_v0 }
0x2aa8   :  { %5866 = vmatpush3.bf16.msra.mxu1 %v6259_v45 }
0x2aa9   :  { %5879 = vmatprep.subr.bf16.mxu1 %v6515_v0 }
0x2aae   :  { %4205 = vrot.lane.b32.xlu1 %v7524_v49, %s6517_s6 }
0x2b2a   :  { %v4146_v51 = vpop.xlane.xlu1 %4145 }
0x2b2b   :  { %6131 = vrcp.f32 %v4146_v51  ;;  %v3997_v51 = vadd.f32 %v3995_v44, %v7583_v5 }
0x2b2e   :  { %v4206_v6 = vpop.permute.xlu1 %4205 }
0x2b35   :  { %v6132_v57 = vpop.eup %6131 }
0x2b36   :  { %v4150_v43 = vmul.f32 0.17677669, %v6132_v57 }
0x2b38   :  { %v4152_v54 = vmul.f32 %v6128_v33, %v4150_v43  ;;  %v3999_v43 = vsel %vm201_vm0, %v3997_v51, 0.0 }
0x2b3a   :  { %v4154_v52 = vpack.c.bf16 %v4152_v54, %v4152_v54 }
0x2b3c   :  { %5860 = vmatmul.mubr.msk.bf16.vlgmr.msra.gmra.mrb[100].mxu0 %vm426_vm5, %v4154_v52 }
0x2b3d   :  { %5872 = vmatpush3.bf16.msra.mxu0 %v6260_v53  ;;  %5875 = vmatprep.mubr.msk.bf16.mxu0 %vm6516_vm1, %v6515_v0  ;;  %v3996_v53 = vadd.f32 %v6262_v13, %v7613_v21 }
0x2b3e   :  { %5873 = vmatprep.subr.bf16.mxu0 %v6515_v0 }
0x2b3f   :  { %v3998_v7 = vadd.f32 %v3996_v53, %v7586_v37 }
0x2b41   :  { %5874 = vmatpush3.bf16.msra.mxu0 %v6261_v55 }
0x2b42   :  { %5885 = vmatprep.subr.bf16.mxu0 %v6515_v0 }
0x2b76   :  { %v4198_v59 = vpop.f32.mrb[96].mxu1 }
0x2b77   :  { %v4199_v10 = vadd.f32 %v4198_v59, %v4157_v58  ;;  %v5855_v32 = vpop.f32.mrb[97].mxu1 }
0x2b78   :  { %v4201_v31 = vpop.f32.mrb[98].mxu1 }
0x2b79   :  { %v5856_v35 = vpop.f32.mrb[99].mxu1  ;;  %v4253_v42 = vsel %vm201_vm0, %v4199_v10, 0.0 }
0x2b7a   :  { %4254 = vadd.xlane.f32.xlu1 %v4253_v42 }
0x2c07   :  { %v4255_v15 = vpop.xlane.xlu1 %4254 }
0x2c08   :  { %v4259_v26 = vmul.f32 0.03125, %v4255_v15 }
0x2c0a   :  { %v4261_v9 = vsub.f32 %v4199_v10, %v4259_v26  ;;  %v4002_v10 = vsel %vm201_vm0, %v3998_v7, 0.0 }
0x2c0c   :  { %v4263_v45 = vmul.f32 %v4261_v9, %v4261_v9 }
0x2c0e   :  { %v4265_v57 = vsel %vm201_vm0, %v4263_v45, 0.0 }
0x2c0f   :  { %v4247_v16 = vpop.f32.mrb[100].mxu0 }
0x2c10   :  { %v4248_v33 = vadd.f32 %v4247_v16, %v4206_v6  ;;  %v5861_v20 = vpop.f32.mrb[101].mxu0 }
0x2c11   :  { %v4250_v36 = vpop.f32.mrb[102].mxu0 }
0x2c12   :  { %v5862_v18 = vpop.f32.mrb[103].mxu0  ;;  %v4256_v47 = vsel %vm201_vm0, %v4248_v33, 0.0 }
0x2c13   :  { %4257 = vadd.xlane.f32.xlu0 %v4256_v47  ;;  %v6263_v18 = vld [vmem:[#allocation12] ss:$0 sm:$0xff] }
0x2c17   :  { %4266 = vadd.xlane.f32.xlu0 %v4265_v57 }
0x2c1b   :  { %4000 = vadd.xlane.f32.xlu0 %v3999_v43 }
0x2ca0   :  { %v4258_v54 = vpop.xlane.xlu0 %4257 }
0x2ca1   :  { %v4260_v52 = vmul.f32 0.03125, %v4258_v54 }
0x2ca3   :  { %v4262_v55 = vsub.f32 %v4248_v33, %v4260_v52 }
0x2ca4   :  { %v4267_v5 = vpop.xlane.xlu0 %4266 }
0x2ca5   :  { %v4264_v58 = vmul.f32 %v4262_v55, %v4262_v55  ;;  %v4271_v32 = vmul.f32 0.03125, %v4267_v5  ;;  %v6264_v5 = vld [vmem:[#allocation15] ss:$0 sm:$0xff] }
0x2ca7   :  { %v4268_v59 = vsel %vm201_vm0, %v4264_v58, 0.0  ;;  %v4273_v31 = vadd.f32 1e-05, %v4271_v32 }
0x2ca8   :  { %4269 = vadd.xlane.f32.xlu1 %v4268_v59 }
0x2ca9   :  { %6133 = vrsqrt.f32 %v4273_v31 }
0x2cac   :  { %4003 = vadd.xlane.f32.xlu1 %v4002_v10 }
0x2cb3   :  { %v6134_v15 = vpop.eup %6133 }
0x2cb4   :  { %v4277_v21 = vmul.f32 %v6134_v15, %v4261_v9 }
0x2cb6   :  { %v4279_v16 = vmul.f32 %v4277_v21, %v6995_v40 }
0x2cb8   :  { %v4281_v20 = vadd.f32 %v4279_v16, %v7000_v48 }
0x2d35   :  { %v4270_v35 = vpop.xlane.xlu1 %4269 }
0x2d36   :  { %v4272_v42 = vmul.f32 0.03125, %v4270_v35 }
0x2d38   :  { %v4274_v6 = vadd.f32 1e-05, %v4272_v42 }
0x2d39   :  { %v4004_v53 = vpop.xlane.xlu1 %4003 }
0x2d3a   :  { %6135 = vrsqrt.f32 %v4274_v6  ;;  %v4006_v58 = vmul.f32 0.03125, %v4004_v53 }
0x2d3c   :  { %v4008_v42 = vsub.f32 %v3998_v7, %v4006_v58 }
0x2d44   :  { %v6136_v26 = vpop.eup %6135 }
0x2d45   :  { %v4278_v37 = vmul.f32 %v6136_v26, %v4262_v55 }
0x2d47   :  { %v4280_v33 = vmul.f32 %v4278_v37, %v6995_v40 }
0x2d49   :  { %v4282_v36 = vadd.f32 %v4280_v33, %v7000_v48  ;;  %v4001_v48 = vpop.xlane.xlu0 %4000 }
0x2d4a   :  { %v4005_v55 = vmul.f32 0.03125, %v4001_v48 }
0x2d4b   :  { %v4283_v13 = vpack.c.bf16 %v4282_v36, %v4281_v20 }
0x2d4c   :  { %v4007_v10 = vsub.f32 %v3997_v51, %v4005_v55 }
0x2d4d   :  { %5868 = vmatmul.mubr.msk.bf16.vlgmr.msra.gmra.mrb[100].mxu1 %vm201_vm0, %v4283_v13  ;;  %v4010_v13 = vmul.f32 %v4008_v42, %v4008_v42 }
0x2d4e   :  { %5881 = vmatprep.mubr.msk.bf16.mxu1 %vm6516_vm1, %v6515_v0  ;;  %v4009_v37 = vmul.f32 %v4007_v10, %v4007_v10 }
0x2d4f   :  { %v4014_v51 = vsel %vm201_vm0, %v4010_v13, 0.0 }
0x2e20   :  { %v4321_v44 = vpop.f32.mrb[100].mxu1 }
0x2e21   :  { %v4328_v47 = vadd.f32 %v6263_v18, %v4321_v44  ;;  %v5869_v9 = vpop.f32.mrb[101].mxu1  ;;  %v4011_v44 = vsel %vm201_vm0, %v4009_v37, 0.0 }
0x2e22   :  { %v4324_v45 = vpop.f32.mrb[102].mxu1 }
0x2e23   :  { %v4329_v57 = vadd.f32 %v6263_v18, %v4324_v45  ;;  %v5870_v43 = vpop.f32.mrb[103].mxu1  ;;  %v4330_v54 = vmax.f32 %v4328_v47, 0.0 }
0x2e25   :  { %v4331_v52 = vmax.f32 %v4329_v57, 0.0 }
0x2e27   :  { %v4332_v40 = vpack.c.bf16 %v4331_v52, %v4330_v54 }
0x2e29   :  { %5876 = vmatmul.mubr.msk.bf16.vlgmr.msra.gmra.mrb[104].mxu0 %vm201_vm0, %v4332_v40 }
0x2e2a   :  { %5887 = vmatprep.mubr.msk.bf16.mxu0 %vm6516_vm1, %v6515_v0 }
0x2efc   :  { %v4370_v59 = vpop.f32.mrb[104].mxu0 }
0x2efd   :  { %v4377_v32 = vadd.f32 %v6264_v5, %v4370_v59  ;;  %v5877_v31 = vpop.f32.mrb[105].mxu0 }
0x2efe   :  { %v4373_v35 = vpop.f32.mrb[106].mxu0 }
0x2eff   :  { %v4379_v6 = vadd.f32 %v4377_v32, %v4281_v20  ;;  %v4378_v15 = vadd.f32 %v6264_v5, %v4373_v35  ;;  %v5878_v21 = vpop.f32.mrb[107].mxu0 }
0x2f01   :  { %v4380_v26 = vadd.f32 %v4378_v15, %v4282_v36  ;;  %v4381_v16 = vsel %vm201_vm0, %v4379_v6, 0.0 }
0x2f02   :  { %4382 = vadd.xlane.f32.xlu0 %v4381_v16 }
0x2f03   :  { %v4384_v33 = vsel %vm201_vm0, %v4380_v26, 0.0 }
0x2f04   :  { %4385 = vadd.xlane.f32.xlu1 %v4384_v33 }
0x2f06   :  { %4012 = vadd.xlane.f32.xlu0 %v4011_v44 }
0x2f08   :  { %4015 = vadd.xlane.f32.xlu1 %v4014_v51 }
0x2f8f   :  { %v4383_v18 = vpop.xlane.xlu0 %4382 }
0x2f90   :  { %v4387_v7 = vmul.f32 0.03125, %v4383_v18 }
0x2f91   :  { %v4386_v20 = vpop.xlane.xlu1 %4385 }
0x2f92   :  { %v4389_v47 = vsub.f32 %v4379_v6, %v4387_v7  ;;  %v4388_v9 = vmul.f32 0.03125, %v4386_v20 }
0x2f93   :  { %v4013_v36 = vpop.xlane.xlu0 %4012 }
0x2f94   :  { %v4390_v45 = vsub.f32 %v4380_v26, %v4388_v9  ;;  %v4017_v57 = vmul.f32 0.03125, %v4013_v36  ;;  %v4391_v43 = vmul.f32 %v4389_v47, %v4389_v47 }
0x2f95   :  { %v4016_v54 = vpop.xlane.xlu1 %4015 }
0x2f96   :  { %v4019_v52 = vadd.f32 1e-05, %v4017_v57  ;;  %v4018_v40 = vmul.f32 0.03125, %v4016_v54  ;;  %v4393_v48 = vsel %vm201_vm0, %v4391_v43, 0.0  ;;  %v4392_v53 = vmul.f32 %v4390_v45, %v4390_v45 }
0x2f97   :  { %4394 = vadd.xlane.f32.xlu0 %v4393_v48 }
0x2f98   :  { %6137 = vrsqrt.f32 %v4019_v52  ;;  %v4020_v55 = vadd.f32 1e-05, %v4018_v40  ;;  %v4396_v58 = vsel %vm201_vm0, %v4392_v53, 0.0 }
0x2f99   :  { %4397 = vadd.xlane.f32.xlu1 %v4396_v58 }
0x2f9a   :  { %6139 = vrsqrt.f32 %v4020_v55 }
0x2fa2   :  { %v6138_v59 = vpop.eup %6137 }
0x2fa3   :  { %v4023_v5 = vmul.f32 %v6138_v59, %v4007_v10 }
0x2fa4   :  { %v6140_v32 = vpop.eup %6139 }
0x2fa5   :  { %v4025_v31 = vmul.f32 %v4023_v5, %v7034_v62  ;;  %v4024_v35 = vmul.f32 %v6140_v32, %v4008_v42 }
0x2fa7   :  { %v4026_v6 = vmul.f32 %v4024_v35, %v7034_v62  ;;  %v7667_v15 = vadd.f32 %v4025_v31, %v7038_v2 }
0x2fa9   :  { %v4413_v21 = vpack.c.bf16 %v7667_v15, %v7667_v15  ;;  %5178 = vst.msk [vmem:[#allocation2] sm:$0xff] %vm201_vm0, %v7667_v15  ;;  %5308 = vst.msk [vmem:[%s8188_s23 + $0x40] sm:$0xff] %vm201_vm0, %v7667_v15  ;;  %v7679_v10 = vadd.f32 %v4026_v6, %v7038_v2 }
0x2fab   :  { %v4419_v62 = vsel %vm201_vm0, %v4413_v21, 0  ;;  %v4414_v42 = vpack.c.bf16 %v7679_v10, %v7679_v10  ;;  %5179 = vst.msk [vmem:[#allocation2 + $0x8] sm:$0xff] %vm201_vm0, %v7679_v10  ;;  %5309 = vst.msk [vmem:[%s8188_s23 + $0x50] sm:$0xff] %vm201_vm0, %v7679_v10 }
0x2fac   :  { %5880 = vmatpush3.bf16.xpose.msra.mxu1 %v4419_v62 }
0x2fad   :  { %v4465_v26 = vsel %vm201_vm0, %v4414_v42, 0  ;;  %5891 = vmatprep.subr.bf16.mxu1 %v6515_v0 }
0x2fae   :  { %5886 = vmatpush3.bf16.xpose.msra.mxu0 %v4465_v26 }
0x2faf   :  { %5897 = vmatprep.subr.bf16.mxu0 %v6515_v0 }
0x3024   :  { %v4395_v2 = vpop.xlane.xlu0 %4394 }
0x3025   :  { %v4399_v16 = vmul.f32 0.03125, %v4395_v2 }
0x3026   :  { %v4398_v37 = vpop.xlane.xlu1 %4397 }
0x3027   :  { %v4401_v33 = vadd.f32 1e-05, %v4399_v16  ;;  %v4400_v13 = vmul.f32 0.03125, %v4398_v37 }
0x3029   :  { %6141 = vrsqrt.f32 %v4401_v33  ;;  %v4402_v44 = vadd.f32 1e-05, %v4400_v13 }
0x302b   :  { %6143 = vrsqrt.f32 %v4402_v44 }
0x3033   :  { %v6142_v51 = vpop.eup %6141 }
0x3034   :  { %v4405_v18 = vmul.f32 %v6142_v51, %v4389_v47 }
0x3035   :  { %v6144_v7 = vpop.eup %6143 }
0x3036   :  { %v4407_v20 = vmul.f32 %v4405_v18, %v7050_v25  ;;  %v4406_v9 = vmul.f32 %v6144_v7, %v4390_v45 }
0x3038   :  { %v4408_v36 = vmul.f32 %v4406_v9, %v7050_v25  ;;  %v7697_v57 = vadd.f32 %v4407_v20, %v7054_v28 }
0x303a   :  { %v4411_v43 = vpack.c.bf16 %v7697_v57, %v7697_v57  ;;  %v7702_v54 = vadd.f32 %v4408_v36, %v7054_v28  ;;  %v6265_v36 = vld [vmem:[%s8210_s1] sm:$0xff]  }
0x303c   :  { %5882 = vmatmul.mubr.msk.bf16.vlgmr.msra.gmra.mrb[104].mxu1 %vm201_vm0, %v4411_v43  ;;  %v4412_v47 = vpack.c.bf16 %v7702_v54, %v7702_v54  ;;  %v6266_v43 = vld [vmem:[%s8174_s9] sm:$0xff]  }
0x303d   :  { %5893 = vmatprep.mubr.msk.bf16.mxu1 %vm6516_vm1, %v6515_v0 }
0x303e   :  { %5888 = vmatmul.mubr.msk.bf16.vlgmr.msra.gmra.mrb[108].mxu0 %vm201_vm0, %v4412_v47  ;;  %v6267_v47 = vld [vmem:[%s8210_s1 + $0x8] sm:$0xff]  }
0x303f   :  { %5899 = vmatprep.mubr.msk.bf16.mxu0 %vm6516_vm1, %v6515_v0 }
0x310f   :  { %v4455_v25 = vpop.f32.mrb[104].mxu1 }
0x3110   :  { %v5883_v45 = vpop.f32.mrb[105].mxu1  ;;  %v4507_v52 = vsel %vm426_vm5, %v4455_v25, -inf }
0x3111   :  { %v4501_v40 = vpop.f32.mrb[108].mxu0  ;;  %4508 = vmax.xlane.f32.xlu0 %v4507_v52  ;;  %v4458_v28 = vpop.f32.mrb[106].mxu1 }
0x3112   :  { %v5884_v48 = vpop.f32.mrb[107].mxu1  ;;  %v5889_v53 = vpop.f32.mrb[109].mxu0  ;;  %v4510_v55 = vsel %vm426_vm5, %v4501_v40, -inf }
0x3113   :  { %4511 = vmax.xlane.f32.xlu1 %v4510_v55  ;;  %v4504_v58 = vpop.f32.mrb[110].mxu0 }
0x3114   :  { %v5890_v59 = vpop.f32.mrb[111].mxu0 }
0x319e   :  { %v4509_v5 = vpop.xlane.xlu0 %4508 }
0x319f   :  { %v4513_v32 = vsub.f32 %v4455_v25, %v4509_v5  ;;  %v6268_v25 = vld [vmem:[%s8174_s9 + $0x8] sm:$0xff]  }
0x31a0   :  { %v4512_v31 = vpop.xlane.xlu1 %4511 }
0x31a1   :  { %v4515_v35 = vmul.f32 1.442695, %v4513_v32  ;;  %v4514_v6 = vsub.f32 %v4501_v40, %v4512_v31 }
0x31a3   :  { %6145 = vpow2.f32 %v4515_v35  ;;  %v4517_v21 = vmul.f32 1.442695, %v4514_v6 }
0x31a5   :  { %6147 = vpow2.f32 %v4517_v21 }
0x31ad   :  { %v6146_v62 = vpop.eup %6145 }
0x31ae   :  { %v4519_v42 = vsel %vm426_vm5, %v6146_v62, 0.0 }
0x31af   :  { %v6148_v26 = vpop.eup %6147  ;;  %4520 = vadd.xlane.f32.xlu0 %v4519_v42 }
0x31b0   :  { %v4522_v2 = vsel %vm426_vm5, %v6148_v26, 0.0 }
0x31b1   :  { %4523 = vadd.xlane.f32.xlu1 %v4522_v2 }
0x31c2   :  { %4584 = vrot.lane.b32.xlu1 %v7528_v1, %s6504_s7 }
0x31c5   :  { %4533 = vrot.lane.b32.xlu0 %v7522_v41, %s6504_s7 }
0x31c6   :  { %4535 = vrot.lane.b32.xlu1 %v7515_v34, %s6504_s7 }
0x31ca   :  { %4586 = vrot.lane.b32.xlu1 %v7524_v49, %s6504_s7 }
0x323c   :  { %v4521_v16 = vpop.xlane.xlu0 %4520 }
0x323d   :  { %6149 = vrcp.f32 %v4521_v16 }
0x323e   :  { %v4524_v37 = vpop.xlane.xlu1 %4523 }
0x323f   :  { %6151 = vrcp.f32 %v4524_v37 }
0x3240   :  { %v4534_v33 = vpop.permute.xlu0 %4533 }
0x3241   :  { %v4542_v13 = vsel %vm456_vm4, %v4534_v33, 0 }
0x3242   :  { %v4585_v44 = vpop.permute.xlu1 %4584  ;;  %5892 = vmatpush3.bf16.msra.mxu1 %v4542_v13 }
0x3243   :  { %v4593_v1 = vsel %vm456_vm4, %v4585_v44, 0  ;;  %5903 = vmatprep.subr.bf16.mxu1 %v6515_v0 }
0x3244   :  { %5898 = vmatpush3.bf16.msra.mxu0 %v4593_v1 }
0x3245   :  { %5911 = vmatprep.subr.bf16.mxu0 %v6515_v0 }
0x3246   :  { %v4536_v45 = vpop.permute.xlu1 %4535 }
0x3247   :  { %v6150_v34 = vpop.eup %6149 }
0x3248   :  { %v4526_v41 = vmul.f32 0.17677669, %v6150_v34 }
0x3249   :  { %v6152_v51 = vpop.eup %6151 }
0x324a   :  { %v4529_v49 = vmul.f32 %v6146_v62, %v4526_v41  ;;  %v4528_v18 = vmul.f32 0.17677669, %v6152_v51  ;;  %v4587_v40 = vpop.permute.xlu1 %4586 }
0x324c   :  { %v4531_v7 = vpack.c.bf16 %v4529_v49, %v4529_v49  ;;  %v4530_v20 = vmul.f32 %v6148_v26, %v4528_v18 }
0x324e   :  { %v4532_v9 = vpack.c.bf16 %v4530_v20, %v4530_v20  ;;  %5894 = vmatmul.mubr.msk.bf16.vlgmr.msra.gmra.mrb[108].mxu1 %vm426_vm5, %v4531_v7 }
0x324f   :  { %5904 = vmatpush3.bf16.msra.mxu1 %v6265_v36  ;;  %5907 = vmatprep.mubr.msk.bf16.mxu1 %vm6516_vm1, %v6515_v0 }
0x3250   :  { %5900 = vmatmul.mubr.msk.bf16.vlgmr.msra.gmra.mrb[112].mxu0 %vm426_vm5, %v4532_v9  ;;  %5905 = vmatprep.subr.bf16.mxu1 %v6515_v0 }
0x3251   :  { %5912 = vmatpush3.bf16.msra.mxu0 %v6266_v43  ;;  %5915 = vmatprep.mubr.msk.bf16.mxu0 %vm6516_vm1, %v6515_v0 }
0x3252   :  { %5913 = vmatprep.subr.bf16.mxu0 %v6515_v0 }
0x3253   :  { %5906 = vmatpush3.bf16.msra.mxu1 %v6267_v47 }
0x3254   :  { %5974 = vmatprep.subr.bf16.mxu1 %v7118_v8 }
0x3255   :  { %5914 = vmatpush3.bf16.msra.mxu0 %v6268_v25 }
0x3256   :  { %5982 = vmatprep.subr.bf16.mxu0 %v7190_v63 }
0x3321   :  { %v4578_v52 = vpop.f32.mrb[108].mxu1 }
0x3322   :  { %v4579_v28 = vadd.f32 %v4578_v52, %v4536_v45  ;;  %v5895_v48 = vpop.f32.mrb[109].mxu1 }
0x3323   :  { %v4581_v0 = vpop.f32.mrb[110].mxu1  ;;  %v4629_v53 = vpop.f32.mrb[112].mxu0 }
0x3324   :  { %v4630_v55 = vadd.f32 %v4629_v53, %v4587_v40  ;;  %v5896_v58 = vpop.f32.mrb[111].mxu1  ;;  %v5901_v59 = vpop.f32.mrb[113].mxu0  ;;  %v4635_v5 = vsel %vm201_vm0, %v4579_v28, 0.0  ;;  %v6269_v53 = vld [vmem:[%s8173_s8] ss:$0 sm:$0xff] }
0x3325   :  { %v4632_v32 = vpop.f32.mrb[114].mxu0  ;;  %4636 = vadd.xlane.f32.xlu0 %v4635_v5 }
0x3326   :  { %v5902_v31 = vpop.f32.mrb[115].mxu0  ;;  %v4638_v35 = vsel %vm201_vm0, %v4630_v55, 0.0 }
0x3327   :  { %4639 = vadd.xlane.f32.xlu1 %v4638_v35 }
0x3338   :  { %4803 = vrot.lane.b32.xlu1 %v7702_v54, %s6518_s25  ;;  %v7765_v54 = vld [vmem:[%s8212_s28] ss:$0 sm:$0xff] }
0x3339   :  { %v3181_v1 = vadd.f32 %v7765_v54, %v7548_v56 }
0x333b   :  { %v7770_v34 = vadd.f32 %v3181_v1, %v7464_v46 }
0x333d   :  { %v3185_v41 = vsel %vm201_vm0, %v7770_v34, 0.0 }
0x33b2   :  { %v4637_v6 = vpop.xlane.xlu0 %4636 }
0x33b3   :  { %v4641_v21 = vmul.f32 0.03125, %v4637_v6 }
0x33b4   :  { %v4640_v62 = vpop.xlane.xlu1 %4639 }
0x33b5   :  { %v4643_v42 = vsub.f32 %v4579_v28, %v4641_v21  ;;  %v4642_v26 = vmul.f32 0.03125, %v4640_v62 }
0x33b7   :  { %v4644_v2 = vsub.f32 %v4630_v55, %v4642_v26  ;;  %v4645_v16 = vmul.f32 %v4643_v42, %v4643_v42 }
0x33b8   :  { %v4804_v37 = vpop.permute.xlu1 %4803 }
0x33b9   :  { %5311 = vst.msk [vmem:[%s8188_s23 + $0x50] sm:$0xff] %vm1985_vm2, %v4804_v37  ;;  %v4647_v33 = vsel %vm201_vm0, %v4645_v16, 0.0  ;;  %v4646_v13 = vmul.f32 %v4644_v2, %v4644_v2 }
0x33ba   :  { %4648 = vadd.xlane.f32.xlu0 %v4647_v33 }
0x33bb   :  { %v4650_v44 = vsel %vm201_vm0, %v4646_v13, 0.0 }
0x33be   :  { %4651 = vadd.xlane.f32.xlu0 %v4650_v44 }
0x33d4   :  { %4801 = vrot.lane.b32.xlu0 %v7697_v57, %s6518_s25 }
0x33f3   :  { %3186 = vadd.xlane.f32.xlu0 %v3185_v41 }
0x3447   :  { %v4649_v51 = vpop.xlane.xlu0 %4648 }
0x3448   :  { %v4653_v49 = vmul.f32 0.03125, %v4649_v51 }
0x344a   :  { %v4655_v18 = vadd.f32 1e-05, %v4653_v49 }
0x344b   :  { %v4652_v7 = vpop.xlane.xlu0 %4651 }
0x344c   :  { %6153 = vrsqrt.f32 %v4655_v18  ;;  %v4654_v57 = vmul.f32 0.03125, %v4652_v7 }
0x344e   :  { %v4656_v20 = vadd.f32 1e-05, %v4654_v57 }
0x344f   :  { %v4802_v9 = vpop.permute.xlu0 %4801 }
0x3450   :  { %6155 = vrsqrt.f32 %v4656_v20  ;;  %5310 = vst.msk [vmem:[%s8188_s23 + $0x40] sm:$0xff] %vm1985_vm2, %v4802_v9  ;;  %4904 = vrot.lane.b32.xlu1 %v4802_v9, %s6517_s6 }
0x3454   :  { %4906 = vrot.lane.b32.xlu1 %v4804_v37, %s6517_s6 }
0x3456   :  { %v6154_v46 = vpop.eup %6153 }
0x3457   :  { %v4659_v56 = vmul.f32 %v6154_v46, %v4643_v42 }
0x3459   :  { %v4661_v43 = vmul.f32 %v4659_v56, %v7126_v24 }
0x345a   :  { %v6156_v36 = vpop.eup %6155 }
0x345b   :  { %v4660_v47 = vmul.f32 %v6156_v36, %v4644_v2  ;;  %v4663_v45 = vadd.f32 %v4661_v43, %v7130_v12 }
0x345d   :  { %v4662_v25 = vmul.f32 %v4660_v47, %v7126_v24  ;;  %v3182_v24 = vadd.f32 %v7765_v54, %v7550_v29 }
0x345f   :  { %v4664_v52 = vadd.f32 %v4662_v25, %v7130_v12  ;;  %v3184_v12 = vadd.f32 %v3182_v24, %v7467_v19 }
0x3461   :  { %v4665_v40 = vpack.c.bf16 %v4664_v52, %v4663_v45  ;;  %v3188_v28 = vsel %vm201_vm0, %v3184_v12, 0.0 }
0x3463   :  { %5908 = vmatmul.mubr.msk.bf16.vlgmr.msra.gmra.mrb[112].mxu1 %vm201_vm0, %v4665_v40 }
0x3464   :  { %5976 = vmatpush3.bf16.msra.mxu1 %v7118_v8  ;;  %5927 = vmatprep.mubr.msk.f32.mxu1 %vm201_vm0, %v7667_v15 }
0x3465   :  { %5978 = vmatprep.subr.bf16.mxu1 %v7141_v39 }
0x3468   :  { %5980 = vmatpush3.bf16.msra.mxu1 %v7141_v39 }
0x346b   :  { %5928 = vmatmul.mubr.msk.f32.vlgmr.msra.gmra.mrb[116].mxu1 %vm201_vm0, %v7679_v10 }
0x3478   :  { %3189 = vadd.xlane.f32.xlu1 %v3188_v28 }
0x3480   :  { %v3187_v42 = vpop.xlane.xlu0 %3186 }
0x3481   :  { %v3191_v2 = vmul.f32 0.03125, %v3187_v42 }
0x34c2   :  { %v4905_v48 = vpop.permute.xlu1 %4904 }
0x34c3   :  { %5182 = vst.msk [vmem:[#allocation3] sm:$0xff] %vm201_vm0, %v4905_v48 }
0x34c6   :  { %v4907_v8 = vpop.permute.xlu1 %4906 }
0x34c7   :  { %5183 = vst.msk [vmem:[#allocation3 + $0x8] sm:$0xff] %vm201_vm0, %v4907_v8 }
0x3505   :  { %v3190_v15 = vpop.xlane.xlu1 %3189 }
0x3506   :  { %v3192_v0 = vmul.f32 0.03125, %v3190_v15 }
0x3508   :  { %v7798_v39 = vsub.f32 %v3184_v12, %v3192_v0  ;;  %v7833_v12 = vld [vmem:[#allocation18] ss:$0 sm:$0xff] }
0x3509   :  { %v1829_v15 = vadd.f32 %v7833_v12, %v7252_v4 }
0x350a   :  { %v3196_v10 = vmul.f32 %v7798_v39, %v7798_v39 }
0x350c   :  { %v3200_v29 = vsel %vm201_vm0, %v3196_v10, 0.0 }
0x350d   :  { %3201 = vadd.xlane.f32.xlu1 %v3200_v29  ;;  %v1831_v29 = vmax.f32 %v1829_v15, 0.0 }
0x3536   :  { %v4703_v19 = vpop.f32.mrb[112].mxu1 }
0x3537   :  { %v4710_v55 = vadd.f32 %v6269_v53, %v4703_v19  ;;  %v5909_v58 = vpop.f32.mrb[113].mxu1  ;;  %v3409_v19 = vadd.f32 %v7833_v12, %v7554_v30 }
0x3538   :  { %v4706_v59 = vpop.f32.mrb[114].mxu1 }
0x3539   :  { %v4711_v5 = vadd.f32 %v6269_v53, %v4706_v59  ;;  %v5910_v32 = vpop.f32.mrb[115].mxu1  ;;  %v4712_v31 = vmax.f32 %v4710_v55, 0.0  ;;  %v6270_v53 = vld [vmem:[%s8211_s12] sm:$0xf] }
0x353a   :  { %v7846_v55 = vrot.slane %v6270_v53, %v7027_v60  ;;  %v3411_v32 = vmax.f32 %v3409_v19, 0.0 }
0x353b   :  { %v4713_v35 = vmax.f32 %v4711_v5, 0.0 }
0x353c   :  { %v3413_v60 = vmax.f32 %v3411_v32, 1e-08 }
0x353d   :  { %v4714_v6 = vpack.c.bf16 %v4713_v35, %v4712_v31  ;;  %v7851_v31 = vrot.slane %v6270_v53, %v7030_v61 }
0x353e   :  { %v7806_v21 = vpop.f32.mrb[116].mxu1 }
0x353f   :  { %5916 = vmatmul.mubr.msk.bf16.vlgmr.msra.gmra.mrb[116].mxu0 %vm201_vm0, %v4714_v6  ;;  %v7809_v62 = vpop.f32.mrb[117].mxu1 }
0x3540   :  { %5984 = vmatpush3.bf16.msra.mxu0 %v7190_v63  ;;  %5938 = vmatprep.mubr.msk.f32.mxu0 %vm201_vm0, %v4905_v48  ;;  %v3193_v63 = vsub.f32 %v7770_v34, %v3191_v2 }
0x3541   :  { %5986 = vmatprep.subr.bf16.mxu0 %v7202_v22 }
0x3542   :  { %v3195_v7 = vmul.f32 %v3193_v63, %v3193_v63 }
0x3544   :  { %5988 = vmatpush3.bf16.msra.mxu0 %v7202_v22  ;;  %v3197_v57 = vsel %vm201_vm0, %v3195_v7, 0.0 }
0x3547   :  { %5939 = vmatmul.mubr.msk.f32.vlgmr.msra.gmra.mrb[120].mxu0 %vm201_vm0, %v4907_v8  ;;  %v1830_v8 = vadd.f32 %v7250_v3, %v7833_v12  ;;  %v1833_v3 = vmax.f32 %v1831_v29, 1e-08 }
0x3549   :  { %v1832_v10 = vmax.f32 %v1830_v8, 0.0 }
0x354b   :  { %v1834_v59 = vmax.f32 %v1832_v10, 1e-08 }
0x354d   :  { %v1836_v6 = vmin.f32 %v1834_v59, 1.0 }
0x359a   :  { %v3202_v20 = vpop.xlane.xlu1 %3201 }
0x359b   :  { %v3204_v9 = vmul.f32 0.03125, %v3202_v20  ;;  %v3410_v20 = vadd.f32 %v7552_v38, %v7833_v12 }
0x359d   :  { %v3206_v56 = vadd.f32 1e-05, %v3204_v9 }
0x359f   :  { %6157 = vrsqrt.f32 %v3206_v56 }
0x35a9   :  { %v6158_v0 = vpop.eup %6157 }
0x35aa   :  { %v3210_v58 = vmul.f32 %v6158_v0, %v7798_v39 }
0x35ac   :  { %v3212_v30 = vmul.f32 %v3210_v58, %v7846_v55 }
0x35ae   :  { %v3214_v39 = vadd.f32 %v3212_v30, %v7851_v31  ;;  %v7908_v30 = vround.rtne.f32 %v6809_v14 }
0x35b0   :  { %v1844_v14 = vadd.f32 0.5, %v7908_v30 }
0x3612   :  { %v4752_v26 = vpop.f32.mrb[116].mxu0 }
0x3613   :  { %v4759_v16 = vadd.f32 %v7765_v54, %v4752_v26  ;;  %v5917_v37 = vpop.f32.mrb[117].mxu0  ;;  %v1835_v26 = vmin.f32 %v1833_v3, 1.0 }
0x3614   :  { %v4755_v33 = vpop.f32.mrb[118].mxu0 }
0x3615   :  { %v4761_v13 = vadd.f32 %v4759_v16, %v4663_v45  ;;  %v4760_v44 = vadd.f32 %v7765_v54, %v4755_v33  ;;  %v5918_v1 = vpop.f32.mrb[119].mxu0  ;;  %v5236_v16 = vld [vmem:[#allocation17] ss:$0 sm:$0xff]  ;;  %v3415_v33 = vmin.f32 %v3413_v60, 1.0 }
0x3616   :  { %v1737_v61 = vadd.f32 %v7204_v23, %v5236_v16  ;;  %v3323_v1 = vadd.f32 %v7502_v50, %v5236_v16  ;;  %v4901_v23 = vadd.f32 %v7806_v21, %v5236_v16 }
0x3617   :  { %v4762_v41 = vadd.f32 %v4760_v44, %v4664_v52  ;;  %v4763_v51 = vsel %vm201_vm0, %v4761_v13, 0.0  ;;  %v1736_v44 = vadd.f32 %v5236_v16, %v7207_v27  ;;  %v4900_v27 = vadd.f32 %v5236_v16, %v7809_v62 }
0x3618   :  { %4764 = vadd.xlane.f32.xlu0 %v4763_v51  ;;  %v5989_v62 = vround.rtne.f32 %v6802_v11 }
0x3619   :  { %v4766_v18 = vsel %vm201_vm0, %v4762_v41, 0.0 }
0x361a   :  { %v7820_v22 = vpop.f32.mrb[120].mxu0  ;;  %v1843_v3 = vadd.f32 0.5, %v5989_v62 }
0x361b   :  { %v4978_v49 = vpop.f32.mrb[121].mxu0  ;;  %v4988_v56 = vadd.f32 %v7820_v22, %v7833_v12 }
0x361c   :  { %4767 = vadd.xlane.f32.xlu0 %v4766_v18  ;;  %v4987_v4 = vadd.f32 %v7833_v12, %v4978_v49 }
0x361e   :  { %v4989_v2 = vmax.f32 %v4987_v4, 0.0 }
0x3620   :  { %3198 = vadd.xlane.f32.xlu0 %v3197_v57 }
0x36a5   :  { %v4765_v54 = vpop.xlane.xlu0 %4764 }
0x36a6   :  { %v4769_v46 = vmul.f32 0.03125, %v4765_v54 }
0x36a8   :  { %v7824_v34 = vsub.f32 %v4761_v13, %v4769_v46  ;;  %v4991_v13 = vmax.f32 %v4989_v2, 1e-08  ;;  %v3412_v46 = vmax.f32 %v3410_v20, 0.0 }
0x36a9   :  { %v4768_v36 = vpop.xlane.xlu0 %4767 }
0x36aa   :  { %v4770_v43 = vmul.f32 0.03125, %v4768_v36  ;;  %v4773_v47 = vmul.f32 %v7824_v34, %v7824_v34  ;;  %v3414_v11 = vmax.f32 %v3412_v46, 1e-08 }
0x36ac   :  { %v7828_v25 = vsub.f32 %v4762_v41, %v4770_v43  ;;  %v4775_v45 = vsel %vm201_vm0, %v4773_v47, 0.0  ;;  %v3322_v41 = vadd.f32 %v5236_v16, %v7505_v17  ;;  %v3416_v22 = vmin.f32 %v3414_v11, 1.0 }
0x36ad   :  { %4776 = vadd.xlane.f32.xlu0 %v4775_v45  ;;  %v3199_v52 = vpop.xlane.xlu0 %3198 }
0x36ae   :  { %v3203_v40 = vmul.f32 0.03125, %v3199_v52  ;;  %v4774_v24 = vmul.f32 %v7828_v25, %v7828_v25 }
0x36b0   :  { %v3205_v28 = vadd.f32 1e-05, %v3203_v40  ;;  %v4778_v48 = vsel %vm201_vm0, %v4774_v24, 0.0  ;;  %v4990_v40 = vmax.f32 %v4988_v56, 0.0 }
0x36b1   :  { %4779 = vadd.xlane.f32.xlu1 %v4778_v48 }
0x36b2   :  { %6159 = vrsqrt.f32 %v3205_v28  ;;  %v4992_v12 = vmax.f32 %v4990_v40, 1e-08 }
0x36b3   :  { %6161 = vrcp.f32 %v1836_v6 }
0x36b4   :  { %6163 = vrcp.f32 %v1835_v26  ;;  %v4994_v10 = vmin.f32 %v4992_v12, 1.0 }
0x36b5   :  { %6165 = vrcp.f32 %v3415_v33 }
0x36bc   :  { %v6160_v5 = vpop.eup %6159 }
0x36bd   :  { %v3209_v35 = vmul.f32 %v6160_v5, %v3193_v63  ;;  %v4993_v63 = vmin.f32 %v4991_v13, 1.0  ;;  %v6162_v51 = vpop.eup %6161  ;;  %v5240_v5 = vadd.f32 -0.5, %v5989_v62 }
0x36be   :  { %v6164_v49 = vpop.eup %6163  ;;  %v1842_v50 = vmul.f32 0.70710677, %v6162_v51 }
0x36bf   :  { %v3211_v42 = vmul.f32 %v3209_v35, %v7846_v55  ;;  %6167 = vrcp.f32 %v4993_v63  ;;  %v1840_v18 = vmul.f32 0.70710677, %v6164_v49  ;;  %v6166_v7 = vpop.eup %6165 }
0x36c0   :  { %v3420_v17 = vmul.f32 0.70710677, %v6166_v7 }
0x36c1   :  { %v3213_v37 = vadd.f32 %v3211_v42, %v7851_v31 }
0x36c2   :  { %3235 = vrot.lane.b32.xlu1 %v3214_v39, %s6504_s7 }
0x36c3   :  { %3233 = vrot.lane.b32.xlu0 %v3213_v37, %s6504_s7 }
0x36c6   :  { %1849 = vrot.lane.b32.xlu1 %v1737_v61, %s6504_s7  ;;  %v5241_v61 = vadd.f32 -0.5, %v7908_v30 }
0x36c7   :  { %1847 = vrot.lane.b32.xlu0 %v1736_v44, %s6504_s7 }
0x36c9   :  { %v6168_v57 = vpop.eup %6167 }
0x36ca   :  { %3429 = vrot.lane.b32.xlu1 %v3323_v1, %s6504_s7  ;;  %v4998_v21 = vmul.f32 0.70710677, %v6168_v57 }
0x36cb   :  { %3427 = vrot.lane.b32.xlu0 %v3322_v41, %s6504_s7 }
0x36ce   :  { %5007 = vrot.lane.b32.xlu1 %v4901_v23, %s6504_s7 }
0x36cf   :  { %5005 = vrot.lane.b32.xlu0 %v4900_v27, %s6504_s7 }
0x36d2   :  { %1859 = vrot.lane.b32.xlu1 %v1842_v50, %s6504_s7 }
0x36d3   :  { %1857 = vrot.lane.b32.xlu0 %v1840_v18, %s6504_s7 }
0x36d7   :  { %3437 = vrot.lane.b32.xlu0 %v3420_v17, %s6504_s7 }
0x36db   :  { %5015 = vrot.lane.b32.xlu0 %v4998_v21, %s6504_s7 }
0x36df   :  { %2004 = vrot.lane.b32.xlu0 %v5989_v62, %s6504_s7 }
0x373a   :  { %v4777_v9 = vpop.xlane.xlu0 %4776 }
0x373b   :  { %v4781_v54 = vmul.f32 0.03125, %v4777_v9 }
0x373d   :  { %v4783_v36 = vadd.f32 1e-05, %v4781_v54 }
0x373e   :  { %v4780_v43 = vpop.xlane.xlu1 %4779  ;;  %v3234_v47 = vpop.permute.xlu0 %3233 }
0x373f   :  { %6169 = vrsqrt.f32 %v4783_v36  ;;  %v4782_v45 = vmul.f32 0.03125, %v4780_v43  ;;  %v5991_v52 = vround.rtne.f32 %v3234_v47  ;;  %5273 = vst.msk [vmem:[%s8188_s23 + $0x20] sm:$0xff] %vm1988_vm3, %v3234_v47 }
0x3741   :  { %v4784_v38 = vadd.f32 1e-05, %v4782_v45  ;;  %3582 = vrot.lane.b32.xlu0 %v5991_v52, %s6504_s7  ;;  %v3423_v33 = vadd.f32 0.5, %v5991_v52  ;;  %v5267_v7 = vadd.f32 -0.5, %v5991_v52 }
0x3742   :  { %v3236_v24 = vpop.permute.xlu1 %3235  ;;  %v1848_v28 = vpop.permute.xlu0 %1847 }
0x3743   :  { %6171 = vrsqrt.f32 %v4784_v38  ;;  %5274 = vst.msk [vmem:[%s8188_s23 + $0x30] sm:$0xff] %vm1988_vm3, %v3236_v24  ;;  %v7890_v48 = vround.rtne.f32 %v3236_v24  ;;  %v1853_v42 = vsub.f32 %v1843_v3, %v1848_v28  ;;  %v1913_v26 = vsub.f32 %v5240_v5, %v1848_v28 }
0x3744   :  { %6173 = vrcp.f32 %v3416_v22 }
0x3745   :  { %v7893_v29 = vadd.f32 0.5, %v7890_v48  ;;  %v7896_v19 = vadd.f32 -0.5, %v7890_v48  ;;  %6175 = vrcp.f32 %v4994_v10 }
0x3746   :  { %v1850_v8 = vpop.permute.xlu1 %1849  ;;  %v3428_v15 = vpop.permute.xlu0 %3427 }
0x3747   :  { %v1854_v63 = vsub.f32 %v1844_v14, %v1850_v8  ;;  %v1914_v41 = vsub.f32 %v5241_v61, %v1850_v8  ;;  %v3493_v20 = vsub.f32 %v5267_v7, %v3428_v15 }
0x3749   :  { %v6170_v0 = vpop.eup %6169 }
0x374a   :  { %v7898_v53 = vpop.permute.xlu1 %3429  ;;  %v7900_v58 = vpop.permute.xlu0 %5005  ;;  %v4787_v59 = vmul.f32 %v6170_v0, %v7824_v34 }
0x374b   :  { %v3434_v32 = vsub.f32 %v7893_v29, %v7898_v53  ;;  %v3494_v4 = vsub.f32 %v7896_v19, %v7898_v53 }
0x374c   :  { %v4789_v35 = vmul.f32 %v4787_v59, %v7846_v55 }
0x374d   :  { %v6172_v6 = vpop.eup %6171 }
0x374e   :  { %v7911_v60 = vpop.permute.xlu1 %5007  ;;  %v1858_v34 = vpop.permute.xlu0 %1857  ;;  %v4791_v2 = vadd.f32 %v4789_v35, %v7851_v31  ;;  %v4788_v39 = vmul.f32 %v6172_v6, %v7828_v25  ;;  %v3433_v25 = vsub.f32 %v3423_v33, %v3428_v15 }
0x374f   :  { %v7915_v16 = vmul.f32 %v1858_v34, %v1853_v42  ;;  %v7917_v37 = vmul.f32 %v1913_v26, %v1858_v34  ;;  %v6174_v49 = vpop.eup %6173 }
0x3750   :  { %4811 = vrot.lane.b32.xlu1 %v4791_v2, %s6504_s7  ;;  %v4790_v13 = vmul.f32 %v4788_v39, %v7846_v55  ;;  %v3422_v46 = vmul.f32 0.70710677, %v6174_v49  ;;  %v6176_v56 = vpop.eup %6175 }
0x3751   :  { %v1865_v44 = vand.u32 2147483647, %v7915_v16  ;;  %v1917_v1 = vand.u32 2147483647, %v7917_v37  ;;  %v5000_v24 = vmul.f32 0.70710677, %v6176_v56 }
0x3752   :  { %v1860_v23 = vpop.permute.xlu1 %1859  ;;  %v3438_v51 = vpop.permute.xlu0 %3437  ;;  %v4792_v27 = vadd.f32 %v4790_v13, %v7851_v31  ;;  %vm1905_vm6 = vcmp.ge.f32.partialorder %v7915_v16, 0.0  ;;  %vm1957_vm7 = vcmp.ge.f32.partialorder %v7917_v37, 0.0 }
0x3753   :  { %v1867_v50 = vmul.f32 0.3275911, %v1865_v44  ;;  %v1919_v18 = vmul.f32 0.3275911, %v1917_v1  ;;  %v7926_v17 = vmul.f32 %v1860_v23, %v1854_v63  ;;  %v7928_v57 = vmul.f32 %v1914_v41, %v1860_v23 }
0x3754   :  { %v7930_v55 = vmul.f32 %v3438_v51, %v3433_v25  ;;  %4813 = vrot.lane.b32.xlu1 %v4792_v27, %s6504_s7  ;;  %v7938_v45 = vmul.f32 %v3493_v20, %v3438_v51  ;;  %v1893_v12 = vsub.f32 0.0, %v1865_v44  ;;  %v1945_v8 = vsub.f32 0.0, %v1917_v1 }
0x3755   :  { %v1869_v21 = vadd.f32 1.0, %v1867_v50  ;;  %v1921_v62 = vadd.f32 1.0, %v1919_v18  ;;  %v1866_v9 = vand.u32 2147483647, %v7926_v17  ;;  %v1918_v54 = vand.u32 2147483647, %v7928_v57 }
0x3756   :  { %v7935_v31 = vpop.permute.xlu0 %5015  ;;  %v3445_v36 = vand.u32 2147483647, %v7930_v55  ;;  %v3497_v22 = vand.u32 2147483647, %v7938_v45  ;;  %v1895_v59 = vmul.f32 %v1893_v12, %v1865_v44  ;;  %v1947_v35 = vmul.f32 %v1945_v8, %v1917_v1 }
0x3757   :  { %6177 = vrcp.f32 %v1869_v21  ;;  %v1868_v43 = vmul.f32 0.3275911, %v1866_v9  ;;  %v1920_v47 = vmul.f32 0.3275911, %v1918_v54  ;;  %v1894_v6 = vsub.f32 0.0, %v1866_v9 }
0x3758   :  { %6179 = vrcp.f32 %v1921_v62  ;;  %3439 = vrot.lane.b32.xlu1 %v3422_v46, %s6504_s7  ;;  %v3447_v52 = vmul.f32 0.3275911, %v3445_v36  ;;  %v3499_v15 = vmul.f32 0.3275911, %v3497_v22  ;;  %v1946_v26 = vsub.f32 0.0, %v1918_v54 }
0x3759   :  { %v1870_v11 = vadd.f32 1.0, %v1868_v43  ;;  %v1922_v40 = vadd.f32 1.0, %v1920_v47  ;;  %v3473_v2 = vsub.f32 0.0, %v3445_v36  ;;  %v1897_v39 = vmul.f32 1.442695, %v1895_v59 }
0x375a   :  { %v2005_v38 = vpop.permute.xlu0 %2004  ;;  %v3449_v28 = vadd.f32 1.0, %v3447_v52  ;;  %v3501_v0 = vadd.f32 1.0, %v3499_v15  ;;  %v1949_v33 = vmul.f32 1.442695, %v1947_v35  ;;  %v1896_v13 = vmul.f32 %v1894_v6, %v1866_v9 }
0x375b   :  { %2010 = vst.msk [vmem:[%s8188_s23 + $0x8] sm:$0xff] %vm201_vm0, %v2005_v38  ;;  %6181 = vrcp.f32 %v1870_v11  ;;  %v1948_v41 = vmul.f32 %v1946_v26, %v1918_v54  ;;  %v3475_v51 = vmul.f32 %v3473_v2, %v3445_v36  ;;  %v3525_v27 = vsub.f32 0.0, %v3497_v22 }
0x375c   :  { %5017 = vrot.lane.b32.xlu1 %v5000_v24, %s6504_s7  ;;  %6183 = vrcp.f32 %v1922_v40  ;;  %v1899_v7 = vmul.f32 1.442695, %v1896_v13  ;;  %vm1906_vm8 = vcmp.ge.f32.partialorder %v7926_v17, 0.0  ;;  %vm1958_vm9 = vcmp.ge.f32.partialorder %v7928_v57, 0.0 }
0x375d   :  { %6185 = vrcp.f32 %v3449_v28  ;;  %v1951_v9 = vmul.f32 1.442695, %v1948_v41  ;;  %v3477_v43 = vmul.f32 1.442695, %v3475_v51  ;;  %v3527_v47 = vmul.f32 %v3525_v27, %v3497_v22 }
0x375e   :  { %6187 = vrcp.f32 %v3501_v0  ;;  %vm3485_vm10 = vcmp.ge.f32.partialorder %v7930_v55, 0.0  ;;  %vm3537_vm11 = vcmp.ge.f32.partialorder %v7938_v45, 0.0 }
0x375f   :  { %6189 = vpow2.f32 %v1897_v39  ;;  %v3529_v22 = vmul.f32 1.442695, %v3527_v47 }
0x3760   :  { %2006 = vrot.lane.b32.xlu1 %v7908_v30, %s6504_s7  ;;  %6191 = vpow2.f32 %v1949_v33 }
0x3761   :  { %v6178_v10 = vpop.eup %6177  ;;  %6193 = vpow2.f32 %v1899_v7 }
0x3762   :  { %v7949_v3 = vpop.eup %6179  ;;  %v1875_v5 = vmul.f32 1.0614054, %v6178_v10  ;;  %6195 = vpow2.f32 %v1951_v9 }
0x3763   :  { %v1927_v42 = vmul.f32 1.0614054, %v7949_v3  ;;  %6197 = vpow2.f32 %v3477_v43 }
0x3764   :  { %v1877_v34 = vadd.f32 -1.4531521, %v1875_v5  ;;  %3584 = vrot.lane.b32.xlu1 %v7890_v48, %s6504_s7  ;;  %6199 = vpow2.f32 %v3529_v22 }
0x3765   :  { %v1929_v14 = vadd.f32 -1.4531521, %v1927_v42  ;;  %v7954_v61 = vpop.eup %6181 }
0x3766   :  { %v1879_v30 = vmul.f32 %v6178_v10, %v1877_v34  ;;  %v7956_v44 = vpop.eup %6183  ;;  %v1876_v63 = vmul.f32 1.0614054, %v7954_v61 }
0x3767   :  { %v1931_v1 = vmul.f32 %v7949_v3, %v1929_v14  ;;  %v1928_v23 = vmul.f32 1.0614054, %v7956_v44  ;;  %v7961_v50 = vpop.eup %6185 }
0x3768   :  { %v1881_v25 = vadd.f32 1.4214138, %v1879_v30  ;;  %v1878_v49 = vadd.f32 -1.4531521, %v1876_v63  ;;  %v3455_v54 = vmul.f32 1.0614054, %v7961_v50  ;;  %v7966_v46 = vpop.eup %6187 }
0x3769   :  { %v1933_v48 = vadd.f32 1.4214138, %v1931_v1  ;;  %v1930_v21 = vadd.f32 -1.4531521, %v1928_v23  ;;  %v3507_v28 = vmul.f32 1.0614054, %v7966_v46  ;;  %v6190_v39 = vpop.eup %6189 }
0x376a   :  { %v1883_v18 = vmul.f32 %v6178_v10, %v1881_v25  ;;  %v1880_v20 = vmul.f32 %v7954_v61, %v1878_v49  ;;  %v3457_v40 = vadd.f32 -1.4531521, %v3455_v54  ;;  %v6192_v13 = vpop.eup %6191 }
0x376b   :  { %v1935_v62 = vmul.f32 %v7949_v3, %v1933_v48  ;;  %v1932_v36 = vmul.f32 %v7956_v44, %v1930_v21  ;;  %v3509_v5 = vadd.f32 -1.4531521, %v3507_v28  ;;  %v6194_v7 = vpop.eup %6193 }
0x376c   :  { %v1885_v56 = vadd.f32 -0.28449672, %v1883_v18  ;;  %v1882_v11 = vadd.f32 1.4214138, %v1880_v20  ;;  %v3459_v15 = vmul.f32 %v7961_v50, %v3457_v40  ;;  %v6196_v9 = vpop.eup %6195 }
0x376d   :  { %v1937_v52 = vadd.f32 -0.28449672, %v1935_v62  ;;  %v1934_v24 = vadd.f32 1.4214138, %v1932_v36  ;;  %v3511_v2 = vmul.f32 %v7966_v46, %v3509_v5 }
0x376e   :  { %v1887_v38 = vmul.f32 %v6178_v10, %v1885_v56  ;;  %v1884_v8 = vmul.f32 %v7954_v61, %v1882_v11  ;;  %v3461_v42 = vadd.f32 1.4214138, %v3459_v15 }
0x376f   :  { %v1939_v12 = vmul.f32 %v7949_v3, %v1937_v52  ;;  %v1936_v59 = vmul.f32 %v7956_v44, %v1934_v24  ;;  %v3513_v41 = vadd.f32 1.4214138, %v3511_v2 }
0x3770   :  { %v1889_v0 = vadd.f32 0.2548296, %v1887_v38  ;;  %v1886_v6 = vadd.f32 -0.28449672, %v1884_v8  ;;  %v3463_v33 = vmul.f32 %v7961_v50, %v3461_v42  ;;  %v6198_v38 = vpop.eup %6197 }
0x3771   :  { %v1941_v35 = vadd.f32 0.2548296, %v1939_v12  ;;  %v1938_v34 = vadd.f32 -0.28449672, %v1936_v59  ;;  %v3515_v48 = vmul.f32 %v7966_v46, %v3513_v41  ;;  %v6200_v37 = vpop.eup %6199 }
0x3772   :  { %v1891_v26 = vmul.f32 %v6178_v10, %v1889_v0  ;;  %v1888_v30 = vmul.f32 %v7954_v61, %v1886_v6  ;;  %v3465_v51 = vadd.f32 -0.28449672, %v3463_v33 }
0x3773   :  { %v1943_v14 = vmul.f32 %v7949_v3, %v1941_v35  ;;  %v1940_v63 = vmul.f32 %v7956_v44, %v1938_v34  ;;  %v3517_v20 = vadd.f32 -0.28449672, %v3515_v48 }
0x3774   :  { %v1901_v1 = vmul.f32 %v6190_v39, %v1891_v26  ;;  %v1890_v23 = vadd.f32 0.2548296, %v1888_v30  ;;  %v3467_v18 = vmul.f32 %v7961_v50, %v3465_v51 }
0x3775   :  { %v1953_v25 = vmul.f32 %v6192_v13, %v1943_v14  ;;  %v1942_v27 = vadd.f32 0.2548296, %v1940_v63  ;;  %v3519_v52 = vmul.f32 %v7966_v46, %v3517_v20 }
0x3776   :  { %v1903_v10 = vsub.f32 1.0, %v1901_v1  ;;  %v1892_v3 = vmul.f32 %v7954_v61, %v1890_v23  ;;  %v3469_v36 = vadd.f32 0.2548296, %v3467_v18 }
0x3777   :  { %v1955_v49 = vsub.f32 1.0, %v1953_v25  ;;  %v1944_v62 = vmul.f32 %v7956_v44, %v1942_v27  ;;  %v3521_v28 = vadd.f32 0.2548296, %v3519_v52 }
0x3778   :  { %v1907_v21 = vsub.f32 0.0, %v1903_v10  ;;  %v1902_v56 = vmul.f32 %v6194_v7, %v1892_v3  ;;  %v3471_v40 = vmul.f32 %v7961_v50, %v3469_v36 }
0x3779   :  { %v1959_v54 = vsub.f32 0.0, %v1955_v49  ;;  %v1954_v47 = vmul.f32 %v6196_v9, %v1944_v62  ;;  %v3523_v0 = vmul.f32 %v7966_v46, %v3521_v28 }
0x377a   :  { %v1909_v43 = vsel %vm1905_vm6, %v1903_v10, %v1907_v21  ;;  %v1904_v11 = vsub.f32 1.0, %v1902_v56  ;;  %v3481_v8 = vmul.f32 %v6198_v38, %v3471_v40 }
0x377b   :  { %v1961_v61 = vsel %vm1957_vm7, %v1955_v49, %v1959_v54  ;;  %v1956_v44 = vsub.f32 1.0, %v1954_v47  ;;  %v3533_v35 = vmul.f32 %v6200_v37, %v3523_v0 }
0x377c   :  { %v1963_v24 = vsub.f32 %v1909_v43, %v1961_v61  ;;  %v1908_v12 = vsub.f32 0.0, %v1904_v11  ;;  %v3483_v5 = vsub.f32 1.0, %v3481_v8 }
0x377d   :  { %v1960_v15 = vsub.f32 0.0, %v1956_v44  ;;  %v3535_v26 = vsub.f32 1.0, %v3533_v35 }
0x377e   :  { %v1965_v16 = vmul.f32 0.5, %v1963_v24  ;;  %v1910_v59 = vsel %vm1906_vm8, %v1904_v11, %v1908_v12  ;;  %v3487_v42 = vsub.f32 0.0, %v3483_v5 }
0x377f   :  { %v1962_v22 = vsel %vm1958_vm9, %v1956_v44, %v1960_v15  ;;  %v3539_v39 = vsub.f32 0.0, %v3535_v26 }
0x3780   :  { %v1967_v50 = vmax.f32 %v1965_v16, 0.0  ;;  %v1964_v6 = vsub.f32 %v1910_v59, %v1962_v22  ;;  %v3489_v17 = vsel %vm3485_vm10, %v3483_v5, %v3487_v42 }
0x3781   :  { %v3541_v57 = vsel %vm3537_vm11, %v3535_v26, %v3539_v39 }
0x3782   :  { %1993 = vrot.lane.b32.xlu0 %v1967_v50, %s6518_s25  ;;  %v1969_v34 = vadd.f32 1e-08, %v1967_v50  ;;  %v1966_v2 = vmul.f32 0.5, %v1964_v6  ;;  %v3543_v14 = vsub.f32 %v3489_v17, %v3541_v57 }
0x3784   :  { %6201 = vlog2.f32 %v1969_v34  ;;  %v1968_v46 = vmax.f32 %v1966_v2, 0.0  ;;  %v3545_v33 = vmul.f32 0.5, %v3543_v14 }
0x3786   :  { %1995 = vrot.lane.b32.xlu1 %v1968_v46, %s6518_s25  ;;  %v1970_v30 = vadd.f32 1e-08, %v1968_v46  ;;  %v3547_v13 = vmax.f32 %v3545_v33, 0.0 }
0x3788   :  { %6203 = vlog2.f32 %v1970_v30  ;;  %v3549_v1 = vadd.f32 1e-08, %v3547_v13 }
0x378a   :  { %6205 = vlog2.f32 %v3549_v1 }
0x378e   :  { %v6202_v63 = vpop.eup %6201 }
0x378f   :  { %v1972_v41 = vmul.f32 0.6931472, %v6202_v63 }
0x3791   :  { %v1975_v25 = vsub.f32 0.0, %v1972_v41 }
0x3792   :  { %v6204_v55 = vpop.eup %6203 }
0x3793   :  { %v1977_v23 = vmul.f32 1.442695, %v1975_v25  ;;  %v1974_v51 = vmul.f32 0.6931472, %v6204_v55 }
0x3794   :  { %v6206_v49 = vpop.eup %6205 }
0x3795   :  { %v1979_v10 = vmax.f32 %v1977_v23, 0.0  ;;  %v1976_v27 = vsub.f32 0.0, %v1974_v51  ;;  %v3552_v18 = vmul.f32 0.6931472, %v6206_v49 }
0x3797   :  { %v1981_v45 = vmin.f32 %v1979_v10, 50.0  ;;  %v1978_v48 = vmul.f32 1.442695, %v1976_v27  ;;  %v3555_v21 = vsub.f32 0.0, %v3552_v18 }
0x3799   :  { %2014 = vrot.lane.b32.xlu0 %v1981_v45, %s6517_s6  ;;  %v1980_v3 = vmax.f32 %v1978_v48, 0.0  ;;  %v3557_v62 = vmul.f32 1.442695, %v3555_v21 }
0x379b   :  { %v1982_v7 = vmin.f32 %v1980_v3, 50.0  ;;  %v3559_v20 = vmax.f32 %v3557_v62, 0.0 }
0x379d   :  { %3572 = vrot.lane.b32.xlu0 %v3547_v13, %s6518_s25  ;;  %2016 = vrot.lane.b32.xlu1 %v1982_v7, %s6517_s6  ;;  %v3561_v9 = vmin.f32 %v3559_v20, 50.0 }
0x37a1   :  { %3592 = vrot.lane.b32.xlu0 %v3561_v9, %s6517_s6 }
0x37b3   :  { %v3583_v54 = vpop.permute.xlu0 %3582 }
0x37b4   :  { %5277 = vst.msk [vmem:[%s8188_s23 + $0x28] sm:$0xff] %vm201_vm0, %v3583_v54 }
0x37c2   :  { %v4812_v56 = vpop.permute.xlu1 %4811 }
0x37c3   :  { %v5993_v36 = vround.rtne.f32 %v4812_v56  ;;  %5312 = vst.msk [vmem:[%s8188_s23 + $0x40] sm:$0xff] %vm1988_vm3, %v4812_v56 }
0x37c5   :  { %v5001_v43 = vadd.f32 0.5, %v5993_v36  ;;  %v5306_v47 = vadd.f32 -0.5, %v5993_v36  ;;  %5160 = vrot.lane.b32.xlu0 %v5993_v36, %s6504_s7 }
0x37c6   :  { %v4814_v52 = vpop.permute.xlu1 %4813 }
0x37c7   :  { %v5011_v61 = vsub.f32 %v5001_v43, %v7900_v58  ;;  %v5071_v11 = vsub.f32 %v5306_v47, %v7900_v58  ;;  %v8009_v40 = vround.rtne.f32 %v4814_v52  ;;  %5313 = vst.msk [vmem:[%s8188_s23 + $0x50] sm:$0xff] %vm1988_vm3, %v4814_v52 }
0x37c9   :  { %v8016_v38 = vmul.f32 %v7935_v31, %v5011_v61  ;;  %v8019_v24 = vmul.f32 %v5071_v11, %v7935_v31  ;;  %v5002_v28 = vadd.f32 0.5, %v8009_v40  ;;  %v5307_v59 = vadd.f32 -0.5, %v8009_v40 }
0x37ca   :  { %v3440_v44 = vpop.permute.xlu1 %3439 }
0x37cb   :  { %v5023_v12 = vand.u32 2147483647, %v8016_v38  ;;  %v5075_v58 = vand.u32 2147483647, %v8019_v24  ;;  %v8027_v8 = vmul.f32 %v3440_v44, %v3434_v32  ;;  %v8032_v16 = vmul.f32 %v3494_v4, %v3440_v44 }
0x37cc   :  { %v5012_v29 = vsub.f32 %v5002_v28, %v7911_v60  ;;  %v5072_v53 = vsub.f32 %v5307_v59, %v7911_v60  ;;  %vm5063_vm13 = vcmp.ge.f32.partialorder %v8016_v38, 0.0  ;;  %vm5115_vm14 = vcmp.ge.f32.partialorder %v8019_v24, 0.0 }
0x37cd   :  { %v5025_v15 = vmul.f32 0.3275911, %v5023_v12  ;;  %v5077_v31 = vmul.f32 0.3275911, %v5075_v58  ;;  %v3446_v0 = vand.u32 2147483647, %v8027_v8 }
0x37ce   :  { %v3498_v37 = vand.u32 2147483647, %v8032_v16  ;;  %v5018_v5 = vpop.permute.xlu1 %5017  ;;  %v5051_v17 = vsub.f32 0.0, %v5023_v12  ;;  %v5103_v57 = vsub.f32 0.0, %v5075_v58  ;;  %vm3486_vm15 = vcmp.ge.f32.partialorder %v8027_v8, 0.0 }
0x37cf   :  { %v5027_v22 = vadd.f32 1.0, %v5025_v15  ;;  %v5079_v35 = vadd.f32 1.0, %v5077_v31  ;;  %v3448_v32 = vmul.f32 0.3275911, %v3446_v0  ;;  %v8038_v6 = vmul.f32 %v5018_v5, %v5012_v29 }
0x37d0   :  { %v3500_v50 = vmul.f32 0.3275911, %v3498_v37  ;;  %v8046_v34 = vmul.f32 %v5072_v53, %v5018_v5  ;;  %v5053_v30 = vmul.f32 %v5051_v17, %v5023_v12  ;;  %v5105_v1 = vmul.f32 %v5103_v57, %v5075_v58 }
0x37d1   :  { %6207 = vrcp.f32 %v5027_v22  ;;  %v3450_v19 = vadd.f32 1.0, %v3448_v32  ;;  %v5024_v26 = vand.u32 2147483647, %v8038_v6  ;;  %v3474_v63 = vsub.f32 0.0, %v3446_v0 }
0x37d2   :  { %6209 = vrcp.f32 %v5079_v35  ;;  %v2007_v4 = vpop.permute.xlu1 %2006  ;;  %v3502_v42 = vadd.f32 1.0, %v3500_v50  ;;  %v5076_v39 = vand.u32 2147483647, %v8046_v34  ;;  %v3526_v55 = vsub.f32 0.0, %v3498_v37 }
0x37d3   :  { %2011 = vst.msk [vmem:[%s8188_s23 + $0x18] sm:$0xff] %vm201_vm0, %v2007_v4  ;;  %6211 = vrcp.f32 %v3450_v19  ;;  %v5026_v2 = vmul.f32 0.3275911, %v5024_v26  ;;  %v5055_v51 = vmul.f32 1.442695, %v5053_v30  ;;  %v3476_v48 = vmul.f32 %v3474_v63, %v3446_v0 }
0x37d4   :  { %6213 = vrcp.f32 %v3502_v42  ;;  %v5078_v14 = vmul.f32 0.3275911, %v5076_v39  ;;  %v5107_v45 = vmul.f32 1.442695, %v5105_v1  ;;  %v5052_v49 = vsub.f32 0.0, %v5024_v26 }
0x37d5   :  { %v5028_v60 = vadd.f32 1.0, %v5026_v2  ;;  %v3528_v62 = vmul.f32 %v3526_v55, %v3498_v37  ;;  %v5104_v20 = vsub.f32 0.0, %v5076_v39  ;;  %v3479_v47 = vmul.f32 1.442695, %v3476_v48 }
0x37d6   :  { %v3585_v46 = vpop.permute.xlu1 %3584  ;;  %v5080_v33 = vadd.f32 1.0, %v5078_v14  ;;  %v5054_v52 = vmul.f32 %v5052_v49, %v5024_v26  ;;  %vm3538_vm1 = vcmp.ge.f32.partialorder %v8032_v16, 0.0  ;;  %vm5064_vm3 = vcmp.ge.f32.partialorder %v8038_v6, 0.0 }
0x37d7   :  { %5278 = vst.msk [vmem:[%s8188_s23 + $0x38] sm:$0xff] %vm201_vm0, %v3585_v46  ;;  %6215 = vrcp.f32 %v5028_v60  ;;  %v3531_v58 = vmul.f32 1.442695, %v3528_v62  ;;  %v5106_v15 = vmul.f32 %v5104_v20, %v5076_v39  ;;  %vm5116_vm4 = vcmp.ge.f32.partialorder %v8046_v34, 0.0 }
0x37d8   :  { %6217 = vrcp.f32 %v5080_v33  ;;  %v5057_v35 = vmul.f32 1.442695, %v5054_v52 }
0x37d9   :  { %6219 = vpow2.f32 %v5055_v51  ;;  %v5109_v26 = vmul.f32 1.442695, %v5106_v15 }
0x37da   :  { %6221 = vpow2.f32 %v5107_v45 }
0x37db   :  { %v8053_v13 = vpop.eup %6207  ;;  %6223 = vpow2.f32 %v3479_v47 }
0x37dc   :  { %v8055_v41 = vpop.eup %6209  ;;  %v5033_v25 = vmul.f32 1.0614054, %v8053_v13  ;;  %6225 = vpow2.f32 %v3531_v58 }
0x37dd   :  { %v5085_v23 = vmul.f32 1.0614054, %v8055_v41  ;;  %v8059_v27 = vpop.eup %6211  ;;  %6227 = vpow2.f32 %v5057_v35 }
0x37de   :  { %v5035_v10 = vadd.f32 -1.4531521, %v5033_v25  ;;  %v3456_v18 = vmul.f32 1.0614054, %v8059_v27  ;;  %v8063_v21 = vpop.eup %6213  ;;  %6229 = vpow2.f32 %v5109_v26 }
0x37df   :  { %v5087_v3 = vadd.f32 -1.4531521, %v5085_v23  ;;  %v3508_v56 = vmul.f32 1.0614054, %v8063_v21 }
0x37e0   :  { %v5037_v7 = vmul.f32 %v8053_v13, %v5035_v10  ;;  %v3458_v54 = vadd.f32 -1.4531521, %v3456_v18 }
0x37e1   :  { %v5089_v9 = vmul.f32 %v8055_v41, %v5087_v3  ;;  %v8067_v43 = vpop.eup %6215  ;;  %v3510_v44 = vadd.f32 -1.4531521, %v3508_v56 }
0x37e2   :  { %v5039_v36 = vadd.f32 1.4214138, %v5037_v7  ;;  %v3460_v11 = vmul.f32 %v8059_v27, %v3458_v54  ;;  %v5034_v28 = vmul.f32 1.0614054, %v8067_v43  ;;  %v8073_v0 = vpop.eup %6217 }
0x37e3   :  { %v5091_v61 = vadd.f32 1.4214138, %v5089_v9  ;;  %v3512_v59 = vmul.f32 %v8063_v21, %v3510_v44  ;;  %v5086_v29 = vmul.f32 1.0614054, %v8073_v0  ;;  %v6220_v30 = vpop.eup %6219 }
0x37e4   :  { %v5041_v12 = vmul.f32 %v8053_v13, %v5039_v36  ;;  %v3462_v37 = vadd.f32 1.4214138, %v3460_v11  ;;  %v5036_v5 = vadd.f32 -1.4531521, %v5034_v28  ;;  %v6222_v55 = vpop.eup %6221 }
0x37e5   :  { %v5093_v31 = vmul.f32 %v8055_v41, %v5091_v61  ;;  %v3514_v19 = vadd.f32 1.4214138, %v3512_v59  ;;  %v5088_v42 = vadd.f32 -1.4531521, %v5086_v29 }
0x37e6   :  { %v5043_v22 = vadd.f32 -0.28449672, %v5041_v12  ;;  %v3464_v50 = vmul.f32 %v8059_v27, %v3462_v37  ;;  %v5038_v53 = vmul.f32 %v8067_v43, %v5036_v5 }
0x37e7   :  { %v5095_v32 = vadd.f32 -0.28449672, %v5093_v31  ;;  %v3516_v39 = vmul.f32 %v8063_v21, %v3514_v19  ;;  %v5090_v60 = vmul.f32 %v8073_v0, %v5088_v42 }
0x37e8   :  { %v5045_v4 = vmul.f32 %v8053_v13, %v5043_v22  ;;  %v3466_v17 = vadd.f32 -0.28449672, %v3464_v50  ;;  %v5040_v46 = vadd.f32 1.4214138, %v5038_v53 }
0x37e9   :  { %v5097_v2 = vmul.f32 %v8055_v41, %v5095_v32  ;;  %v3518_v1 = vadd.f32 -0.28449672, %v3516_v39  ;;  %v5092_v23 = vadd.f32 1.4214138, %v5090_v60 }
0x37ea   :  { %v5047_v57 = vadd.f32 0.2548296, %v5045_v4  ;;  %v3468_v33 = vmul.f32 %v8059_v27, %v3466_v17  ;;  %v5042_v63 = vmul.f32 %v8067_v43, %v5040_v46 }
0x37eb   :  { %v5099_v14 = vadd.f32 0.2548296, %v5097_v2  ;;  %v3520_v45 = vmul.f32 %v8063_v21, %v3518_v1  ;;  %v5094_v3 = vmul.f32 %v8073_v0, %v5092_v23 }
0x37ec   :  { %v5049_v25 = vmul.f32 %v8053_v13, %v5047_v57  ;;  %v3470_v10 = vadd.f32 0.2548296, %v3468_v33  ;;  %v5044_v48 = vadd.f32 -0.28449672, %v5042_v63  ;;  %v6224_v13 = vpop.eup %6223 }
0x37ed   :  { %v5101_v51 = vmul.f32 %v8055_v41, %v5099_v14  ;;  %v3522_v62 = vadd.f32 0.2548296, %v3520_v45  ;;  %v5096_v54 = vadd.f32 -0.28449672, %v5094_v3  ;;  %v6226_v61 = vpop.eup %6225 }
0x37ee   :  { %v5059_v49 = vmul.f32 %v6220_v30, %v5049_v25  ;;  %v3472_v7 = vmul.f32 %v8059_v27, %v3470_v10  ;;  %v5046_v20 = vmul.f32 %v8067_v43, %v5044_v48  ;;  %v6228_v31 = vpop.eup %6227 }
0x37ef   :  { %v5111_v18 = vmul.f32 %v6222_v55, %v5101_v51  ;;  %v3524_v41 = vmul.f32 %v8063_v21, %v3522_v62  ;;  %v5098_v11 = vmul.f32 %v8073_v0, %v5096_v54  ;;  %v6230_v24 = vpop.eup %6229 }
0x37f0   :  { %v5061_v9 = vsub.f32 1.0, %v5059_v49  ;;  %v3482_v36 = vmul.f32 %v6224_v13, %v3472_v7  ;;  %v5048_v47 = vadd.f32 0.2548296, %v5046_v20 }
0x37f1   :  { %v5113_v56 = vsub.f32 1.0, %v5111_v18  ;;  %v3534_v28 = vmul.f32 %v6226_v61, %v3524_v41  ;;  %v5100_v37 = vadd.f32 0.2548296, %v5098_v11 }
0x37f2   :  { %v5065_v52 = vsub.f32 0.0, %v5061_v9  ;;  %v3484_v44 = vsub.f32 1.0, %v3482_v36  ;;  %v5050_v12 = vmul.f32 %v8067_v43, %v5048_v47 }
0x37f3   :  { %v5117_v27 = vsub.f32 0.0, %v5113_v56  ;;  %v3536_v5 = vsub.f32 1.0, %v3534_v28  ;;  %v5102_v35 = vmul.f32 %v8073_v0, %v5100_v37 }
0x37f4   :  { %v1994_v58 = vpop.permute.xlu0 %1993  ;;  %v5067_v15 = vsel %vm5063_vm13, %v5061_v9, %v5065_v52  ;;  %v3488_v59 = vsub.f32 0.0, %v3484_v44  ;;  %v5060_v38 = vmul.f32 %v6228_v31, %v5050_v12 }
0x37f5   :  { %2000 = vst.msk [vmem:[%s8188_s23] sm:$0xff] %vm1999_vm12, %v1994_v58  ;;  %v5119_v21 = vsel %vm5115_vm14, %v5113_v56, %v5117_v27  ;;  %v3540_v29 = vsub.f32 0.0, %v3536_v5  ;;  %v5112_v19 = vmul.f32 %v6230_v24, %v5102_v35 }
0x37f6   :  { %v5121_v22 = vsub.f32 %v5067_v15, %v5119_v21  ;;  %v3490_v43 = vsel %vm3486_vm15, %v3484_v44, %v3488_v59  ;;  %v5062_v32 = vsub.f32 1.0, %v5060_v38 }
0x37f7   :  { %v3542_v4 = vsel %vm3538_vm1, %v3536_v5, %v3540_v29  ;;  %v5114_v8 = vsub.f32 1.0, %v5112_v19 }
0x37f8   :  { %v5123_v50 = vmul.f32 0.5, %v5121_v22  ;;  %v1996_v53 = vpop.permute.xlu1 %1995  ;;  %v5066_v42 = vsub.f32 0.0, %v5062_v32  ;;  %v3544_v2 = vsub.f32 %v3490_v43, %v3542_v4 }
0x37f9   :  { %2001 = vst.msk [vmem:[%s8188_s23 + $0x10] sm:$0xff] %vm1999_vm12, %v1996_v53  ;;  %v5118_v16 = vsub.f32 0.0, %v5114_v8 }
0x37fa   :  { %v5125_v26 = vmax.f32 %v5123_v50, 0.0  ;;  %v3546_v17 = vmul.f32 0.5, %v3544_v2  ;;  %v5068_v39 = vsel %vm5064_vm3, %v5062_v32, %v5066_v42 }
0x37fb   :  { %v5120_v46 = vsel %vm5116_vm4, %v5114_v8, %v5118_v16 }
0x37fc   :  { %5150 = vrot.lane.b32.xlu0 %v5125_v26, %s6518_s25  ;;  %v5127_v0 = vadd.f32 1e-08, %v5125_v26  ;;  %v3548_v57 = vmax.f32 %v3546_v17, 0.0  ;;  %v5122_v60 = vsub.f32 %v5068_v39, %v5120_v46 }
0x37fe   :  { %6231 = vlog2.f32 %v5127_v0  ;;  %3574 = vrot.lane.b32.xlu1 %v3548_v57, %s6518_s25  ;;  %v3550_v14 = vadd.f32 1e-08, %v3548_v57  ;;  %v5124_v30 = vmul.f32 0.5, %v5122_v60 }
0x3800   :  { %6233 = vlog2.f32 %v3550_v14  ;;  %v5126_v33 = vmax.f32 %v5124_v30, 0.0 }
0x3802   :  { %v5128_v1 = vadd.f32 1e-08, %v5126_v33 }
0x3804   :  { %6235 = vlog2.f32 %v5128_v1 }
0x3808   :  { %v6232_v6 = vpop.eup %6231 }
0x3809   :  { %v5130_v63 = vmul.f32 0.6931472, %v6232_v6 }
0x380a   :  { %v6234_v34 = vpop.eup %6233 }
0x380b   :  { %v2015_v25 = vpop.permute.xlu0 %2014  ;;  %v5133_v55 = vsub.f32 0.0, %v5130_v63  ;;  %v3554_v51 = vmul.f32 0.6931472, %v6234_v34 }
0x380c   :  { %2020 = vst.msk [vmem:[%s8188_s23 + $0x8] sm:$0xff] %vm1985_vm2, %v2015_v25 }
0x380d   :  { %v5135_v23 = vmul.f32 1.442695, %v5133_v55  ;;  %v3556_v49 = vsub.f32 0.0, %v3554_v51 }
0x380e   :  { %v6236_v18 = vpop.eup %6235 }
0x380f   :  { %v3573_v10 = vpop.permute.xlu0 %3572  ;;  %v5137_v45 = vmax.f32 %v5135_v23, 0.0  ;;  %v2017_v48 = vpop.permute.xlu1 %2016  ;;  %v3558_v7 = vmul.f32 1.442695, %v3556_v49  ;;  %v5132_v62 = vmul.f32 0.6931472, %v6236_v18 }
0x3810   :  { %5275 = vst.msk [vmem:[%s8188_s23 + $0x20] sm:$0xff] %vm1999_vm12, %v3573_v10 }
0x3811   :  { %2021 = vst.msk [vmem:[%s8188_s23 + $0x18] sm:$0xff] %vm1985_vm2, %v2017_v48  ;;  %v5139_v3 = vmin.f32 %v5137_v45, 50.0  ;;  %v3560_v20 = vmax.f32 %v3558_v7, 0.0  ;;  %v5134_v54 = vsub.f32 0.0, %v5132_v62 }
0x3813   :  { %5170 = vrot.lane.b32.xlu0 %v5139_v3, %s6517_s6  ;;  %v3593_v9 = vpop.permute.xlu0 %3592  ;;  %v3562_v13 = vmin.f32 %v3560_v20, 50.0  ;;  %v5136_v56 = vmul.f32 1.442695, %v5134_v54 }
0x3814   :  { %5279 = vst.msk [vmem:[%s8188_s23 + $0x28] sm:$0xff] %vm1985_vm2, %v3593_v9 }
0x3815   :  { %3594 = vrot.lane.b32.xlu1 %v3562_v13, %s6517_s6  ;;  %v5138_v36 = vmax.f32 %v5136_v56, 0.0 }
0x3817   :  { %v5140_v41 = vmin.f32 %v5138_v36, 50.0 }
0x3819   :  { %5162 = vrot.lane.b32.xlu1 %v8009_v40, %s6504_s7 }
0x381d   :  { %5152 = vrot.lane.b32.xlu1 %v5126_v33, %s6518_s25 }
0x3821   :  { %5172 = vrot.lane.b32.xlu1 %v5140_v41, %s6517_s6 }
0x3837   :  { %v5161_v47 = vpop.permute.xlu0 %5160 }
0x3838   :  { %5316 = vst.msk [vmem:[%s8188_s23 + $0x48] sm:$0xff] %vm201_vm0, %v5161_v47 }
0x386e   :  { %v5151_v52 = vpop.permute.xlu0 %5150 }
0x386f   :  { %5314 = vst.msk [vmem:[%s8188_s23 + $0x40] sm:$0xff] %vm1999_vm12, %v5151_v52 }
0x3870   :  { %v3575_v61 = vpop.permute.xlu1 %3574 }
0x3871   :  { %5276 = vst.msk [vmem:[%s8188_s23 + $0x30] sm:$0xff] %vm1999_vm12, %v3575_v61 }
0x3885   :  { %v5171_v40 = vpop.permute.xlu0 %5170 }
0x3886   :  { %5318 = vst.msk [vmem:[%s8188_s23 + $0x48] sm:$0xff] %vm1985_vm2, %v5171_v40 }
0x3887   :  { %v3595_v11 = vpop.permute.xlu1 %3594 }
0x3888   :  { %5280 = vst.msk [vmem:[%s8188_s23 + $0x38] sm:$0xff] %vm1985_vm2, %v3595_v11 }
0x388b   :  { %v5163_v27 = vpop.permute.xlu1 %5162 }
0x388c   :  { %5317 = vst.msk [vmem:[%s8188_s23 + $0x58] sm:$0xff] %vm201_vm0, %v5163_v27 }
0x388f   :  { %v5153_v44 = vpop.permute.xlu1 %5152 }
0x3890   :  { %5315 = vst.msk [vmem:[%s8188_s23 + $0x50] sm:$0xff] %vm1999_vm12, %v5153_v44 }
0x3893   :  { %v5173_v28 = vpop.permute.xlu1 %5172 }
0x3894   :  { %5319 = vst.msk [vmem:[%s8188_s23 + $0x58] sm:$0xff] %vm1985_vm2, %v5173_v28 }
0x3895   :  { %5188 = vsyncpa [#allocation5], 1 }
0x3896   :  { %5189 = vsyncpa [#allocation7], 1 }
0x3897   :  { %5190 = vsyncpa [#allocation10], 1 }
0x3898   :  { %5191 = vsyncpa [#allocation13], 1 }
0x3899   :  { %5192 = vsyncpa [#allocation16], 1 }
0x389a   :  { %5193 = vsyncpa [#allocation19], 1 }

</bundles_post_ra>
